<compile_context>
chip_gen: v6e
topology: v6e:2x2x1
jax: 0.10.0
libtpu: 0.0.40
codegen_flags: <defaults>
</compile_context>

<pallas_src>
import functools

import jax
import jax.numpy as jnp
from jax.experimental import pallas as pl
from jax.experimental.pallas import tpu as pltpu


# ----------------------------------------------------------------------------
# Small helpers
# ----------------------------------------------------------------------------
def _round_up(x, m):
    return (x + m - 1) // m * m


def _vmem_limit(block_bytes):
    """Scoped-VMEM request: 2x (double buffering) + headroom, clamped."""
    need = 2 * int(sum(block_bytes)) + (8 << 20)
    return int(min(max(need, 16 << 20), 32 << 20))


def _pick_tile_m(M, target):
    """M-tile: multiple of 8, <= target, and >=2 grid steps when M allows."""
    if M < 8:
        return M
    tm = min(target, M)
    tm = max(8, (tm // 8) * 8)
    if tm >= M and M >= 16:           # ensure >=2 "parallel" steps (megacore)
        tm = max(8, _round_up((M + 1) // 2, 8))
    return tm


def _im2col(x_nhwc, k, stride, padding, k_align=32):
    """(M, Kpad) bf16 patch matrix; tap order (kh, kw, cin) matches w.reshape.

    The K dim is zero-padded up to a multiple of `k_align` (conv1: 27 -> 32)
    so the MXU reduction dim is aligned; the matching weight rows are padded
    with zeros in the wrapper.
    """
    N, H, W, Cin = x_nhwc.shape
    if padding:
        x_nhwc = jnp.pad(
            x_nhwc, ((0, 0), (padding, padding), (padding, padding), (0, 0)))
    Hp, Wp = H + 2 * padding, W + 2 * padding
    Ho = (Hp - k) // stride + 1
    Wo = (Wp - k) // stride + 1
    cols = [
        x_nhwc[:, kh:kh + stride * (Ho - 1) + 1:stride,
               kw:kw + stride * (Wo - 1) + 1:stride, :]
        for kh in range(k) for kw in range(k)
    ]
    Kdim = k * k * Cin
    Kpad = _round_up(Kdim, k_align)
    if Kpad > Kdim:
        cols.append(jnp.zeros((N, Ho, Wo, Kpad - Kdim), x_nhwc.dtype))
    patches = jnp.concatenate(cols, axis=-1).reshape(N * Ho * Wo, Kpad)
    return patches, (N, Ho, Wo), Kpad


# ----------------------------------------------------------------------------
# Pallas kernels
# ----------------------------------------------------------------------------
def _gemm_bias_relu_kernel(p_ref, w_ref, b_ref, o_ref):
    """o = relu(p @ w + b) for one M-tile. p:(tm,K) bf16, w:(K,C) bf16, b f32."""
    z = jnp.dot(p_ref[...], w_ref[...], preferred_element_type=jnp.float32)
    z = jnp.maximum(z + b_ref[...], 0.0)
    o_ref[...] = z.astype(o_ref.dtype)


def _head_kernel(p_ref, w7_ref, b7_ref, w8_ref, b8_ref, w9_ref, b9_ref,
                 o_ref, *, hw):
    """Fused conv7(3x3 via patches) + conv8(1x1) + conv9(1x1) + mean pool.

    p:(bpt*hw, K) bf16.  Every conv is ReLU'd (conv9 included, matching the
    reference).  The global mean pool is an in-kernel reduction over the hw
    rows of each batch element -- no pooling matrix, no HBM intermediates.
    """
    y = jnp.dot(p_ref[...], w7_ref[...], preferred_element_type=jnp.float32)
    y = jnp.maximum(y + b7_ref[...], 0.0)
    y = jnp.dot(y.astype(w8_ref.dtype), w8_ref[...],
                preferred_element_type=jnp.float32)
    y = jnp.maximum(y + b8_ref[...], 0.0)
    y = jnp.dot(y.astype(w9_ref.dtype), w9_ref[...],
                preferred_element_type=jnp.float32)
    y = jnp.maximum(y + b9_ref[...], 0.0)
    bpt, c9 = o_ref.shape
    o_ref[...] = jnp.mean(y.reshape(bpt, hw, c9), axis=1).astype(o_ref.dtype)


# ----------------------------------------------------------------------------
# Wrappers (XLA-side layout plumbing + pallas_call)
# ----------------------------------------------------------------------------
def conv2d_relu(x_nhwc, w, b, *, stride=1, padding=1, tile_m=512,
                lane_pad=128):
    """KxK conv, fused bias + ReLU, as one tiled im2col GEMM (bf16 in, bf16 out)."""
    KH, KW, Cin, Cout = w.shape
    # Slice off any zero-padded channels produced by the previous layer.
    x = x_nhwc[..., :Cin].astype(jnp.bfloat16)
    patches, (N, Ho, Wo), Kpad = _im2col(x, KH, stride, padding)
    M = N * Ho * Wo

    w2 = w.reshape(KH * KW * Cin, Cout)
    if Kpad > KH * KW * Cin:
        w2 = jnp.pad(w2, ((0, Kpad - KH * KW * Cin), (0, 0)))
    Cout_p = Cout
    if Cout < lane_pad:                      # lane-dense (unmasked) stores
        Cout_p = lane_pad
        w2 = jnp.pad(w2, ((0, 0), (0, Cout_p - Cout)))
        b = jnp.pad(b, (0, Cout_p - Cout))
    w2 = w2.astype(jnp.bfloat16)
    b2 = b.reshape(1, Cout_p).astype(jnp.float32)

    tm = _pick_tile_m(M, tile_m)
    grid_m = pl.cdiv(M, tm)
    vmem = _vmem_limit([tm * Kpad * 2, Kpad * Cout_p * 2,
                        Cout_p * 4, tm * Cout_p * 2])

    out = pl.pallas_call(
        _gemm_bias_relu_kernel,
        out_shape=jax.ShapeDtypeStruct((M, Cout_p), jnp.bfloat16),
        grid=(grid_m,),
        in_specs=[
            pl.BlockSpec((tm, Kpad), lambda i: (i, 0)),
            pl.BlockSpec((Kpad, Cout_p), lambda i: (0, 0)),
            pl.BlockSpec((1, Cout_p), lambda i: (0, 0)),
        ],
        out_specs=pl.BlockSpec((tm, Cout_p), lambda i: (i, 0)),
        compiler_params=pltpu.CompilerParams(
            dimension_semantics=("parallel",), vmem_limit_bytes=vmem),
    )(patches, w2, b2)
    return out.reshape(N, Ho, Wo, Cout_p)


def conv_head(x_nhwc, p7, p8, p9, *, rows_target=512):
    """Fused conv7 (3x3, pad 1) + conv8 (1x1) + conv9 (1x1) + global mean pool."""
    (w7, b7), (w8, b8), (w9, b9) = p7, p8, p9
    KH, KW, Cin7, C7 = w7.shape
    x = x_nhwc[..., :Cin7].astype(jnp.bfloat16)
    patches, (N, Ho, Wo), Kpad = _im2col(x, KH, 1, 1)
    hw = Ho * Wo
    C8, C9 = w8.shape[-1], w9.shape[-1]

    w7m = w7.reshape(KH * KW * Cin7, C7)
    if Kpad > KH * KW * Cin7:
        w7m = jnp.pad(w7m, ((0, Kpad - KH * KW * Cin7), (0, 0)))
    w7m = w7m.astype(jnp.bfloat16)
    w8m = w8.reshape(C7, C8).astype(jnp.bfloat16)
    w9m = w9.reshape(C8, C9).astype(jnp.bfloat16)

    # Whole batch elements per tile, so the mean pool is a purely local
    # reduction (no accumulator state, no pooling matrix).
    bpt = max(1, rows_target // hw)
    if bpt >= N:
        bpt = N
        if N >= 16:                      # keep >=2 grid steps when batch allows
            bpt = max(8, _round_up(N // 2, 8))
    else:
        bpt = min(max(8, (bpt // 8) * 8), N)
    if bpt != N and (bpt * hw) % 8 != 0:
        bpt = N                          # sublane-alignment fallback
    # TODO(synk): for very large spatial maps (bpt*hw patches > VMEM) this
    # would additionally need hw-axis tiling with a partial-sum accumulator.
    grid_n = pl.cdiv(N, bpt)
    vmem = _vmem_limit([bpt * hw * Kpad * 2, Kpad * C7 * 2, C7 * C8 * 2,
                        C8 * C9 * 2, (C7 + C8 + C9) * 4, bpt * C9 * 4])

    kernel = functools.partial(_head_kernel, hw=hw)
    out = pl.pallas_call(
        kernel,
        out_shape=jax.ShapeDtypeStruct((N, C9), jnp.float32),
        grid=(grid_n,),
        in_specs=[
            pl.BlockSpec((bpt * hw, Kpad), lambda i: (i, 0)),
            pl.BlockSpec((Kpad, C7), lambda i: (0, 0)),
            pl.BlockSpec((1, C7), lambda i: (0, 0)),
            pl.BlockSpec((C7, C8), lambda i: (0, 0)),
            pl.BlockSpec((1, C8), lambda i: (0, 0)),
            pl.BlockSpec((C8, C9), lambda i: (0, 0)),
            pl.BlockSpec((1, C9), lambda i: (0, 0)),
        ],
        out_specs=pl.BlockSpec((bpt, C9), lambda i: (i, 0)),
        compiler_params=pltpu.CompilerParams(
            dimension_semantics=("parallel",), vmem_limit_bytes=vmem),
    )(patches, w7m, b7.reshape(1, C7).astype(jnp.float32),
      w8m, b8.reshape(1, C8).astype(jnp.float32),
      w9m, b9.reshape(1, C9).astype(jnp.float32))
    return out


# ----------------------------------------------------------------------------
# AllConvNetStefOe: parameter construction + forward
# ----------------------------------------------------------------------------
def init_allconvnet(key, nc=3, num_classes=10, only_1st_layer_bias=False):
    """Torch-default-style uniform init. Weights stored (KH, KW, Cin, Cout)."""
    cfgs = [
        (nc, 96, 3),            # conv1
        (96, 96, 3),            # conv2
        (96, 96, 3),            # conv3 (stride 2)
        (96, 192, 3),           # conv4
        (192, 192, 3),          # conv5
        (192, 192, 3),          # conv6 (stride 2)
        (192, 192, 3),          # conv7
        (192, 192, 1),          # conv8
        (192, num_classes, 1),  # conv9
    ]
    params = []
    for idx, (cin, cout, k) in enumerate(cfgs):
        key, kw_, kb_ = jax.random.split(key, 3)
        fan_in = cin * k * k
        bound = 1.0 / (fan_in ** 0.5)
        w = jax.random.uniform(kw_, (k, k, cin, cout), jnp.float32,
                               -bound, bound)
        has_bias = True if idx == 0 else (not only_1st_layer_bias)
        if has_bias:
            b = jax.random.uniform(kb_, (cout,), jnp.float32, -bound, bound)
        else:
            b = jnp.zeros((cout,), jnp.float32)
        params.append((w, b))
    return params


def allconvnet_forward(params, x_nchw):
    # TODO(synk): F.dropout branches (p=0.2 on input, p=0.5 after conv3/conv6)
    # are not implemented; module default dropout=False (inference path).
    x = jnp.transpose(x_nchw, (0, 2, 3, 1))            # NCHW -> NHWC
    strides = (1, 1, 2, 1, 1, 2)                       # conv1..conv6
    for (w, b), s in zip(params[:6], strides):
        x = conv2d_relu(x, w, b, stride=s, padding=1)
    # conv7 + conv8 + conv9 + global mean pool fused into one kernel
    return conv_head(x, params[6], params[7], params[8])


if __name__ == "__main__":
    key = jax.random.PRNGKey(0)
    k_param, k_x = jax.random.split(key)

    batch, nc, H, W = 2, 3, 16, 16
    num_classes = 10

    params = init_allconvnet(k_param, nc=nc, num_classes=num_classes,
                             only_1st_layer_bias=False)
    x = jax.random.normal(k_x, (batch, nc, H, W), dtype=jnp.float32)  # NCHW

    fwd = jax.jit(allconvnet_forward)
    out = jax.block_until_ready(fwd(params, x))
    assert out.shape == (batch, num_classes), out.shape
    assert bool(jnp.all(jnp.isfinite(out)))
    print("KERNEL_OK")
</pallas_src>

<mosaic_0001>
module attributes {stable_mosaic.version = 11 : i64} {
  func.func @_gemm_bias_relu_kernel(%arg0: i32, %arg1: memref<256x32xbf16, #tpu.memory_space<vmem>>, %arg2: memref<32x128xbf16, #tpu.memory_space<vmem>>, %arg3: memref<1x128xf32, #tpu.memory_space<vmem>>, %arg4: memref<256x128xbf16, #tpu.memory_space<vmem>>) attributes {dimension_semantics = [#tpu.dimension_semantics<parallel>], iteration_bounds = array<i64: 2>, scalar_prefetch = 0 : i64, scratch_operands = 0 : i64, tpu.core_type = #tpu.core_type<tc>, window_params = [{transform_indices = @transform_0, window_bounds = array<i64: 256, 32>}, {pipeline_mode = #tpu.pipeline_mode<synchronous>, transform_indices = @transform_1, window_bounds = array<i64: 32, 128>}, {pipeline_mode = #tpu.pipeline_mode<synchronous>, transform_indices = @transform_2, window_bounds = array<i64: 1, 128>}, {transform_indices = @transform_3, window_bounds = array<i64: 256, 128>}]} {
    %c0 = arith.constant 0 : index
    %c0_0 = arith.constant 0 : index
    %0 = vector.load %arg1[%c0, %c0_0] : memref<256x32xbf16, #tpu.memory_space<vmem>>, vector<256x32xbf16>
    %c0_1 = arith.constant 0 : index
    %c0_2 = arith.constant 0 : index
    %1 = vector.load %arg2[%c0_1, %c0_2] : memref<32x128xbf16, #tpu.memory_space<vmem>>, vector<32x128xbf16>
    %cst = arith.constant dense<0.000000e+00> : vector<256x128xf32>
    %2 = tpu.matmul %0, %1, %cst {dimension_numbers = #tpu.dot_dimension_numbers<[1], [0], [0], [1], [0, 0, 1, 1], [], []>} : vector<256x32xbf16>, vector<32x128xbf16>, vector<256x128xf32> -> vector<256x128xf32>
    %c0_3 = arith.constant 0 : index
    %c0_4 = arith.constant 0 : index
    %3 = vector.load %arg3[%c0_3, %c0_4] : memref<1x128xf32, #tpu.memory_space<vmem>>, vector<1x128xf32>
    %4 = vector.broadcast %3 : vector<1x128xf32> to vector<256x128xf32>
    %5 = arith.addf %2, %4 : vector<256x128xf32>
    %cst_5 = arith.constant 0.000000e+00 : f32
    %6 = vector.broadcast %cst_5 : f32 to vector<256x128xf32>
    %7 = arith.maximumf %5, %6 : vector<256x128xf32>
    %8 = arith.truncf %7 : vector<256x128xf32> to vector<256x128xbf16>
    %c0_6 = arith.constant 0 : index
    %c0_7 = arith.constant 0 : index
    %9 = vector.load %arg4[%c0_6, %c0_7] : memref<256x128xbf16, #tpu.memory_space<vmem>>, vector<256x128xbf16>
    tpu.vector_store %arg4[%c0_6, %c0_7], %8 {strides = array<i32>} : memref<256x128xbf16, #tpu.memory_space<vmem>>, vector<256x128xbf16>,
    return
  }
  func.func @transform_0(%arg0: i32) -> (i32, i32) {
    %c0_i32 = arith.constant 0 : i32
    %c0_i32_0 = arith.constant 0 : i32
    return %arg0, %c0_i32 : i32, i32
  }
  func.func @transform_1(%arg0: i32) -> (i32, i32) {
    %c0_i32 = arith.constant 0 : i32
    %c0_i32_0 = arith.constant 0 : i32
    %c0_i32_1 = arith.constant 0 : i32
    return %c0_i32, %c0_i32_0 : i32, i32
  }
  func.func @transform_2(%arg0: i32) -> (i32, i32) {
    %c0_i32 = arith.constant 0 : i32
    %c0_i32_0 = arith.constant 0 : i32
    %c0_i32_1 = arith.constant 0 : i32
    return %c0_i32, %c0_i32_0 : i32, i32
  }
  func.func @transform_3(%arg0: i32) -> (i32, i32) {
    %c0_i32 = arith.constant 0 : i32
    %c0_i32_0 = arith.constant 0 : i32
    return %arg0, %c0_i32 : i32, i32
  }
}

module attributes {stable_mosaic.version = 11 : i64} {
  func.func @_gemm_bias_relu_kernel(%arg0: i32, %arg1: memref<256x864xbf16, #tpu.memory_space<vmem>>, %arg2: memref<864x128xbf16, #tpu.memory_space<vmem>>, %arg3: memref<1x128xf32, #tpu.memory_space<vmem>>, %arg4: memref<256x128xbf16, #tpu.memory_space<vmem>>) attributes {dimension_semantics = [#tpu.dimension_semantics<parallel>], iteration_bounds = array<i64: 2>, scalar_prefetch = 0 : i64, scratch_operands = 0 : i64, tpu.core_type = #tpu.core_type<tc>, window_params = [{transform_indices = @transform_0, window_bounds = array<i64: 256, 864>}, {pipeline_mode = #tpu.pipeline_mode<synchronous>, transform_indices = @transform_1, window_bounds = array<i64: 864, 128>}, {pipeline_mode = #tpu.pipeline_mode<synchronous>, transform_indices = @transform_2, window_bounds = array<i64: 1, 128>}, {transform_indices = @transform_3, window_bounds = array<i64: 256, 128>}]} {
    %c0 = arith.constant 0 : index
    %c0_0 = arith.constant 0 : index
    %0 = vector.load %arg1[%c0, %c0_0] : memref<256x864xbf16, #tpu.memory_space<vmem>>, vector<256x864xbf16>
    %c0_1 = arith.constant 0 : index
    %c0_2 = arith.constant 0 : index
    %1 = vector.load %arg2[%c0_1, %c0_2] : memref<864x128xbf16, #tpu.memory_space<vmem>>, vector<864x128xbf16>
    %cst = arith.constant dense<0.000000e+00> : vector<256x128xf32>
    %2 = tpu.matmul %0, %1, %cst {dimension_numbers = #tpu.dot_dimension_numbers<[1], [0], [0], [1], [0, 0, 1, 1], [], []>} : vector<256x864xbf16>, vector<864x128xbf16>, vector<256x128xf32> -> vector<256x128xf32>
    %c0_3 = arith.constant 0 : index
    %c0_4 = arith.constant 0 : index
    %3 = vector.load %arg3[%c0_3, %c0_4] : memref<1x128xf32, #tpu.memory_space<vmem>>, vector<1x128xf32>
    %4 = vector.broadcast %3 : vector<1x128xf32> to vector<256x128xf32>
    %5 = arith.addf %2, %4 : vector<256x128xf32>
    %cst_5 = arith.constant 0.000000e+00 : f32
    %6 = vector.broadcast %cst_5 : f32 to vector<256x128xf32>
    %7 = arith.maximumf %5, %6 : vector<256x128xf32>
    %8 = arith.truncf %7 : vector<256x128xf32> to vector<256x128xbf16>
    %c0_6 = arith.constant 0 : index
    %c0_7 = arith.constant 0 : index
    %9 = vector.load %arg4[%c0_6, %c0_7] : memref<256x128xbf16, #tpu.memory_space<vmem>>, vector<256x128xbf16>
    tpu.vector_store %arg4[%c0_6, %c0_7], %8 {strides = array<i32>} : memref<256x128xbf16, #tpu.memory_space<vmem>>, vector<256x128xbf16>,
    return
  }
  func.func @transform_0(%arg0: i32) -> (i32, i32) {
    %c0_i32 = arith.constant 0 : i32
    %c0_i32_0 = arith.constant 0 : i32
    return %arg0, %c0_i32 : i32, i32
  }
  func.func @transform_1(%arg0: i32) -> (i32, i32) {
    %c0_i32 = arith.constant 0 : i32
    %c0_i32_0 = arith.constant 0 : i32
    %c0_i32_1 = arith.constant 0 : i32
    return %c0_i32, %c0_i32_0 : i32, i32
  }
  func.func @transform_2(%arg0: i32) -> (i32, i32) {
    %c0_i32 = arith.constant 0 : i32
    %c0_i32_0 = arith.constant 0 : i32
    %c0_i32_1 = arith.constant 0 : i32
    return %c0_i32, %c0_i32_0 : i32, i32
  }
  func.func @transform_3(%arg0: i32) -> (i32, i32) {
    %c0_i32 = arith.constant 0 : i32
    %c0_i32_0 = arith.constant 0 : i32
    return %arg0, %c0_i32 : i32, i32
  }
}

module attributes {stable_mosaic.version = 11 : i64} {
  func.func @_gemm_bias_relu_kernel(%arg0: i32, %arg1: memref<64x864xbf16, #tpu.memory_space<vmem>>, %arg2: memref<864x128xbf16, #tpu.memory_space<vmem>>, %arg3: memref<1x128xf32, #tpu.memory_space<vmem>>, %arg4: memref<64x128xbf16, #tpu.memory_space<vmem>>) attributes {dimension_semantics = [#tpu.dimension_semantics<parallel>], iteration_bounds = array<i64: 2>, scalar_prefetch = 0 : i64, scratch_operands = 0 : i64, tpu.core_type = #tpu.core_type<tc>, window_params = [{transform_indices = @transform_0, window_bounds = array<i64: 64, 864>}, {pipeline_mode = #tpu.pipeline_mode<synchronous>, transform_indices = @transform_1, window_bounds = array<i64: 864, 128>}, {pipeline_mode = #tpu.pipeline_mode<synchronous>, transform_indices = @transform_2, window_bounds = array<i64: 1, 128>}, {transform_indices = @transform_3, window_bounds = array<i64: 64, 128>}]} {
    %c0 = arith.constant 0 : index
    %c0_0 = arith.constant 0 : index
    %0 = vector.load %arg1[%c0, %c0_0] : memref<64x864xbf16, #tpu.memory_space<vmem>>, vector<64x864xbf16>
    %c0_1 = arith.constant 0 : index
    %c0_2 = arith.constant 0 : index
    %1 = vector.load %arg2[%c0_1, %c0_2] : memref<864x128xbf16, #tpu.memory_space<vmem>>, vector<864x128xbf16>
    %cst = arith.constant dense<0.000000e+00> : vector<64x128xf32>
    %2 = tpu.matmul %0, %1, %cst {dimension_numbers = #tpu.dot_dimension_numbers<[1], [0], [0], [1], [0, 0, 1, 1], [], []>} : vector<64x864xbf16>, vector<864x128xbf16>, vector<64x128xf32> -> vector<64x128xf32>
    %c0_3 = arith.constant 0 : index
    %c0_4 = arith.constant 0 : index
    %3 = vector.load %arg3[%c0_3, %c0_4] : memref<1x128xf32, #tpu.memory_space<vmem>>, vector<1x128xf32>
    %4 = vector.broadcast %3 : vector<1x128xf32> to vector<64x128xf32>
    %5 = arith.addf %2, %4 : vector<64x128xf32>
    %cst_5 = arith.constant 0.000000e+00 : f32
    %6 = vector.broadcast %cst_5 : f32 to vector<64x128xf32>
    %7 = arith.maximumf %5, %6 : vector<64x128xf32>
    %8 = arith.truncf %7 : vector<64x128xf32> to vector<64x128xbf16>
    %c0_6 = arith.constant 0 : index
    %c0_7 = arith.constant 0 : index
    %9 = vector.load %arg4[%c0_6, %c0_7] : memref<64x128xbf16, #tpu.memory_space<vmem>>, vector<64x128xbf16>
    tpu.vector_store %arg4[%c0_6, %c0_7], %8 {strides = array<i32>} : memref<64x128xbf16, #tpu.memory_space<vmem>>, vector<64x128xbf16>,
    return
  }
  func.func @transform_0(%arg0: i32) -> (i32, i32) {
    %c0_i32 = arith.constant 0 : i32
    %c0_i32_0 = arith.constant 0 : i32
    return %arg0, %c0_i32 : i32, i32
  }
  func.func @transform_1(%arg0: i32) -> (i32, i32) {
    %c0_i32 = arith.constant 0 : i32
    %c0_i32_0 = arith.constant 0 : i32
    %c0_i32_1 = arith.constant 0 : i32
    return %c0_i32, %c0_i32_0 : i32, i32
  }
  func.func @transform_2(%arg0: i32) -> (i32, i32) {
    %c0_i32 = arith.constant 0 : i32
    %c0_i32_0 = arith.constant 0 : i32
    %c0_i32_1 = arith.constant 0 : i32
    return %c0_i32, %c0_i32_0 : i32, i32
  }
  func.func @transform_3(%arg0: i32) -> (i32, i32) {
    %c0_i32 = arith.constant 0 : i32
    %c0_i32_0 = arith.constant 0 : i32
    return %arg0, %c0_i32 : i32, i32
  }
}

module attributes {stable_mosaic.version = 11 : i64} {
  func.func @_gemm_bias_relu_kernel(%arg0: i32, %arg1: memref<64x864xbf16, #tpu.memory_space<vmem>>, %arg2: memref<864x192xbf16, #tpu.memory_space<vmem>>, %arg3: memref<1x192xf32, #tpu.memory_space<vmem>>, %arg4: memref<64x192xbf16, #tpu.memory_space<vmem>>) attributes {dimension_semantics = [#tpu.dimension_semantics<parallel>], iteration_bounds = array<i64: 2>, scalar_prefetch = 0 : i64, scratch_operands = 0 : i64, tpu.core_type = #tpu.core_type<tc>, window_params = [{transform_indices = @transform_0, window_bounds = array<i64: 64, 864>}, {pipeline_mode = #tpu.pipeline_mode<synchronous>, transform_indices = @transform_1, window_bounds = array<i64: 864, 192>}, {pipeline_mode = #tpu.pipeline_mode<synchronous>, transform_indices = @transform_2, window_bounds = array<i64: 1, 192>}, {transform_indices = @transform_3, window_bounds = array<i64: 64, 192>}]} {
    %c0 = arith.constant 0 : index
    %c0_0 = arith.constant 0 : index
    %0 = vector.load %arg1[%c0, %c0_0] : memref<64x864xbf16, #tpu.memory_space<vmem>>, vector<64x864xbf16>
    %c0_1 = arith.constant 0 : index
    %c0_2 = arith.constant 0 : index
    %1 = vector.load %arg2[%c0_1, %c0_2] : memref<864x192xbf16, #tpu.memory_space<vmem>>, vector<864x192xbf16>
    %cst = arith.constant dense<0.000000e+00> : vector<64x192xf32>
    %2 = tpu.matmul %0, %1, %cst {dimension_numbers = #tpu.dot_dimension_numbers<[1], [0], [0], [1], [0, 0, 1, 1], [], []>} : vector<64x864xbf16>, vector<864x192xbf16>, vector<64x192xf32> -> vector<64x192xf32>
    %c0_3 = arith.constant 0 : index
    %c0_4 = arith.constant 0 : index
    %3 = vector.load %arg3[%c0_3, %c0_4] : memref<1x192xf32, #tpu.memory_space<vmem>>, vector<1x192xf32>
    %4 = vector.broadcast %3 : vector<1x192xf32> to vector<64x192xf32>
    %5 = arith.addf %2, %4 : vector<64x192xf32>
    %cst_5 = arith.constant 0.000000e+00 : f32
    %6 = vector.broadcast %cst_5 : f32 to vector<64x192xf32>
    %7 = arith.maximumf %5, %6 : vector<64x192xf32>
    %8 = arith.truncf %7 : vector<64x192xf32> to vector<64x192xbf16>
    %c0_6 = arith.constant 0 : index
    %c0_7 = arith.constant 0 : index
    %9 = vector.load %arg4[%c0_6, %c0_7] : memref<64x192xbf16, #tpu.memory_space<vmem>>, vector<64x192xbf16>
    tpu.vector_store %arg4[%c0_6, %c0_7], %8 {strides = array<i32>} : memref<64x192xbf16, #tpu.memory_space<vmem>>, vector<64x192xbf16>,
    return
  }
  func.func @transform_0(%arg0: i32) -> (i32, i32) {
    %c0_i32 = arith.constant 0 : i32
    %c0_i32_0 = arith.constant 0 : i32
    return %arg0, %c0_i32 : i32, i32
  }
  func.func @transform_1(%arg0: i32) -> (i32, i32) {
    %c0_i32 = arith.constant 0 : i32
    %c0_i32_0 = arith.constant 0 : i32
    %c0_i32_1 = arith.constant 0 : i32
    return %c0_i32, %c0_i32_0 : i32, i32
  }
  func.func @transform_2(%arg0: i32) -> (i32, i32) {
    %c0_i32 = arith.constant 0 : i32
    %c0_i32_0 = arith.constant 0 : i32
    %c0_i32_1 = arith.constant 0 : i32
    return %c0_i32, %c0_i32_0 : i32, i32
  }
  func.func @transform_3(%arg0: i32) -> (i32, i32) {
    %c0_i32 = arith.constant 0 : i32
    %c0_i32_0 = arith.constant 0 : i32
    return %arg0, %c0_i32 : i32, i32
  }
}

module attributes {stable_mosaic.version = 11 : i64} {
  func.func @_gemm_bias_relu_kernel(%arg0: i32, %arg1: memref<64x1728xbf16, #tpu.memory_space<vmem>>, %arg2: memref<1728x192xbf16, #tpu.memory_space<vmem>>, %arg3: memref<1x192xf32, #tpu.memory_space<vmem>>, %arg4: memref<64x192xbf16, #tpu.memory_space<vmem>>) attributes {dimension_semantics = [#tpu.dimension_semantics<parallel>], iteration_bounds = array<i64: 2>, scalar_prefetch = 0 : i64, scratch_operands = 0 : i64, tpu.core_type = #tpu.core_type<tc>, window_params = [{transform_indices = @transform_0, window_bounds = array<i64: 64, 1728>}, {pipeline_mode = #tpu.pipeline_mode<synchronous>, transform_indices = @transform_1, window_bounds = array<i64: 1728, 192>}, {pipeline_mode = #tpu.pipeline_mode<synchronous>, transform_indices = @transform_2, window_bounds = array<i64: 1, 192>}, {transform_indices = @transform_3, window_bounds = array<i64: 64, 192>}]} {
    %c0 = arith.constant 0 : index
    %c0_0 = arith.constant 0 : index
    %0 = vector.load %arg1[%c0, %c0_0] : memref<64x1728xbf16, #tpu.memory_space<vmem>>, vector<64x1728xbf16>
    %c0_1 = arith.constant 0 : index
    %c0_2 = arith.constant 0 : index
    %1 = vector.load %arg2[%c0_1, %c0_2] : memref<1728x192xbf16, #tpu.memory_space<vmem>>, vector<1728x192xbf16>
    %cst = arith.constant dense<0.000000e+00> : vector<64x192xf32>
    %2 = tpu.matmul %0, %1, %cst {dimension_numbers = #tpu.dot_dimension_numbers<[1], [0], [0], [1], [0, 0, 1, 1], [], []>} : vector<64x1728xbf16>, vector<1728x192xbf16>, vector<64x192xf32> -> vector<64x192xf32>
    %c0_3 = arith.constant 0 : index
    %c0_4 = arith.constant 0 : index
    %3 = vector.load %arg3[%c0_3, %c0_4] : memref<1x192xf32, #tpu.memory_space<vmem>>, vector<1x192xf32>
    %4 = vector.broadcast %3 : vector<1x192xf32> to vector<64x192xf32>
    %5 = arith.addf %2, %4 : vector<64x192xf32>
    %cst_5 = arith.constant 0.000000e+00 : f32
    %6 = vector.broadcast %cst_5 : f32 to vector<64x192xf32>
    %7 = arith.maximumf %5, %6 : vector<64x192xf32>
    %8 = arith.truncf %7 : vector<64x192xf32> to vector<64x192xbf16>
    %c0_6 = arith.constant 0 : index
    %c0_7 = arith.constant 0 : index
    %9 = vector.load %arg4[%c0_6, %c0_7] : memref<64x192xbf16, #tpu.memory_space<vmem>>, vector<64x192xbf16>
    tpu.vector_store %arg4[%c0_6, %c0_7], %8 {strides = array<i32>} : memref<64x192xbf16, #tpu.memory_space<vmem>>, vector<64x192xbf16>,
    return
  }
  func.func @transform_0(%arg0: i32) -> (i32, i32) {
    %c0_i32 = arith.constant 0 : i32
    %c0_i32_0 = arith.constant 0 : i32
    return %arg0, %c0_i32 : i32, i32
  }
  func.func @transform_1(%arg0: i32) -> (i32, i32) {
    %c0_i32 = arith.constant 0 : i32
    %c0_i32_0 = arith.constant 0 : i32
    %c0_i32_1 = arith.constant 0 : i32
    return %c0_i32, %c0_i32_0 : i32, i32
  }
  func.func @transform_2(%arg0: i32) -> (i32, i32) {
    %c0_i32 = arith.constant 0 : i32
    %c0_i32_0 = arith.constant 0 : i32
    %c0_i32_1 = arith.constant 0 : i32
    return %c0_i32, %c0_i32_0 : i32, i32
  }
  func.func @transform_3(%arg0: i32) -> (i32, i32) {
    %c0_i32 = arith.constant 0 : i32
    %c0_i32_0 = arith.constant 0 : i32
    return %arg0, %c0_i32 : i32, i32
  }
}

module attributes {stable_mosaic.version = 11 : i64} {
  func.func @_gemm_bias_relu_kernel(%arg0: i32, %arg1: memref<16x1728xbf16, #tpu.memory_space<vmem>>, %arg2: memref<1728x192xbf16, #tpu.memory_space<vmem>>, %arg3: memref<1x192xf32, #tpu.memory_space<vmem>>, %arg4: memref<16x192xbf16, #tpu.memory_space<vmem>>) attributes {dimension_semantics = [#tpu.dimension_semantics<parallel>], iteration_bounds = array<i64: 2>, scalar_prefetch = 0 : i64, scratch_operands = 0 : i64, tpu.core_type = #tpu.core_type<tc>, window_params = [{transform_indices = @transform_0, window_bounds = array<i64: 16, 1728>}, {pipeline_mode = #tpu.pipeline_mode<synchronous>, transform_indices = @transform_1, window_bounds = array<i64: 1728, 192>}, {pipeline_mode = #tpu.pipeline_mode<synchronous>, transform_indices = @transform_2, window_bounds = array<i64: 1, 192>}, {transform_indices = @transform_3, window_bounds = array<i64: 16, 192>}]} {
    %c0 = arith.constant 0 : index
    %c0_0 = arith.constant 0 : index
    %0 = vector.load %arg1[%c0, %c0_0] : memref<16x1728xbf16, #tpu.memory_space<vmem>>, vector<16x1728xbf16>
    %c0_1 = arith.constant 0 : index
    %c0_2 = arith.constant 0 : index
    %1 = vector.load %arg2[%c0_1, %c0_2] : memref<1728x192xbf16, #tpu.memory_space<vmem>>, vector<1728x192xbf16>
    %cst = arith.constant dense<0.000000e+00> : vector<16x192xf32>
    %2 = tpu.matmul %0, %1, %cst {dimension_numbers = #tpu.dot_dimension_numbers<[1], [0], [0], [1], [0, 0, 1, 1], [], []>} : vector<16x1728xbf16>, vector<1728x192xbf16>, vector<16x192xf32> -> vector<16x192xf32>
    %c0_3 = arith.constant 0 : index
    %c0_4 = arith.constant 0 : index
    %3 = vector.load %arg3[%c0_3, %c0_4] : memref<1x192xf32, #tpu.memory_space<vmem>>, vector<1x192xf32>
    %4 = vector.broadcast %3 : vector<1x192xf32> to vector<16x192xf32>
    %5 = arith.addf %2, %4 : vector<16x192xf32>
    %cst_5 = arith.constant 0.000000e+00 : f32
    %6 = vector.broadcast %cst_5 : f32 to vector<16x192xf32>
    %7 = arith.maximumf %5, %6 : vector<16x192xf32>
    %8 = arith.truncf %7 : vector<16x192xf32> to vector<16x192xbf16>
    %c0_6 = arith.constant 0 : index
    %c0_7 = arith.constant 0 : index
    %9 = vector.load %arg4[%c0_6, %c0_7] : memref<16x192xbf16, #tpu.memory_space<vmem>>, vector<16x192xbf16>
    tpu.vector_store %arg4[%c0_6, %c0_7], %8 {strides = array<i32>} : memref<16x192xbf16, #tpu.memory_space<vmem>>, vector<16x192xbf16>,
    return
  }
  func.func @transform_0(%arg0: i32) -> (i32, i32) {
    %c0_i32 = arith.constant 0 : i32
    %c0_i32_0 = arith.constant 0 : i32
    return %arg0, %c0_i32 : i32, i32
  }
  func.func @transform_1(%arg0: i32) -> (i32, i32) {
    %c0_i32 = arith.constant 0 : i32
    %c0_i32_0 = arith.constant 0 : i32
    %c0_i32_1 = arith.constant 0 : i32
    return %c0_i32, %c0_i32_0 : i32, i32
  }
  func.func @transform_2(%arg0: i32) -> (i32, i32) {
    %c0_i32 = arith.constant 0 : i32
    %c0_i32_0 = arith.constant 0 : i32
    %c0_i32_1 = arith.constant 0 : i32
    return %c0_i32, %c0_i32_0 : i32, i32
  }
  func.func @transform_3(%arg0: i32) -> (i32, i32) {
    %c0_i32 = arith.constant 0 : i32
    %c0_i32_0 = arith.constant 0 : i32
    return %arg0, %c0_i32 : i32, i32
  }
}

module attributes {stable_mosaic.version = 11 : i64} {
  func.func @_head_kernel(%arg0: i32, %arg1: memref<32x1728xbf16, #tpu.memory_space<vmem>>, %arg2: memref<1728x192xbf16, #tpu.memory_space<vmem>>, %arg3: memref<1x192xf32, #tpu.memory_space<vmem>>, %arg4: memref<192x192xbf16, #tpu.memory_space<vmem>>, %arg5: memref<1x192xf32, #tpu.memory_space<vmem>>, %arg6: memref<192x10xbf16, #tpu.memory_space<vmem>>, %arg7: memref<1x10xf32, #tpu.memory_space<vmem>>, %arg8: memref<2x10xf32, #tpu.memory_space<vmem>>) attributes {dimension_semantics = [#tpu.dimension_semantics<parallel>], iteration_bounds = array<i64: 1>, scalar_prefetch = 0 : i64, scratch_operands = 0 : i64, tpu.core_type = #tpu.core_type<tc>, window_params = [{transform_indices = @transform_0, window_bounds = array<i64: 32, 1728>}, {pipeline_mode = #tpu.pipeline_mode<synchronous>, transform_indices = @transform_1, window_bounds = array<i64: 1728, 192>}, {pipeline_mode = #tpu.pipeline_mode<synchronous>, transform_indices = @transform_2, window_bounds = array<i64: 1, 192>}, {pipeline_mode = #tpu.pipeline_mode<synchronous>, transform_indices = @transform_3, window_bounds = array<i64: 192, 192>}, {pipeline_mode = #tpu.pipeline_mode<synchronous>, transform_indices = @transform_4, window_bounds = array<i64: 1, 192>}, {pipeline_mode = #tpu.pipeline_mode<synchronous>, transform_indices = @transform_5, window_bounds = array<i64: 192, 10>}, {pipeline_mode = #tpu.pipeline_mode<synchronous>, transform_indices = @transform_6, window_bounds = array<i64: 1, 10>}, {transform_indices = @transform_7, window_bounds = array<i64: 2, 10>}]} {
    %c0 = arith.constant 0 : index
    %c0_0 = arith.constant 0 : index
    %0 = vector.load %arg1[%c0, %c0_0] : memref<32x1728xbf16, #tpu.memory_space<vmem>>, vector<32x1728xbf16>
    %c0_1 = arith.constant 0 : index
    %c0_2 = arith.constant 0 : index
    %1 = vector.load %arg2[%c0_1, %c0_2] : memref<1728x192xbf16, #tpu.memory_space<vmem>>, vector<1728x192xbf16>
    %cst = arith.constant dense<0.000000e+00> : vector<32x192xf32>
    %2 = tpu.matmul %0, %1, %cst {dimension_numbers = #tpu.dot_dimension_numbers<[1], [0], [0], [1], [0, 0, 1, 1], [], []>} : vector<32x1728xbf16>, vector<1728x192xbf16>, vector<32x192xf32> -> vector<32x192xf32>
    %c0_3 = arith.constant 0 : index
    %c0_4 = arith.constant 0 : index
    %3 = vector.load %arg3[%c0_3, %c0_4] : memref<1x192xf32, #tpu.memory_space<vmem>>, vector<1x192xf32>
    %4 = vector.broadcast %3 : vector<1x192xf32> to vector<32x192xf32>
    %5 = arith.addf %2, %4 : vector<32x192xf32>
    %cst_5 = arith.constant 0.000000e+00 : f32
    %6 = vector.broadcast %cst_5 : f32 to vector<32x192xf32>
    %7 = arith.maximumf %5, %6 : vector<32x192xf32>
    %8 = arith.truncf %7 : vector<32x192xf32> to vector<32x192xbf16>
    %c0_6 = arith.constant 0 : index
    %c0_7 = arith.constant 0 : index
    %9 = vector.load %arg4[%c0_6, %c0_7] : memref<192x192xbf16, #tpu.memory_space<vmem>>, vector<192x192xbf16>
    %cst_8 = arith.constant dense<0.000000e+00> : vector<32x192xf32>
    %10 = tpu.matmul %8, %9, %cst_8 {dimension_numbers = #tpu.dot_dimension_numbers<[1], [0], [0], [1], [0, 0, 1, 1], [], []>} : vector<32x192xbf16>, vector<192x192xbf16>, vector<32x192xf32> -> vector<32x192xf32>
    %c0_9 = arith.constant 0 : index
    %c0_10 = arith.constant 0 : index
    %11 = vector.load %arg5[%c0_9, %c0_10] : memref<1x192xf32, #tpu.memory_space<vmem>>, vector<1x192xf32>
    %12 = vector.broadcast %11 : vector<1x192xf32> to vector<32x192xf32>
    %13 = arith.addf %10, %12 : vector<32x192xf32>
    %cst_11 = arith.constant 0.000000e+00 : f32
    %14 = vector.broadcast %cst_11 : f32 to vector<32x192xf32>
    %15 = arith.maximumf %13, %14 : vector<32x192xf32>
    %16 = arith.truncf %15 : vector<32x192xf32> to vector<32x192xbf16>
    %c0_12 = arith.constant 0 : index
    %c0_13 = arith.constant 0 : index
    %17 = vector.load %arg6[%c0_12, %c0_13] : memref<192x10xbf16, #tpu.memory_space<vmem>>, vector<192x10xbf16>
    %cst_14 = arith.constant dense<0.000000e+00> : vector<32x10xf32>
    %18 = tpu.matmul %16, %17, %cst_14 {dimension_numbers = #tpu.dot_dimension_numbers<[1], [0], [0], [1], [0, 0, 1, 1], [], []>} : vector<32x192xbf16>, vector<192x10xbf16>, vector<32x10xf32> -> vector<32x10xf32>
    %c0_15 = arith.constant 0 : index
    %c0_16 = arith.constant 0 : index
    %19 = vector.load %arg7[%c0_15, %c0_16] : memref<1x10xf32, #tpu.memory_space<vmem>>, vector<1x10xf32>
    %20 = vector.broadcast %19 : vector<1x10xf32> to vector<32x10xf32>
    %21 = arith.addf %18, %20 : vector<32x10xf32>
    %cst_17 = arith.constant 0.000000e+00 : f32
    %22 = vector.broadcast %cst_17 : f32 to vector<32x10xf32>
    %23 = arith.maximumf %21, %22 : vector<32x10xf32>
    %24 = vector.shape_cast %23 : vector<32x10xf32> to vector<2x16x10xf32>
    %cst_18 = arith.constant dense<0.000000e+00> : vector<2x10xf32>
    %25 = vector.multi_reduction <add>, %24, %cst_18 [1] : vector<2x16x10xf32> to vector<2x10xf32>
    %cst_19 = arith.constant 1.600000e+01 : f32
    %26 = vector.broadcast %cst_19 : f32 to vector<2x10xf32>
    %27 = arith.divf %25, %26 : vector<2x10xf32>
    %c0_20 = arith.constant 0 : index
    %c0_21 = arith.constant 0 : index
    %28 = vector.load %arg8[%c0_20, %c0_21] : memref<2x10xf32, #tpu.memory_space<vmem>>, vector<2x10xf32>
    tpu.vector_store %arg8[%c0_20, %c0_21], %27 {strides = array<i32>} : memref<2x10xf32, #tpu.memory_space<vmem>>, vector<2x10xf32>,
    return
  }
  func.func @transform_0(%arg0: i32) -> (i32, i32) {
    %c0_i32 = arith.constant 0 : i32
    %c0_i32_0 = arith.constant 0 : i32
    return %arg0, %c0_i32 : i32, i32
  }
  func.func @transform_1(%arg0: i32) -> (i32, i32) {
    %c0_i32 = arith.constant 0 : i32
    %c0_i32_0 = arith.constant 0 : i32
    %c0_i32_1 = arith.constant 0 : i32
    return %c0_i32, %c0_i32_0 : i32, i32
  }
  func.func @transform_2(%arg0: i32) -> (i32, i32) {
    %c0_i32 = arith.constant 0 : i32
    %c0_i32_0 = arith.constant 0 : i32
    %c0_i32_1 = arith.constant 0 : i32
    return %c0_i32, %c0_i32_0 : i32, i32
  }
  func.func @transform_3(%arg0: i32) -> (i32, i32) {
    %c0_i32 = arith.constant 0 : i32
    %c0_i32_0 = arith.constant 0 : i32
    %c0_i32_1 = arith.constant 0 : i32
    return %c0_i32, %c0_i32_0 : i32, i32
  }
  func.func @transform_4(%arg0: i32) -> (i32, i32) {
    %c0_i32 = arith.constant 0 : i32
    %c0_i32_0 = arith.constant 0 : i32
    %c0_i32_1 = arith.constant 0 : i32
    return %c0_i32, %c0_i32_0 : i32, i32
  }
  func.func @transform_5(%arg0: i32) -> (i32, i32) {
    %c0_i32 = arith.constant 0 : i32
    %c0_i32_0 = arith.constant 0 : i32
    %c0_i32_1 = arith.constant 0 : i32
    return %c0_i32, %c0_i32_0 : i32, i32
  }
  func.func @transform_6(%arg0: i32) -> (i32, i32) {
    %c0_i32 = arith.constant 0 : i32
    %c0_i32_0 = arith.constant 0 : i32
    %c0_i32_1 = arith.constant 0 : i32
    return %c0_i32, %c0_i32_0 : i32, i32
  }
  func.func @transform_7(%arg0: i32) -> (i32, i32) {
    %c0_i32 = arith.constant 0 : i32
    %c0_i32_0 = arith.constant 0 : i32
    return %arg0, %c0_i32 : i32, i32
  }
}

</mosaic_0001>

<bundles_post_ra>
// kernel: allconvnet_forward.7
= control target key start
LH: loop header
LB: loop body
LE: loop exit
PB: predicated region body
PF: predicated region fallthrough
CT: control target
= control target key end

     0   :  { %s1085_s12 = smov 0   ;;  %s1204_s0 = inlined_call_operand.vmem [shape: bf16[512,32], index: 0, kind: input, shape index: {}]   ;;  %s1205_s1 = inlined_call_operand.vmem [shape: bf16[32,128], index: 1, kind: input, shape index: {}]   ;;  %s1206_s2 = inlined_call_operand.vmem [shape: f32[1,128], index: 2, kind: input, shape index: {}]   ;;  %s1207_s3 = inlined_call_operand.vmem [shape: bf16[512,128], index: 3, kind: output, shape index: {}]  }
   0x1 LB: > { %s768_s13 = sadd.s32 4294967295, %s1063_s12   ;;  %p772_p0 = scmp.ge.s32.totalorder %s1063_s12, 1  ;;  %s1063_s12 = sphi %s1085_s12, %s13_s12  }
   0x2   : > { %p138_p1 = scmp.lt.s32.totalorder %s1063_s12, 3 }
   0x4   : > { %p139_p2 = pnand %p772_p0, %p138_p1 }
   0x5   : > { %s773_s16 = sshll.u32 (!%p139_p2), %s768_s13, 5 }
   0x6   : > { %142 = sbr.rel (%p139_p2) target bundleno = 250 (0xfa), region = 32  ;;  %p163_p3 = scmp.lt.s32.totalorder (!%p139_p2), %s773_s16, 63 }
   0xb   : > { %v1039_v0 = vld [vmem:[%s1205_s1 + $0x8] sm:$0xff]   ;;  %v1040_v1 = vld [vmem:[%s1205_s1] sm:$0xff]   ;;  %s1209_s16 = smov (!%p163_p3, %s773_s16), 63  ;;  %vm310_vm0 = vcmask 261120  }
   0xc   : > { %991 = vmatprep.subr.bf16.mxu0 %v1039_v0  ;;  %1027 = vmatprep.subr.bf16.mxu1 %v1039_v0  ;;  %s774_s19 = sshll.u32 %s1209_s16, 2  ;;  %v1144_v19 = vld [vmem:[%s1206_s2] ss:$0 sm:$0xff] }
   0xd   : > { %992 = vmatpush3.bf16.msra.mxu0 %v1039_v0  ;;  %1029 = vmatpush3.bf16.msra.mxu1 %v1039_v0  ;;  %s1107_s22 = scalar_lea.vmem %s1204_s0, %s774_s19  ;;  %s1158_s27 = scalar_lea.vmem %s1207_s3, %s774_s19 }
   0xe   : > { %993 = vmatprep.subr.bf16.mxu0 %v1040_v1  ;;  %1028 = vmatprep.subr.bf16.mxu1 %v1040_v1  ;;  %v1041_v2 = vld [vmem:[%s1107_s22] sm:$0xff]   ;;  %v1043_v4 = vld [vmem:[%s1107_s22 + $0x8] sm:$0xff]   ;;  %v1045_v6 = vld [vmem:[%s1107_s22 + $0x10] sm:$0xff]  }
   0xf   : > { %v1042_v3 = vld [vmem:[%s1107_s22 + $0x40] sm:$0xff]   ;;  %995 = vmatprep.mubr.msk.bf16.mxu0 %vm310_vm0, %v1041_v2  ;;  %v1044_v5 = vld [vmem:[%s1107_s22 + $0x48] sm:$0xff]   ;;  %v1046_v7 = vld [vmem:[%s1107_s22 + $0x50] sm:$0xff]  }
  0x10   : > { %1011 = vmatprep.mubr.msk.bf16.mxu1 %vm310_vm0, %v1042_v3  ;;  %v1047_v8 = vld [vmem:[%s1107_s22 + $0x18] sm:$0xff]   ;;  %v1049_v10 = vld [vmem:[%s1107_s22 + $0x20] sm:$0xff]   ;;  %v1051_v12 = vld [vmem:[%s1107_s22 + $0x28] sm:$0xff]  }
  0x11   : > { %994 = vmatpush3.bf16.msra.mxu0 %v1040_v1  ;;  %1030 = vmatpush3.bf16.msra.mxu1 %v1040_v1  ;;  %v1048_v9 = vld [vmem:[%s1107_s22 + $0x58] sm:$0xff]   ;;  %v1050_v11 = vld [vmem:[%s1107_s22 + $0x60] sm:$0xff]   ;;  %v1052_v13 = vld [vmem:[%s1107_s22 + $0x68] sm:$0xff]  }
  0x12   : > { %v1053_v14 = vld [vmem:[%s1107_s22 + $0x30] sm:$0xff]   ;;  %v1055_v16 = vld [vmem:[%s1107_s22 + $0x38] sm:$0xff]  }
  0x13   : > { %v1054_v15 = vld [vmem:[%s1107_s22 + $0x70] sm:$0xff]   ;;  %v1056_v17 = vld [vmem:[%s1107_s22 + $0x78] sm:$0xff]  }
  0x14   : > { %996 = vmatmul.mubr.msk.bf16.vlgmr.msra.gmra.mxu0 %vm310_vm0, %v1043_v4  ;;  %1012 = vmatmul.mubr.msk.bf16.vlgmr.msra.gmra.mxu1 %vm310_vm0, %v1044_v5 }
  0x15   : > { %999 = vmatprep.mubr.msk.bf16.mxu0 %vm310_vm0, %v1045_v6  ;;  %1015 = vmatprep.mubr.msk.bf16.mxu1 %vm310_vm0, %v1046_v7 }
  0x1c   : > { %1000 = vmatmul.mubr.msk.bf16.gmra.mxu0 %vm310_vm0, %v1047_v8  ;;  %1016 = vmatmul.mubr.msk.bf16.gmra.mxu1 %vm310_vm0, %v1048_v9 }
  0x1d   : > { %1003 = vmatprep.mubr.msk.bf16.mxu0 %vm310_vm0, %v1049_v10  ;;  %1019 = vmatprep.mubr.msk.bf16.mxu1 %vm310_vm0, %v1050_v11 }
  0x24   : > { %1004 = vmatmul.mubr.msk.bf16.gmra.mxu0 %vm310_vm0, %v1051_v12  ;;  %1020 = vmatmul.mubr.msk.bf16.gmra.mxu1 %vm310_vm0, %v1052_v13 }
  0x25   : > { %1007 = vmatprep.mubr.msk.bf16.mxu0 %vm310_vm0, %v1053_v14  ;;  %1023 = vmatprep.mubr.msk.bf16.mxu1 %vm310_vm0, %v1054_v15 }
  0x2c   : > { %1008 = vmatmul.mubr.msk.bf16.gmra.mxu0 %vm310_vm0, %v1055_v16  ;;  %1024 = vmatmul.mubr.msk.bf16.gmra.mxu1 %vm310_vm0, %v1056_v17 }
  0xd4   : > { %v997_v18 = vpop.f32.mrf.mxu0  ;;  %v1013_v20 = vpop.f32.mrf.mxu1 }
  0xd5   : > { %v402_v22 = vadd.f32 %v997_v18, %v1144_v19  ;;  %v466_v24 = vadd.f32 %v1013_v20, %v1144_v19 }
  0xd6   : > { %v393_v21 = vpop.f32.mrf.mxu0  ;;  %v457_v23 = vpop.f32.mrf.mxu1 }
  0xd7   : > { %v394_v26 = vadd.f32 %v1144_v19, %v393_v21  ;;  %v458_v29 = vadd.f32 %v1144_v19, %v457_v23  ;;  %v522_v32 = vmax.f32 %v402_v22, 0.0  ;;  %v538_v36 = vmax.f32 %v466_v24, 0.0 }
  0xd8   : > { %v998_v25 = vpop.f32.mrf.mxu0  ;;  %v1014_v28 = vpop.f32.mrf.mxu1 }
  0xd9   : > { %v405_v27 = vadd.f32 %v998_v25, %v1144_v19  ;;  %v469_v30 = vadd.f32 %v1014_v28, %v1144_v19  ;;  %v520_v40 = vmax.f32 %v394_v26, 0.0  ;;  %v536_v44 = vmax.f32 %v458_v29, 0.0 }
  0xda   : > { %v396_v31 = vpop.f32.mrf.mxu0  ;;  %v460_v35 = vpop.f32.mrf.mxu1 }
  0xdb   : > { %v523_v33 = vmax.f32 %v405_v27, 0.0  ;;  %v397_v34 = vadd.f32 %v1144_v19, %v396_v31  ;;  %v539_v37 = vmax.f32 %v469_v30, 0.0  ;;  %v461_v38 = vadd.f32 %v1144_v19, %v460_v35 }
  0xdc   : > { %v1001_v39 = vpop.f32.mrf.mxu0  ;;  %v1017_v43 = vpop.f32.mrf.mxu1 }
  0xdd   : > { %v886_v41 = vpack.c.bf16 %v523_v33, %v522_v32  ;;  %v521_v42 = vmax.f32 %v397_v34, 0.0  ;;  %v926_v45 = vpack.c.bf16 %v539_v37, %v538_v36  ;;  %v537_v46 = vmax.f32 %v461_v38, 0.0 }
  0xde   : > { %v409_v47 = vpop.f32.mrf.mxu0  ;;  %v418_v49 = vadd.f32 %v1001_v39, %v1144_v19  ;;  %v473_v50 = vpop.f32.mrf.mxu1  ;;  %v482_v52 = vadd.f32 %v1017_v43, %v1144_v19 }
  0xdf   : > { %958 = vst [vmem:[%s1158_s27 + $0x8] sm:$0xff] %v886_v41   ;;  %v881_v48 = vpack.c.bf16 %v521_v42, %v520_v40  ;;  %966 = vst [vmem:[%s1158_s27 + $0x48] sm:$0xff] %v926_v45   ;;  %v921_v51 = vpack.c.bf16 %v537_v46, %v536_v44  ;;  %v410_v54 = vadd.f32 %v1144_v19, %v409_v47 }
  0xe0   : > { %v1002_v53 = vpop.f32.mrf.mxu0  ;;  %v1018_v56 = vpop.f32.mrf.mxu1  ;;  %v474_v57 = vadd.f32 %v1144_v19, %v473_v50  ;;  %v526_v60 = vmax.f32 %v418_v49, 0.0  ;;  %v542_v0 = vmax.f32 %v482_v52, 0.0 }
  0xe1   : > { %882 = vst [vmem:[%s1158_s27] sm:$0xff] %v881_v48   ;;  %v421_v55 = vadd.f32 %v1002_v53, %v1144_v19  ;;  %965 = vst [vmem:[%s1158_s27 + $0x40] sm:$0xff] %v921_v51   ;;  %v485_v58 = vadd.f32 %v1018_v56, %v1144_v19  ;;  %v524_v4 = vmax.f32 %v410_v54, 0.0 }
  0xe2   : > { %v412_v59 = vpop.f32.mrf.mxu0  ;;  %v476_v63 = vpop.f32.mrf.mxu1  ;;  %v540_v8 = vmax.f32 %v474_v57, 0.0 }
  0xe3   : > { %v527_v61 = vmax.f32 %v421_v55, 0.0  ;;  %v413_v62 = vadd.f32 %v1144_v19, %v412_v59  ;;  %v543_v1 = vmax.f32 %v485_v58, 0.0  ;;  %v477_v2 = vadd.f32 %v1144_v19, %v476_v63 }
  0xe4   : > { %v1005_v3 = vpop.f32.mrf.mxu0  ;;  %v1021_v7 = vpop.f32.mrf.mxu1 }
  0xe5   : > { %v896_v5 = vpack.c.bf16 %v527_v61, %v526_v60  ;;  %v525_v6 = vmax.f32 %v413_v62, 0.0  ;;  %v936_v9 = vpack.c.bf16 %v543_v1, %v542_v0  ;;  %v541_v10 = vmax.f32 %v477_v2, 0.0 }
  0xe6   : > { %v425_v11 = vpop.f32.mrf.mxu0  ;;  %v434_v13 = vadd.f32 %v1005_v3, %v1144_v19  ;;  %v489_v14 = vpop.f32.mrf.mxu1  ;;  %v498_v16 = vadd.f32 %v1021_v7, %v1144_v19 }
  0xe7   : > { %960 = vst [vmem:[%s1158_s27 + $0x18] sm:$0xff] %v896_v5   ;;  %v891_v12 = vpack.c.bf16 %v525_v6, %v524_v4  ;;  %968 = vst [vmem:[%s1158_s27 + $0x58] sm:$0xff] %v936_v9   ;;  %v931_v15 = vpack.c.bf16 %v541_v10, %v540_v8  ;;  %v426_v18 = vadd.f32 %v1144_v19, %v425_v11 }
  0xe8   : > { %v1006_v17 = vpop.f32.mrf.mxu0  ;;  %v1022_v21 = vpop.f32.mrf.mxu1  ;;  %v490_v22 = vadd.f32 %v1144_v19, %v489_v14  ;;  %v530_v25 = vmax.f32 %v434_v13, 0.0  ;;  %v546_v29 = vmax.f32 %v498_v16, 0.0 }
  0xe9   : > { %959 = vst [vmem:[%s1158_s27 + $0x10] sm:$0xff] %v891_v12   ;;  %v437_v20 = vadd.f32 %v1006_v17, %v1144_v19  ;;  %967 = vst [vmem:[%s1158_s27 + $0x50] sm:$0xff] %v931_v15   ;;  %v501_v23 = vadd.f32 %v1022_v21, %v1144_v19  ;;  %v528_v33 = vmax.f32 %v426_v18, 0.0 }
  0xea   : > { %v428_v24 = vpop.f32.mrf.mxu0  ;;  %v492_v28 = vpop.f32.mrf.mxu1  ;;  %v544_v37 = vmax.f32 %v490_v22, 0.0 }
  0xeb   : > { %v531_v26 = vmax.f32 %v437_v20, 0.0  ;;  %v429_v27 = vadd.f32 %v1144_v19, %v428_v24  ;;  %v547_v30 = vmax.f32 %v501_v23, 0.0  ;;  %v493_v31 = vadd.f32 %v1144_v19, %v492_v28 }
  0xec   : > { %v1009_v32 = vpop.f32.mrf.mxu0  ;;  %v1025_v36 = vpop.f32.mrf.mxu1 }
  0xed   : > { %v906_v34 = vpack.c.bf16 %v531_v26, %v530_v25  ;;  %v529_v35 = vmax.f32 %v429_v27, 0.0  ;;  %v946_v38 = vpack.c.bf16 %v547_v30, %v546_v29  ;;  %v545_v39 = vmax.f32 %v493_v31, 0.0 }
  0xee   : > { %v441_v40 = vpop.f32.mrf.mxu0  ;;  %v450_v42 = vadd.f32 %v1009_v32, %v1144_v19  ;;  %v505_v43 = vpop.f32.mrf.mxu1  ;;  %v514_v45 = vadd.f32 %v1025_v36, %v1144_v19 }
  0xef   : > { %962 = vst [vmem:[%s1158_s27 + $0x28] sm:$0xff] %v906_v34   ;;  %v901_v41 = vpack.c.bf16 %v529_v35, %v528_v33  ;;  %970 = vst [vmem:[%s1158_s27 + $0x68] sm:$0xff] %v946_v38   ;;  %v941_v44 = vpack.c.bf16 %v545_v39, %v544_v37  ;;  %v442_v47 = vadd.f32 %v1144_v19, %v441_v40 }
  0xf0   : > { %v1010_v46 = vpop.f32.mrf.mxu0  ;;  %v1026_v49 = vpop.f32.mrf.mxu1  ;;  %v506_v50 = vadd.f32 %v1144_v19, %v505_v43  ;;  %v534_v53 = vmax.f32 %v450_v42, 0.0  ;;  %v550_v57 = vmax.f32 %v514_v45, 0.0 }
  0xf1   : > { %961 = vst [vmem:[%s1158_s27 + $0x20] sm:$0xff] %v901_v41   ;;  %v453_v48 = vadd.f32 %v1010_v46, %v1144_v19  ;;  %969 = vst [vmem:[%s1158_s27 + $0x60] sm:$0xff] %v941_v44   ;;  %v517_v51 = vadd.f32 %v1026_v49, %v1144_v19  ;;  %v532_v60 = vmax.f32 %v442_v47, 0.0 }
  0xf2   : > { %v444_v52 = vpop.f32.mrf.mxu0  ;;  %v508_v56 = vpop.f32.mrf.mxu1  ;;  %v548_v63 = vmax.f32 %v506_v50, 0.0 }
  0xf3   : > { %v535_v54 = vmax.f32 %v453_v48, 0.0  ;;  %v445_v55 = vadd.f32 %v1144_v19, %v444_v52  ;;  %v551_v58 = vmax.f32 %v517_v51, 0.0  ;;  %v509_v59 = vadd.f32 %v1144_v19, %v508_v56 }
  0xf5   : > { %v916_v61 = vpack.c.bf16 %v535_v54, %v534_v53  ;;  %v533_v62 = vmax.f32 %v445_v55, 0.0  ;;  %v956_v0 = vpack.c.bf16 %v551_v58, %v550_v57  ;;  %v549_v1 = vmax.f32 %v509_v59, 0.0 }
  0xf7   : > { %964 = vst [vmem:[%s1158_s27 + $0x38] sm:$0xff] %v916_v61   ;;  %v911_v2 = vpack.c.bf16 %v533_v62, %v532_v60  ;;  %972 = vst [vmem:[%s1158_s27 + $0x78] sm:$0xff] %v956_v0   ;;  %v951_v3 = vpack.c.bf16 %v549_v1, %v548_v63 }
  0xf9   : > { %963 = vst [vmem:[%s1158_s27 + $0x30] sm:$0xff] %v911_v2   ;;  %971 = vst [vmem:[%s1158_s27 + $0x70] sm:$0xff] %v951_v3  }
  0xfa PF: > { %s13_s12 = sadd.s32 1, %s1063_s12  }
  0xfb   : > { %p10_p4 = scmp.ge.s32.totalorder %s13_s12, 4  }
  0xfd   :  { %12 = sbr.rel (!%p10_p4) target bundleno = 1 (0x1), region = 62 }

// kernel: allconvnet_forward.8
= control target key start
LH: loop header
LB: loop body
LE: loop exit
PB: predicated region body
PF: predicated region fallthrough
CT: control target
= control target key end

     0   :  { %s3268_s12 = smov 0   ;;  %s3927_s0 = inlined_call_operand.vmem [shape: bf16[512,864], index: 0, kind: input, shape index: {}]   ;;  %s3928_s1 = inlined_call_operand.vmem [shape: bf16[864,128], index: 1, kind: input, shape index: {}]   ;;  %s3929_s2 = inlined_call_operand.vmem [shape: f32[1,128], index: 2, kind: input, shape index: {}]   ;;  %s3930_s3 = inlined_call_operand.vmem [shape: bf16[512,128], index: 3, kind: output, shape index: {}]  }
   0x1 LB: > { %s2246_s13 = sadd.s32 4294967295, %s3246_s12   ;;  %p2250_p0 = scmp.ge.s32.totalorder %s3246_s12, 1  ;;  %s3246_s12 = sphi %s3268_s12, %s13_s12  }
   0x2   : > { %p139_p1 = scmp.lt.s32.totalorder %s3246_s12, 3 }
   0x4   : > { %p140_p2 = pnand %p2250_p0, %p139_p1 }
   0x6   : > { %143 = sbr.rel (%p140_p2) target bundleno = 470 (0x1d6), region = 32 }
   0xb   : > { %v3026_v0 = vld [vmem:[%s3928_s1 + $0x78] sm:$0xff]   ;;  %s2251_s16 = sshll.u32 %s2246_s13, 5  ;;  %v3028_v2 = vld [vmem:[%s3928_s1 + $0x70] sm:$0xff]   ;;  %v3030_v4 = vld [vmem:[%s3928_s1 + $0x68] sm:$0xff]   ;;  %vm1305_vm0 = vcmask 785408  }
   0xc   : > { %v3027_v1 = vld [vmem:[%s3928_s1 + $0x38] sm:$0xff]   ;;  %2599 = vmatprep.subr.bf16.mxu0 %v3026_v0  ;;  %3001 = vmatprep.subr.bf16.mxu1 %v3026_v0  ;;  %p165_p3 = scmp.lt.s32.totalorder %s2251_s16, 63  ;;  %v3029_v3 = vld [vmem:[%s3928_s1 + $0x30] sm:$0xff]   ;;  %v3031_v5 = vld [vmem:[%s3928_s1 + $0x28] sm:$0xff]  }
   0xd   : > { %2600 = vmatpush3.bf16.msra.mxu0 %v3027_v1  ;;  %3009 = vmatpush3.bf16.msra.mxu1 %v3027_v1  ;;  %v3032_v6 = vld [vmem:[%s3928_s1 + $0x60] sm:$0xff]   ;;  %v3034_v8 = vld [vmem:[%s3928_s1 + $0x58] sm:$0xff]   ;;  %v3036_v10 = vld [vmem:[%s3928_s1 + $0x50] sm:$0xff]  }
   0xe   : > { %2601 = vmatprep.subr.bf16.mxu0 %v3028_v2  ;;  %3002 = vmatprep.subr.bf16.mxu1 %v3028_v2  ;;  %s3954_s16 = smov (!%p165_p3, %s2251_s16), 63  ;;  %v3033_v7 = vld [vmem:[%s3928_s1 + $0x20] sm:$0xff]   ;;  %v3035_v9 = vld [vmem:[%s3928_s1 + $0x18] sm:$0xff]   ;;  %v3037_v13 = vld [vmem:[%s3928_s1 + $0x10] sm:$0xff]  }
   0xf   : > { %s3017_s29 = smul.u32 28, %s3954_s16  ;;  %v3038_v14 = vld [vmem:[%s3928_s1 + $0x48] sm:$0xff]   ;;  %v3040_v16 = vld [vmem:[%s3928_s1 + $0x40] sm:$0xff]   ;;  %v3048_v18 = vld [vmem:[%s3928_s1 + $0xf8] sm:$0xff]   ;;  %s2254_s4 = sshll.u32 %s3954_s16, 2 }
  0x10   : > { %v3039_v15 = vld [vmem:[%s3928_s1 + $0x8] sm:$0xff]   ;;  %v3041_v17 = vld [vmem:[%s3928_s1] sm:$0xff]   ;;  %v3049_v21 = vld [vmem:[%s3928_s1 + $0x178] sm:$0xff]   ;;  %s3840_s6 = scalar_lea.vmem %s3930_s3, %s2254_s4 }
  0x11   : > { %2602 = vmatpush3.bf16.msra.mxu0 %v3029_v3  ;;  %3010 = vmatpush3.bf16.msra.mxu1 %v3029_v3  ;;  %s3309_s9 = scalar_lea.vmem %s3927_s0, %s3017_s29  ;;  %v3050_v22 = vld [vmem:[%s3928_s1 + $0xb8] sm:$0xff]   ;;  %v3052_v24 = vld [vmem:[%s3928_s1 + $0xf0] sm:$0xff]   ;;  %v3060_v32 = vld [vmem:[%s3928_s1 + $0xe8] sm:$0xff]  }
  0x12   : > { %2603 = vmatprep.subr.bf16.mxu0 %v3030_v4  ;;  %3003 = vmatprep.subr.bf16.mxu1 %v3030_v4  ;;  %v3044_v11 = vld [vmem:[%s3309_s9 + $0x4] ss:$28 sps:$4 sm:$0xff]   ;;  %v3051_v23 = vld [vmem:[%s3928_s1 + $0x138] sm:$0xff]   ;;  %v3063_v27 = vld [vmem:[%s3928_s1 + $0x170] sm:$0xff]  }
  0x13   : > { %v3047_v12 = vld [vmem:[%s3309_s9 + $0x2a4] ss:$28 sps:$4 sm:$0xff]   ;;  %1386 = vmatprep.mubr.bf16.mxu0 %v3044_v11  ;;  %v3054_v25 = vld [vmem:[%s3309_s9 + $0x3c] ss:$28 sps:$4 sm:$0xff]   ;;  %v3053_v28 = vld [vmem:[%s3928_s1 + $0xb0] sm:$0xff]  }
  0x14   : > { %1482 = vmatprep.mubr.bf16.mxu1 %v3047_v12  ;;  %v3042_v19 = vld [vmem:[%s3309_s9] ss:$28 sps:$4 sm:$0xff]   ;;  %v3065_v29 = vld [vmem:[%s3928_s1 + $0x130] sm:$0xff]   ;;  %v3061_v33 = vld [vmem:[%s3928_s1 + $0xa8] sm:$0xff]  }
  0x15   : > { %2604 = vmatpush3.bf16.msra.mxu0 %v3031_v5  ;;  %3011 = vmatpush3.bf16.msra.mxu1 %v3031_v5  ;;  %v3045_v20 = vld [vmem:[%s3309_s9 + $0x2a0] ss:$28 sps:$4 sm:$0xff]   ;;  %v3058_v30 = vld [vmem:[%s3309_s9 + $0x38] ss:$28 sps:$4 sm:$0xff]   ;;  %v3070_v39 = vld [vmem:[%s3309_s9 + $0x70] ss:$28 sps:$4 sm:$0xff]  }
  0x16   : > { %2605 = vmatprep.subr.bf16.mxu0 %v3032_v6  ;;  %3004 = vmatprep.subr.bf16.mxu1 %v3032_v6  ;;  %v3056_v26 = vld [vmem:[%s3309_s9 + $0x2dc] ss:$28 sps:$4 sm:$0xff]   ;;  %v3062_v34 = vld [vmem:[%s3928_s1 + $0xe0] sm:$0xff]   ;;  %v3066_v35 = vld [vmem:[%s3309_s9 + $0x74] ss:$28 sps:$4 sm:$0xff]  }
  0x17   : > { %v3059_v31 = vld [vmem:[%s3309_s9 + $0x2d8] ss:$28 sps:$4 sm:$0xff]   ;;  %v3064_v37 = vld [vmem:[%s3928_s1 + $0xa0] sm:$0xff]   ;;  %v3071_v40 = vld [vmem:[%s3309_s9 + $0x310] ss:$28 sps:$4 sm:$0xff]  }
  0x18   : > { %v3068_v36 = vld [vmem:[%s3309_s9 + $0x314] ss:$28 sps:$4 sm:$0xff]   ;;  %v3072_v38 = vld [vmem:[%s3928_s1 + $0xd8] sm:$0xff]   ;;  %v3083_v41 = vld [vmem:[%s3928_s1 + $0x168] sm:$0xff]  }
  0x19   : > { %2606 = vmatpush3.bf16.msra.mxu0 %v3033_v7  ;;  %3012 = vmatpush3.bf16.msra.mxu1 %v3033_v7  ;;  %v3073_v42 = vld [vmem:[%s3928_s1 + $0x98] sm:$0xff]   ;;  %v3074_v43 = vld [vmem:[%s3928_s1 + $0xd0] sm:$0xff]   ;;  %v3085_v44 = vld [vmem:[%s3928_s1 + $0x128] sm:$0xff]  }
  0x1a   : > { %2607 = vmatprep.subr.bf16.mxu0 %v3034_v8  ;;  %3005 = vmatprep.subr.bf16.mxu1 %v3034_v8  ;;  %v3076_v45 = vld [vmem:[%s3309_s9 + $0xac] ss:$28 sps:$4 sm:$0xff]   ;;  %v3075_v47 = vld [vmem:[%s3928_s1 + $0x90] sm:$0xff]   ;;  %v3094_v51 = vld [vmem:[%s3928_s1 + $0x160] sm:$0xff]  }
  0x1b   : > { %v3078_v46 = vld [vmem:[%s3309_s9 + $0x34c] ss:$28 sps:$4 sm:$0xff]   ;;  %v3096_v53 = vld [vmem:[%s3928_s1 + $0x120] sm:$0xff]   ;;  %v3109_v60 = vld [vmem:[%s3928_s1 + $0x158] sm:$0xff]  }
  0x1c   : > { %v3082_v48 = vld [vmem:[%s3928_s1 + $0xc8] sm:$0xff]   ;;  %v3088_v54 = vld [vmem:[%s3309_s9 + $0xe4] ss:$28 sps:$4 sm:$0xff]   ;;  %v3110_v61 = vld [vmem:[%s3928_s1 + $0x118] sm:$0xff]  }
  0x1d   : > { %2608 = vmatpush3.bf16.msra.mxu0 %v3035_v9  ;;  %3013 = vmatpush3.bf16.msra.mxu1 %v3035_v9  ;;  %v3080_v49 = vld [vmem:[%s3309_s9 + $0xa8] ss:$28 sps:$4 sm:$0xff]   ;;  %v3093_v62 = vld [vmem:[%s3309_s9 + $0xe0] ss:$28 sps:$4 sm:$0xff]   ;;  %v3118_v2 = vld [vmem:[%s3928_s1 + $0x150] sm:$0xff]  }
  0x1e   : > { %2609 = vmatprep.subr.bf16.mxu0 %v3036_v10  ;;  %3006 = vmatprep.subr.bf16.mxu1 %v3036_v10  ;;  %v3081_v50 = vld [vmem:[%s3309_s9 + $0x348] ss:$28 sps:$4 sm:$0xff]   ;;  %v3097_v63 = vld [vmem:[%s3309_s9 + $0x11c] ss:$28 sps:$4 sm:$0xff]   ;;  %v3119_v3 = vld [vmem:[%s3928_s1 + $0x110] sm:$0xff]  }
  0x1f   : > { %v3084_v52 = vld [vmem:[%s3928_s1 + $0x88] sm:$0xff]   ;;  %v3086_v55 = vld [vmem:[%s3928_s1 + $0xc0] sm:$0xff]   ;;  %v3101_v4 = vld [vmem:[%s3309_s9 + $0x118] ss:$28 sps:$4 sm:$0xff]  }
  0x20   : > { %v3092_v56 = vld [vmem:[%s3309_s9 + $0xc] ss:$28 sps:$4 sm:$0xff]   ;;  %v3087_v57 = vld [vmem:[%s3928_s1 + $0x80] sm:$0xff]   ;;  %v3103_v6 = vld [vmem:[%s3309_s9 + $0x154] ss:$28 sps:$4 sm:$0xff]  }
  0x21   : > { %2610 = vmatpush3.bf16.msra.mxu0 %v3037_v13  ;;  %3014 = vmatpush3.bf16.msra.mxu1 %v3037_v13  ;;  %v3095_v58 = vld [vmem:[%s3928_s1 + $0x1a8] sm:$0xff]   ;;  %v3099_v0 = vld [vmem:[%s3309_s9 + $0x44] ss:$28 sps:$4 sm:$0xff]   ;;  %v3105_v7 = vld [vmem:[%s3309_s9 + $0x7c] ss:$28 sps:$4 sm:$0xff]  }
  0x22   : > { %2611 = vmatprep.subr.bf16.mxu0 %v3038_v14  ;;  %3007 = vmatprep.subr.bf16.mxu1 %v3038_v14  ;;  %v3090_v59 = vld [vmem:[%s3309_s9 + $0x8] ss:$28 sps:$4 sm:$0xff]   ;;  %v3102_v5 = vld [vmem:[%s3309_s9 + $0x40] ss:$28 sps:$4 sm:$0xff]   ;;  %v3107_v10 = vld [vmem:[%s3309_s9 + $0x150] ss:$28 sps:$4 sm:$0xff]  }
  0x23   : > { %v3117_v1 = vld [vmem:[%s3928_s1 + $0x1a0] sm:$0xff]   ;;  %v3132_v8 = vld [vmem:[%s3928_s1 + $0x148] sm:$0xff]   ;;  %v3108_v11 = vld [vmem:[%s3309_s9 + $0x78] ss:$28 sps:$4 sm:$0xff]  }
  0x24   : > { %v3133_v9 = vld [vmem:[%s3928_s1 + $0x108] sm:$0xff]   ;;  %v3138_v13 = vld [vmem:[%s3928_s1 + $0x198] sm:$0xff]   ;;  %v3113_v14 = vld [vmem:[%s3309_s9 + $0xb4] ss:$28 sps:$4 sm:$0xff]  }
  0x25   : > { %2612 = vmatpush3.bf16.msra.mxu0 %v3039_v15  ;;  %3015 = vmatpush3.bf16.msra.mxu1 %v3039_v15  ;;  %v3111_v12 = vld [vmem:[%s3309_s9 + $0x18c] ss:$28 sps:$4 sm:$0xff]   ;;  %v3141_v15 = vld [vmem:[%s3928_s1 + $0x140] sm:$0xff]  }
  0x26   : > { %2613 = vmatprep.subr.bf16.mxu0 %v3040_v16  ;;  %3008 = vmatprep.subr.bf16.mxu1 %v3040_v16  ;;  %v3142_v16 = vld [vmem:[%s3928_s1 + $0x100] sm:$0xff]  }
  0x29   : > { %2614 = vmatpush3.bf16.msra.mxu0 %v3041_v17  ;;  %3016 = vmatpush3.bf16.msra.mxu1 %v3041_v17  ;;  %v3115_v17 = vld [vmem:[%s3309_s9 + $0x188] ss:$28 sps:$4 sm:$0xff]  }
  0x2a   : > { %2711 = vmatprep.subr.bf16.mxu1 %v3048_v18  ;;  %2823 = vmatprep.subr.bf16.mxu0 %v3049_v21  ;;  %v3116_v18 = vld [vmem:[%s3309_s9 + $0xb0] ss:$28 sps:$4 sm:$0xff]  }
  0x2b   : > { %v3122_v21 = vld [vmem:[%s3309_s9 + $0xec] ss:$28 sps:$4 sm:$0xff]  }
  0x2c   : > { %1387 = vmatmul.mubr.bf16.vlgmr.msra.gmra.mxu0 %v3042_v19  ;;  %1483 = vmatmul.mubr.bf16.vlgmr.msra.gmra.mxu1 %v3045_v20  ;;  %v3120_v19 = vld [vmem:[%s3309_s9 + $0x1c4] ss:$28 sps:$4 sm:$0xff]   ;;  %v3155_v20 = vld [vmem:[%s3928_s1 + $0x190] sm:$0xff]  }
  0x2d   : > { %2712 = vmatpush3.bf16.msra.mxu1 %v3050_v22  ;;  %2824 = vmatpush3.bf16.msra.mxu0 %v3051_v23  ;;  %v3124_v22 = vld [vmem:[%s3309_s9 + $0x1c0] ss:$28 sps:$4 sm:$0xff]   ;;  %v3125_v23 = vld [vmem:[%s3309_s9 + $0xe8] ss:$28 sps:$4 sm:$0xff]  }
  0x2e   : > { %2713 = vmatprep.subr.bf16.mxu1 %v3052_v24  ;;  %1394 = vmatprep.mubr.bf16.mxu0 %v3054_v25  ;;  %v3126_v24 = vld [vmem:[%s3309_s9 + $0x1fc] ss:$28 sps:$4 sm:$0xff]   ;;  %v3128_v25 = vld [vmem:[%s3309_s9 + $0x124] ss:$28 sps:$4 sm:$0xff]  }
  0x2f   : > { %1490 = vmatprep.mubr.bf16.mxu1 %v3056_v26  ;;  %2825 = vmatprep.subr.bf16.mxu0 %v3063_v27  ;;  %v3174_v26 = vld [vmem:[%s3928_s1 + $0x188] sm:$0xff]   ;;  %v3130_v27 = vld [vmem:[%s3309_s9 + $0x1f8] ss:$28 sps:$4 sm:$0xff]  }
  0x31   : > { %2714 = vmatpush3.bf16.msra.mxu1 %v3053_v28  ;;  %2826 = vmatpush3.bf16.msra.mxu0 %v3065_v29  ;;  %v3131_v28 = vld [vmem:[%s3309_s9 + $0x120] ss:$28 sps:$4 sm:$0xff]   ;;  %v3134_v29 = vld [vmem:[%s3309_s9 + $0x234] ss:$28 sps:$4 sm:$0xff]  }
  0x32   : > { %2715 = vmatprep.subr.bf16.mxu1 %v3060_v32  ;;  %2827 = vmatprep.subr.bf16.mxu0 %v3083_v41  ;;  %v3139_v32 = vld [vmem:[%s3309_s9 + $0x230] ss:$28 sps:$4 sm:$0xff]   ;;  %v3154_v41 = vld [vmem:[%s3309_s9 + $0x1c8] ss:$28 sps:$4 sm:$0xff]  }
  0x34   : > { %1395 = vmatmul.mubr.bf16.gmra.mxu0 %v3058_v30  ;;  %1491 = vmatmul.mubr.bf16.gmra.mxu1 %v3059_v31  ;;  %v3136_v30 = vld [vmem:[%s3309_s9 + $0x15c] ss:$28 sps:$4 sm:$0xff]   ;;  %v3191_v31 = vld [vmem:[%s3928_s1 + $0x180] sm:$0xff]  }
  0x35   : > { %2716 = vmatpush3.bf16.msra.mxu1 %v3061_v33  ;;  %1402 = vmatprep.mubr.bf16.mxu0 %v3066_v35  ;;  %v3140_v33 = vld [vmem:[%s3309_s9 + $0x158] ss:$28 sps:$4 sm:$0xff]  }
  0x36   : > { %2717 = vmatprep.subr.bf16.mxu1 %v3062_v34  ;;  %1498 = vmatprep.mubr.bf16.mxu1 %v3068_v36  ;;  %v3143_v34 = vld [vmem:[%s3309_s9 + $0x26c] ss:$28 sps:$4 sm:$0xff]   ;;  %v3145_v35 = vld [vmem:[%s3309_s9 + $0x194] ss:$28 sps:$4 sm:$0xff]  }
  0x37   : > { %2828 = vmatpush3.bf16.msra.mxu0 %v3085_v44  ;;  %v3147_v36 = vld [vmem:[%s3309_s9 + $0x268] ss:$28 sps:$4 sm:$0xff]   ;;  %v3160_v44 = vld [vmem:[%s3309_s9 + $0x200] ss:$28 sps:$4 sm:$0xff]  }
  0x38   : > { %2829 = vmatprep.subr.bf16.mxu0 %v3094_v51  ;;  %v3170_v51 = vld [vmem:[%s3309_s9 + $0xbc] ss:$28 sps:$4 sm:$0xff]  }
  0x39   : > { %2718 = vmatpush3.bf16.msra.mxu1 %v3064_v37  ;;  %v3148_v37 = vld [vmem:[%s3309_s9 + $0x190] ss:$28 sps:$4 sm:$0xff]  }
  0x3a   : > { %2719 = vmatprep.subr.bf16.mxu1 %v3072_v38  ;;  %v3149_v38 = vld [vmem:[%s3309_s9 + $0x1cc] ss:$28 sps:$4 sm:$0xff]  }
  0x3b   : > { %2830 = vmatpush3.bf16.msra.mxu0 %v3096_v53  ;;  %v3173_v53 = vld [vmem:[%s3309_s9 + $0xb8] ss:$28 sps:$4 sm:$0xff]  }
  0x3c   : > { %1403 = vmatmul.mubr.bf16.gmra.mxu0 %v3070_v39  ;;  %1499 = vmatmul.mubr.bf16.gmra.mxu1 %v3071_v40  ;;  %v3153_v39 = vld [vmem:[%s3309_s9 + $0x14] ss:$28 sps:$4 sm:$0xff]  }
  0x3d   : > { %2720 = vmatpush3.bf16.msra.mxu1 %v3073_v42  ;;  %1410 = vmatprep.mubr.bf16.mxu0 %v3076_v45  ;;  %v3151_v40 = vld [vmem:[%s3309_s9 + $0x10] ss:$28 sps:$4 sm:$0xff]   ;;  %v3156_v42 = vld [vmem:[%s3309_s9 + $0x204] ss:$28 sps:$4 sm:$0xff]  }
  0x3e   : > { %2721 = vmatprep.subr.bf16.mxu1 %v3074_v43  ;;  %1506 = vmatprep.mubr.bf16.mxu1 %v3078_v46  ;;  %v3158_v43 = vld [vmem:[%s3309_s9 + $0x4c] ss:$28 sps:$4 sm:$0xff]   ;;  %v3162_v46 = vld [vmem:[%s3309_s9 + $0x23c] ss:$28 sps:$4 sm:$0xff]  }
  0x3f   : > { %2831 = vmatprep.subr.bf16.mxu0 %v3109_v60  ;;  %v3161_v45 = vld [vmem:[%s3309_s9 + $0x48] ss:$28 sps:$4 sm:$0xff]   ;;  %v3185_v60 = vld [vmem:[%s3309_s9 + $0x2e0] ss:$28 sps:$4 sm:$0xff]  }
  0x40   : > { %2832 = vmatpush3.bf16.msra.mxu0 %v3110_v61  ;;  %v3186_v61 = vld [vmem:[%s3309_s9 + $0x128] ss:$28 sps:$4 sm:$0xff]  }
  0x41   : > { %2722 = vmatpush3.bf16.msra.mxu1 %v3075_v47  ;;  %2833 = vmatprep.subr.bf16.mxu0 %v3118_v2  ;;  %v3164_v47 = vld [vmem:[%s3309_s9 + $0x84] ss:$28 sps:$4 sm:$0xff]   ;;  %v3194_v2 = vld [vmem:[%s3309_s9 + $0x354] ss:$28 sps:$4 sm:$0xff]  }
  0x42   : > { %2723 = vmatprep.subr.bf16.mxu1 %v3082_v48  ;;  %v3166_v48 = vld [vmem:[%s3309_s9 + $0x238] ss:$28 sps:$4 sm:$0xff]  }
  0x44   : > { %1411 = vmatmul.mubr.bf16.gmra.mxu0 %v3080_v49  ;;  %1507 = vmatmul.mubr.bf16.gmra.mxu1 %v3081_v50  ;;  %v3167_v49 = vld [vmem:[%s3309_s9 + $0x80] ss:$28 sps:$4 sm:$0xff]   ;;  %v3168_v50 = vld [vmem:[%s3309_s9 + $0x274] ss:$28 sps:$4 sm:$0xff]  }
  0x45   : > { %2724 = vmatpush3.bf16.msra.mxu1 %v3084_v52  ;;  %1418 = vmatprep.mubr.bf16.mxu0 %v3088_v54  ;;  %v3172_v52 = vld [vmem:[%s3309_s9 + $0x270] ss:$28 sps:$4 sm:$0xff]  }
  0x46   : > { %2725 = vmatprep.subr.bf16.mxu1 %v3086_v55  ;;  %1547 = vmatprep.mubr.bf16.mxu1 %v3092_v56  ;;  %v3175_v54 = vld [vmem:[%s3309_s9 + $0x2ac] ss:$28 sps:$4 sm:$0xff]   ;;  %v3177_v55 = vld [vmem:[%s3309_s9 + $0xf4] ss:$28 sps:$4 sm:$0xff]  }
  0x47   : > { %2834 = vmatpush3.bf16.msra.mxu0 %v3119_v3  ;;  %v3179_v56 = vld [vmem:[%s3309_s9 + $0x2a8] ss:$28 sps:$4 sm:$0xff]   ;;  %v3196_v3 = vld [vmem:[%s3309_s9 + $0x19c] ss:$28 sps:$4 sm:$0xff]  }
  0x48   : > { %2835 = vmatprep.subr.bf16.mxu0 %v3132_v8  ;;  %v3203_v8 = vld [vmem:[%s3309_s9 + $0x1d0] ss:$28 sps:$4 sm:$0xff]  }
  0x49   : > { %2726 = vmatpush3.bf16.msra.mxu1 %v3087_v57  ;;  %v3180_v57 = vld [vmem:[%s3309_s9 + $0xf0] ss:$28 sps:$4 sm:$0xff]  }
  0x4a   : > { %2957 = vmatprep.subr.bf16.mxu1 %v3095_v58 }
  0x4b   : > { %2836 = vmatpush3.bf16.msra.mxu0 %v3133_v9  ;;  %v3204_v9 = vld [vmem:[%s3309_s9 + $0x50] ss:$28 sps:$4 sm:$0xff]  }
  0x4c   : > { %1419 = vmatmul.mubr.bf16.gmra.mxu0 %v3093_v62  ;;  %1548 = vmatmul.mubr.bf16.vlgmr.msra.gmra.mxu1 %v3090_v59  ;;  %v3183_v59 = vld [vmem:[%s3309_s9 + $0x12c] ss:$28 sps:$4 sm:$0xff]   ;;  %v3187_v62 = vld [vmem:[%s3309_s9 + $0x31c] ss:$28 sps:$4 sm:$0xff]  }
  0x4d   : > { %2958 = vmatpush3.bf16.msra.mxu1 %v3095_v58  ;;  %1426 = vmatprep.mubr.bf16.mxu0 %v3097_v63  ;;  %v3181_v58 = vld [vmem:[%s3309_s9 + $0x2e4] ss:$28 sps:$4 sm:$0xff]  }
  0x4e   : > { %1555 = vmatprep.mubr.bf16.mxu1 %v3099_v0  ;;  %2959 = vmatprep.subr.bf16.mxu1 %v3117_v1  ;;  %v3189_v63 = vld [vmem:[%s3309_s9 + $0x164] ss:$28 sps:$4 sm:$0xff]   ;;  %v3192_v0 = vld [vmem:[%s3309_s9 + $0x318] ss:$28 sps:$4 sm:$0xff]  }
  0x4f   : > { %2837 = vmatprep.subr.bf16.mxu0 %v3141_v15  ;;  %v3212_v15 = vld [vmem:[%s3309_s9 + $0xf8] ss:$28 sps:$4 sm:$0xff]  }
  0x50   : > { %2838 = vmatpush3.bf16.msra.mxu0 %v3142_v16  ;;  %v3213_v16 = vld [vmem:[%s3309_s9 + $0x240] ss:$28 sps:$4 sm:$0xff]  }
  0x51   : > { %2960 = vmatpush3.bf16.msra.mxu1 %v3117_v1  ;;  %v3193_v1 = vld [vmem:[%s3309_s9 + $0x160] ss:$28 sps:$4 sm:$0xff]  }
  0x52   : > { %2961 = vmatprep.subr.bf16.mxu1 %v3138_v13 }
  0x54   : > { %1427 = vmatmul.mubr.bf16.gmra.mxu0 %v3101_v4  ;;  %1556 = vmatmul.mubr.bf16.gmra.mxu1 %v3102_v5  ;;  %v3198_v4 = vld [vmem:[%s3309_s9 + $0x350] ss:$28 sps:$4 sm:$0xff]   ;;  %v3199_v5 = vld [vmem:[%s3309_s9 + $0x198] ss:$28 sps:$4 sm:$0xff]  }
  0x55   : > { %1434 = vmatprep.mubr.bf16.mxu0 %v3103_v6  ;;  %1563 = vmatprep.mubr.bf16.mxu1 %v3105_v7  ;;  %v3200_v6 = vld [vmem:[%s3309_s9 + $0x1d4] ss:$28 sps:$4 sm:$0xff]  }
  0x56   : > { %2962 = vmatpush3.bf16.msra.mxu1 %v3138_v13  ;;  %v3202_v7 = vld [vmem:[%s3309_s9 + $0x18] ss:$28 sps:$4 sm:$0xff]   ;;  %v3209_v13 = vld [vmem:[%s3309_s9 + $0xc0] ss:$28 sps:$4 sm:$0xff]  }
  0x57   : > { %2963 = vmatprep.subr.bf16.mxu1 %v3155_v20 }
  0x5a   : > { %2964 = vmatpush3.bf16.msra.mxu1 %v3155_v20  ;;  %v3218_v20 = vld [vmem:[%s3309_s9 + $0x278] ss:$28 sps:$4 sm:$0xff]  }
  0x5b   : > { %2965 = vmatprep.subr.bf16.mxu1 %v3174_v26 }
  0x5c   : > { %1435 = vmatmul.mubr.bf16.gmra.mxu0 %v3107_v10  ;;  %1564 = vmatmul.mubr.bf16.gmra.mxu1 %v3108_v11  ;;  %v3205_v10 = vld [vmem:[%s3309_s9 + $0x20c] ss:$28 sps:$4 sm:$0xff]  }
  0x5d   : > { %1442 = vmatprep.mubr.bf16.mxu0 %v3111_v12  ;;  %1571 = vmatprep.mubr.bf16.mxu1 %v3113_v14  ;;  %v3207_v11 = vld [vmem:[%s3309_s9 + $0x88] ss:$28 sps:$4 sm:$0xff]  }
  0x5e   : > { %2966 = vmatpush3.bf16.msra.mxu1 %v3174_v26  ;;  %v3208_v12 = vld [vmem:[%s3309_s9 + $0x208] ss:$28 sps:$4 sm:$0xff]  }
  0x5f   : > { %2967 = vmatprep.subr.bf16.mxu1 %v3191_v31  ;;  %v3210_v14 = vld [vmem:[%s3309_s9 + $0x244] ss:$28 sps:$4 sm:$0xff]   ;;  %v3225_v26 = vld [vmem:[%s3309_s9 + $0x2ec] ss:$28 sps:$4 sm:$0xff]  }
  0x62   : > { %2968 = vmatpush3.bf16.msra.mxu1 %v3191_v31 }
  0x64   : > { %1443 = vmatmul.mubr.bf16.gmra.mxu0 %v3115_v17  ;;  %1572 = vmatmul.mubr.bf16.gmra.mxu1 %v3116_v18  ;;  %v3214_v17 = vld [vmem:[%s3309_s9 + $0x130] ss:$28 sps:$4 sm:$0xff]   ;;  %v3215_v18 = vld [vmem:[%s3309_s9 + $0x27c] ss:$28 sps:$4 sm:$0xff]  }
  0x65   : > { %1450 = vmatprep.mubr.bf16.mxu0 %v3120_v19  ;;  %1579 = vmatprep.mubr.bf16.mxu1 %v3122_v21  ;;  %v3217_v19 = vld [vmem:[%s3309_s9 + $0x168] ss:$28 sps:$4 sm:$0xff]   ;;  %v3219_v21 = vld [vmem:[%s3309_s9 + $0x1a0] ss:$28 sps:$4 sm:$0xff]  }
  0x6c   : > { %1451 = vmatmul.mubr.bf16.gmra.mxu0 %v3124_v22  ;;  %1580 = vmatmul.mubr.bf16.gmra.mxu1 %v3125_v23  ;;  %v3220_v22 = vld [vmem:[%s3309_s9 + $0x2b4] ss:$28 sps:$4 sm:$0xff]  }
  0x6d   : > { %1458 = vmatprep.mubr.bf16.mxu0 %v3126_v24  ;;  %1587 = vmatprep.mubr.bf16.mxu1 %v3128_v25  ;;  %v3222_v23 = vld [vmem:[%s3309_s9 + $0x1d8] ss:$28 sps:$4 sm:$0xff]   ;;  %v3223_v24 = vld [vmem:[%s3309_s9 + $0x2b0] ss:$28 sps:$4 sm:$0xff]  }
  0x6e   : > { %v3224_v25 = vld [vmem:[%s3309_s9 + $0x210] ss:$28 sps:$4 sm:$0xff]  }
  0x74   : > { %1459 = vmatmul.mubr.bf16.gmra.mxu0 %v3130_v27  ;;  %1588 = vmatmul.mubr.bf16.gmra.mxu1 %v3131_v28  ;;  %v3227_v27 = vld [vmem:[%s3309_s9 + $0x248] ss:$28 sps:$4 sm:$0xff]  }
  0x75   : > { %1466 = vmatprep.mubr.bf16.mxu0 %v3134_v29  ;;  %1595 = vmatprep.mubr.bf16.mxu1 %v3136_v30 }
  0x7c   : > { %1467 = vmatmul.mubr.bf16.gmra.mxu0 %v3139_v32  ;;  %1596 = vmatmul.mubr.bf16.gmra.mxu1 %v3140_v33 }
  0x7d   : > { %1474 = vmatprep.mubr.bf16.mxu0 %v3143_v34  ;;  %1603 = vmatprep.mubr.bf16.mxu1 %v3145_v35 }
  0x84   : > { %1475 = vmatmul.mubr.bf16.gmra.mxu0 %v3147_v36  ;;  %1604 = vmatmul.mubr.bf16.gmra.mxu1 %v3148_v37  ;;  %v3228_v36 = vld [vmem:[%s3309_s9 + $0x2e8] ss:$28 sps:$4 sm:$0xff]   ;;  %v3229_v37 = vld [vmem:[%s3309_s9 + $0x280] ss:$28 sps:$4 sm:$0xff]  }
  0x85   : > { %1611 = vmatprep.mubr.bf16.mxu1 %v3149_v38  ;;  %1708 = vmatprep.mubr.bf16.mxu0 %v3153_v39  ;;  %v3230_v38 = vld [vmem:[%s3309_s9 + $0x324] ss:$28 sps:$4 sm:$0xff]   ;;  %v3232_v39 = vld [vmem:[%s3309_s9 + $0x2b8] ss:$28 sps:$4 sm:$0xff]  }
  0x8c   : > { %1612 = vmatmul.mubr.bf16.gmra.mxu1 %v3154_v41  ;;  %1709 = vmatmul.mubr.bf16.vlgmr.msra.gmra.mxu0 %v3151_v40 }
  0x8d   : > { %1619 = vmatprep.mubr.bf16.mxu1 %v3156_v42  ;;  %1716 = vmatprep.mubr.bf16.mxu0 %v3158_v43 }
  0x94   : > { %1620 = vmatmul.mubr.bf16.gmra.mxu1 %v3160_v44  ;;  %1717 = vmatmul.mubr.bf16.gmra.mxu0 %v3161_v45 }
  0x95   : > { %1627 = vmatprep.mubr.bf16.mxu1 %v3162_v46  ;;  %1724 = vmatprep.mubr.bf16.mxu0 %v3164_v47 }
  0x9c   : > { %1628 = vmatmul.mubr.bf16.gmra.mxu1 %v3166_v48  ;;  %1725 = vmatmul.mubr.bf16.gmra.mxu0 %v3167_v49 }
  0x9d   : > { %1635 = vmatprep.mubr.bf16.mxu1 %v3168_v50  ;;  %1732 = vmatprep.mubr.bf16.mxu0 %v3170_v51 }
  0xa4   : > { %1636 = vmatmul.mubr.bf16.gmra.mxu1 %v3172_v52  ;;  %1733 = vmatmul.mubr.bf16.gmra.mxu0 %v3173_v53  ;;  %v3233_v52 = vld [vmem:[%s3309_s9 + $0x320] ss:$28 sps:$4 sm:$0xff]   ;;  %v3234_v53 = vld [vmem:[%s3309_s9 + $0x2f0] ss:$28 sps:$4 sm:$0xff]  }
  0xa5   : > { %1643 = vmatprep.mubr.bf16.mxu1 %v3175_v54  ;;  %1740 = vmatprep.mubr.bf16.mxu0 %v3177_v55  ;;  %v3235_v54 = vld [vmem:[%s3309_s9 + $0x35c] ss:$28 sps:$4 sm:$0xff]   ;;  %v3237_v55 = vld [vmem:[%s3309_s9 + $0x328] ss:$28 sps:$4 sm:$0xff]  }
  0xac   : > { %1644 = vmatmul.mubr.bf16.gmra.mxu1 %v3179_v56  ;;  %1741 = vmatmul.mubr.bf16.gmra.mxu0 %v3180_v57 }
  0xad   : > { %1651 = vmatprep.mubr.bf16.mxu1 %v3181_v58  ;;  %1748 = vmatprep.mubr.bf16.mxu0 %v3183_v59 }
  0xb4   : > { %1652 = vmatmul.mubr.bf16.gmra.mxu1 %v3185_v60  ;;  %1749 = vmatmul.mubr.bf16.gmra.mxu0 %v3186_v61 }
  0xb5   : > { %1659 = vmatprep.mubr.bf16.mxu1 %v3187_v62  ;;  %1756 = vmatprep.mubr.bf16.mxu0 %v3189_v63 }
  0xbc   : > { %1660 = vmatmul.mubr.bf16.gmra.mxu1 %v3192_v0  ;;  %1757 = vmatmul.mubr.bf16.gmra.mxu0 %v3193_v1 }
  0xbd   : > { %1667 = vmatprep.mubr.bf16.mxu1 %v3194_v2  ;;  %1764 = vmatprep.mubr.bf16.mxu0 %v3196_v3 }
  0xc4   : > { %1668 = vmatmul.mubr.bf16.gmra.mxu1 %v3198_v4  ;;  %1765 = vmatmul.mubr.bf16.gmra.mxu0 %v3199_v5  ;;  %v3238_v4 = vld [vmem:[%s3309_s9 + $0x358] ss:$28 sps:$4 sm:$0xff]   ;;  %v3239_v5 = vld [vmem:[%s3309_s9 + $0x360] ss:$28 sps:$4 sm:$0xff]  }
  0xc5   : > { %1772 = vmatprep.mubr.bf16.mxu0 %v3200_v6  ;;  %2969 = vmatprep.mubr.msk.bf16.mxu1 %vm1305_vm0, %v3202_v7 }
  0xcc   : > { %1773 = vmatmul.mubr.bf16.gmra.mxu0 %v3203_v8  ;;  %2970 = vmatmul.mubr.msk.bf16.vlgmr.msra.gmra.mxu1 %vm1305_vm0, %v3204_v9 }
  0xcd   : > { %1780 = vmatprep.mubr.bf16.mxu0 %v3205_v10  ;;  %2973 = vmatprep.mubr.msk.bf16.mxu1 %vm1305_vm0, %v3207_v11 }
  0xd4   : > { %1781 = vmatmul.mubr.bf16.gmra.mxu0 %v3208_v12  ;;  %2974 = vmatmul.mubr.msk.bf16.gmra.mxu1 %vm1305_vm0, %v3209_v13 }
  0xd5   : > { %1788 = vmatprep.mubr.bf16.mxu0 %v3210_v14  ;;  %2977 = vmatprep.mubr.msk.bf16.mxu1 %vm1305_vm0, %v3212_v15 }
  0xdc   : > { %1789 = vmatmul.mubr.bf16.gmra.mxu0 %v3213_v16  ;;  %2978 = vmatmul.mubr.msk.bf16.gmra.mxu1 %vm1305_vm0, %v3214_v17 }
  0xdd   : > { %1796 = vmatprep.mubr.bf16.mxu0 %v3215_v18  ;;  %2981 = vmatprep.mubr.msk.bf16.mxu1 %vm1305_vm0, %v3217_v19 }
  0xe4   : > { %1797 = vmatmul.mubr.bf16.gmra.mxu0 %v3218_v20  ;;  %2982 = vmatmul.mubr.msk.bf16.gmra.mxu1 %vm1305_vm0, %v3219_v21 }
  0xe5   : > { %1804 = vmatprep.mubr.bf16.mxu0 %v3220_v22  ;;  %2985 = vmatprep.mubr.msk.bf16.mxu1 %vm1305_vm0, %v3222_v23  ;;  %v3603_v22 = vld [vmem:[%s3929_s2] ss:$0 sm:$0xff] }
  0xec   : > { %v2615_v28 = vpop.f32.mrf.mxu0  ;;  %v2687_v29 = vpop.f32.mrf.mxu1  ;;  %1805 = vmatmul.mubr.bf16.gmra.mxu0 %v3223_v24  ;;  %2986 = vmatmul.mubr.msk.bf16.gmra.mxu1 %vm1305_vm0, %v3224_v25 }
  0xed   : > { %1812 = vmatprep.mubr.bf16.mxu0 %v3225_v26  ;;  %2989 = vmatprep.mubr.msk.bf16.mxu1 %vm1305_vm0, %v3227_v27 }
  0xee   : > { %v2616_v30 = vpop.f32.mrf.mxu0  ;;  %v2688_v31 = vpop.f32.mrf.mxu1 }
  0xef   : > { %v3559_v32 = vadd.f32 %v2616_v30, %v2615_v28  ;;  %v3561_v33 = vadd.f32 %v2688_v31, %v2687_v29 }
  0xf0   : > { %v2618_v34 = vpop.f32.mrf.mxu0  ;;  %v2690_v35 = vpop.f32.mrf.mxu1 }
  0xf1   : > { %v1389_v27 = vadd.f32 %v3559_v32, %v3603_v22 }
  0xf2   : > { %v2619_v40 = vpop.f32.mrf.mxu0  ;;  %v2691_v41 = vpop.f32.mrf.mxu1 }
  0xf3   : > { %v3567_v42 = vadd.f32 %v2619_v40, %v2618_v34  ;;  %v3569_v43 = vadd.f32 %v2691_v41, %v2690_v35 }
  0xf4   : > { %v2621_v44 = vpop.f32.mrf.mxu0  ;;  %v2693_v45 = vpop.f32.mrf.mxu1  ;;  %1813 = vmatmul.mubr.bf16.gmra.mxu0 %v3228_v36  ;;  %2990 = vmatmul.mubr.msk.bf16.gmra.mxu1 %vm1305_vm0, %v3229_v37 }
  0xf5   : > { %1820 = vmatprep.mubr.bf16.mxu0 %v3230_v38  ;;  %2993 = vmatprep.mubr.msk.bf16.mxu1 %vm1305_vm0, %v3232_v39  ;;  %v1392_v37 = vadd.f32 %v3567_v42, %v3603_v22 }
  0xf6   : > { %v2622_v46 = vpop.f32.mrf.mxu0  ;;  %v2694_v47 = vpop.f32.mrf.mxu1 }
  0xf7   : > { %v3573_v48 = vadd.f32 %v2622_v46, %v2621_v44  ;;  %v3575_v49 = vadd.f32 %v2694_v47, %v2693_v45 }
  0xf8   : > { %v2624_v50 = vpop.f32.mrf.mxu0  ;;  %v2696_v51 = vpop.f32.mrf.mxu1 }
  0xf9   : > { %v1397_v46 = vadd.f32 %v3573_v48, %v3603_v22 }
  0xfa   : > { %v2625_v56 = vpop.f32.mrf.mxu0  ;;  %v2697_v57 = vpop.f32.mrf.mxu1 }
  0xfb   : > { %v3581_v58 = vadd.f32 %v2625_v56, %v2624_v50  ;;  %v3583_v59 = vadd.f32 %v2697_v57, %v2696_v51 }
  0xfc   : > { %v2627_v60 = vpop.f32.mrf.mxu0  ;;  %v2699_v61 = vpop.f32.mrf.mxu1  ;;  %1821 = vmatmul.mubr.bf16.gmra.mxu0 %v3233_v52  ;;  %2994 = vmatmul.mubr.msk.bf16.gmra.mxu1 %vm1305_vm0, %v3234_v53 }
  0xfd   : > { %1828 = vmatprep.mubr.bf16.mxu0 %v3235_v54  ;;  %2997 = vmatprep.mubr.msk.bf16.mxu1 %vm1305_vm0, %v3237_v55  ;;  %v1400_v55 = vadd.f32 %v3581_v58, %v3603_v22 }
  0xfe   : > { %v2628_v62 = vpop.f32.mrf.mxu0  ;;  %v2700_v63 = vpop.f32.mrf.mxu1 }
  0xff   : > { %v2629_v0 = vadd.f32 %v2628_v62, %v2627_v60  ;;  %v3587_v1 = vadd.f32 %v2700_v63, %v2699_v61 }
 0x100   : > { %v2630_v2 = vpop.f32.mrf.mxu0  ;;  %v2702_v3 = vpop.f32.mrf.mxu1 }
 0x102   : > { %v2631_v6 = vpop.f32.mrf.mxu0  ;;  %v2703_v7 = vpop.f32.mrf.mxu1 }
 0x103   : > { %v2632_v8 = vadd.f32 %v2631_v6, %v2630_v2  ;;  %v3591_v9 = vadd.f32 %v2703_v7, %v2702_v3  ;;  %v1405_v2 = vadd.f32 %v2629_v0, %v3603_v22 }
 0x104   : > { %v2633_v10 = vpop.f32.mrf.mxu0  ;;  %v2705_v11 = vpop.f32.mrf.mxu1  ;;  %1829 = vmatmul.mubr.bf16.gmra.mxu0 %v3238_v4  ;;  %2998 = vmatmul.mubr.msk.bf16.gmra.mxu1 %vm1305_vm0, %v3239_v5 }
 0x106   : > { %v2634_v12 = vpop.f32.mrf.mxu0  ;;  %v2706_v13 = vpop.f32.mrf.mxu1 }
 0x107   : > { %v2635_v14 = vadd.f32 %v2634_v12, %v2633_v10  ;;  %v3594_v15 = vadd.f32 %v2706_v13, %v2705_v11  ;;  %v1408_v11 = vadd.f32 %v2632_v8, %v3603_v22 }
 0x108   : > { %v2636_v16 = vpop.f32.mrf.mxu0  ;;  %v2708_v17 = vpop.f32.mrf.mxu1 }
 0x10a   : > { %v2637_v18 = vpop.f32.mrf.mxu0  ;;  %v2709_v19 = vpop.f32.mrf.mxu1 }
 0x10b   : > { %v3596_v20 = vadd.f32 %v2637_v18, %v2636_v16  ;;  %v3598_v21 = vadd.f32 %v2709_v19, %v2708_v17 }
 0x10c   : > { %v2639_v23 = vpop.f32.mrf.mxu0  ;;  %v2727_v24 = vpop.f32.mrf.mxu1 }
 0x10e   : > { %v2640_v25 = vpop.f32.mrf.mxu0  ;;  %v2728_v26 = vpop.f32.mrf.mxu1 }
 0x10f   : > { %v3607_v28 = vadd.f32 %v2640_v25, %v2639_v23  ;;  %v2729_v29 = vadd.f32 %v2728_v26, %v2727_v24  ;;  %v1413_v23 = vadd.f32 %v2635_v14, %v3603_v22 }
 0x110   : > { %v2642_v30 = vpop.f32.mrf.mxu0  ;;  %v2730_v31 = vpop.f32.mrf.mxu1 }
 0x111   : > { %v3609_v34 = vadd.f32 %v2729_v29, %v1389_v27 }
 0x112   : > { %v2643_v35 = vpop.f32.mrf.mxu0  ;;  %v2731_v36 = vpop.f32.mrf.mxu1 }
 0x113   : > { %v3613_v38 = vadd.f32 %v2643_v35, %v2642_v30  ;;  %v2732_v39 = vadd.f32 %v2731_v36, %v2730_v31  ;;  %v1416_v31 = vadd.f32 %v3596_v20, %v3603_v22 }
 0x114   : > { %v2645_v40 = vpop.f32.mrf.mxu0  ;;  %v2733_v41 = vpop.f32.mrf.mxu1 }
 0x115   : > { %v3615_v44 = vadd.f32 %v2732_v39, %v1392_v37 }
 0x116   : > { %v2646_v32 = vpop.f32.mrf.mxu0  ;;  %v2734_v45 = vpop.f32.mrf.mxu1 }
 0x117   : > { %v3619_v47 = vadd.f32 %v2646_v32, %v2645_v40  ;;  %v2735_v50 = vadd.f32 %v2734_v45, %v2733_v41  ;;  %v1421_v32 = vadd.f32 %v3607_v28, %v3603_v22 }
 0x118   : > { %v2648_v51 = vpop.f32.mrf.mxu0  ;;  %v2736_v52 = vpop.f32.mrf.mxu1 }
 0x119   : > { %v3621_v53 = vadd.f32 %v2735_v50, %v1397_v46 }
 0x11a   : > { %v2649_v42 = vpop.f32.mrf.mxu0  ;;  %v2737_v54 = vpop.f32.mrf.mxu1 }
 0x11b   : > { %v3625_v56 = vadd.f32 %v2649_v42, %v2648_v51  ;;  %v2738_v57 = vadd.f32 %v2737_v54, %v2736_v52  ;;  %v1424_v54 = vadd.f32 %v3613_v38, %v3603_v22 }
 0x11c   : > { %v2651_v60 = vpop.f32.mrf.mxu0  ;;  %v2739_v61 = vpop.f32.mrf.mxu1 }
 0x11d   : > { %v3627_v62 = vadd.f32 %v2738_v57, %v1400_v55 }
 0x11e   : > { %v2652_v48 = vpop.f32.mrf.mxu0  ;;  %v2740_v63 = vpop.f32.mrf.mxu1 }
 0x11f   : > { %v3630_v3 = vadd.f32 %v2652_v48, %v2651_v60  ;;  %v2741_v4 = vadd.f32 %v2740_v63, %v2739_v61 }
 0x120   : > { %v2654_v5 = vpop.f32.mrf.mxu0  ;;  %v2742_v6 = vpop.f32.mrf.mxu1 }
 0x121   : > { %v3632_v7 = vadd.f32 %v2741_v4, %v1405_v2  ;;  %v1429_v2 = vadd.f32 %v3619_v47, %v3603_v22 }
 0x122   : > { %v2655_v10 = vpop.f32.mrf.mxu0  ;;  %v2743_v58 = vpop.f32.mrf.mxu1 }
 0x123   : > { %v3635_v12 = vadd.f32 %v2655_v10, %v2654_v5  ;;  %v2744_v13 = vadd.f32 %v2743_v58, %v2742_v6 }
 0x124   : > { %v2657_v16 = vpop.f32.mrf.mxu0  ;;  %v2745_v17 = vpop.f32.mrf.mxu1 }
 0x125   : > { %v3637_v18 = vadd.f32 %v2744_v13, %v1408_v11  ;;  %v1432_v13 = vadd.f32 %v3625_v56, %v3603_v22  ;;  %v1440_v56 = vadd.f32 %v3635_v12, %v3603_v22 }
 0x126   : > { %v2658_v19 = vpop.f32.mrf.mxu0  ;;  %v2746_v0 = vpop.f32.mrf.mxu1 }
 0x127   : > { %v3640_v24 = vadd.f32 %v2658_v19, %v2657_v16  ;;  %v2747_v25 = vadd.f32 %v2746_v0, %v2745_v17 }
 0x128   : > { %v2660_v26 = vpop.f32.mrf.mxu0  ;;  %v2748_v27 = vpop.f32.mrf.mxu1 }
 0x129   : > { %v3642_v29 = vadd.f32 %v2747_v25, %v1413_v23 }
 0x12a   : > { %v2661_v30 = vpop.f32.mrf.mxu0  ;;  %v2749_v8 = vpop.f32.mrf.mxu1 }
 0x12b   : > { %v3646_v35 = vadd.f32 %v2661_v30, %v2660_v26  ;;  %v2750_v36 = vadd.f32 %v2749_v8, %v2748_v27  ;;  %v1437_v26 = vadd.f32 %v3630_v3, %v3603_v22  ;;  %v1445_v3 = vadd.f32 %v3640_v24, %v3603_v22 }
 0x12c   : > { %v2663_v37 = vpop.f32.mrf.mxu0  ;;  %v2751_v39 = vpop.f32.mrf.mxu1 }
 0x12d   : > { %v3648_v40 = vadd.f32 %v2750_v36, %v1416_v31  ;;  %v1448_v12 = vadd.f32 %v3646_v35, %v3603_v22 }
 0x12e   : > { %v2664_v14 = vpop.f32.mrf.mxu0  ;;  %v2752_v41 = vpop.f32.mrf.mxu1 }
 0x12f   : > { %v3652_v45 = vadd.f32 %v2664_v14, %v2663_v37  ;;  %v2753_v46 = vadd.f32 %v2752_v41, %v2751_v39 }
 0x130   : > { %v2666_v50 = vpop.f32.mrf.mxu0  ;;  %v2754_v51 = vpop.f32.mrf.mxu1 }
 0x131   : > { %v3654_v52 = vadd.f32 %v2753_v46, %v1421_v32  ;;  %v1453_v24 = vadd.f32 %v3652_v45, %v3603_v22 }
 0x132   : > { %v2667_v20 = vpop.f32.mrf.mxu0  ;;  %v2755_v42 = vpop.f32.mrf.mxu1 }
 0x133   : > { %v3658_v55 = vadd.f32 %v2667_v20, %v2666_v50  ;;  %v2756_v57 = vadd.f32 %v2755_v42, %v2754_v51 }
 0x134   : > { %v2669_v60 = vpop.f32.mrf.mxu0  ;;  %v2757_v61 = vpop.f32.mrf.mxu1 }
 0x135   : > { %v3660_v48 = vadd.f32 %v2756_v57, %v1424_v54 }
 0x136   : > { %v2670_v28 = vpop.f32.mrf.mxu0  ;;  %v2758_v63 = vpop.f32.mrf.mxu1 }
 0x137   : > { %v3664_v4 = vadd.f32 %v2670_v28, %v2669_v60  ;;  %v2759_v5 = vadd.f32 %v2758_v63, %v2757_v61 }
 0x138   : > { %v2672_v6 = vpop.f32.mrf.mxu0  ;;  %v2760_v10 = vpop.f32.mrf.mxu1 }
 0x139   : > { %v3666_v58 = vadd.f32 %v2759_v5, %v1429_v2 }
 0x13a   : > { %v2673_v38 = vpop.f32.mrf.mxu0  ;;  %v2761_v11 = vpop.f32.mrf.mxu1 }
 0x13b   : > { %v2674_v16 = vadd.f32 %v2673_v38, %v2672_v6  ;;  %v2762_v17 = vadd.f32 %v2761_v11, %v2760_v10 }
 0x13c   : > { %v2675_v19 = vpop.f32.mrf.mxu0  ;;  %v2763_v0 = vpop.f32.mrf.mxu1 }
 0x13d   : > { %v3670_v23 = vadd.f32 %v2762_v17, %v1432_v13 }
 0x13e   : > { %v2676_v25 = vpop.f32.mrf.mxu0  ;;  %v2764_v47 = vpop.f32.mrf.mxu1 }
 0x13f   : > { %v2677_v27 = vadd.f32 %v2676_v25, %v2675_v19  ;;  %v2765_v30 = vadd.f32 %v2764_v47, %v2763_v0 }
 0x140   : > { %v2678_v8 = vpop.f32.mrf.mxu0  ;;  %v2766_v31 = vpop.f32.mrf.mxu1 }
 0x141   : > { %v3674_v36 = vadd.f32 %v2765_v30, %v1437_v26 }
 0x142   : > { %v2679_v37 = vpop.f32.mrf.mxu0  ;;  %v2767_v39 = vpop.f32.mrf.mxu1 }
 0x143   : > { %v2680_v14 = vadd.f32 %v2679_v37, %v2678_v8  ;;  %v2768_v41 = vadd.f32 %v2767_v39, %v2766_v31  ;;  %v1456_v8 = vadd.f32 %v3658_v55, %v3603_v22 }
 0x144   : > { %v2681_v32 = vpop.f32.mrf.mxu0  ;;  %v2769_v46 = vpop.f32.mrf.mxu1 }
 0x145   : > { %v3678_v50 = vadd.f32 %v2768_v41, %v1440_v56 }
 0x146   : > { %v2682_v51 = vpop.f32.mrf.mxu0  ;;  %v2770_v20 = vpop.f32.mrf.mxu1 }
 0x147   : > { %v2683_v42 = vadd.f32 %v2682_v51, %v2681_v32  ;;  %v2771_v54 = vadd.f32 %v2770_v20, %v2769_v46  ;;  %v1461_v32 = vadd.f32 %v3664_v4, %v3603_v22  ;;  %v1469_v4 = vadd.f32 %v2677_v27, %v3603_v22 }
 0x148   : > { %v2684_v57 = vpop.f32.mrf.mxu0  ;;  %v2772_v60 = vpop.f32.mrf.mxu1 }
 0x149   : > { %v3682_v61 = vadd.f32 %v2771_v54, %v1445_v3  ;;  %v1464_v54 = vadd.f32 %v2674_v16, %v3603_v22  ;;  %v1472_v16 = vadd.f32 %v2680_v14, %v3603_v22  ;;  %v1477_v27 = vadd.f32 %v2683_v42, %v3603_v22 }
 0x14a   : > { %v2685_v28 = vpop.f32.mrf.mxu0  ;;  %v2773_v63 = vpop.f32.mrf.mxu1  ;;  %v1485_v42 = vadd.f32 %v3561_v33, %v3603_v22 }
 0x14b   : > { %v2686_v2 = vadd.f32 %v2685_v28, %v2684_v57  ;;  %v2774_v5 = vadd.f32 %v2773_v63, %v2772_v60 }
 0x14c   : > { %v2775_v6 = vpop.f32.mrf.mxu1  ;;  %v2839_v10 = vpop.f32.mrf.mxu0 }
 0x14d   : > { %v3686_v38 = vadd.f32 %v2774_v5, %v1448_v12  ;;  %v1480_v14 = vadd.f32 %v2686_v2, %v3603_v22 }
 0x14e   : > { %v2776_v11 = vpop.f32.mrf.mxu1  ;;  %v2840_v13 = vpop.f32.mrf.mxu0 }
 0x14f   : > { %v2777_v17 = vadd.f32 %v2776_v11, %v2775_v6  ;;  %v2841_v19 = vadd.f32 %v2840_v13, %v2839_v10 }
 0x150   : > { %v2778_v0 = vpop.f32.mrf.mxu1  ;;  %v3690_v25 = vpop.f32.mrf.mxu0 }
 0x151   : > { %v3692_v47 = vadd.f32 %v2777_v17, %v1453_v24  ;;  %v3695_v35 = vadd.f32 %v2841_v19, %v3609_v34 }
 0x152   : > { %v2779_v26 = vpop.f32.mrf.mxu1  ;;  %v3697_v30 = vpop.f32.mrf.mxu0 }
 0x153   : > { %v2780_v31 = vadd.f32 %v2779_v26, %v2778_v0 }
 0x154   : > { %v2781_v37 = vpop.f32.mrf.mxu1  ;;  %v3701_v39 = vpop.f32.mrf.mxu0 }
 0x155   : > { %v3703_v45 = vadd.f32 %v2780_v31, %v1456_v8 }
 0x156   : > { %v2782_v56 = vpop.f32.mrf.mxu1  ;;  %v3705_v41 = vpop.f32.mrf.mxu0 }
 0x157   : > { %v2783_v34 = vadd.f32 %v2782_v56, %v2781_v37 }
 0x158   : > { %v2784_v46 = vpop.f32.mrf.mxu1  ;;  %v3709_v51 = vpop.f32.mrf.mxu0 }
 0x159   : > { %v3711_v20 = vadd.f32 %v2783_v34, %v1461_v32 }
 0x15a   : > { %v2785_v3 = vpop.f32.mrf.mxu1  ;;  %v3713_v55 = vpop.f32.mrf.mxu0 }
 0x15b   : > { %v2786_v57 = vadd.f32 %v2785_v3, %v2784_v46 }
 0x15c   : > { %v2787_v60 = vpop.f32.mrf.mxu1  ;;  %v3716_v28 = vpop.f32.mrf.mxu0 }
 0x15d   : > { %v3718_v63 = vadd.f32 %v2786_v57, %v1464_v54 }
 0x15e   : > { %v2788_v12 = vpop.f32.mrf.mxu1  ;;  %v3720_v5 = vpop.f32.mrf.mxu0 }
 0x15f   : > { %v2789_v6 = vadd.f32 %v2788_v12, %v2787_v60 }
 0x160   : > { %v2790_v10 = vpop.f32.mrf.mxu1  ;;  %v3723_v11 = vpop.f32.mrf.mxu0 }
 0x161   : > { %v3725_v13 = vadd.f32 %v2789_v6, %v1469_v4 }
 0x162   : > { %v2791_v24 = vpop.f32.mrf.mxu1  ;;  %v3727_v17 = vpop.f32.mrf.mxu0 }
 0x163   : > { %3931 = vst [vmem:[#allocation2_spill] sm:$0xff] %v3725_v13  ;;  %v2792_v19 = vadd.f32 %v2791_v24, %v2790_v10 }
 0x164   : > { %v2793_v0 = vpop.f32.mrf.mxu1  ;;  %v3730_v26 = vpop.f32.mrf.mxu0 }
 0x165   : > { %v3732_v8 = vadd.f32 %v2792_v19, %v1472_v16 }
 0x166   : > { %v2794_v31 = vpop.f32.mrf.mxu1  ;;  %v3734_v37 = vpop.f32.mrf.mxu0 }
 0x167   : > { %3932 = vst [vmem:[#allocation3_spill] sm:$0xff] %v3732_v8  ;;  %v2795_v56 = vadd.f32 %v2794_v31, %v2793_v0 }
 0x168   : > { %v2796_v32 = vpop.f32.mrf.mxu1  ;;  %v3737_v34 = vpop.f32.mrf.mxu0 }
 0x169   : > { %v3739_v46 = vadd.f32 %v2795_v56, %v1477_v27  ;;  %v1488_v27 = vadd.f32 %v3569_v43, %v3603_v22 }
 0x16a   : > { %v2797_v3 = vpop.f32.mrf.mxu1  ;;  %v3741_v54 = vpop.f32.mrf.mxu0 }
 0x16b   : > { %3933 = vst [vmem:[#allocation4_spill] sm:$0xff] %v3739_v46  ;;  %v2798_v57 = vadd.f32 %v2797_v3, %v2796_v32 }
 0x16c   : > { %v2799_v60 = vpop.f32.mrf.mxu1  ;;  %v3744_v12 = vpop.f32.mrf.mxu0 }
 0x16d   : > { %v3746_v4 = vadd.f32 %v2798_v57, %v1480_v14 }
 0x16e   : > { %v2800_v6 = vpop.f32.mrf.mxu1  ;;  %v3748_v10 = vpop.f32.mrf.mxu0 }
 0x16f   : > { %3934 = vst [vmem:[#allocation5_spill] sm:$0xff] %v3746_v4  ;;  %v2801_v24 = vadd.f32 %v2800_v6, %v2799_v60  ;;  %v1493_v60 = vadd.f32 %v3575_v49, %v3603_v22 }
 0x170   : > { %v2802_v16 = vpop.f32.mrf.mxu1  ;;  %v3752_v19 = vpop.f32.mrf.mxu0 }
 0x171   : > { %v3754_v0 = vadd.f32 %v2801_v24, %v1485_v42 }
 0x172   : > { %v2803_v31 = vpop.f32.mrf.mxu1  ;;  %v3756_v2 = vpop.f32.mrf.mxu0 }
 0x173   : > { %3935 = vst [vmem:[#allocation6_spill] sm:$0xff] %v3754_v0  ;;  %v2804_v56 = vadd.f32 %v2803_v31, %v2802_v16  ;;  %v1496_v16 = vadd.f32 %v3583_v59, %v3603_v22 }
 0x174   : > { %v2805_v32 = vpop.f32.mrf.mxu1  ;;  %v3760_v3 = vpop.f32.mrf.mxu0 }
 0x175   : > { %v3762_v14 = vadd.f32 %v2804_v56, %v1488_v27 }
 0x176   : > { %v2806_v57 = vpop.f32.mrf.mxu1  ;;  %v3764_v33 = vpop.f32.mrf.mxu0 }
 0x177   : > { %3936 = vst [vmem:[#allocation7_spill] sm:$0xff] %v3762_v14  ;;  %v2807_v6 = vadd.f32 %v2806_v57, %v2805_v32  ;;  %v1501_v32 = vadd.f32 %v3587_v1, %v3603_v22 }
 0x178   : > { %v2808_v42 = vpop.f32.mrf.mxu1  ;;  %v3768_v24 = vpop.f32.mrf.mxu0 }
 0x179   : > { %v3770_v0 = vadd.f32 %v2807_v6, %v1493_v60 }
 0x17a   : > { %v2809_v8 = vpop.f32.mrf.mxu1  ;;  %v3772_v43 = vpop.f32.mrf.mxu0 }
 0x17b   : > { %3937 = vst [vmem:[#allocation8_spill] sm:$0xff] %v3770_v0  ;;  %v2810_v31 = vadd.f32 %v2809_v8, %v2808_v42  ;;  %v1504_v8 = vadd.f32 %v3591_v9, %v3603_v22 }
 0x17c   : > { %v2811_v27 = vpop.f32.mrf.mxu1  ;;  %v3776_v56 = vpop.f32.mrf.mxu0 }
 0x17d   : > { %v3778_v14 = vadd.f32 %v2810_v31, %v1496_v16 }
 0x17e   : > { %v2812_v4 = vpop.f32.mrf.mxu1  ;;  %v3780_v49 = vpop.f32.mrf.mxu0 }
 0x17f   : > { %3938 = vst [vmem:[#allocation9_spill] sm:$0xff] %v3778_v14  ;;  %v2813_v57 = vadd.f32 %v2812_v4, %v2811_v27  ;;  %v1509_v4 = vadd.f32 %v3594_v15, %v3603_v22 }
 0x180   : > { %v2814_v60 = vpop.f32.mrf.mxu1  ;;  %v3784_v6 = vpop.f32.mrf.mxu0 }
 0x181   : > { %v3786_v0 = vadd.f32 %v2813_v57, %v1501_v32 }
 0x182   : > { %v2815_v13 = vpop.f32.mrf.mxu1  ;;  %v3788_v59 = vpop.f32.mrf.mxu0 }
 0x183   : > { %3939 = vst [vmem:[#allocation10_spill] sm:$0xff] %v3786_v0  ;;  %v2816_v42 = vadd.f32 %v2815_v13, %v2814_v60  ;;  %v2847_v0 = vadd.f32 %v3705_v41, %v3701_v39 }
 0x184   : > { %v2817_v16 = vpop.f32.mrf.mxu1  ;;  %v3792_v31 = vpop.f32.mrf.mxu0 }
 0x185   : > { %v3794_v14 = vadd.f32 %v2816_v42, %v1504_v8  ;;  %v1512_v8 = vadd.f32 %v3598_v21, %v3603_v22  ;;  %v2850_v42 = vadd.f32 %v3713_v55, %v3709_v51  ;;  %v1719_v41 = vadd.f32 %v2847_v0, %v3621_v53 }
 0x186   : > { %v2818_v46 = vpop.f32.mrf.mxu1  ;;  %v3796_v1 = vpop.f32.mrf.mxu0  ;;  %v2859_v55 = vadd.f32 %v3734_v37, %v3730_v26  ;;  %v2853_v53 = vadd.f32 %v3720_v5, %v3716_v28  ;;  %v2856_v26 = vadd.f32 %v3727_v17, %v3723_v11 }
 0x187   : > { %3940 = vst [vmem:[#allocation11_spill] sm:$0xff] %v3794_v14  ;;  %v2819_v27 = vadd.f32 %v2818_v46, %v2817_v16  ;;  %v2844_v14 = vadd.f32 %v3697_v30, %v3690_v25  ;;  %v1722_v21 = vadd.f32 %v2850_v42, %v3627_v62  ;;  %v2862_v62 = vadd.f32 %v3741_v54, %v3737_v34 }
 0x188   : > { %v2820_v32 = vpop.f32.mrf.mxu1  ;;  %v3800_v57 = vpop.f32.mrf.mxu0  ;;  %v1735_v34 = vadd.f32 %v2859_v55, %v3642_v29  ;;  %v1730_v29 = vadd.f32 %v2856_v26, %v3637_v18  ;;  %v2865_v55 = vadd.f32 %v3748_v10, %v3744_v12 }
 0x189   : > { %v3804_v9 = vadd.f32 %v2819_v27, %v1509_v4  ;;  %v1714_v30 = vadd.f32 %v2844_v14, %v3615_v44 }
 0x18a   : > { %v2821_v13 = vpop.f32.mrf.mxu1  ;;  %v3806_v60 = vpop.f32.mrf.mxu0  ;;  %v1743_v26 = vadd.f32 %v2865_v55, %v3654_v52 }
 0x18b   : > { %3941 = vst [vmem:[#allocation12_spill] sm:$0xff] %v3804_v9  ;;  %v2822_v15 = vadd.f32 %v2821_v13, %v2820_v32  ;;  %v2886_v52 = vadd.f32 %v3806_v60, %v3800_v57 }
 0x18c   : > { %v3812_v46 = vpop.f32.mrf.mxu0  ;;  %v2971_v16 = vpop.f32.mrf.mxu1 }
 0x18d   : > { %v3816_v39 = vadd.f32 %v2822_v15, %v1512_v8  ;;  %v1880_v9 = vadd.f32 %v2971_v16, %v1719_v41  ;;  %v1738_v16 = vadd.f32 %v2862_v62, %v3648_v40  ;;  %v1770_v60 = vadd.f32 %v2886_v52, %v3686_v38 }
 0x18e   : > { %v3819_v4 = vpop.f32.mrf.mxu0  ;;  %v1871_v27 = vpop.f32.mrf.mxu1 }
 0x18f   : > { %v1872_v32 = vadd.f32 %v1871_v27, %v3695_v35  ;;  %v2000_v8 = vmax.f32 %v1880_v9, 0.0  ;;  %v1727_v9 = vadd.f32 %v2853_v53, %v3632_v7  ;;  %v2874_v7 = vadd.f32 %v3772_v43, %v3768_v24 }
 0x190   : > { %v3822_v22 = vpop.f32.mrf.mxu0  ;;  %v2972_v51 = vpop.f32.mrf.mxu1 }
 0x191   : > { %v1883_v25 = vadd.f32 %v2972_v51, %v1722_v21  ;;  %v1998_v28 = vmax.f32 %v1872_v32, 0.0  ;;  %v2871_v21 = vadd.f32 %v3764_v33, %v3760_v3  ;;  %v2868_v3 = vadd.f32 %v3756_v2, %v3752_v19 }
 0x192   : > { %v3831_v0 = vpop.f32.mrf.mxu0  ;;  %v1874_v13 = vpop.f32.mrf.mxu1 }
 0x193   : > { %v2001_v42 = vmax.f32 %v1883_v25, 0.0  ;;  %v1875_v15 = vadd.f32 %v1874_v13, %v1714_v30  ;;  %v1751_v12 = vadd.f32 %v2871_v21, %v3666_v58  ;;  %v1746_v58 = vadd.f32 %v2868_v3, %v3660_v48 }
 0x194   : > { %v3842_v44 = vpop.f32.mrf.mxu0  ;;  %v2975_v35 = vpop.f32.mrf.mxu1 }
 0x195   : > { %v2512_v5 = vpack.c.bf16 %v2001_v42, %v2000_v8  ;;  %v1999_v37 = vmax.f32 %v1875_v15, 0.0  ;;  %v1896_v17 = vadd.f32 %v2975_v35, %v1735_v34  ;;  %v1754_v35 = vadd.f32 %v2874_v7, %v3670_v23 }
 0x196   : > { %v3845_v54 = vpop.f32.mrf.mxu0  ;;  %v1887_v14 = vpop.f32.mrf.mxu1  ;;  %v2877_v34 = vadd.f32 %v3780_v49, %v3776_v56 }
 0x197   : > { %2584 = vst [vmem:[%s3840_s6 + $0x8] sm:$0xff] %v2512_v5   ;;  %v2507_v11 = vpack.c.bf16 %v1999_v37, %v1998_v28  ;;  %v1888_v51 = vadd.f32 %v1887_v14, %v1727_v9  ;;  %v2004_v40 = vmax.f32 %v1896_v17, 0.0  ;;  %v2883_v28 = vadd.f32 %v3796_v1, %v3792_v31 }
 0x198   : > { %v3850_v41 = vpop.f32.mrf.mxu0  ;;  %v2976_v27 = vpop.f32.mrf.mxu1  ;;  %v2880_v31 = vadd.f32 %v3788_v59, %v3784_v6  ;;  %v1759_v57 = vadd.f32 %v2877_v34, %v3674_v36  ;;  %v2895_v6 = vadd.f32 %v3845_v54, %v3842_v44 }
 0x199   : > { %2508 = vst [vmem:[%s3840_s6] sm:$0xff] %v2507_v11   ;;  %v1899_v32 = vadd.f32 %v2976_v27, %v1738_v16  ;;  %v2002_v18 = vmax.f32 %v1888_v51, 0.0  ;;  %v1767_v56 = vadd.f32 %v2883_v28, %v3682_v61  ;;  %v2889_v61 = vadd.f32 %v3819_v4, %v3812_v46 }
 0x19a   : > { %v2897_v25 = vpop.f32.mrf.mxu0  ;;  %v1890_v30 = vpop.f32.mrf.mxu1 }
 0x19b   : > { %v2005_v53 = vmax.f32 %v1899_v32, 0.0  ;;  %v1891_v13 = vadd.f32 %v1890_v30, %v1730_v29  ;;  %v2898_v36 = vadd.f32 %v2897_v25, %v3850_v41  ;;  %v1775_v41 = vadd.f32 %v2889_v61, %v3692_v47 }
 0x19c   : > { %v3862_v33 = vpop.f32.mrf.mxu0  ;;  %v2979_v62 = vpop.f32.mrf.mxu1 }
 0x19d   : > { %v2522_v8 = vpack.c.bf16 %v2005_v53, %v2004_v40  ;;  %v2003_v42 = vmax.f32 %v1891_v13, 0.0  ;;  %v1912_v43 = vadd.f32 %v2979_v62, %v1751_v12  ;;  %v1762_v40 = vadd.f32 %v2880_v31, %v3678_v50  ;;  %v3942_v31 = vld [vmem:[#allocation4_spill] sm:$0xff] }
 0x19e   : > { %v3865_v10 = vpop.f32.mrf.mxu0  ;;  %v1903_v15 = vpop.f32.mrf.mxu1  ;;  %v1783_v12 = vadd.f32 %v2895_v6, %v3711_v20  ;;  %v1786_v25 = vadd.f32 %v2898_v36, %v3718_v63 }
 0x19f   : > { %2586 = vst [vmem:[%s3840_s6 + $0x18] sm:$0xff] %v2522_v8   ;;  %v2517_v24 = vpack.c.bf16 %v2003_v42, %v2002_v18  ;;  %v1904_v5 = vadd.f32 %v1903_v15, %v1743_v26  ;;  %v2008_v23 = vmax.f32 %v1912_v43, 0.0  ;;  %v2892_v18 = vadd.f32 %v3831_v0, %v3822_v22 }
 0x1a0   : > { %v3870_v19 = vpop.f32.mrf.mxu0  ;;  %v2980_v2 = vpop.f32.mrf.mxu1  ;;  %v2901_v20 = vadd.f32 %v3865_v10, %v3862_v33 }
 0x1a1   : > { %2585 = vst [vmem:[%s3840_s6 + $0x10] sm:$0xff] %v2517_v24   ;;  %v1915_v37 = vadd.f32 %v2980_v2, %v1754_v35  ;;  %v2006_v27 = vmax.f32 %v1904_v5, 0.0  ;;  %v1778_v2 = vadd.f32 %v2892_v18, %v3703_v45 }
 0x1a2   : > { %v2903_v14 = vpop.f32.mrf.mxu0  ;;  %v1906_v11 = vpop.f32.mrf.mxu1 }
 0x1a3   : > { %v2009_v17 = vmax.f32 %v1915_v37, 0.0  ;;  %v1907_v9 = vadd.f32 %v1906_v11, %v1746_v58  ;;  %v2904_v63 = vadd.f32 %v2903_v14, %v3870_v19 }
 0x1a4   : > { %v2905_v1 = vpop.f32.mrf.mxu0  ;;  %v2983_v16 = vpop.f32.mrf.mxu1 }
 0x1a5   : > { %v2532_v48 = vpack.c.bf16 %v2009_v17, %v2008_v23  ;;  %v2007_v21 = vmax.f32 %v1907_v9, 0.0  ;;  %v1928_v29 = vadd.f32 %v2983_v16, %v1767_v56 }
 0x1a6   : > { %v2906_v49 = vpop.f32.mrf.mxu0  ;;  %v1919_v51 = vpop.f32.mrf.mxu1 }
 0x1a7   : > { %2588 = vst [vmem:[%s3840_s6 + $0x28] sm:$0xff] %v2532_v48   ;;  %v2527_v32 = vpack.c.bf16 %v2007_v21, %v2006_v27  ;;  %v1920_v59 = vadd.f32 %v1919_v51, %v1759_v57  ;;  %v2012_v3 = vmax.f32 %v1928_v29, 0.0  ;;  %v2907_v22 = vadd.f32 %v2906_v49, %v2905_v1  ;;  %v3943_v27 = vld [vmem:[#allocation2_spill] sm:$0xff]  ;;  %v3944_v21 = vld [vmem:[#allocation5_spill] sm:$0xff]  ;;  %v3945_v29 = vld [vmem:[#allocation3_spill] sm:$0xff] }
 0x1a8   : > { %v2908_v55 = vpop.f32.mrf.mxu0  ;;  %v2984_v30 = vpop.f32.mrf.mxu1  ;;  %v1791_v48 = vadd.f32 %v2901_v20, %v3943_v27  ;;  %v1794_v57 = vadd.f32 %v2904_v63, %v3945_v29  ;;  %v3952_v27 = vld [vmem:[#allocation11_spill] sm:$0xff] }
 0x1a9   : > { %2587 = vst [vmem:[%s3840_s6 + $0x20] sm:$0xff] %v2527_v32   ;;  %v1931_v7 = vadd.f32 %v2984_v30, %v1770_v60  ;;  %v2010_v8 = vmax.f32 %v1920_v59, 0.0  ;;  %v1799_v45 = vadd.f32 %v2907_v22, %v3942_v31 }
 0x1aa   : > { %v2909_v53 = vpop.f32.mrf.mxu0  ;;  %v1922_v13 = vpop.f32.mrf.mxu1 }
 0x1ab   : > { %v2013_v38 = vmax.f32 %v1931_v7, 0.0  ;;  %v1923_v62 = vadd.f32 %v1922_v13, %v1762_v40  ;;  %v2910_v37 = vadd.f32 %v2909_v53, %v2908_v55 }
 0x1ac   : > { %v2911_v44 = vpop.f32.mrf.mxu0  ;;  %v2987_v54 = vpop.f32.mrf.mxu1 }
 0x1ad   : > { %v2542_v42 = vpack.c.bf16 %v2013_v38, %v2012_v3  ;;  %v2011_v50 = vmax.f32 %v1923_v62, 0.0  ;;  %v1944_v24 = vadd.f32 %v2987_v54, %v1783_v12  ;;  %v1802_v56 = vadd.f32 %v2910_v37, %v3944_v21  ;;  %v3946_v62 = vld [vmem:[#allocation8_spill] sm:$0xff] }
 0x1ae   : > { %v2912_v46 = vpop.f32.mrf.mxu0  ;;  %v1935_v4 = vpop.f32.mrf.mxu1 }
 0x1af   : > { %2590 = vst [vmem:[%s3840_s6 + $0x38] sm:$0xff] %v2542_v42   ;;  %v2537_v15 = vpack.c.bf16 %v2011_v50, %v2010_v8  ;;  %v1936_v0 = vadd.f32 %v1935_v4, %v1775_v41  ;;  %v2016_v58 = vmax.f32 %v1944_v24, 0.0  ;;  %v2913_v60 = vadd.f32 %v2912_v46, %v2911_v44  ;;  %v3947_v50 = vld [vmem:[#allocation6_spill] sm:$0xff]  ;;  %v3948_v46 = vld [vmem:[#allocation9_spill] sm:$0xff] }
 0x1b0   : > { %v2914_v43 = vpop.f32.mrf.mxu0  ;;  %v2988_v26 = vpop.f32.mrf.mxu1 }
 0x1b1   : > { %2589 = vst [vmem:[%s3840_s6 + $0x30] sm:$0xff] %v2537_v15   ;;  %v1947_v35 = vadd.f32 %v2988_v26, %v1786_v25  ;;  %v2014_v23 = vmax.f32 %v1936_v0, 0.0  ;;  %v1807_v12 = vadd.f32 %v2913_v60, %v3947_v50 }
 0x1b2   : > { %v2915_v28 = vpop.f32.mrf.mxu0  ;;  %v1938_v5 = vpop.f32.mrf.mxu1 }
 0x1b3   : > { %v2017_v34 = vmax.f32 %v1947_v35, 0.0  ;;  %v1939_v47 = vadd.f32 %v1938_v5, %v1778_v2  ;;  %v2916_v61 = vadd.f32 %v2915_v28, %v2914_v43  ;;  %v3949_v43 = vld [vmem:[#allocation7_spill] sm:$0xff] }
 0x1b4   : > { %v2917_v11 = vpop.f32.mrf.mxu0  ;;  %v2991_v52 = vpop.f32.mrf.mxu1 }
 0x1b5   : > { %v2552_v17 = vpack.c.bf16 %v2017_v34, %v2016_v58  ;;  %v2015_v9 = vmax.f32 %v1939_v47, 0.0  ;;  %v1960_v10 = vadd.f32 %v2991_v52, %v1799_v45  ;;  %v1810_v26 = vadd.f32 %v2916_v61, %v3949_v43 }
 0x1b6   : > { %v2918_v1 = vpop.f32.mrf.mxu0  ;;  %v1951_v16 = vpop.f32.mrf.mxu1 }
 0x1b7   : > { %2592 = vst [vmem:[%s3840_s6 + $0x48] sm:$0xff] %v2552_v17   ;;  %v2547_v33 = vpack.c.bf16 %v2015_v9, %v2014_v23  ;;  %v2919_v19 = vadd.f32 %v2918_v1, %v2917_v11  ;;  %v1952_v14 = vadd.f32 %v1951_v16, %v1791_v48  ;;  %v2020_v6 = vmax.f32 %v1960_v10, 0.0  ;;  %v3950_v9 = vld [vmem:[#allocation10_spill] sm:$0xff]  ;;  %v3951_v16 = vld [vmem:[#allocation12_spill] sm:$0xff] }
 0x1b8   : > { %v2920_v49 = vpop.f32.mrf.mxu0  ;;  %v2992_v51 = vpop.f32.mrf.mxu1 }
 0x1b9   : > { %2591 = vst [vmem:[%s3840_s6 + $0x40] sm:$0xff] %v2547_v33   ;;  %v1963_v32 = vadd.f32 %v2992_v51, %v1802_v56  ;;  %v2018_v36 = vmax.f32 %v1952_v14, 0.0  ;;  %v1815_v18 = vadd.f32 %v2919_v19, %v3946_v62 }
 0x1ba   : > { %v2921_v55 = vpop.f32.mrf.mxu0  ;;  %v1954_v30 = vpop.f32.mrf.mxu1 }
 0x1bb   : > { %v2021_v59 = vmax.f32 %v1963_v32, 0.0  ;;  %v2922_v7 = vadd.f32 %v2921_v55, %v2920_v49  ;;  %v1955_v40 = vadd.f32 %v1954_v30, %v1794_v57 }
 0x1bc   : > { %v2923_v53 = vpop.f32.mrf.mxu0  ;;  %v2995_v13 = vpop.f32.mrf.mxu1 }
 0x1bd   : > { %v2562_v3 = vpack.c.bf16 %v2021_v59, %v2020_v6  ;;  %v2019_v38 = vmax.f32 %v1955_v40, 0.0  ;;  %v1976_v42 = vadd.f32 %v2995_v13, %v1815_v18  ;;  %v1818_v4 = vadd.f32 %v2922_v7, %v3948_v46 }
 0x1be   : > { %v2924_v54 = vpop.f32.mrf.mxu0  ;;  %v1967_v8 = vpop.f32.mrf.mxu1 }
 0x1bf   : > { %2594 = vst [vmem:[%s3840_s6 + $0x58] sm:$0xff] %v2562_v3   ;;  %v2557_v44 = vpack.c.bf16 %v2019_v38, %v2018_v36  ;;  %v1968_v41 = vadd.f32 %v1967_v8, %v1807_v12  ;;  %v2024_v35 = vmax.f32 %v1976_v42, 0.0  ;;  %v2925_v2 = vadd.f32 %v2924_v54, %v2923_v53 }
 0x1c0   : > { %v2926_v15 = vpop.f32.mrf.mxu0  ;;  %v2996_v24 = vpop.f32.mrf.mxu1 }
 0x1c1   : > { %2593 = vst [vmem:[%s3840_s6 + $0x50] sm:$0xff] %v2557_v44   ;;  %v1979_v25 = vadd.f32 %v2996_v24, %v1818_v4  ;;  %v2022_v58 = vmax.f32 %v1968_v41, 0.0  ;;  %v1823_v31 = vadd.f32 %v2925_v2, %v3950_v9 }
 0x1c2   : > { %v2927_v22 = vpop.f32.mrf.mxu0  ;;  %v1970_v0 = vpop.f32.mrf.mxu1 }
 0x1c3   : > { %v2025_v20 = vmax.f32 %v1979_v25, 0.0  ;;  %v1971_v28 = vadd.f32 %v1970_v0, %v1810_v26  ;;  %v2928_v47 = vadd.f32 %v2927_v22, %v2926_v15 }
 0x1c4   : > { %v2929_v5 = vpop.f32.mrf.mxu0  ;;  %v2999_v37 = vpop.f32.mrf.mxu1 }
 0x1c5   : > { %v2572_v34 = vpack.c.bf16 %v2025_v20, %v2024_v35  ;;  %v2023_v63 = vmax.f32 %v1971_v28, 0.0  ;;  %v1826_v48 = vadd.f32 %v2928_v47, %v3952_v27 }
 0x1c6   : > { %v2930_v11 = vpop.f32.mrf.mxu0  ;;  %v1983_v52 = vpop.f32.mrf.mxu1 }
 0x1c7   : > { %2596 = vst [vmem:[%s3840_s6 + $0x68] sm:$0xff] %v2572_v34   ;;  %v2567_v23 = vpack.c.bf16 %v2023_v63, %v2022_v58  ;;  %v2931_v17 = vadd.f32 %v2930_v11, %v2929_v5  ;;  %v1984_v10 = vadd.f32 %v1983_v52, %v1823_v31 }
 0x1c8   : > { %v2932_v45 = vpop.f32.mrf.mxu0  ;;  %v3000_v1 = vpop.f32.mrf.mxu1 }
 0x1c9   : > { %2595 = vst [vmem:[%s3840_s6 + $0x60] sm:$0xff] %v2567_v23   ;;  %v1831_v33 = vadd.f32 %v2931_v17, %v3951_v16  ;;  %v2026_v14 = vmax.f32 %v1984_v10, 0.0 }
 0x1ca   : > { %v2933_v21 = vpop.f32.mrf.mxu0  ;;  %v1986_v56 = vpop.f32.mrf.mxu1 }
 0x1cb   : > { %v2934_v49 = vadd.f32 %v2933_v21, %v2932_v45  ;;  %v1987_v51 = vadd.f32 %v1986_v56, %v1826_v48  ;;  %v1992_v19 = vadd.f32 %v2999_v37, %v1831_v33 }
 0x1cd   : > { %v1834_v32 = vadd.f32 %v2934_v49, %v3816_v39  ;;  %v2027_v29 = vmax.f32 %v1987_v51, 0.0  ;;  %v2028_v55 = vmax.f32 %v1992_v19, 0.0 }
 0x1cf   : > { %v1995_v57 = vadd.f32 %v3000_v1, %v1834_v32  ;;  %v2577_v60 = vpack.c.bf16 %v2027_v29, %v2026_v14 }
 0x1d1   : > { %v2029_v30 = vmax.f32 %v1995_v57, 0.0  ;;  %2597 = vst [vmem:[%s3840_s6 + $0x70] sm:$0xff] %v2577_v60  }
 0x1d3   : > { %v2582_v6 = vpack.c.bf16 %v2029_v30, %v2028_v55 }
 0x1d5   : > { %2598 = vst [vmem:[%s3840_s6 + $0x78] sm:$0xff] %v2582_v6  }
 0x1d6 PF: > { %s13_s12 = sadd.s32 1, %s3246_s12  }
 0x1d7   : > { %p10_p4 = scmp.ge.s32.totalorder %s13_s12, 4  }
 0x1d9   :  { %12 = sbr.rel (!%p10_p4) target bundleno = 1 (0x1), region = 62 }

// kernel: allconvnet_forward.9
= control target key start
LH: loop header
LB: loop body
LE: loop exit
PB: predicated region body
PF: predicated region fallthrough
CT: control target
= control target key end

     0   :  { %s1584_s12 = smov 0   ;;  %s1849_s0 = inlined_call_operand.vmem [shape: bf16[128,864], index: 0, kind: input, shape index: {}]   ;;  %s1850_s1 = inlined_call_operand.vmem [shape: bf16[864,128], index: 1, kind: input, shape index: {}]   ;;  %s1851_s2 = inlined_call_operand.vmem [shape: f32[1,128], index: 2, kind: input, shape index: {}]   ;;  %s1852_s3 = inlined_call_operand.vmem [shape: bf16[128,128], index: 3, kind: output, shape index: {}]  }
   0x1 LB: > { %s1166_s13 = sadd.s32 4294967295, %s1562_s12   ;;  %p1170_p0 = scmp.ge.s32.totalorder %s1562_s12, 1  ;;  %s1562_s12 = sphi %s1584_s12, %s13_s12  }
   0x2   : > { %p139_p1 = scmp.lt.s32.totalorder %s1562_s12, 3 }
   0x4   : > { %p140_p2 = pnand %p1170_p0, %p139_p1 }
   0x5   : > { %s1171_s17 = sshll.u32 (!%p140_p2), %s1166_s13, 3 }
   0x6   : > { %143 = sbr.rel (%p140_p2) target bundleno = 310 (0x136), region = 32  ;;  %p165_p3 = scmp.lt.s32.totalorder (!%p140_p2), %s1171_s17, 15 }
   0xb   : > { %v1462_v0 = vld [vmem:[%s1850_s1 + $0x78] sm:$0xff]   ;;  %v1466_v4 = vld [vmem:[%s1850_s1 + $0x70] sm:$0xff]   ;;  %v1470_v8 = vld [vmem:[%s1850_s1 + $0x68] sm:$0xff]   ;;  %s1854_s17 = smov (!%p165_p3, %s1171_s17), 15  ;;  %vm789_vm0 = vcmask 785408  }
   0xc   : > { %v1463_v1 = vld [vmem:[%s1850_s1 + $0x38] sm:$0xff]   ;;  %1303 = vmatprep.subr.bf16.mxu0 %v1462_v0  ;;  %v1467_v5 = vld [vmem:[%s1850_s1 + $0x30] sm:$0xff]   ;;  %v1471_v9 = vld [vmem:[%s1850_s1 + $0x28] sm:$0xff]   ;;  %s1453_s14 = smul.u32 28, %s1854_s17  ;;  %s1174_s29 = sshll.u32 %s1854_s17, 2 }
   0xd   : > { %v1464_v2 = vld [vmem:[%s1850_s1 + $0xf8] sm:$0xff]   ;;  %1304 = vmatpush3.bf16.msra.mxu0 %v1463_v1  ;;  %v1468_v6 = vld [vmem:[%s1850_s1 + $0xf0] sm:$0xff]   ;;  %v1472_v10 = vld [vmem:[%s1850_s1 + $0xe8] sm:$0xff]   ;;  %s1828_s5 = scalar_lea.vmem %s1852_s3, %s1174_s29 }
   0xe   : > { %v1465_v3 = vld [vmem:[%s1850_s1 + $0xb8] sm:$0xff]   ;;  %1343 = vmatprep.subr.bf16.mxu1 %v1464_v2  ;;  %1305 = vmatprep.subr.bf16.mxu0 %v1466_v4  ;;  %v1469_v7 = vld [vmem:[%s1850_s1 + $0xb0] sm:$0xff]   ;;  %v1473_v11 = vld [vmem:[%s1850_s1 + $0xa8] sm:$0xff]   ;;  %s1687_s13 = scalar_lea.vmem %s1849_s0, %s1453_s14 }
   0xf   : > { %1344 = vmatpush3.bf16.msra.mxu1 %v1465_v3  ;;  %v1474_v12 = vld [vmem:[%s1850_s1 + $0x60] sm:$0xff]   ;;  %v1478_v16 = vld [vmem:[%s1850_s1 + $0x58] sm:$0xff]   ;;  %v1482_v20 = vld [vmem:[%s1850_s1 + $0x50] sm:$0xff]  }
  0x10   : > { %1345 = vmatprep.subr.bf16.mxu1 %v1468_v6  ;;  %v1475_v13 = vld [vmem:[%s1850_s1 + $0x20] sm:$0xff]   ;;  %v1479_v17 = vld [vmem:[%s1850_s1 + $0x18] sm:$0xff]   ;;  %v1483_v21 = vld [vmem:[%s1850_s1 + $0x10] sm:$0xff]  }
  0x11   : > { %1306 = vmatpush3.bf16.msra.mxu0 %v1467_v5  ;;  %v1476_v14 = vld [vmem:[%s1850_s1 + $0xe0] sm:$0xff]   ;;  %v1480_v18 = vld [vmem:[%s1850_s1 + $0xd8] sm:$0xff]   ;;  %v1484_v22 = vld [vmem:[%s1850_s1 + $0xd0] sm:$0xff]  }
  0x12   : > { %1307 = vmatprep.subr.bf16.mxu0 %v1470_v8  ;;  %v1477_v15 = vld [vmem:[%s1850_s1 + $0xa0] sm:$0xff]   ;;  %v1481_v19 = vld [vmem:[%s1850_s1 + $0x98] sm:$0xff]   ;;  %v1485_v23 = vld [vmem:[%s1850_s1 + $0x90] sm:$0xff]  }
  0x13   : > { %1346 = vmatpush3.bf16.msra.mxu1 %v1469_v7  ;;  %v1486_v24 = vld [vmem:[%s1850_s1 + $0x48] sm:$0xff]   ;;  %v1490_v28 = vld [vmem:[%s1850_s1 + $0x40] sm:$0xff]   ;;  %v1497_v34 = vld [vmem:[%s1850_s1 + $0x178] sm:$0xff]  }
  0x14   : > { %1347 = vmatprep.subr.bf16.mxu1 %v1472_v10  ;;  %v1487_v25 = vld [vmem:[%s1850_s1 + $0x8] sm:$0xff]   ;;  %v1491_v29 = vld [vmem:[%s1850_s1] sm:$0xff]   ;;  %v1501_v37 = vld [vmem:[%s1850_s1 + $0x138] sm:$0xff]  }
  0x15   : > { %1308 = vmatpush3.bf16.msra.mxu0 %v1471_v9  ;;  %v1488_v26 = vld [vmem:[%s1850_s1 + $0xc8] sm:$0xff]   ;;  %v1492_v30 = vld [vmem:[%s1850_s1 + $0xc0] sm:$0xff]   ;;  %v1502_v38 = vld [vmem:[%s1850_s1 + $0x170] sm:$0xff]  }
  0x16   : > { %1309 = vmatprep.subr.bf16.mxu0 %v1474_v12  ;;  %v1489_v27 = vld [vmem:[%s1850_s1 + $0x88] sm:$0xff]   ;;  %v1493_v31 = vld [vmem:[%s1687_s13] ss:$28 sps:$4 sm:$0xff]   ;;  %v1503_v39 = vld [vmem:[%s1850_s1 + $0x130] sm:$0xff]  }
  0x17   : > { %1348 = vmatpush3.bf16.msra.mxu1 %v1473_v11  ;;  %v1495_v32 = vld [vmem:[%s1687_s13 + $0x4] ss:$28 sps:$4 sm:$0xff]   ;;  %v1500_v36 = vld [vmem:[%s1687_s13 + $0xc] ss:$28 sps:$4 sm:$0xff]   ;;  %v1504_v40 = vld [vmem:[%s1687_s13 + $0x3c] ss:$28 sps:$4 sm:$0xff]  }
  0x18   : > { %1349 = vmatprep.subr.bf16.mxu1 %v1476_v14  ;;  %v1496_v33 = vld [vmem:[%s1850_s1 + $0x80] sm:$0xff]   ;;  %834 = vmatprep.mubr.bf16.mxu0 %v1495_v32  ;;  %v1506_v41 = vld [vmem:[%s1687_s13 + $0x38] ss:$28 sps:$4 sm:$0xff]   ;;  %v1507_v42 = vld [vmem:[%s1850_s1 + $0x168] sm:$0xff]  }
  0x19   : > { %1310 = vmatpush3.bf16.msra.mxu0 %v1475_v13  ;;  %v1498_v35 = vld [vmem:[%s1687_s13 + $0x8] ss:$28 sps:$4 sm:$0xff]   ;;  %899 = vmatprep.mubr.bf16.mxu1 %v1500_v36  ;;  %v1511_v45 = vld [vmem:[%s1687_s13 + $0x40] ss:$28 sps:$4 sm:$0xff]   ;;  %v1515_v49 = vld [vmem:[%s1687_s13 + $0x74] ss:$28 sps:$4 sm:$0xff]  }
  0x1a   : > { %1311 = vmatprep.subr.bf16.mxu0 %v1478_v16  ;;  %v1508_v43 = vld [vmem:[%s1687_s13 + $0x44] ss:$28 sps:$4 sm:$0xff]   ;;  %v1510_v44 = vld [vmem:[%s1850_s1 + $0x128] sm:$0xff]   ;;  %v1518_v51 = vld [vmem:[%s1850_s1 + $0x158] sm:$0xff]  }
  0x1b   : > { %1350 = vmatpush3.bf16.msra.mxu1 %v1477_v15  ;;  %v1512_v46 = vld [vmem:[%s1850_s1 + $0x160] sm:$0xff]   ;;  %v1513_v47 = vld [vmem:[%s1850_s1 + $0x1a8] sm:$0xff]   ;;  %v1520_v53 = vld [vmem:[%s1687_s13 + $0x7c] ss:$28 sps:$4 sm:$0xff]  }
  0x1c   : > { %1351 = vmatprep.subr.bf16.mxu1 %v1480_v18  ;;  %v1514_v48 = vld [vmem:[%s1850_s1 + $0x120] sm:$0xff]   ;;  %v1517_v50 = vld [vmem:[%s1687_s13 + $0x70] ss:$28 sps:$4 sm:$0xff]   ;;  %v1522_v54 = vld [vmem:[%s1850_s1 + $0x118] sm:$0xff]  }
  0x1d   : > { %1312 = vmatpush3.bf16.msra.mxu0 %v1479_v17  ;;  %v1519_v52 = vld [vmem:[%s1850_s1 + $0x1a0] sm:$0xff]   ;;  %v1523_v55 = vld [vmem:[%s1687_s13 + $0x78] ss:$28 sps:$4 sm:$0xff]   ;;  %v1527_v59 = vld [vmem:[%s1687_s13 + $0xac] ss:$28 sps:$4 sm:$0xff]  }
  0x1e   : > { %1313 = vmatprep.subr.bf16.mxu0 %v1482_v20  ;;  %v1524_v56 = vld [vmem:[%s1850_s1 + $0x150] sm:$0xff]   ;;  %v1525_v57 = vld [vmem:[%s1850_s1 + $0x198] sm:$0xff]   ;;  %v1529_v60 = vld [vmem:[%s1687_s13 + $0xa8] ss:$28 sps:$4 sm:$0xff]  }
  0x1f   : > { %1352 = vmatpush3.bf16.msra.mxu1 %v1481_v19  ;;  %v1526_v58 = vld [vmem:[%s1850_s1 + $0x110] sm:$0xff]   ;;  %v1530_v61 = vld [vmem:[%s1850_s1 + $0x148] sm:$0xff]   ;;  %v1536_v2 = vld [vmem:[%s1850_s1 + $0x140] sm:$0xff]  }
  0x20   : > { %1353 = vmatprep.subr.bf16.mxu1 %v1484_v22  ;;  %v1531_v62 = vld [vmem:[%s1850_s1 + $0x190] sm:$0xff]   ;;  %v1534_v0 = vld [vmem:[%s1850_s1 + $0x108] sm:$0xff]   ;;  %v1538_v4 = vld [vmem:[%s1850_s1 + $0x100] sm:$0xff]  }
  0x21   : > { %1314 = vmatpush3.bf16.msra.mxu0 %v1483_v21  ;;  %v1532_v63 = vld [vmem:[%s1687_s13 + $0xb4] ss:$28 sps:$4 sm:$0xff]   ;;  %v1537_v3 = vld [vmem:[%s1850_s1 + $0x188] sm:$0xff]   ;;  %v1542_v7 = vld [vmem:[%s1850_s1 + $0x180] sm:$0xff]  }
  0x22   : > { %1315 = vmatprep.subr.bf16.mxu0 %v1486_v24  ;;  %v1535_v1 = vld [vmem:[%s1687_s13 + $0xb0] ss:$28 sps:$4 sm:$0xff]   ;;  %v1543_v8 = vld [vmem:[%s1687_s13 + $0x18] ss:$28 sps:$4 sm:$0xff]   ;;  %v1551_v11 = vld [vmem:[%s1687_s13 + $0x88] ss:$28 sps:$4 sm:$0xff]  }
  0x23   : > { %1354 = vmatpush3.bf16.msra.mxu1 %v1485_v23  ;;  %v1539_v5 = vld [vmem:[%s1687_s13 + $0x10] ss:$28 sps:$4 sm:$0xff]   ;;  %v1547_v12 = vld [vmem:[%s1687_s13 + $0x48] ss:$28 sps:$4 sm:$0xff]   ;;  %v1552_v14 = vld [vmem:[%s1687_s13 + $0xc0] ss:$28 sps:$4 sm:$0xff]  }
  0x24   : > { %1355 = vmatprep.subr.bf16.mxu1 %v1488_v26  ;;  %v1541_v6 = vld [vmem:[%s1687_s13 + $0x14] ss:$28 sps:$4 sm:$0xff]   ;;  %v1545_v10 = vld [vmem:[%s1687_s13 + $0x4c] ss:$28 sps:$4 sm:$0xff]   ;;  %v1548_v13 = vld [vmem:[%s1687_s13 + $0x84] ss:$28 sps:$4 sm:$0xff]  }
  0x25   : > { %1316 = vmatpush3.bf16.msra.mxu0 %v1487_v25  ;;  %v1544_v9 = vld [vmem:[%s1687_s13 + $0x50] ss:$28 sps:$4 sm:$0xff]   ;;  %v1550_v15 = vld [vmem:[%s1687_s13 + $0x80] ss:$28 sps:$4 sm:$0xff]   ;;  %v1555_v17 = vld [vmem:[%s1687_s13 + $0xb8] ss:$28 sps:$4 sm:$0xff]  }
  0x26   : > { %1317 = vmatprep.subr.bf16.mxu0 %v1490_v28  ;;  %v1553_v16 = vld [vmem:[%s1687_s13 + $0xbc] ss:$28 sps:$4 sm:$0xff]  }
  0x27   : > { %1356 = vmatpush3.bf16.msra.mxu1 %v1489_v27 }
  0x28   : > { %1357 = vmatprep.subr.bf16.mxu1 %v1492_v30 }
  0x29   : > { %1318 = vmatpush3.bf16.msra.mxu0 %v1491_v29 }
  0x2a   : > { %1383 = vmatprep.subr.bf16.mxu0 %v1497_v34 }
  0x2b   : > { %1358 = vmatpush3.bf16.msra.mxu1 %v1496_v33 }
  0x2c   : > { %835 = vmatmul.mubr.bf16.vlgmr.msra.gmra.mxu0 %v1493_v31  ;;  %1433 = vmatprep.subr.bf16.mxu1 %v1513_v47 }
  0x2d   : > { %1384 = vmatpush3.bf16.msra.mxu0 %v1501_v37  ;;  %842 = vmatprep.mubr.bf16.mxu0 %v1504_v40 }
  0x2e   : > { %900 = vmatmul.mubr.bf16.vlgmr.msra.gmra.mxu1 %v1498_v35  ;;  %1385 = vmatprep.subr.bf16.mxu0 %v1502_v38 }
  0x2f   : > { %907 = vmatprep.mubr.bf16.mxu1 %v1508_v43  ;;  %1434 = vmatpush3.bf16.msra.mxu1 %v1513_v47 }
  0x30   : > { %1435 = vmatprep.subr.bf16.mxu1 %v1519_v52 }
  0x31   : > { %1386 = vmatpush3.bf16.msra.mxu0 %v1503_v39 }
  0x32   : > { %1387 = vmatprep.subr.bf16.mxu0 %v1507_v42 }
  0x33   : > { %1436 = vmatpush3.bf16.msra.mxu1 %v1519_v52 }
  0x34   : > { %843 = vmatmul.mubr.bf16.gmra.mxu0 %v1506_v41  ;;  %1437 = vmatprep.subr.bf16.mxu1 %v1525_v57 }
  0x35   : > { %1388 = vmatpush3.bf16.msra.mxu0 %v1510_v44  ;;  %850 = vmatprep.mubr.bf16.mxu0 %v1515_v49 }
  0x36   : > { %908 = vmatmul.mubr.bf16.gmra.mxu1 %v1511_v45  ;;  %1389 = vmatprep.subr.bf16.mxu0 %v1512_v46 }
  0x37   : > { %915 = vmatprep.mubr.bf16.mxu1 %v1520_v53  ;;  %1438 = vmatpush3.bf16.msra.mxu1 %v1525_v57 }
  0x38   : > { %1439 = vmatprep.subr.bf16.mxu1 %v1531_v62 }
  0x39   : > { %1390 = vmatpush3.bf16.msra.mxu0 %v1514_v48  ;;  %v1811_v48 = vld [vmem:[%s1851_s2] ss:$0 sm:$0xff] }
  0x3a   : > { %1391 = vmatprep.subr.bf16.mxu0 %v1518_v51 }
  0x3b   : > { %1440 = vmatpush3.bf16.msra.mxu1 %v1531_v62 }
  0x3c   : > { %851 = vmatmul.mubr.bf16.gmra.mxu0 %v1517_v50  ;;  %1441 = vmatprep.subr.bf16.mxu1 %v1537_v3 }
  0x3d   : > { %1392 = vmatpush3.bf16.msra.mxu0 %v1522_v54  ;;  %858 = vmatprep.mubr.bf16.mxu0 %v1527_v59 }
  0x3e   : > { %916 = vmatmul.mubr.bf16.gmra.mxu1 %v1523_v55  ;;  %1393 = vmatprep.subr.bf16.mxu0 %v1524_v56 }
  0x3f   : > { %923 = vmatprep.mubr.bf16.mxu1 %v1532_v63  ;;  %1442 = vmatpush3.bf16.msra.mxu1 %v1537_v3 }
  0x40   : > { %1443 = vmatprep.subr.bf16.mxu1 %v1542_v7 }
  0x41   : > { %1394 = vmatpush3.bf16.msra.mxu0 %v1526_v58 }
  0x42   : > { %1395 = vmatprep.subr.bf16.mxu0 %v1530_v61 }
  0x43   : > { %1444 = vmatpush3.bf16.msra.mxu1 %v1542_v7 }
  0x44   : > { %859 = vmatmul.mubr.bf16.gmra.mxu0 %v1529_v60 }
  0x45   : > { %1396 = vmatpush3.bf16.msra.mxu0 %v1534_v0  ;;  %964 = vmatprep.mubr.bf16.mxu0 %v1541_v6 }
  0x46   : > { %924 = vmatmul.mubr.bf16.gmra.mxu1 %v1535_v1  ;;  %1397 = vmatprep.subr.bf16.mxu0 %v1536_v2 }
  0x47   : > { %1445 = vmatprep.mubr.msk.bf16.mxu1 %vm789_vm0, %v1543_v8 }
  0x49   : > { %1398 = vmatpush3.bf16.msra.mxu0 %v1538_v4 }
  0x4c   : > { %965 = vmatmul.mubr.bf16.vlgmr.msra.gmra.mxu0 %v1539_v5 }
  0x4d   : > { %972 = vmatprep.mubr.bf16.mxu0 %v1545_v10 }
  0x4e   : > { %1446 = vmatmul.mubr.msk.bf16.vlgmr.msra.gmra.mxu1 %vm789_vm0, %v1544_v9 }
  0x4f   : > { %1449 = vmatprep.mubr.msk.bf16.mxu1 %vm789_vm0, %v1551_v11 }
  0x54   : > { %973 = vmatmul.mubr.bf16.gmra.mxu0 %v1547_v12 }
  0x55   : > { %980 = vmatprep.mubr.bf16.mxu0 %v1548_v13 }
  0x56   : > { %1450 = vmatmul.mubr.msk.bf16.gmra.mxu1 %vm789_vm0, %v1552_v14 }
  0x5c   : > { %981 = vmatmul.mubr.bf16.gmra.mxu0 %v1550_v15 }
  0x5d   : > { %988 = vmatprep.mubr.bf16.mxu0 %v1553_v16 }
  0x64   : > { %989 = vmatmul.mubr.bf16.gmra.mxu0 %v1555_v17 }
  0xec   : > { %v1319_v18 = vpop.f32.mrf.mxu0 }
  0xee   : > { %v1320_v19 = vpop.f32.mrf.mxu0  ;;  %v1359_v20 = vpop.f32.mrf.mxu1 }
  0xef   : > { %v1321_v46 = vadd.f32 %v1320_v19, %v1319_v18 }
  0xf0   : > { %v1322_v21 = vpop.f32.mrf.mxu0  ;;  %v1360_v22 = vpop.f32.mrf.mxu1 }
  0xf1   : > { %v837_v51 = vadd.f32 %v1321_v46, %v1811_v48  ;;  %v1361_v52 = vadd.f32 %v1360_v22, %v1359_v20 }
  0xf2   : > { %v1323_v23 = vpop.f32.mrf.mxu0  ;;  %v1362_v24 = vpop.f32.mrf.mxu1 }
  0xf3   : > { %v1324_v53 = vadd.f32 %v1323_v23, %v1322_v21  ;;  %v902_v58 = vadd.f32 %v1361_v52, %v837_v51 }
  0xf4   : > { %v1325_v25 = vpop.f32.mrf.mxu0  ;;  %v1363_v26 = vpop.f32.mrf.mxu1 }
  0xf5   : > { %v840_v59 = vadd.f32 %v1324_v53, %v1811_v48  ;;  %v1364_v60 = vadd.f32 %v1363_v26, %v1362_v24 }
  0xf6   : > { %v1326_v27 = vpop.f32.mrf.mxu0  ;;  %v1365_v28 = vpop.f32.mrf.mxu1 }
  0xf7   : > { %v1327_v56 = vadd.f32 %v1326_v27, %v1325_v25  ;;  %v905_v5 = vadd.f32 %v1364_v60, %v840_v59 }
  0xf8   : > { %v1328_v29 = vpop.f32.mrf.mxu0  ;;  %v1366_v30 = vpop.f32.mrf.mxu1 }
  0xf9   : > { %v845_v2 = vadd.f32 %v1327_v56, %v1811_v48  ;;  %v1367_v3 = vadd.f32 %v1366_v30, %v1365_v28 }
  0xfa   : > { %v1329_v31 = vpop.f32.mrf.mxu0  ;;  %v1368_v32 = vpop.f32.mrf.mxu1 }
  0xfb   : > { %v1330_v6 = vadd.f32 %v1329_v31, %v1328_v29  ;;  %v910_v13 = vadd.f32 %v1367_v3, %v845_v2 }
  0xfc   : > { %v1331_v33 = vpop.f32.mrf.mxu0  ;;  %v1369_v34 = vpop.f32.mrf.mxu1 }
  0xfd   : > { %v848_v16 = vadd.f32 %v1330_v6, %v1811_v48  ;;  %v1370_v17 = vadd.f32 %v1369_v34, %v1368_v32 }
  0xfe   : > { %v1332_v35 = vpop.f32.mrf.mxu0  ;;  %v1371_v36 = vpop.f32.mrf.mxu1 }
  0xff   : > { %v1333_v14 = vadd.f32 %v1332_v35, %v1331_v33  ;;  %v913_v28 = vadd.f32 %v1370_v17, %v848_v16 }
 0x100   : > { %v1334_v37 = vpop.f32.mrf.mxu0  ;;  %v1372_v38 = vpop.f32.mrf.mxu1 }
 0x101   : > { %v853_v25 = vadd.f32 %v1333_v14, %v1811_v48  ;;  %v1373_v26 = vadd.f32 %v1372_v38, %v1371_v36 }
 0x102   : > { %v1335_v39 = vpop.f32.mrf.mxu0  ;;  %v1796_v40 = vpop.f32.mrf.mxu1 }
 0x103   : > { %v1336_v29 = vadd.f32 %v1335_v39, %v1334_v37  ;;  %v918_v46 = vadd.f32 %v1373_v26, %v853_v25 }
 0x104   : > { %v1798_v41 = vpop.f32.mrf.mxu0  ;;  %v1800_v42 = vpop.f32.mrf.mxu1 }
 0x105   : > { %v856_v38 = vadd.f32 %v1336_v29, %v1811_v48  ;;  %v1376_v52 = vadd.f32 %v1800_v42, %v1796_v40 }
 0x106   : > { %v1338_v43 = vpop.f32.mrf.mxu0  ;;  %v1802_v44 = vpop.f32.mrf.mxu1 }
 0x107   : > { %v1339_v51 = vadd.f32 %v1338_v43, %v1798_v41  ;;  %v921_v43 = vadd.f32 %v1376_v52, %v856_v38 }
 0x108   : > { %v1804_v45 = vpop.f32.mrf.mxu0  ;;  %v1806_v47 = vpop.f32.mrf.mxu1 }
 0x109   : > { %v861_v59 = vadd.f32 %v1339_v51, %v1811_v48  ;;  %v1379_v60 = vadd.f32 %v1806_v47, %v1802_v44 }
 0x10a   : > { %v1813_v49 = vpop.f32.mrf.mxu0  ;;  %v1815_v50 = vpop.f32.mrf.mxu1 }
 0x10b   : > { %v926_v2 = vadd.f32 %v1379_v60, %v861_v59 }
 0x10c   : > { %v1399_v54 = vpop.f32.mrf.mxu0  ;;  %v1818_v55 = vpop.f32.mrf.mxu1 }
 0x10d   : > { %v1382_v44 = vadd.f32 %v1818_v55, %v1815_v50 }
 0x10e   : > { %v1400_v57 = vpop.f32.mrf.mxu0  ;;  %v1447_v62 = vpop.f32.mrf.mxu1 }
 0x10f   : > { %v1401_v61 = vadd.f32 %v1400_v57, %v1399_v54 }
 0x110   : > { %v1402_v63 = vpop.f32.mrf.mxu0  ;;  %v1031_v1 = vpop.f32.mrf.mxu1 }
 0x111   : > { %v967_v0 = vadd.f32 %v1401_v61, %v902_v58  ;;  %v1342_v61 = vadd.f32 %v1813_v49, %v1804_v45 }
 0x112   : > { %v1403_v4 = vpop.f32.mrf.mxu0  ;;  %v1448_v8 = vpop.f32.mrf.mxu1 }
 0x113   : > { %v1404_v7 = vadd.f32 %v1403_v4, %v1402_v63  ;;  %v1032_v10 = vadd.f32 %v1031_v1, %v967_v0  ;;  %v864_v4 = vadd.f32 %v1342_v61, %v1811_v48 }
 0x114   : > { %v1405_v9 = vpop.f32.mrf.mxu0  ;;  %v1034_v12 = vpop.f32.mrf.mxu1 }
 0x115   : > { %v970_v11 = vadd.f32 %v1404_v7, %v905_v5  ;;  %v1062_v22 = vmax.f32 %v1032_v10, 0.0 }
 0x116   : > { %v1406_v15 = vpop.f32.mrf.mxu0  ;;  %v1451_v21 = vpop.f32.mrf.mxu1 }
 0x117   : > { %v1407_v18 = vadd.f32 %v1406_v15, %v1405_v9  ;;  %v1035_v19 = vadd.f32 %v1034_v12, %v970_v11  ;;  %v929_v9 = vadd.f32 %v1382_v44, %v864_v4 }
 0x118   : > { %v1408_v20 = vpop.f32.mrf.mxu0  ;;  %v1047_v33 = vpop.f32.mrf.mxu1 }
 0x119   : > { %v975_v23 = vadd.f32 %v1407_v18, %v910_v13  ;;  %v1063_v24 = vmax.f32 %v1035_v19, 0.0 }
 0x11a   : > { %v1409_v27 = vpop.f32.mrf.mxu0  ;;  %v1452_v39 = vpop.f32.mrf.mxu1 }
 0x11b   : > { %v1283_v30 = vpack.c.bf16 %v1063_v24, %v1062_v22  ;;  %v1410_v31 = vadd.f32 %v1409_v27, %v1408_v20  ;;  %v1040_v34 = vadd.f32 %v1447_v62, %v975_v23 }
 0x11c   : > { %v1411_v32 = vpop.f32.mrf.mxu0  ;;  %v1050_v63 = vpop.f32.mrf.mxu1 }
 0x11d   : > { %1284 = vst [vmem:[%s1828_s5] sm:$0xff] %v1283_v30   ;;  %v978_v35 = vadd.f32 %v1410_v31, %v913_v28  ;;  %v1064_v56 = vmax.f32 %v1040_v34, 0.0 }
 0x11e   : > { %v1412_v36 = vpop.f32.mrf.mxu0 }
 0x11f   : > { %v1043_v53 = vadd.f32 %v1448_v8, %v978_v35  ;;  %v1413_v54 = vadd.f32 %v1412_v36, %v1411_v32 }
 0x120   : > { %v1414_v37 = vpop.f32.mrf.mxu0 }
 0x121   : > { %v1065_v57 = vmax.f32 %v1043_v53, 0.0  ;;  %v983_v58 = vadd.f32 %v1413_v54, %v918_v46 }
 0x122   : > { %v1415_v41 = vpop.f32.mrf.mxu0 }
 0x123   : > { %v1288_v62 = vpack.c.bf16 %v1065_v57, %v1064_v56  ;;  %v1416_v40 = vadd.f32 %v1415_v41, %v1414_v37  ;;  %v1048_v0 = vadd.f32 %v1047_v33, %v983_v58 }
 0x124   : > { %v1417_v42 = vpop.f32.mrf.mxu0 }
 0x125   : > { %1300 = vst [vmem:[%s1828_s5 + $0x8] sm:$0xff] %v1288_v62   ;;  %v986_v1 = vadd.f32 %v1416_v40, %v921_v43  ;;  %v1066_v45 = vmax.f32 %v1048_v0, 0.0 }
 0x126   : > { %v1418_v3 = vpop.f32.mrf.mxu0 }
 0x127   : > { %v1419_v47 = vadd.f32 %v1418_v3, %v1417_v42  ;;  %v1051_v5 = vadd.f32 %v1050_v63, %v986_v1 }
 0x128   : > { %v1420_v6 = vpop.f32.mrf.mxu0 }
 0x129   : > { %v991_v49 = vadd.f32 %v1419_v47, %v926_v2  ;;  %v1067_v7 = vmax.f32 %v1051_v5, 0.0 }
 0x12a   : > { %v1421_v8 = vpop.f32.mrf.mxu0 }
 0x12b   : > { %v1293_v10 = vpack.c.bf16 %v1067_v7, %v1066_v45  ;;  %v1422_v11 = vadd.f32 %v1421_v8, %v1420_v6  ;;  %v1056_v12 = vadd.f32 %v1451_v21, %v991_v49 }
 0x12d   : > { %1301 = vst [vmem:[%s1828_s5 + $0x10] sm:$0xff] %v1293_v10   ;;  %v994_v13 = vadd.f32 %v1422_v11, %v929_v9  ;;  %v1068_v15 = vmax.f32 %v1056_v12, 0.0 }
 0x12f   : > { %v1059_v14 = vadd.f32 %v1452_v39, %v994_v13 }
 0x131   : > { %v1069_v48 = vmax.f32 %v1059_v14, 0.0 }
 0x133   : > { %v1298_v16 = vpack.c.bf16 %v1069_v48, %v1068_v15 }
 0x135   : > { %1302 = vst [vmem:[%s1828_s5 + $0x18] sm:$0xff] %v1298_v16  }
 0x136 PF: > { %s13_s12 = sadd.s32 1, %s1562_s12  }
 0x137   : > { %p10_p4 = scmp.ge.s32.totalorder %s13_s12, 4  }
 0x139   :  { %12 = sbr.rel (!%p10_p4) target bundleno = 1 (0x1), region = 62 }

// kernel: allconvnet_forward.10
= control target key start
LH: loop header
LB: loop body
LE: loop exit
PB: predicated region body
PF: predicated region fallthrough
CT: control target
= control target key end

     0   :  { %s1860_s12 = smov 0   ;;  %s2352_s0 = inlined_call_operand.vmem [shape: bf16[128,864], index: 0, kind: input, shape index: {}]   ;;  %s2353_s1 = inlined_call_operand.vmem [shape: bf16[864,192], index: 1, kind: input, shape index: {}]   ;;  %s2354_s2 = inlined_call_operand.vmem [shape: f32[1,192], index: 2, kind: input, shape index: {}]   ;;  %s2355_s3 = inlined_call_operand.vmem [shape: bf16[128,192], index: 3, kind: output, shape index: {}]  }
   0x1 LB: > { %s1450_s13 = sadd.s32 4294967295, %s1837_s12   ;;  %p1454_p0 = scmp.ge.s32.totalorder %s1837_s12, 1  ;;  %s1837_s12 = sphi %s1860_s12, %s13_s12  }
   0x2   : > { %p139_p1 = scmp.lt.s32.totalorder %s1837_s12, 3 }
   0x4   : > { %p140_p2 = pnand %p1454_p0, %p139_p1 }
   0x5   : > { %s1455_s22 = sshll.u32 (!%p140_p2), %s1450_s13, 3 }
   0x6   : > { %143 = sbr.rel (%p140_p2) target bundleno = 372 (0x174), region = 32  ;;  %p166_p3 = scmp.lt.s32.totalorder (!%p140_p2), %s1455_s22, 15 }
   0xb   : > { %v1629_v0 = vld [vmem:[%s2353_s1 + $0x74] ss:$8 sps:$4 sm:$0xff]   ;;  %v1631_v1 = vld [vmem:[%s2353_s1 + $0x70] ss:$8 sps:$4 sm:$0xff]   ;;  %v1635_v4 = vld [vmem:[%s2353_s1 + $0x64] ss:$8 sps:$4 sm:$0xff]  }
   0xc   : > { %1025 = vmatprep.subr.bf16.mxu0 %v1629_v0  ;;  %v1632_v2 = vld [vmem:[%s2353_s1 + $0x174] ss:$8 sps:$4 sm:$0xff]   ;;  %v1634_v3 = vld [vmem:[%s2353_s1 + $0x170] ss:$8 sps:$4 sm:$0xff]   ;;  %v1637_v5 = vld [vmem:[%s2353_s1 + $0x60] ss:$8 sps:$4 sm:$0xff]  }
   0xd   : > { %1026 = vmatpush1.bf16.msra.mxu0 %v1631_v1  ;;  %1098 = vmatprep.subr.bf16.mxu1 %v1632_v2  ;;  %v1638_v6 = vld [vmem:[%s2353_s1 + $0x164] ss:$8 sps:$4 sm:$0xff]   ;;  %v1640_v7 = vld [vmem:[%s2353_s1 + $0x160] ss:$8 sps:$4 sm:$0xff]   ;;  %v1641_v8 = vld [vmem:[%s2353_s1 + $0x54] ss:$8 sps:$4 sm:$0xff]  }
   0xe   : > { %1099 = vmatpush1.bf16.msra.mxu1 %v1634_v3  ;;  %1027 = vmatprep.subr.bf16.mxu0 %v1635_v4  ;;  %v1643_v9 = vld [vmem:[%s2353_s1 + $0x50] ss:$8 sps:$4 sm:$0xff]   ;;  %v1644_v10 = vld [vmem:[%s2353_s1 + $0x154] ss:$8 sps:$4 sm:$0xff]   ;;  %v1647_v11 = vld [vmem:[%s2353_s1 + $0x44] ss:$8 sps:$4 sm:$0xff]  }
   0xf   : > { %1100 = vmatprep.subr.bf16.mxu1 %v1638_v6  ;;  %v1646_v12 = vld [vmem:[%s2353_s1 + $0x150] ss:$8 sps:$4 sm:$0xff]   ;;  %v1650_v13 = vld [vmem:[%s2353_s1 + $0x144] ss:$8 sps:$4 sm:$0xff]   ;;  %v1649_v14 = vld [vmem:[%s2353_s1 + $0x40] ss:$8 sps:$4 sm:$0xff]  }
  0x10   : > { %v1653_v15 = vld [vmem:[%s2353_s1 + $0x34] ss:$8 sps:$4 sm:$0xff]   ;;  %v1652_v16 = vld [vmem:[%s2353_s1 + $0x140] ss:$8 sps:$4 sm:$0xff]   ;;  %v1655_v18 = vld [vmem:[%s2353_s1 + $0x30] ss:$8 sps:$4 sm:$0xff]  }
  0x11   : > { %1028 = vmatpush1.bf16.msra.mxu0 %v1637_v5  ;;  %v1656_v17 = vld [vmem:[%s2353_s1 + $0x134] ss:$8 sps:$4 sm:$0xff]   ;;  %v1659_v19 = vld [vmem:[%s2353_s1 + $0x24] ss:$8 sps:$4 sm:$0xff]   ;;  %v1658_v20 = vld [vmem:[%s2353_s1 + $0x130] ss:$8 sps:$4 sm:$0xff]  }
  0x12   : > { %1029 = vmatprep.subr.bf16.mxu0 %v1641_v8  ;;  %1101 = vmatpush1.bf16.msra.mxu1 %v1640_v7  ;;  %v1662_v21 = vld [vmem:[%s2353_s1 + $0x124] ss:$8 sps:$4 sm:$0xff]   ;;  %v1661_v22 = vld [vmem:[%s2353_s1 + $0x20] ss:$8 sps:$4 sm:$0xff]   ;;  %v1665_v23 = vld [vmem:[%s2353_s1 + $0x14] ss:$8 sps:$4 sm:$0xff]  }
  0x13   : > { %1102 = vmatprep.subr.bf16.mxu1 %v1644_v10  ;;  %v1664_v24 = vld [vmem:[%s2353_s1 + $0x120] ss:$8 sps:$4 sm:$0xff]   ;;  %v1668_v25 = vld [vmem:[%s2353_s1 + $0x114] ss:$8 sps:$4 sm:$0xff]   ;;  %v1667_v26 = vld [vmem:[%s2353_s1 + $0x10] ss:$8 sps:$4 sm:$0xff]  }
  0x14   : > { %v1671_v27 = vld [vmem:[%s2353_s1 + $0x4] ss:$8 sps:$4 sm:$0xff]   ;;  %v1670_v28 = vld [vmem:[%s2353_s1 + $0x110] ss:$8 sps:$4 sm:$0xff]   ;;  %v1673_v30 = vld [vmem:[%s2353_s1] ss:$8 sps:$4 sm:$0xff]  }
  0x15   : > { %1030 = vmatpush1.bf16.msra.mxu0 %v1643_v9  ;;  %v1674_v29 = vld [vmem:[%s2353_s1 + $0x104] ss:$8 sps:$4 sm:$0xff]   ;;  %v1677_v31 = vld [vmem:[%s2353_s1 + $0xf4] ss:$8 sps:$4 sm:$0xff]   ;;  %v1676_v32 = vld [vmem:[%s2353_s1 + $0x100] ss:$8 sps:$4 sm:$0xff]  }
  0x16   : > { %1031 = vmatprep.subr.bf16.mxu0 %v1647_v11  ;;  %1103 = vmatpush1.bf16.msra.mxu1 %v1646_v12  ;;  %v1680_v33 = vld [vmem:[%s2353_s1 + $0x1f4] ss:$8 sps:$4 sm:$0xff]   ;;  %v1679_v34 = vld [vmem:[%s2353_s1 + $0xf0] ss:$8 sps:$4 sm:$0xff]   ;;  %v1683_v35 = vld [vmem:[%s2353_s1 + $0xe4] ss:$8 sps:$4 sm:$0xff]  }
  0x17   : > { %1104 = vmatprep.subr.bf16.mxu1 %v1650_v13  ;;  %s2359_s22 = smov (!%p166_p3, %s1455_s22), 15  ;;  %v1682_v36 = vld [vmem:[%s2353_s1 + $0x1f0] ss:$8 sps:$4 sm:$0xff]   ;;  %v1686_v37 = vld [vmem:[%s2353_s1 + $0x1e4] ss:$8 sps:$4 sm:$0xff]   ;;  %vm1012_vm0 = vcmask 785408  }
  0x18   : > { %v1685_v38 = vld [vmem:[%s2353_s1 + $0xe0] ss:$8 sps:$4 sm:$0xff]   ;;  %v1689_v39 = vld [vmem:[%s2353_s1 + $0xd4] ss:$8 sps:$4 sm:$0xff]   ;;  %s1619_s19 = smul.u32 28, %s2359_s22  ;;  %vm1381_vm1 = vcmask 1043456  }
  0x19   : > { %1032 = vmatpush1.bf16.msra.mxu0 %v1649_v14  ;;  %v1688_v40 = vld [vmem:[%s2353_s1 + $0x1e0] ss:$8 sps:$4 sm:$0xff]   ;;  %v1692_v41 = vld [vmem:[%s2353_s1 + $0x1d4] ss:$8 sps:$4 sm:$0xff]   ;;  %v1691_v42 = vld [vmem:[%s2353_s1 + $0xd0] ss:$8 sps:$4 sm:$0xff]  }
  0x1a   : > { %1033 = vmatprep.subr.bf16.mxu0 %v1653_v15  ;;  %1105 = vmatpush1.bf16.msra.mxu1 %v1652_v16  ;;  %v1695_v43 = vld [vmem:[%s2353_s1 + $0xc4] ss:$8 sps:$4 sm:$0xff]   ;;  %s2008_s13 = scalar_lea.vmem %s2352_s0, %s1619_s19  ;;  %v1694_v44 = vld [vmem:[%s2353_s1 + $0x1d0] ss:$8 sps:$4 sm:$0xff]   ;;  %v1697_v46 = vld [vmem:[%s2353_s1 + $0xc0] ss:$8 sps:$4 sm:$0xff]  }
  0x1b   : > { %1106 = vmatprep.subr.bf16.mxu1 %v1656_v17  ;;  %v1698_v45 = vld [vmem:[%s2353_s1 + $0x1c4] ss:$8 sps:$4 sm:$0xff]   ;;  %v1701_v48 = vld [vmem:[%s2353_s1 + $0xb4] ss:$8 sps:$4 sm:$0xff]   ;;  %v1700_v49 = vld [vmem:[%s2353_s1 + $0x1c0] ss:$8 sps:$4 sm:$0xff]  }
  0x1c   : > { %v1726_v47 = vld [vmem:[%s2008_s13 + $0x4] ss:$28 sps:$4 sm:$0xff]   ;;  %v1704_v50 = vld [vmem:[%s2353_s1 + $0x1b4] ss:$8 sps:$4 sm:$0xff]   ;;  %v1733_v51 = vld [vmem:[%s2008_s13 + $0xc] ss:$28 sps:$4 sm:$0xff]  }
  0x1d   : > { %1034 = vmatpush1.bf16.msra.mxu0 %v1655_v18  ;;  %1057 = vmatprep.mubr.bf16.mxu0 %v1726_v47  ;;  %v1703_v52 = vld [vmem:[%s2353_s1 + $0xb0] ss:$8 sps:$4 sm:$0xff]   ;;  %v1707_v53 = vld [vmem:[%s2353_s1 + $0xa4] ss:$8 sps:$4 sm:$0xff]   ;;  %v1709_v56 = vld [vmem:[%s2353_s1 + $0xa0] ss:$8 sps:$4 sm:$0xff]  }
  0x1e   : > { %1035 = vmatprep.subr.bf16.mxu0 %v1659_v19  ;;  %1107 = vmatpush1.bf16.msra.mxu1 %v1658_v20  ;;  %v1706_v54 = vld [vmem:[%s2353_s1 + $0x1b0] ss:$8 sps:$4 sm:$0xff]   ;;  %v1710_v55 = vld [vmem:[%s2353_s1 + $0x1a4] ss:$8 sps:$4 sm:$0xff]   ;;  %v1713_v57 = vld [vmem:[%s2353_s1 + $0x94] ss:$8 sps:$4 sm:$0xff]  }
  0x1f   : > { %1108 = vmatprep.subr.bf16.mxu1 %v1662_v21  ;;  %1130 = vmatprep.mubr.bf16.mxu1 %v1733_v51  ;;  %v1712_v58 = vld [vmem:[%s2353_s1 + $0x1a0] ss:$8 sps:$4 sm:$0xff]   ;;  %v1716_v59 = vld [vmem:[%s2353_s1 + $0x194] ss:$8 sps:$4 sm:$0xff]   ;;  %v1715_v60 = vld [vmem:[%s2353_s1 + $0x90] ss:$8 sps:$4 sm:$0xff]  }
  0x20   : > { %v1719_v61 = vld [vmem:[%s2353_s1 + $0x84] ss:$8 sps:$4 sm:$0xff]   ;;  %v1718_v62 = vld [vmem:[%s2353_s1 + $0x190] ss:$8 sps:$4 sm:$0xff]   ;;  %v1721_v0 = vld [vmem:[%s2353_s1 + $0x80] ss:$8 sps:$4 sm:$0xff]  }
  0x21   : > { %1036 = vmatpush1.bf16.msra.mxu0 %v1661_v22  ;;  %v1722_v63 = vld [vmem:[%s2353_s1 + $0x184] ss:$8 sps:$4 sm:$0xff]   ;;  %v1727_v1 = vld [vmem:[%s2353_s1 + $0x180] ss:$8 sps:$4 sm:$0xff]   ;;  %v1730_v3 = vld [vmem:[%s2353_s1 + $0x274] ss:$8 sps:$4 sm:$0xff]  }
  0x22   : > { %1037 = vmatprep.subr.bf16.mxu0 %v1665_v23  ;;  %1109 = vmatpush1.bf16.msra.mxu1 %v1664_v24  ;;  %v1724_v2 = vld [vmem:[%s2008_s13] ss:$28 sps:$4 sm:$0xff]   ;;  %v1728_v4 = vld [vmem:[%s2353_s1 + $0x270] ss:$8 sps:$4 sm:$0xff]   ;;  %v1731_v5 = vld [vmem:[%s2008_s13 + $0x8] ss:$28 sps:$4 sm:$0xff]  }
  0x23   : > { %1110 = vmatprep.subr.bf16.mxu1 %v1668_v25  ;;  %v1762_v6 = vld [vmem:[%s2353_s1 + $0x354] ss:$8 sps:$4 sm:$0xff]   ;;  %v1736_v7 = vld [vmem:[%s2353_s1 + $0x264] ss:$8 sps:$4 sm:$0xff]   ;;  %v1760_v9 = vld [vmem:[%s2353_s1 + $0x350] ss:$8 sps:$4 sm:$0xff]  }
  0x24   : > { %v1758_v8 = vld [vmem:[%s2008_s13 + $0x3c] ss:$28 sps:$4 sm:$0xff]   ;;  %v1764_v10 = vld [vmem:[%s2008_s13 + $0x44] ss:$28 sps:$4 sm:$0xff]   ;;  %v1776_v20 = vld [vmem:[%s2008_s13 + $0x74] ss:$28 sps:$4 sm:$0xff]  }
  0x25   : > { %1038 = vmatpush1.bf16.msra.mxu0 %v1667_v26  ;;  %v1772_v11 = vld [vmem:[%s2353_s1 + $0x344] ss:$8 sps:$4 sm:$0xff]   ;;  %v1734_v12 = vld [vmem:[%s2353_s1 + $0x260] ss:$8 sps:$4 sm:$0xff]   ;;  %v1739_v13 = vld [vmem:[%s2353_s1 + $0x254] ss:$8 sps:$4 sm:$0xff]  }
  0x26   : > { %1039 = vmatprep.subr.bf16.mxu0 %v1671_v27  ;;  %1111 = vmatpush1.bf16.msra.mxu1 %v1670_v28  ;;  %v1737_v14 = vld [vmem:[%s2353_s1 + $0x250] ss:$8 sps:$4 sm:$0xff]   ;;  %v1770_v15 = vld [vmem:[%s2353_s1 + $0x340] ss:$8 sps:$4 sm:$0xff]   ;;  %v1742_v16 = vld [vmem:[%s2353_s1 + $0x244] ss:$8 sps:$4 sm:$0xff]  }
  0x27   : > { %1112 = vmatprep.subr.bf16.mxu1 %v1674_v29  ;;  %v1763_v17 = vld [vmem:[%s2008_s13 + $0x38] ss:$28 sps:$4 sm:$0xff]   ;;  %v1766_v19 = vld [vmem:[%s2008_s13 + $0x40] ss:$28 sps:$4 sm:$0xff]   ;;  %v1793_v23 = vld [vmem:[%s2353_s1 + $0x324] ss:$8 sps:$4 sm:$0xff]  }
  0x28   : > { %v1787_v18 = vld [vmem:[%s2353_s1 + $0x334] ss:$8 sps:$4 sm:$0xff]   ;;  %v1785_v22 = vld [vmem:[%s2353_s1 + $0x330] ss:$8 sps:$4 sm:$0xff]   ;;  %v1740_v24 = vld [vmem:[%s2353_s1 + $0x240] ss:$8 sps:$4 sm:$0xff]  }
  0x29   : > { %1040 = vmatpush1.bf16.msra.mxu0 %v1673_v30  ;;  %v1779_v21 = vld [vmem:[%s2008_s13 + $0x7c] ss:$28 sps:$4 sm:$0xff]   ;;  %v1791_v27 = vld [vmem:[%s2353_s1 + $0x320] ss:$8 sps:$4 sm:$0xff]   ;;  %v1748_v28 = vld [vmem:[%s2353_s1 + $0x224] ss:$8 sps:$4 sm:$0xff]  }
  0x2a   : > { %1041 = vmatprep.subr.bf16.mxu0 %v1677_v31  ;;  %1113 = vmatpush1.bf16.msra.mxu1 %v1676_v32  ;;  %v1745_v25 = vld [vmem:[%s2353_s1 + $0x234] ss:$8 sps:$4 sm:$0xff]   ;;  %v1743_v26 = vld [vmem:[%s2353_s1 + $0x230] ss:$8 sps:$4 sm:$0xff]   ;;  %v1794_v32 = vld [vmem:[%s2008_s13 + $0xac] ss:$28 sps:$4 sm:$0xff]  }
  0x2b   : > { %1114 = vmatprep.subr.bf16.mxu1 %v1680_v33  ;;  %v1778_v29 = vld [vmem:[%s2008_s13 + $0x70] ss:$28 sps:$4 sm:$0xff]   ;;  %v1805_v30 = vld [vmem:[%s2353_s1 + $0x314] ss:$8 sps:$4 sm:$0xff]   ;;  %s1610_s15 = sshll.u32 %s2359_s22, 3  ;;  %vm1382_vm2 = vcmask 523268  }
  0x2c   : > { %v1781_v31 = vld [vmem:[%s2008_s13 + $0x78] ss:$28 sps:$4 sm:$0xff]   ;;  %s2292_s18 = scalar_lea.vmem %s2355_s3, %s1610_s15  ;;  %vm2295_vm3 = vmor %vm1382_vm2, %vm1381_vm1 }
  0x2d   : > { %1042 = vmatpush2.bf16.msra.mxu0 %v1679_v34  ;;  %v1797_v33 = vld [vmem:[%s2008_s13 + $0xb4] ss:$28 sps:$4 sm:$0xff]  }
  0x2e   : > { %1043 = vmatprep.subr.bf16.mxu0 %v1683_v35  ;;  %1115 = vmatpush2.bf16.msra.mxu1 %v1682_v36  ;;  %v1803_v34 = vld [vmem:[%s2353_s1 + $0x310] ss:$8 sps:$4 sm:$0xff]   ;;  %v1811_v35 = vld [vmem:[%s2353_s1 + $0x304] ss:$8 sps:$4 sm:$0xff]   ;;  %v1746_v36 = vld [vmem:[%s2353_s1 + $0x220] ss:$8 sps:$4 sm:$0xff]  }
  0x2f   : > { %1116 = vmatprep.subr.bf16.mxu1 %v1686_v37  ;;  %v1751_v37 = vld [vmem:[%s2353_s1 + $0x214] ss:$8 sps:$4 sm:$0xff]   ;;  %v1755_v47 = vld [vmem:[%s2353_s1 + $0x2f0] ss:$8 sps:$4 sm:$0xff]  }
  0x30   : > { %v1775_v51 = vld [vmem:[%s2353_s1 + $0x2d4] ss:$8 sps:$4 sm:$0xff]  }
  0x31   : > { %1044 = vmatpush2.bf16.msra.mxu0 %v1685_v38  ;;  %v1749_v38 = vld [vmem:[%s2353_s1 + $0x210] ss:$8 sps:$4 sm:$0xff]  }
  0x32   : > { %1045 = vmatprep.subr.bf16.mxu0 %v1689_v39  ;;  %1117 = vmatpush2.bf16.msra.mxu1 %v1688_v40  ;;  %v1809_v39 = vld [vmem:[%s2353_s1 + $0x300] ss:$8 sps:$4 sm:$0xff]   ;;  %v1754_v40 = vld [vmem:[%s2353_s1 + $0x204] ss:$8 sps:$4 sm:$0xff]  }
  0x33   : > { %1118 = vmatprep.subr.bf16.mxu1 %v1692_v41  ;;  %v1796_v41 = vld [vmem:[%s2008_s13 + $0xa8] ss:$28 sps:$4 sm:$0xff]  }
  0x35   : > { %1046 = vmatpush2.bf16.msra.mxu0 %v1691_v42  ;;  %v1818_v42 = vld [vmem:[%s2008_s13 + $0x14] ss:$28 sps:$4 sm:$0xff]  }
  0x36   : > { %1047 = vmatprep.subr.bf16.mxu0 %v1695_v43  ;;  %1119 = vmatpush2.bf16.msra.mxu1 %v1694_v44  ;;  %v1799_v43 = vld [vmem:[%s2008_s13 + $0xb0] ss:$28 sps:$4 sm:$0xff]   ;;  %v1752_v44 = vld [vmem:[%s2353_s1 + $0x200] ss:$8 sps:$4 sm:$0xff]  }
  0x37   : > { %1120 = vmatprep.subr.bf16.mxu1 %v1698_v45  ;;  %v1757_v45 = vld [vmem:[%s2353_s1 + $0x2f4] ss:$8 sps:$4 sm:$0xff]  }
  0x39   : > { %1048 = vmatpush2.bf16.msra.mxu0 %v1697_v46  ;;  %v1839_v46 = vmov 0  }
  0x3a   : > { %1049 = vmatprep.subr.bf16.mxu0 %v1701_v48  ;;  %1121 = vmatpush2.bf16.msra.mxu1 %v1700_v49  ;;  %v1769_v48 = vld [vmem:[%s2353_s1 + $0x2e4] ss:$8 sps:$4 sm:$0xff]   ;;  %v1815_v49 = vld [vmem:[%s2008_s13 + $0x18] ss:$28 sps:$4 sm:$0xff]  }
  0x3b   : > { %1122 = vmatprep.subr.bf16.mxu1 %v1704_v50  ;;  %v1767_v50 = vld [vmem:[%s2353_s1 + $0x2e0] ss:$8 sps:$4 sm:$0xff]  }
  0x3d   : > { %1050 = vmatpush2.bf16.msra.mxu0 %v1703_v52  ;;  %v1773_v52 = vld [vmem:[%s2353_s1 + $0x2d0] ss:$8 sps:$4 sm:$0xff]  }
  0x3e   : > { %1051 = vmatprep.subr.bf16.mxu0 %v1707_v53  ;;  %1123 = vmatpush2.bf16.msra.mxu1 %v1706_v54  ;;  %v1784_v53 = vld [vmem:[%s2353_s1 + $0x2c4] ss:$8 sps:$4 sm:$0xff]  }
  0x3f   : > { %1124 = vmatprep.subr.bf16.mxu1 %v1710_v55  ;;  %v1819_v54 = vld [vmem:[%s2008_s13 + $0x50] ss:$28 sps:$4 sm:$0xff]   ;;  %v1782_v55 = vld [vmem:[%s2353_s1 + $0x2c0] ss:$8 sps:$4 sm:$0xff]  }
  0x41   : > { %1052 = vmatpush2.bf16.msra.mxu0 %v1709_v56  ;;  %v1790_v56 = vld [vmem:[%s2353_s1 + $0x2b4] ss:$8 sps:$4 sm:$0xff]  }
  0x42   : > { %1053 = vmatprep.subr.bf16.mxu0 %v1713_v57  ;;  %1125 = vmatpush2.bf16.msra.mxu1 %v1712_v58  ;;  %v1788_v57 = vld [vmem:[%s2353_s1 + $0x2b0] ss:$8 sps:$4 sm:$0xff]   ;;  %v1802_v58 = vld [vmem:[%s2353_s1 + $0x2a4] ss:$8 sps:$4 sm:$0xff]  }
  0x43   : > { %1126 = vmatprep.subr.bf16.mxu1 %v1716_v59  ;;  %v1823_v59 = vld [vmem:[%s2008_s13 + $0x88] ss:$28 sps:$4 sm:$0xff]  }
  0x45   : > { %1054 = vmatpush2.bf16.msra.mxu0 %v1715_v60  ;;  %v1800_v60 = vld [vmem:[%s2353_s1 + $0x2a0] ss:$8 sps:$4 sm:$0xff]  }
  0x46   : > { %1055 = vmatprep.subr.bf16.mxu0 %v1719_v61  ;;  %1127 = vmatpush2.bf16.msra.mxu1 %v1718_v62  ;;  %v1808_v61 = vld [vmem:[%s2353_s1 + $0x294] ss:$8 sps:$4 sm:$0xff]   ;;  %v1806_v62 = vld [vmem:[%s2353_s1 + $0x290] ss:$8 sps:$4 sm:$0xff]  }
  0x47   : > { %1128 = vmatprep.subr.bf16.mxu1 %v1722_v63  ;;  %v1814_v63 = vld [vmem:[%s2353_s1 + $0x284] ss:$8 sps:$4 sm:$0xff]  }
  0x49   : > { %1056 = vmatpush2.bf16.msra.mxu0 %v1721_v0  ;;  %v1827_v0 = vld [vmem:[%s2008_s13 + $0xc0] ss:$28 sps:$4 sm:$0xff]  }
  0x4a   : > { %1171 = vmatprep.subr.bf16.mxu0 %v1730_v3  ;;  %1129 = vmatpush2.bf16.msra.mxu1 %v1727_v1  ;;  %v1812_v1 = vld [vmem:[%s2353_s1 + $0x280] ss:$8 sps:$4 sm:$0xff]  }
  0x4b   : > { %1248 = vmatprep.subr.bf16.mxu1 %v1762_v6  ;;  %v1820_v3 = vld [vmem:[%s2008_s13 + $0x4c] ss:$28 sps:$4 sm:$0xff]   ;;  %v1826_v6 = vld [vmem:[%s2008_s13 + $0x80] ss:$28 sps:$4 sm:$0xff]  }
  0x4c   : > { %1058 = vmatmul.mubr.bf16.vlgmr.msra.gmra.mxu0 %v1724_v2  ;;  %v1816_v2 = vld [vmem:[%s2008_s13 + $0x10] ss:$28 sps:$4 sm:$0xff]  }
  0x4d   : > { %1172 = vmatpush1.bf16.msra.mxu0 %v1728_v4  ;;  %1067 = vmatprep.mubr.bf16.mxu0 %v1758_v8  ;;  %v1822_v4 = vld [vmem:[%s2008_s13 + $0x48] ss:$28 sps:$4 sm:$0xff]   ;;  %v1830_v8 = vld [vmem:[%s2008_s13 + $0xb8] ss:$28 sps:$4 sm:$0xff]  }
  0x4e   : > { %1131 = vmatmul.mubr.bf16.vlgmr.msra.gmra.mxu1 %v1731_v5  ;;  %1173 = vmatprep.subr.bf16.mxu0 %v1736_v7  ;;  %v1824_v5 = vld [vmem:[%s2008_s13 + $0x84] ss:$28 sps:$4 sm:$0xff]   ;;  %v1828_v7 = vld [vmem:[%s2008_s13 + $0xbc] ss:$28 sps:$4 sm:$0xff]  }
  0x4f   : > { %1249 = vmatpush1.bf16.msra.mxu1 %v1760_v9  ;;  %1140 = vmatprep.mubr.bf16.mxu1 %v1764_v10 }
  0x50   : > { %1250 = vmatprep.subr.bf16.mxu1 %v1772_v11 }
  0x51   : > { %1174 = vmatpush1.bf16.msra.mxu0 %v1734_v12 }
  0x52   : > { %1175 = vmatprep.subr.bf16.mxu0 %v1739_v13 }
  0x53   : > { %1251 = vmatpush1.bf16.msra.mxu1 %v1770_v15 }
  0x54   : > { %1068 = vmatmul.mubr.bf16.gmra.mxu0 %v1763_v17  ;;  %1252 = vmatprep.subr.bf16.mxu1 %v1787_v18 }
  0x55   : > { %1176 = vmatpush1.bf16.msra.mxu0 %v1737_v14  ;;  %1077 = vmatprep.mubr.bf16.mxu0 %v1776_v20 }
  0x56   : > { %1177 = vmatprep.subr.bf16.mxu0 %v1742_v16  ;;  %1141 = vmatmul.mubr.bf16.gmra.mxu1 %v1766_v19 }
  0x57   : > { %1150 = vmatprep.mubr.bf16.mxu1 %v1779_v21  ;;  %1253 = vmatpush1.bf16.msra.mxu1 %v1785_v22 }
  0x58   : > { %1254 = vmatprep.subr.bf16.mxu1 %v1793_v23 }
  0x59   : > { %1178 = vmatpush1.bf16.msra.mxu0 %v1740_v24 }
  0x5a   : > { %1179 = vmatprep.subr.bf16.mxu0 %v1745_v25 }
  0x5b   : > { %1255 = vmatpush1.bf16.msra.mxu1 %v1791_v27 }
  0x5c   : > { %1078 = vmatmul.mubr.bf16.gmra.mxu0 %v1778_v29  ;;  %1256 = vmatprep.subr.bf16.mxu1 %v1805_v30 }
  0x5d   : > { %1180 = vmatpush1.bf16.msra.mxu0 %v1743_v26  ;;  %1087 = vmatprep.mubr.bf16.mxu0 %v1794_v32 }
  0x5e   : > { %1181 = vmatprep.subr.bf16.mxu0 %v1748_v28  ;;  %1151 = vmatmul.mubr.bf16.gmra.mxu1 %v1781_v31 }
  0x5f   : > { %1160 = vmatprep.mubr.bf16.mxu1 %v1797_v33  ;;  %1257 = vmatpush1.bf16.msra.mxu1 %v1803_v34 }
  0x60   : > { %1258 = vmatprep.subr.bf16.mxu1 %v1811_v35 }
  0x61   : > { %1182 = vmatpush1.bf16.msra.mxu0 %v1746_v36 }
  0x62   : > { %1183 = vmatprep.subr.bf16.mxu0 %v1751_v37 }
  0x63   : > { %1259 = vmatpush1.bf16.msra.mxu1 %v1809_v39 }
  0x64   : > { %1088 = vmatmul.mubr.bf16.gmra.mxu0 %v1796_v41 }
  0x65   : > { %1184 = vmatpush1.bf16.msra.mxu0 %v1749_v38  ;;  %1203 = vmatprep.mubr.bf16.mxu0 %v1818_v42  ;;  %v322_v38 = vlaneseq }
  0x66   : > { %1185 = vmatprep.subr.bf16.mxu0 %v1754_v40  ;;  %1161 = vmatmul.mubr.bf16.gmra.mxu1 %v1799_v43 }
  0x67   : > { %1276 = vmatprep.mubr.bf16.mxu1 %v1839_v46  ;;  %v323_v41 = vshrl.u32 %v322_v38, 7 }
  0x69   : > { %1186 = vmatpush1.bf16.msra.mxu0 %v1752_v44  ;;  %v324_v44 = vsub.s32 0, %v323_v41 }
  0x6a   : > { %1187 = vmatprep.subr.bf16.mxu0 %v1757_v45  ;;  %v320_v45 = vld [vmem:[%s2354_s2] sm:$0x3] }
  0x6d   : > { %1188 = vmatpush2.bf16.msra.mxu0 %v1755_v47  ;;  %v328_v47 = vsub.s32 1, %v323_v41 }
  0x6e   : > { %1189 = vmatprep.subr.bf16.mxu0 %v1769_v48  ;;  %1596 = vmatmul.mubr.msk.bf16.vlgmr.msra.gmra.mxu1 %vm1012_vm0, %v1815_v49  ;;  %v2271_v49 = vrot.slane %v320_v45, %v324_v44 }
  0x6f   : > { %1286 = vmatprep.mubr.bf16.mxu1 %v1839_v46 }
  0x71   : > { %1190 = vmatpush2.bf16.msra.mxu0 %v1767_v50 }
  0x72   : > { %1191 = vmatprep.subr.bf16.mxu0 %v1775_v51  ;;  %v2273_v51 = vrot.slane %v320_v45, %v328_v47 }
  0x75   : > { %1192 = vmatpush2.bf16.msra.mxu0 %v1773_v52 }
  0x76   : > { %1193 = vmatprep.subr.bf16.mxu0 %v1784_v53  ;;  %1597 = vmatmul.mubr.msk.bf16.gmra.mxu1 %vm1012_vm0, %v1819_v54 }
  0x77   : > { %1296 = vmatprep.mubr.bf16.mxu1 %v1839_v46 }
  0x79   : > { %1194 = vmatpush2.bf16.msra.mxu0 %v1782_v55 }
  0x7a   : > { %1195 = vmatprep.subr.bf16.mxu0 %v1790_v56 }
  0x7d   : > { %1196 = vmatpush2.bf16.msra.mxu0 %v1788_v57 }
  0x7e   : > { %1197 = vmatprep.subr.bf16.mxu0 %v1802_v58  ;;  %1598 = vmatmul.mubr.msk.bf16.gmra.mxu1 %vm1012_vm0, %v1823_v59 }
  0x7f   : > { %1306 = vmatprep.mubr.bf16.mxu1 %v1839_v46 }
  0x81   : > { %1198 = vmatpush2.bf16.msra.mxu0 %v1800_v60 }
  0x82   : > { %1199 = vmatprep.subr.bf16.mxu0 %v1808_v61 }
  0x85   : > { %1200 = vmatpush2.bf16.msra.mxu0 %v1806_v62 }
  0x86   : > { %1201 = vmatprep.subr.bf16.mxu0 %v1814_v63  ;;  %1599 = vmatmul.mubr.msk.bf16.gmra.mxu1 %vm1012_vm0, %v1827_v0 }
  0x89   : > { %1202 = vmatpush2.bf16.msra.mxu0 %v1812_v1 }
  0x8c   : > { %1204 = vmatmul.mubr.bf16.vlgmr.msra.gmra.mxu0 %v1816_v2 }
  0x8d   : > { %1213 = vmatprep.mubr.bf16.mxu0 %v1820_v3 }
  0x94   : > { %1214 = vmatmul.mubr.bf16.gmra.mxu0 %v1822_v4 }
  0x95   : > { %1223 = vmatprep.mubr.bf16.mxu0 %v1824_v5 }
  0x9c   : > { %1224 = vmatmul.mubr.bf16.gmra.mxu0 %v1826_v6 }
  0x9d   : > { %1233 = vmatprep.mubr.bf16.mxu0 %v1828_v7 }
  0xa4   : > { %1234 = vmatmul.mubr.bf16.gmra.mxu0 %v1830_v8 }
 0x10c   : > { %v1059_v10 = vpop.f32.mrf.mxu0 }
 0x10d   : > { %v1060_v53 = vadd.f32 %v1059_v10, %v2271_v49 }
 0x10e   : > { %v1132_v9 = vpop.f32.mrf.mxu1  ;;  %v1061_v13 = vpop.f32.mrf.mxu0 }
 0x10f   : > { %v1062_v55 = vadd.f32 %v1061_v13, %v2273_v51  ;;  %v1133_v57 = vadd.f32 %v1132_v9, %v1060_v53 }
 0x110   : > { %v1134_v11 = vpop.f32.mrf.mxu1  ;;  %v1063_v16 = vpop.f32.mrf.mxu0 }
 0x111   : > { %v1064_v58 = vadd.f32 %v1063_v16, %v2271_v49  ;;  %v1135_v61 = vadd.f32 %v1134_v11, %v1062_v55 }
 0x112   : > { %v1136_v12 = vpop.f32.mrf.mxu1  ;;  %v1065_v19 = vpop.f32.mrf.mxu0 }
 0x113   : > { %v1066_v62 = vadd.f32 %v1065_v19, %v2273_v51  ;;  %v1137_v2 = vadd.f32 %v1136_v12, %v1064_v58 }
 0x114   : > { %v1138_v14 = vpop.f32.mrf.mxu1  ;;  %v1069_v21 = vpop.f32.mrf.mxu0 }
 0x115   : > { %v1070_v0 = vadd.f32 %v1069_v21, %v2271_v49  ;;  %v1139_v8 = vadd.f32 %v1138_v14, %v1066_v62 }
 0x116   : > { %v2234_v15 = vpop.f32.mrf.mxu1  ;;  %v1071_v24 = vpop.f32.mrf.mxu0 }
 0x117   : > { %v1072_v5 = vadd.f32 %v1071_v24, %v2273_v51  ;;  %v1143_v11 = vadd.f32 %v2234_v15, %v1070_v0 }
 0x118   : > { %v2236_v17 = vpop.f32.mrf.mxu1  ;;  %v1073_v27 = vpop.f32.mrf.mxu0 }
 0x119   : > { %v1074_v13 = vadd.f32 %v1073_v27, %v2271_v49  ;;  %v1145_v38 = vadd.f32 %v2236_v17, %v1072_v5 }
 0x11a   : > { %v2238_v18 = vpop.f32.mrf.mxu1  ;;  %v1075_v30 = vpop.f32.mrf.mxu0 }
 0x11b   : > { %v1076_v27 = vadd.f32 %v1075_v30, %v2273_v51  ;;  %v1147_v17 = vadd.f32 %v2238_v18, %v1074_v13 }
 0x11c   : > { %v2240_v20 = vpop.f32.mrf.mxu1  ;;  %v1079_v33 = vpop.f32.mrf.mxu0 }
 0x11d   : > { %v1080_v44 = vadd.f32 %v1079_v33, %v2271_v49 }
 0x11e   : > { %v2242_v22 = vpop.f32.mrf.mxu1  ;;  %v2258_v35 = vpop.f32.mrf.mxu0 }
 0x11f   : > { %v1082_v58 = vadd.f32 %v2258_v35, %v2273_v51  ;;  %v1153_v33 = vadd.f32 %v2242_v22, %v1080_v44 }
 0x120   : > { %v2244_v23 = vpop.f32.mrf.mxu1  ;;  %v2260_v37 = vpop.f32.mrf.mxu0 }
 0x122   : > { %v2246_v25 = vpop.f32.mrf.mxu1  ;;  %v2262_v40 = vpop.f32.mrf.mxu0 }
 0x124   : > { %v2248_v26 = vpop.f32.mrf.mxu1  ;;  %v2264_v43 = vpop.f32.mrf.mxu0 }
 0x126   : > { %v2250_v28 = vpop.f32.mrf.mxu1  ;;  %v2269_v48 = vpop.f32.mrf.mxu0 }
 0x128   : > { %v2252_v29 = vpop.f32.mrf.mxu1  ;;  %v2275_v52 = vpop.f32.mrf.mxu0 }
 0x12a   : > { %v2254_v31 = vpop.f32.mrf.mxu1  ;;  %v2279_v56 = vpop.f32.mrf.mxu0 }
 0x12c   : > { %v2256_v32 = vpop.f32.mrf.mxu1 }
 0x12e   : > { %v1278_v34 = vpop.f32.mrf.mxu1 }
 0x130   : > { %v1280_v36 = vpop.f32.mrf.mxu1 }
 0x132   : > { %v1282_v39 = vpop.f32.mrf.mxu1 }
 0x134   : > { %v1284_v42 = vpop.f32.mrf.mxu1 }
 0x136   : > { %v1288_v46 = vpop.f32.mrf.mxu1 }
 0x138   : > { %v1290_v50 = vpop.f32.mrf.mxu1 }
 0x13a   : > { %v1292_v54 = vpop.f32.mrf.mxu1 }
 0x13c   : > { %v1294_v60 = vpop.f32.mrf.mxu1 }
 0x13e   : > { %v1298_v7 = vpop.f32.mrf.mxu1 }
 0x140   : > { %v1300_v24 = vpop.f32.mrf.mxu1 }
 0x14c   : > { %v1205_v59 = vpop.f32.mrf.mxu0 }
 0x14d   : > { %v1206_v63 = vadd.f32 %v1205_v59, %v1133_v57  ;;  %v1302_v59 = vpop.f32.mrf.mxu1 }
 0x14e   : > { %v1207_v1 = vpop.f32.mrf.mxu0 }
 0x14f   : > { %v1279_v3 = vadd.f32 %v1278_v34, %v1206_v63  ;;  %v1208_v4 = vadd.f32 %v1207_v1, %v1135_v61  ;;  %v1084_v63 = vadd.f32 %v2260_v37, %v2271_v49 }
 0x150   : > { %v1209_v6 = vpop.f32.mrf.mxu0 }
 0x151   : > { %v1281_v9 = vadd.f32 %v1280_v36, %v1208_v4  ;;  %v1210_v10 = vadd.f32 %v1209_v6, %v1137_v2  ;;  %v1317_v19 = vmax.f32 %v1279_v3, 0.0  ;;  %v1155_v3 = vadd.f32 %v2244_v23, %v1082_v58  ;;  %v1304_v4 = vpop.f32.mrf.mxu1 }
 0x152   : > { %v1211_v16 = vpop.f32.mrf.mxu0  ;;  %v1157_v37 = vadd.f32 %v2246_v25, %v1084_v63 }
 0x153   : > { %v1318_v21 = vmax.f32 %v1281_v9, 0.0  ;;  %v1283_v12 = vadd.f32 %v1282_v39, %v1210_v10  ;;  %v1212_v34 = vadd.f32 %v1211_v16, %v1139_v8  ;;  %v1090_v8 = vadd.f32 %v2264_v43, %v2271_v49 }
 0x154   : > { %v1215_v15 = vpop.f32.mrf.mxu0 }
 0x155   : > { %v1611_v36 = vpack.c.bf16 %v1318_v21, %v1317_v19  ;;  %v1285_v39 = vadd.f32 %v1284_v42, %v1212_v34  ;;  %v1216_v41 = vadd.f32 %v1215_v15, %v1143_v11  ;;  %v1319_v47 = vmax.f32 %v1283_v12, 0.0 }
 0x156   : > { %v1217_v45 = vpop.f32.mrf.mxu0  ;;  %v1149_v42 = vadd.f32 %v2240_v20, %v1076_v27  ;;  %v1163_v43 = vadd.f32 %v2250_v28, %v1090_v8  ;;  %v1094_v12 = vadd.f32 %v2275_v52, %v2271_v49 }
 0x157   : > { %1384 = vst.msk [vmem:[%s2292_s18] sm:$0xff] %vm2295_vm3, %v1611_v36  ;;  %v1320_v53 = vmax.f32 %v1285_v39, 0.0  ;;  %v1289_v55 = vadd.f32 %v1288_v46, %v1216_v41  ;;  %v1218_v57 = vadd.f32 %v1217_v45, %v1145_v38 }
 0x158   : > { %v1219_v30 = vpop.f32.mrf.mxu0  ;;  %v1167_v52 = vadd.f32 %v2254_v31, %v1094_v12 }
 0x159   : > { %v1612_v61 = vpack.c.bf16 %v1320_v53, %v1319_v47  ;;  %v1291_v18 = vadd.f32 %v1290_v50, %v1218_v57  ;;  %v1220_v62 = vadd.f32 %v1219_v30, %v1147_v17  ;;  %v1321_v46 = vmax.f32 %v1289_v55, 0.0 }
 0x15a   : > { %v1221_v0 = vpop.f32.mrf.mxu0  ;;  %v1086_v50 = vadd.f32 %v2262_v40, %v2273_v51  ;;  %v1092_v40 = vadd.f32 %v2269_v48, %v2273_v51 }
 0x15b   : > { %1385 = vst.msk [vmem:[%s2292_s18 + $0x8] sm:$0xff] %vm2295_vm3, %v1612_v61  ;;  %v1322_v1 = vmax.f32 %v1291_v18, 0.0  ;;  %v1293_v35 = vadd.f32 %v1292_v54, %v1220_v62  ;;  %v1222_v2 = vadd.f32 %v1221_v0, %v1149_v42 }
 0x15c   : > { %v1225_v20 = vpop.f32.mrf.mxu0  ;;  %v1159_v16 = vadd.f32 %v2248_v26, %v1086_v50  ;;  %v1165_v27 = vadd.f32 %v2252_v29, %v1092_v40 }
 0x15d   : > { %v1613_v22 = vpack.c.bf16 %v1322_v1, %v1321_v46  ;;  %v1295_v5 = vadd.f32 %v1294_v60, %v1222_v2  ;;  %v1226_v6 = vadd.f32 %v1225_v20, %v1153_v33  ;;  %v1323_v54 = vmax.f32 %v1293_v35, 0.0  ;;  %v1308_v60 = vpop.f32.mrf.mxu1 }
 0x15e   : > { %v1227_v9 = vpop.f32.mrf.mxu0 }
 0x15f   : > { %1386 = vst.msk [vmem:[%s2292_s18 + $0x10] sm:$0xff] %vm2295_vm3, %v1613_v22  ;;  %v1324_v23 = vmax.f32 %v1295_v5, 0.0  ;;  %v1299_v10 = vadd.f32 %v1298_v7, %v1226_v6  ;;  %v1228_v11 = vadd.f32 %v1227_v9, %v1155_v3  ;;  %v1310_v26 = vpop.f32.mrf.mxu1 }
 0x160   : > { %v1229_v13 = vpop.f32.mrf.mxu0 }
 0x161   : > { %v1614_v25 = vpack.c.bf16 %v1324_v23, %v1323_v54  ;;  %v1301_v19 = vadd.f32 %v1300_v24, %v1228_v11  ;;  %v1230_v21 = vadd.f32 %v1229_v13, %v1157_v37  ;;  %v1325_v7 = vmax.f32 %v1299_v10, 0.0  ;;  %v1312_v29 = vpop.f32.mrf.mxu1 }
 0x162   : > { %v1231_v34 = vpop.f32.mrf.mxu0  ;;  %v1096_v24 = vadd.f32 %v2279_v56, %v2273_v51 }
 0x163   : > { %1387 = vst.msk [vmem:[%s2292_s18 + $0x18] sm:$0xff] %vm2295_vm3, %v1614_v25  ;;  %v1326_v38 = vmax.f32 %v1301_v19, 0.0  ;;  %v1303_v48 = vadd.f32 %v1302_v59, %v1230_v21  ;;  %v1232_v15 = vadd.f32 %v1231_v34, %v1159_v16  ;;  %v1314_v61 = vpop.f32.mrf.mxu1 }
 0x164   : > { %v1235_v36 = vpop.f32.mrf.mxu0  ;;  %v1169_v55 = vadd.f32 %v2256_v32, %v1096_v24 }
 0x165   : > { %v1615_v28 = vpack.c.bf16 %v1326_v38, %v1325_v7  ;;  %v1305_v39 = vadd.f32 %v1304_v4, %v1232_v15  ;;  %v1236_v49 = vadd.f32 %v1235_v36, %v1163_v43  ;;  %v1327_v17 = vmax.f32 %v1303_v48, 0.0 }
 0x166   : > { %v1237_v41 = vpop.f32.mrf.mxu0 }
 0x167   : > { %1388 = vst.msk [vmem:[%s2292_s18 + $0x20] sm:$0xff] %vm2295_vm3, %v1615_v28  ;;  %v1328_v44 = vmax.f32 %v1305_v39, 0.0  ;;  %v1309_v45 = vadd.f32 %v1308_v60, %v1236_v49  ;;  %v1238_v47 = vadd.f32 %v1237_v41, %v1165_v27 }
 0x168   : > { %v1239_v53 = vpop.f32.mrf.mxu0 }
 0x169   : > { %v1616_v51 = vpack.c.bf16 %v1328_v44, %v1327_v17  ;;  %v1311_v56 = vadd.f32 %v1310_v26, %v1238_v47  ;;  %v1240_v57 = vadd.f32 %v1239_v53, %v1167_v52  ;;  %v1329_v31 = vmax.f32 %v1309_v45, 0.0 }
 0x16a   : > { %v1241_v58 = vpop.f32.mrf.mxu0 }
 0x16b   : > { %1389 = vst.msk [vmem:[%s2292_s18 + $0x28] sm:$0xff] %vm2295_vm3, %v1616_v51  ;;  %v1330_v30 = vmax.f32 %v1311_v56, 0.0  ;;  %v1313_v59 = vadd.f32 %v1312_v29, %v1240_v57  ;;  %v1242_v42 = vadd.f32 %v1241_v58, %v1169_v55 }
 0x16d   : > { %v1617_v18 = vpack.c.bf16 %v1330_v30, %v1329_v31  ;;  %v1315_v62 = vadd.f32 %v1314_v61, %v1242_v42  ;;  %v1331_v33 = vmax.f32 %v1313_v59, 0.0 }
 0x16f   : > { %1390 = vst.msk [vmem:[%s2292_s18 + $0x30] sm:$0xff] %vm2295_vm3, %v1617_v18  ;;  %v1332_v32 = vmax.f32 %v1315_v62, 0.0 }
 0x171   : > { %v1618_v63 = vpack.c.bf16 %v1332_v32, %v1331_v33 }
 0x173   : > { %1391 = vst.msk [vmem:[%s2292_s18 + $0x38] sm:$0xff] %vm2295_vm3, %v1618_v63 }
 0x174 PF: > { %s13_s12 = sadd.s32 1, %s1837_s12  }
 0x175   : > { %p10_p4 = scmp.ge.s32.totalorder %s13_s12, 4  }
 0x177   :  { %12 = sbr.rel (!%p10_p4) target bundleno = 1 (0x1), region = 62 }

// kernel: allconvnet_forward.11
= control target key start
LH: loop header
LB: loop body
LE: loop exit
PB: predicated region body
PF: predicated region fallthrough
CT: control target
= control target key end

     0   :  { %s3251_s12 = smov 0   ;;  %s4181_s0 = inlined_call_operand.vmem [shape: bf16[128,1728], index: 0, kind: input, shape index: {}]   ;;  %s4182_s1 = inlined_call_operand.vmem [shape: bf16[1728,192], index: 1, kind: input, shape index: {}]   ;;  %s4183_s2 = inlined_call_operand.vmem [shape: f32[1,192], index: 2, kind: input, shape index: {}]   ;;  %s4184_s3 = inlined_call_operand.vmem [shape: bf16[128,192], index: 3, kind: output, shape index: {}]  }
   0x1 LB: > { %s2477_s13 = sadd.s32 4294967295, %s3229_s12   ;;  %p2481_p0 = scmp.ge.s32.totalorder %s3229_s12, 1  ;;  %s3229_s12 = sphi %s3251_s12, %s13_s12  }
   0x2   : > { %p139_p1 = scmp.lt.s32.totalorder %s3229_s12, 3 }
   0x4   : > { %p140_p2 = pnand %p2481_p0, %p139_p1 }
   0x6   : > { %143 = sbr.rel (%p140_p2) target bundleno = 467 (0x1d3), region = 32 }
   0xb   : > { %v2815_v0 = vld [vmem:[%s4182_s1 + $0x74] ss:$8 sps:$4 sm:$0xff]   ;;  %v2819_v2 = vld [vmem:[%s4182_s1 + $0x70] ss:$8 sps:$4 sm:$0xff]   ;;  %v2821_v4 = vld [vmem:[%s4182_s1 + $0x64] ss:$8 sps:$4 sm:$0xff]  }
   0xc   : > { %v2817_v1 = vld [vmem:[%s4182_s1 + $0x174] ss:$8 sps:$4 sm:$0xff]   ;;  %1833 = vmatprep.subr.bf16.mxu0 %v2815_v0  ;;  %v2820_v3 = vld [vmem:[%s4182_s1 + $0x170] ss:$8 sps:$4 sm:$0xff]   ;;  %v2823_v5 = vld [vmem:[%s4182_s1 + $0x164] ss:$8 sps:$4 sm:$0xff]  }
   0xd   : > { %1906 = vmatprep.subr.bf16.mxu1 %v2817_v1  ;;  %1834 = vmatpush1.bf16.msra.mxu0 %v2819_v2  ;;  %v2825_v6 = vld [vmem:[%s4182_s1 + $0x60] ss:$8 sps:$4 sm:$0xff]   ;;  %v2827_v8 = vld [vmem:[%s4182_s1 + $0x54] ss:$8 sps:$4 sm:$0xff]   ;;  %v2831_v10 = vld [vmem:[%s4182_s1 + $0x50] ss:$8 sps:$4 sm:$0xff]  }
   0xe   : > { %1907 = vmatpush1.bf16.msra.mxu1 %v2820_v3  ;;  %1835 = vmatprep.subr.bf16.mxu0 %v2821_v4  ;;  %v2826_v7 = vld [vmem:[%s4182_s1 + $0x160] ss:$8 sps:$4 sm:$0xff]   ;;  %v2829_v9 = vld [vmem:[%s4182_s1 + $0x154] ss:$8 sps:$4 sm:$0xff]   ;;  %v2832_v11 = vld [vmem:[%s4182_s1 + $0x150] ss:$8 sps:$4 sm:$0xff]  }
   0xf   : > { %1908 = vmatprep.subr.bf16.mxu1 %v2823_v5  ;;  %v2833_v12 = vld [vmem:[%s4182_s1 + $0x44] ss:$8 sps:$4 sm:$0xff]   ;;  %v2837_v14 = vld [vmem:[%s4182_s1 + $0x40] ss:$8 sps:$4 sm:$0xff]   ;;  %v2839_v16 = vld [vmem:[%s4182_s1 + $0x34] ss:$8 sps:$4 sm:$0xff]  }
  0x10   : > { %v2835_v13 = vld [vmem:[%s4182_s1 + $0x144] ss:$8 sps:$4 sm:$0xff]   ;;  %v2838_v15 = vld [vmem:[%s4182_s1 + $0x140] ss:$8 sps:$4 sm:$0xff]   ;;  %v2841_v17 = vld [vmem:[%s4182_s1 + $0x134] ss:$8 sps:$4 sm:$0xff]  }
  0x11   : > { %1836 = vmatpush1.bf16.msra.mxu0 %v2825_v6  ;;  %v2843_v18 = vld [vmem:[%s4182_s1 + $0x30] ss:$8 sps:$4 sm:$0xff]   ;;  %v2845_v20 = vld [vmem:[%s4182_s1 + $0x24] ss:$8 sps:$4 sm:$0xff]   ;;  %v2849_v22 = vld [vmem:[%s4182_s1 + $0x20] ss:$8 sps:$4 sm:$0xff]  }
  0x12   : > { %1909 = vmatpush1.bf16.msra.mxu1 %v2826_v7  ;;  %1837 = vmatprep.subr.bf16.mxu0 %v2827_v8  ;;  %v2844_v19 = vld [vmem:[%s4182_s1 + $0x130] ss:$8 sps:$4 sm:$0xff]   ;;  %v2847_v21 = vld [vmem:[%s4182_s1 + $0x124] ss:$8 sps:$4 sm:$0xff]   ;;  %v2850_v23 = vld [vmem:[%s4182_s1 + $0x120] ss:$8 sps:$4 sm:$0xff]  }
  0x13   : > { %1910 = vmatprep.subr.bf16.mxu1 %v2829_v9  ;;  %v2851_v24 = vld [vmem:[%s4182_s1 + $0x14] ss:$8 sps:$4 sm:$0xff]   ;;  %v2855_v26 = vld [vmem:[%s4182_s1 + $0x10] ss:$8 sps:$4 sm:$0xff]   ;;  %v2857_v28 = vld [vmem:[%s4182_s1 + $0x4] ss:$8 sps:$4 sm:$0xff]  }
  0x14   : > { %v2853_v25 = vld [vmem:[%s4182_s1 + $0x114] ss:$8 sps:$4 sm:$0xff]   ;;  %v2856_v27 = vld [vmem:[%s4182_s1 + $0x110] ss:$8 sps:$4 sm:$0xff]   ;;  %v2859_v29 = vld [vmem:[%s4182_s1 + $0x104] ss:$8 sps:$4 sm:$0xff]  }
  0x15   : > { %1838 = vmatpush1.bf16.msra.mxu0 %v2831_v10  ;;  %s2482_s24 = sshll.u32 %s2477_s13, 3  ;;  %v2861_v30 = vld [vmem:[%s4182_s1] ss:$8 sps:$4 sm:$0xff]   ;;  %v2863_v32 = vld [vmem:[%s4182_s1 + $0xf4] ss:$8 sps:$4 sm:$0xff]   ;;  %vm1820_vm0 = vcmask 523264  }
  0x16   : > { %1911 = vmatpush1.bf16.msra.mxu1 %v2832_v11  ;;  %1839 = vmatprep.subr.bf16.mxu0 %v2833_v12  ;;  %v2862_v31 = vld [vmem:[%s4182_s1 + $0x100] ss:$8 sps:$4 sm:$0xff]   ;;  %p166_p3 = scmp.lt.s32.totalorder %s2482_s24, 15  ;;  %v2865_v33 = vld [vmem:[%s4182_s1 + $0x1f4] ss:$8 sps:$4 sm:$0xff]   ;;  %vm2408_vm1 = vcmask 1043456  }
  0x17   : > { %1912 = vmatprep.subr.bf16.mxu1 %v2835_v13  ;;  %v2867_v34 = vld [vmem:[%s4182_s1 + $0xf0] ss:$8 sps:$4 sm:$0xff]   ;;  %v2869_v36 = vld [vmem:[%s4182_s1 + $0xe4] ss:$8 sps:$4 sm:$0xff]   ;;  %v2873_v38 = vld [vmem:[%s4182_s1 + $0xe0] ss:$8 sps:$4 sm:$0xff]  }
  0x18   : > { %v2868_v35 = vld [vmem:[%s4182_s1 + $0x1f0] ss:$8 sps:$4 sm:$0xff]   ;;  %s4228_s24 = smov (!%p166_p3, %s2482_s24), 15  ;;  %v2871_v37 = vld [vmem:[%s4182_s1 + $0x1e4] ss:$8 sps:$4 sm:$0xff]   ;;  %vm2409_vm2 = vcmask 523268  }
  0x19   : > { %1840 = vmatpush1.bf16.msra.mxu0 %v2837_v14  ;;  %v2874_v39 = vld [vmem:[%s4182_s1 + $0x1e0] ss:$8 sps:$4 sm:$0xff]   ;;  %v2875_v40 = vld [vmem:[%s4182_s1 + $0xd4] ss:$8 sps:$4 sm:$0xff]   ;;  %s2806_s21 = smul.u32 56, %s4228_s24  ;;  %vm4141_vm3 = vmor %vm2409_vm2, %vm2408_vm1 }
  0x1a   : > { %1913 = vmatpush1.bf16.msra.mxu1 %v2838_v15  ;;  %1841 = vmatprep.subr.bf16.mxu0 %v2839_v16  ;;  %v2877_v41 = vld [vmem:[%s4182_s1 + $0x1d4] ss:$8 sps:$4 sm:$0xff]   ;;  %v2879_v42 = vld [vmem:[%s4182_s1 + $0xd0] ss:$8 sps:$4 sm:$0xff]   ;;  %v2881_v44 = vld [vmem:[%s4182_s1 + $0xc4] ss:$8 sps:$4 sm:$0xff]  }
  0x1b   : > { %1914 = vmatprep.subr.bf16.mxu1 %v2841_v17  ;;  %v2880_v43 = vld [vmem:[%s4182_s1 + $0x1d0] ss:$8 sps:$4 sm:$0xff]   ;;  %s3402_s13 = scalar_lea.vmem %s4181_s0, %s2806_s21  ;;  %v2883_v45 = vld [vmem:[%s4182_s1 + $0x1c4] ss:$8 sps:$4 sm:$0xff]   ;;  %v2885_v46 = vld [vmem:[%s4182_s1 + $0xc0] ss:$8 sps:$4 sm:$0xff]  }
  0x1c   : > { %v2886_v47 = vld [vmem:[%s4182_s1 + $0x1c0] ss:$8 sps:$4 sm:$0xff]   ;;  %v2887_v48 = vld [vmem:[%s4182_s1 + $0xb4] ss:$8 sps:$4 sm:$0xff]   ;;  %v2916_v51 = vld [vmem:[%s3402_s13 + $0xc] ss:$56 sps:$4 sm:$0xff]  }
  0x1d   : > { %1842 = vmatpush1.bf16.msra.mxu0 %v2843_v18  ;;  %v2913_v49 = vld [vmem:[%s3402_s13 + $0x4] ss:$56 sps:$4 sm:$0xff]   ;;  %v2891_v52 = vld [vmem:[%s4182_s1 + $0xb0] ss:$8 sps:$4 sm:$0xff]   ;;  %1938 = vmatprep.mubr.bf16.mxu1 %v2916_v51  ;;  %v2897_v56 = vld [vmem:[%s4182_s1 + $0xa0] ss:$8 sps:$4 sm:$0xff]  }
  0x1e   : > { %1915 = vmatpush1.bf16.msra.mxu1 %v2844_v19  ;;  %1843 = vmatprep.subr.bf16.mxu0 %v2845_v20  ;;  %v2889_v50 = vld [vmem:[%s4182_s1 + $0x1b4] ss:$8 sps:$4 sm:$0xff]   ;;  %v2892_v53 = vld [vmem:[%s4182_s1 + $0x1b0] ss:$8 sps:$4 sm:$0xff]   ;;  %v2893_v54 = vld [vmem:[%s4182_s1 + $0xa4] ss:$8 sps:$4 sm:$0xff]  }
  0x1f   : > { %1916 = vmatprep.subr.bf16.mxu1 %v2847_v21  ;;  %1865 = vmatprep.mubr.bf16.mxu0 %v2913_v49  ;;  %v2895_v55 = vld [vmem:[%s4182_s1 + $0x1a4] ss:$8 sps:$4 sm:$0xff]   ;;  %v2898_v57 = vld [vmem:[%s4182_s1 + $0x1a0] ss:$8 sps:$4 sm:$0xff]   ;;  %v2899_v58 = vld [vmem:[%s4182_s1 + $0x94] ss:$8 sps:$4 sm:$0xff]  }
  0x20   : > { %v2901_v59 = vld [vmem:[%s4182_s1 + $0x194] ss:$8 sps:$4 sm:$0xff]   ;;  %v2903_v60 = vld [vmem:[%s4182_s1 + $0x90] ss:$8 sps:$4 sm:$0xff]   ;;  %v2905_v62 = vld [vmem:[%s4182_s1 + $0x84] ss:$8 sps:$4 sm:$0xff]  }
  0x21   : > { %1844 = vmatpush1.bf16.msra.mxu0 %v2849_v22  ;;  %v2904_v61 = vld [vmem:[%s4182_s1 + $0x190] ss:$8 sps:$4 sm:$0xff]   ;;  %v2907_v63 = vld [vmem:[%s4182_s1 + $0x184] ss:$8 sps:$4 sm:$0xff]   ;;  %v2909_v0 = vld [vmem:[%s4182_s1 + $0x80] ss:$8 sps:$4 sm:$0xff]  }
  0x22   : > { %1917 = vmatpush1.bf16.msra.mxu1 %v2850_v23  ;;  %1845 = vmatprep.subr.bf16.mxu0 %v2851_v24  ;;  %v2910_v1 = vld [vmem:[%s4182_s1 + $0x180] ss:$8 sps:$4 sm:$0xff]   ;;  %v2919_v2 = vld [vmem:[%s4182_s1 + $0x274] ss:$8 sps:$4 sm:$0xff]   ;;  %v2917_v6 = vld [vmem:[%s4182_s1 + $0x270] ss:$8 sps:$4 sm:$0xff]  }
  0x23   : > { %1918 = vmatprep.subr.bf16.mxu1 %v2853_v25  ;;  %v2922_v3 = vld [vmem:[%s4182_s1 + $0x374] ss:$8 sps:$4 sm:$0xff]   ;;  %v2911_v4 = vld [vmem:[%s3402_s13] ss:$56 sps:$4 sm:$0xff]   ;;  %v2925_v8 = vld [vmem:[%s4182_s1 + $0x264] ss:$8 sps:$4 sm:$0xff]  }
  0x24   : > { %v2914_v5 = vld [vmem:[%s3402_s13 + $0x8] ss:$56 sps:$4 sm:$0xff]   ;;  %v2920_v7 = vld [vmem:[%s4182_s1 + $0x370] ss:$8 sps:$4 sm:$0xff]   ;;  %v2928_v9 = vld [vmem:[%s4182_s1 + $0x364] ss:$8 sps:$4 sm:$0xff]  }
  0x25   : > { %1846 = vmatpush1.bf16.msra.mxu0 %v2855_v26  ;;  %v2923_v10 = vld [vmem:[%s4182_s1 + $0x260] ss:$8 sps:$4 sm:$0xff]   ;;  %v2965_v11 = vld [vmem:[%s3402_s13 + $0x74] ss:$56 sps:$4 sm:$0xff]   ;;  %v2929_v15 = vld [vmem:[%s4182_s1 + $0x250] ss:$8 sps:$4 sm:$0xff]  }
  0x26   : > { %1919 = vmatpush1.bf16.msra.mxu1 %v2856_v27  ;;  %1847 = vmatprep.subr.bf16.mxu0 %v2857_v28  ;;  %v2926_v12 = vld [vmem:[%s4182_s1 + $0x360] ss:$8 sps:$4 sm:$0xff]   ;;  %v2931_v13 = vld [vmem:[%s4182_s1 + $0x254] ss:$8 sps:$4 sm:$0xff]   ;;  %v2932_v16 = vld [vmem:[%s4182_s1 + $0x350] ss:$8 sps:$4 sm:$0xff]  }
  0x27   : > { %1920 = vmatprep.subr.bf16.mxu1 %v2859_v29  ;;  %v2934_v14 = vld [vmem:[%s4182_s1 + $0x354] ss:$8 sps:$4 sm:$0xff]   ;;  %v2973_v17 = vld [vmem:[%s3402_s13 + $0x70] ss:$56 sps:$4 sm:$0xff]   ;;  %v2937_v20 = vld [vmem:[%s4182_s1 + $0x244] ss:$8 sps:$4 sm:$0xff]  }
  0x28   : > { %v2974_v18 = vld [vmem:[%s3402_s13 + $0x7c] ss:$56 sps:$4 sm:$0xff]   ;;  %v2976_v19 = vld [vmem:[%s3402_s13 + $0x78] ss:$56 sps:$4 sm:$0xff]   ;;  %v2940_v21 = vld [vmem:[%s4182_s1 + $0x344] ss:$8 sps:$4 sm:$0xff]  }
  0x29   : > { %1848 = vmatpush1.bf16.msra.mxu0 %v2861_v30  ;;  %v2935_v22 = vld [vmem:[%s4182_s1 + $0x240] ss:$8 sps:$4 sm:$0xff]   ;;  %v2983_v23 = vld [vmem:[%s3402_s13 + $0xe4] ss:$56 sps:$4 sm:$0xff]   ;;  %v2941_v27 = vld [vmem:[%s4182_s1 + $0x230] ss:$8 sps:$4 sm:$0xff]  }
  0x2a   : > { %1921 = vmatpush1.bf16.msra.mxu1 %v2862_v31  ;;  %1849 = vmatprep.subr.bf16.mxu0 %v2863_v32  ;;  %v2938_v24 = vld [vmem:[%s4182_s1 + $0x340] ss:$8 sps:$4 sm:$0xff]   ;;  %v2943_v25 = vld [vmem:[%s4182_s1 + $0x234] ss:$8 sps:$4 sm:$0xff]   ;;  %v2944_v28 = vld [vmem:[%s4182_s1 + $0x330] ss:$8 sps:$4 sm:$0xff]  }
  0x2b   : > { %1922 = vmatprep.subr.bf16.mxu1 %v2865_v33  ;;  %v2946_v26 = vld [vmem:[%s4182_s1 + $0x334] ss:$8 sps:$4 sm:$0xff]   ;;  %v2991_v29 = vld [vmem:[%s3402_s13 + $0xe0] ss:$56 sps:$4 sm:$0xff]   ;;  %v2992_v30 = vld [vmem:[%s3402_s13 + $0xec] ss:$56 sps:$4 sm:$0xff]  }
  0x2c   : > { %v2994_v31 = vld [vmem:[%s3402_s13 + $0xe8] ss:$56 sps:$4 sm:$0xff]   ;;  %v2949_v32 = vld [vmem:[%s4182_s1 + $0x224] ss:$8 sps:$4 sm:$0xff]   ;;  %v2972_v49 = vld [vmem:[%s4182_s1 + $0x3f4] ss:$8 sps:$4 sm:$0xff]  }
  0x2d   : > { %1850 = vmatpush2.bf16.msra.mxu0 %v2867_v34  ;;  %v2952_v33 = vld [vmem:[%s4182_s1 + $0x324] ss:$8 sps:$4 sm:$0xff]   ;;  %v2947_v34 = vld [vmem:[%s4182_s1 + $0x220] ss:$8 sps:$4 sm:$0xff]   ;;  %v2970_v51 = vld [vmem:[%s4182_s1 + $0x3f0] ss:$8 sps:$4 sm:$0xff]  }
  0x2e   : > { %1923 = vmatpush2.bf16.msra.mxu1 %v2868_v35  ;;  %1851 = vmatprep.subr.bf16.mxu0 %v2869_v36  ;;  %v3001_v35 = vld [vmem:[%s3402_s13 + $0x154] ss:$56 sps:$4 sm:$0xff]   ;;  %v2950_v36 = vld [vmem:[%s4182_s1 + $0x320] ss:$8 sps:$4 sm:$0xff]  }
  0x2f   : > { %1924 = vmatprep.subr.bf16.mxu1 %v2871_v37  ;;  %v2955_v37 = vld [vmem:[%s4182_s1 + $0x214] ss:$8 sps:$4 sm:$0xff]  }
  0x31   : > { %1852 = vmatpush2.bf16.msra.mxu0 %v2873_v38  ;;  %v2958_v38 = vld [vmem:[%s4182_s1 + $0x314] ss:$8 sps:$4 sm:$0xff]  }
  0x32   : > { %1925 = vmatpush2.bf16.msra.mxu1 %v2874_v39  ;;  %1853 = vmatprep.subr.bf16.mxu0 %v2875_v40  ;;  %v2953_v39 = vld [vmem:[%s4182_s1 + $0x210] ss:$8 sps:$4 sm:$0xff]  }
  0x33   : > { %1926 = vmatprep.subr.bf16.mxu1 %v2877_v41  ;;  %v2956_v40 = vld [vmem:[%s4182_s1 + $0x310] ss:$8 sps:$4 sm:$0xff]  }
  0x34   : > { %v3009_v41 = vld [vmem:[%s3402_s13 + $0x150] ss:$56 sps:$4 sm:$0xff]  }
  0x35   : > { %1854 = vmatpush2.bf16.msra.mxu0 %v2879_v42  ;;  %v3010_v42 = vld [vmem:[%s3402_s13 + $0x15c] ss:$56 sps:$4 sm:$0xff]  }
  0x36   : > { %1927 = vmatpush2.bf16.msra.mxu1 %v2880_v43  ;;  %1855 = vmatprep.subr.bf16.mxu0 %v2881_v44  ;;  %v3012_v43 = vld [vmem:[%s3402_s13 + $0x158] ss:$56 sps:$4 sm:$0xff]   ;;  %v2961_v44 = vld [vmem:[%s4182_s1 + $0x204] ss:$8 sps:$4 sm:$0xff]  }
  0x37   : > { %1928 = vmatprep.subr.bf16.mxu1 %v2883_v45  ;;  %v2964_v45 = vld [vmem:[%s4182_s1 + $0x304] ss:$8 sps:$4 sm:$0xff]  }
  0x39   : > { %1856 = vmatpush2.bf16.msra.mxu0 %v2885_v46  ;;  %v2959_v46 = vld [vmem:[%s4182_s1 + $0x200] ss:$8 sps:$4 sm:$0xff]  }
  0x3a   : > { %1929 = vmatpush2.bf16.msra.mxu1 %v2886_v47  ;;  %1857 = vmatprep.subr.bf16.mxu0 %v2887_v48  ;;  %v2962_v47 = vld [vmem:[%s4182_s1 + $0x300] ss:$8 sps:$4 sm:$0xff]   ;;  %v2969_v48 = vld [vmem:[%s4182_s1 + $0x2f4] ss:$8 sps:$4 sm:$0xff]  }
  0x3b   : > { %1930 = vmatprep.subr.bf16.mxu1 %v2889_v50  ;;  %v2967_v50 = vld [vmem:[%s4182_s1 + $0x2f0] ss:$8 sps:$4 sm:$0xff]  }
  0x3d   : > { %1858 = vmatpush2.bf16.msra.mxu0 %v2891_v52  ;;  %v2979_v52 = vld [vmem:[%s4182_s1 + $0x2e4] ss:$8 sps:$4 sm:$0xff]  }
  0x3e   : > { %1931 = vmatpush2.bf16.msra.mxu1 %v2892_v53  ;;  %1859 = vmatprep.subr.bf16.mxu0 %v2893_v54  ;;  %v2982_v53 = vld [vmem:[%s4182_s1 + $0x3e4] ss:$8 sps:$4 sm:$0xff]  }
  0x3f   : > { %1932 = vmatprep.subr.bf16.mxu1 %v2895_v55  ;;  %v3033_v54 = vld [vmem:[%s3402_s13 + $0x14] ss:$56 sps:$4 sm:$0xff]  }
  0x40   : > { %v3036_v55 = vld [vmem:[%s3402_s13 + $0x1c] ss:$56 sps:$4 sm:$0xff]  }
  0x41   : > { %1860 = vmatpush2.bf16.msra.mxu0 %v2897_v56  ;;  %v2977_v56 = vld [vmem:[%s4182_s1 + $0x2e0] ss:$8 sps:$4 sm:$0xff]  }
  0x42   : > { %1933 = vmatpush2.bf16.msra.mxu1 %v2898_v57  ;;  %1861 = vmatprep.subr.bf16.mxu0 %v2899_v58  ;;  %v2980_v57 = vld [vmem:[%s4182_s1 + $0x3e0] ss:$8 sps:$4 sm:$0xff]   ;;  %v2987_v58 = vld [vmem:[%s4182_s1 + $0x2d4] ss:$8 sps:$4 sm:$0xff]  }
  0x43   : > { %1934 = vmatprep.subr.bf16.mxu1 %v2901_v59  ;;  %v2990_v59 = vld [vmem:[%s4182_s1 + $0x3d4] ss:$8 sps:$4 sm:$0xff]  }
  0x45   : > { %1862 = vmatpush2.bf16.msra.mxu0 %v2903_v60  ;;  %v2985_v60 = vld [vmem:[%s4182_s1 + $0x2d0] ss:$8 sps:$4 sm:$0xff]  }
  0x46   : > { %1935 = vmatpush2.bf16.msra.mxu1 %v2904_v61  ;;  %1863 = vmatprep.subr.bf16.mxu0 %v2905_v62  ;;  %v2988_v61 = vld [vmem:[%s4182_s1 + $0x3d0] ss:$8 sps:$4 sm:$0xff]   ;;  %v2997_v62 = vld [vmem:[%s4182_s1 + $0x2c4] ss:$8 sps:$4 sm:$0xff]  }
  0x47   : > { %1936 = vmatprep.subr.bf16.mxu1 %v2907_v63  ;;  %v3000_v63 = vld [vmem:[%s4182_s1 + $0x3c4] ss:$8 sps:$4 sm:$0xff]  }
  0x49   : > { %1864 = vmatpush2.bf16.msra.mxu0 %v2909_v0  ;;  %v2995_v0 = vld [vmem:[%s4182_s1 + $0x2c0] ss:$8 sps:$4 sm:$0xff]  }
  0x4a   : > { %1937 = vmatpush2.bf16.msra.mxu1 %v2910_v1  ;;  %1979 = vmatprep.subr.bf16.mxu0 %v2919_v2  ;;  %v2998_v1 = vld [vmem:[%s4182_s1 + $0x3c0] ss:$8 sps:$4 sm:$0xff]   ;;  %v3005_v2 = vld [vmem:[%s4182_s1 + $0x2b4] ss:$8 sps:$4 sm:$0xff]  }
  0x4b   : > { %2052 = vmatprep.subr.bf16.mxu1 %v2922_v3  ;;  %v3008_v3 = vld [vmem:[%s4182_s1 + $0x3b4] ss:$8 sps:$4 sm:$0xff]  }
  0x4c   : > { %1866 = vmatmul.mubr.bf16.vlgmr.msra.gmra.mxu0 %v2911_v4  ;;  %v3003_v4 = vld [vmem:[%s4182_s1 + $0x2b0] ss:$8 sps:$4 sm:$0xff]  }
  0x4d   : > { %1939 = vmatmul.mubr.bf16.vlgmr.msra.gmra.mxu1 %v2914_v5  ;;  %1980 = vmatpush1.bf16.msra.mxu0 %v2917_v6  ;;  %v3006_v5 = vld [vmem:[%s4182_s1 + $0x3b0] ss:$8 sps:$4 sm:$0xff]   ;;  %v3015_v6 = vld [vmem:[%s4182_s1 + $0x2a4] ss:$8 sps:$4 sm:$0xff]  }
  0x4e   : > { %2053 = vmatpush1.bf16.msra.mxu1 %v2920_v7  ;;  %1981 = vmatprep.subr.bf16.mxu0 %v2925_v8  ;;  %v3018_v7 = vld [vmem:[%s4182_s1 + $0x3a4] ss:$8 sps:$4 sm:$0xff]   ;;  %v3013_v8 = vld [vmem:[%s4182_s1 + $0x2a0] ss:$8 sps:$4 sm:$0xff]  }
  0x4f   : > { %2054 = vmatprep.subr.bf16.mxu1 %v2928_v9  ;;  %1875 = vmatprep.mubr.bf16.mxu0 %v2965_v11  ;;  %v3016_v9 = vld [vmem:[%s4182_s1 + $0x3a0] ss:$8 sps:$4 sm:$0xff]   ;;  %v3024_v11 = vld [vmem:[%s4182_s1 + $0x394] ss:$8 sps:$4 sm:$0xff]  }
  0x50   : > { %1948 = vmatprep.mubr.bf16.mxu1 %v2974_v18  ;;  %v3039_v18 = vld [vmem:[%s4182_s1 + $0x474] ss:$8 sps:$4 sm:$0xff]  }
  0x51   : > { %1982 = vmatpush1.bf16.msra.mxu0 %v2923_v10  ;;  %v3021_v10 = vld [vmem:[%s4182_s1 + $0x294] ss:$8 sps:$4 sm:$0xff]  }
  0x52   : > { %2055 = vmatpush1.bf16.msra.mxu1 %v2926_v12  ;;  %1983 = vmatprep.subr.bf16.mxu0 %v2931_v13  ;;  %v3019_v12 = vld [vmem:[%s4182_s1 + $0x290] ss:$8 sps:$4 sm:$0xff]  }
  0x53   : > { %2056 = vmatprep.subr.bf16.mxu1 %v2934_v14  ;;  %v3022_v13 = vld [vmem:[%s4182_s1 + $0x390] ss:$8 sps:$4 sm:$0xff]   ;;  %v3027_v14 = vld [vmem:[%s4182_s1 + $0x284] ss:$8 sps:$4 sm:$0xff]  }
  0x54   : > { %1876 = vmatmul.mubr.bf16.gmra.mxu0 %v2973_v17  ;;  %v3028_v17 = vld [vmem:[%s4182_s1 + $0x380] ss:$8 sps:$4 sm:$0xff]  }
  0x55   : > { %1949 = vmatmul.mubr.bf16.gmra.mxu1 %v2976_v19  ;;  %1984 = vmatpush1.bf16.msra.mxu0 %v2929_v15  ;;  %v3030_v15 = vld [vmem:[%s4182_s1 + $0x384] ss:$8 sps:$4 sm:$0xff]   ;;  %v3042_v19 = vld [vmem:[%s4182_s1 + $0x574] ss:$8 sps:$4 sm:$0xff]  }
  0x56   : > { %2057 = vmatpush1.bf16.msra.mxu1 %v2932_v16  ;;  %1985 = vmatprep.subr.bf16.mxu0 %v2937_v20  ;;  %v3025_v16 = vld [vmem:[%s4182_s1 + $0x280] ss:$8 sps:$4 sm:$0xff]  }
  0x57   : > { %2058 = vmatprep.subr.bf16.mxu1 %v2940_v21  ;;  %1885 = vmatprep.mubr.bf16.mxu0 %v2983_v23  ;;  %v3031_v20 = vld [vmem:[%s3402_s13 + $0x10] ss:$56 sps:$4 sm:$0xff]  }
  0x58   : > { %1958 = vmatprep.mubr.bf16.mxu1 %v2992_v30  ;;  %v3034_v21 = vld [vmem:[%s3402_s13 + $0x18] ss:$56 sps:$4 sm:$0xff]   ;;  %v3054_v30 = vld [vmem:[%s4182_s1 + $0x454] ss:$8 sps:$4 sm:$0xff]  }
  0x59   : > { %1986 = vmatpush1.bf16.msra.mxu0 %v2935_v22  ;;  %v3037_v22 = vld [vmem:[%s4182_s1 + $0x470] ss:$8 sps:$4 sm:$0xff]  }
  0x5a   : > { %2059 = vmatpush1.bf16.msra.mxu1 %v2938_v24  ;;  %1987 = vmatprep.subr.bf16.mxu0 %v2943_v25  ;;  %v3040_v23 = vld [vmem:[%s4182_s1 + $0x570] ss:$8 sps:$4 sm:$0xff]   ;;  %v3045_v24 = vld [vmem:[%s4182_s1 + $0x464] ss:$8 sps:$4 sm:$0xff]  }
  0x5b   : > { %2060 = vmatprep.subr.bf16.mxu1 %v2946_v26  ;;  %v3048_v25 = vld [vmem:[%s4182_s1 + $0x564] ss:$8 sps:$4 sm:$0xff]  }
  0x5c   : > { %1886 = vmatmul.mubr.bf16.gmra.mxu0 %v2991_v29  ;;  %v3049_v26 = vld [vmem:[%s3402_s13 + $0x84] ss:$56 sps:$4 sm:$0xff]   ;;  %v3046_v29 = vld [vmem:[%s4182_s1 + $0x560] ss:$8 sps:$4 sm:$0xff]  }
  0x5d   : > { %1959 = vmatmul.mubr.bf16.gmra.mxu1 %v2994_v31  ;;  %1988 = vmatpush1.bf16.msra.mxu0 %v2941_v27  ;;  %v3058_v27 = vld [vmem:[%s3402_s13 + $0x8c] ss:$56 sps:$4 sm:$0xff]   ;;  %v3057_v31 = vld [vmem:[%s4182_s1 + $0x554] ss:$8 sps:$4 sm:$0xff]  }
  0x5e   : > { %2061 = vmatpush1.bf16.msra.mxu1 %v2944_v28  ;;  %1989 = vmatprep.subr.bf16.mxu0 %v2949_v32  ;;  %v3043_v28 = vld [vmem:[%s4182_s1 + $0x460] ss:$8 sps:$4 sm:$0xff]  }
  0x5f   : > { %2062 = vmatprep.subr.bf16.mxu1 %v2952_v33  ;;  %1895 = vmatprep.mubr.bf16.mxu0 %v3001_v35  ;;  %v3051_v32 = vld [vmem:[%s3402_s13 + $0x80] ss:$56 sps:$4 sm:$0xff]  }
  0x60   : > { %1968 = vmatprep.mubr.bf16.mxu1 %v3010_v42  ;;  %v3052_v33 = vld [vmem:[%s4182_s1 + $0x450] ss:$8 sps:$4 sm:$0xff]   ;;  %v3060_v35 = vld [vmem:[%s3402_s13 + $0x88] ss:$56 sps:$4 sm:$0xff]   ;;  %v3072_v42 = vld [vmem:[%s4182_s1 + $0x434] ss:$8 sps:$4 sm:$0xff]  }
  0x61   : > { %1990 = vmatpush1.bf16.msra.mxu0 %v2947_v34  ;;  %v3055_v34 = vld [vmem:[%s4182_s1 + $0x550] ss:$8 sps:$4 sm:$0xff]  }
  0x62   : > { %2063 = vmatpush1.bf16.msra.mxu1 %v2950_v36  ;;  %1991 = vmatprep.subr.bf16.mxu0 %v2955_v37  ;;  %v3063_v36 = vld [vmem:[%s4182_s1 + $0x444] ss:$8 sps:$4 sm:$0xff]  }
  0x63   : > { %2064 = vmatprep.subr.bf16.mxu1 %v2958_v38  ;;  %v3066_v37 = vld [vmem:[%s4182_s1 + $0x544] ss:$8 sps:$4 sm:$0xff]  }
  0x64   : > { %1896 = vmatmul.mubr.bf16.gmra.mxu0 %v3009_v41  ;;  %v3067_v38 = vld [vmem:[%s3402_s13 + $0xf4] ss:$56 sps:$4 sm:$0xff]   ;;  %v3064_v41 = vld [vmem:[%s4182_s1 + $0x540] ss:$8 sps:$4 sm:$0xff]  }
  0x65   : > { %1969 = vmatmul.mubr.bf16.gmra.mxu1 %v3012_v43  ;;  %1992 = vmatpush1.bf16.msra.mxu0 %v2953_v39  ;;  %v3076_v39 = vld [vmem:[%s3402_s13 + $0xfc] ss:$56 sps:$4 sm:$0xff]  }
  0x66   : > { %2065 = vmatpush1.bf16.msra.mxu1 %v2956_v40  ;;  %1993 = vmatprep.subr.bf16.mxu0 %v2961_v44  ;;  %v3061_v40 = vld [vmem:[%s4182_s1 + $0x440] ss:$8 sps:$4 sm:$0xff]   ;;  %v3075_v43 = vld [vmem:[%s4182_s1 + $0x534] ss:$8 sps:$4 sm:$0xff]  }
  0x67   : > { %2066 = vmatprep.subr.bf16.mxu1 %v2964_v45  ;;  %2011 = vmatprep.mubr.bf16.mxu0 %v3033_v54  ;;  %v3069_v44 = vld [vmem:[%s3402_s13 + $0xf0] ss:$56 sps:$4 sm:$0xff]   ;;  %v3090_v54 = vld [vmem:[%s4182_s1 + $0x414] ss:$8 sps:$4 sm:$0xff]  }
  0x68   : > { %2084 = vmatprep.mubr.bf16.mxu1 %v3036_v55  ;;  %v3070_v45 = vld [vmem:[%s4182_s1 + $0x430] ss:$8 sps:$4 sm:$0xff]   ;;  %v3093_v55 = vld [vmem:[%s4182_s1 + $0x514] ss:$8 sps:$4 sm:$0xff]  }
  0x69   : > { %1994 = vmatpush1.bf16.msra.mxu0 %v2959_v46  ;;  %v3073_v46 = vld [vmem:[%s4182_s1 + $0x530] ss:$8 sps:$4 sm:$0xff]  }
  0x6a   : > { %2067 = vmatpush1.bf16.msra.mxu1 %v2962_v47  ;;  %1995 = vmatprep.subr.bf16.mxu0 %v2969_v48  ;;  %v3078_v47 = vld [vmem:[%s3402_s13 + $0xf8] ss:$56 sps:$4 sm:$0xff]   ;;  %v3081_v48 = vld [vmem:[%s4182_s1 + $0x424] ss:$8 sps:$4 sm:$0xff]  }
  0x6b   : > { %2068 = vmatprep.subr.bf16.mxu1 %v2972_v49  ;;  %v3084_v49 = vld [vmem:[%s4182_s1 + $0x524] ss:$8 sps:$4 sm:$0xff]  }
  0x6d   : > { %1996 = vmatpush2.bf16.msra.mxu0 %v2967_v50  ;;  %v3085_v50 = vld [vmem:[%s3402_s13 + $0x164] ss:$56 sps:$4 sm:$0xff]  }
  0x6e   : > { %2069 = vmatpush2.bf16.msra.mxu1 %v2970_v51  ;;  %1997 = vmatprep.subr.bf16.mxu0 %v2979_v52  ;;  %v3094_v51 = vld [vmem:[%s3402_s13 + $0x16c] ss:$56 sps:$4 sm:$0xff]   ;;  %v3079_v52 = vld [vmem:[%s4182_s1 + $0x420] ss:$8 sps:$4 sm:$0xff]  }
  0x6f   : > { %2070 = vmatprep.subr.bf16.mxu1 %v2982_v53  ;;  %v3082_v53 = vld [vmem:[%s4182_s1 + $0x520] ss:$8 sps:$4 sm:$0xff]  }
  0x71   : > { %1998 = vmatpush2.bf16.msra.mxu0 %v2977_v56  ;;  %v3087_v56 = vld [vmem:[%s3402_s13 + $0x160] ss:$56 sps:$4 sm:$0xff]  }
  0x72   : > { %2071 = vmatpush2.bf16.msra.mxu1 %v2980_v57  ;;  %1999 = vmatprep.subr.bf16.mxu0 %v2987_v58  ;;  %v3088_v57 = vld [vmem:[%s4182_s1 + $0x410] ss:$8 sps:$4 sm:$0xff]  }
  0x73   : > { %2072 = vmatprep.subr.bf16.mxu1 %v2990_v59  ;;  %v3091_v58 = vld [vmem:[%s4182_s1 + $0x510] ss:$8 sps:$4 sm:$0xff]   ;;  %v3096_v59 = vld [vmem:[%s3402_s13 + $0x168] ss:$56 sps:$4 sm:$0xff]  }
  0x75   : > { %2000 = vmatpush2.bf16.msra.mxu0 %v2985_v60  ;;  %v3099_v60 = vld [vmem:[%s4182_s1 + $0x404] ss:$8 sps:$4 sm:$0xff]  }
  0x76   : > { %2073 = vmatpush2.bf16.msra.mxu1 %v2988_v61  ;;  %2001 = vmatprep.subr.bf16.mxu0 %v2997_v62  ;;  %v3102_v61 = vld [vmem:[%s4182_s1 + $0x504] ss:$8 sps:$4 sm:$0xff]  }
  0x77   : > { %2074 = vmatprep.subr.bf16.mxu1 %v3000_v63  ;;  %v3153_v62 = vld [vmem:[%s3402_s13 + $0x24] ss:$56 sps:$4 sm:$0xff]  }
  0x78   : > { %v3156_v63 = vld [vmem:[%s3402_s13 + $0x2c] ss:$56 sps:$4 sm:$0xff]  }
  0x79   : > { %2002 = vmatpush2.bf16.msra.mxu0 %v2995_v0  ;;  %v3097_v0 = vld [vmem:[%s4182_s1 + $0x400] ss:$8 sps:$4 sm:$0xff]  }
  0x7a   : > { %2075 = vmatpush2.bf16.msra.mxu1 %v2998_v1  ;;  %2003 = vmatprep.subr.bf16.mxu0 %v3005_v2  ;;  %v3100_v1 = vld [vmem:[%s4182_s1 + $0x500] ss:$8 sps:$4 sm:$0xff]   ;;  %v3105_v2 = vld [vmem:[%s4182_s1 + $0x4f4] ss:$8 sps:$4 sm:$0xff]  }
  0x7b   : > { %2076 = vmatprep.subr.bf16.mxu1 %v3008_v3  ;;  %v3108_v3 = vld [vmem:[%s4182_s1 + $0x5f4] ss:$8 sps:$4 sm:$0xff]  }
  0x7d   : > { %2004 = vmatpush2.bf16.msra.mxu0 %v3003_v4  ;;  %v3103_v4 = vld [vmem:[%s4182_s1 + $0x4f0] ss:$8 sps:$4 sm:$0xff]  }
  0x7e   : > { %2077 = vmatpush2.bf16.msra.mxu1 %v3006_v5  ;;  %2005 = vmatprep.subr.bf16.mxu0 %v3015_v6  ;;  %v3106_v5 = vld [vmem:[%s4182_s1 + $0x5f0] ss:$8 sps:$4 sm:$0xff]   ;;  %v3111_v6 = vld [vmem:[%s4182_s1 + $0x4e4] ss:$8 sps:$4 sm:$0xff]  }
  0x7f   : > { %2078 = vmatprep.subr.bf16.mxu1 %v3018_v7  ;;  %v3114_v7 = vld [vmem:[%s4182_s1 + $0x5e4] ss:$8 sps:$4 sm:$0xff]  }
  0x81   : > { %2006 = vmatpush2.bf16.msra.mxu0 %v3013_v8  ;;  %v3109_v8 = vld [vmem:[%s4182_s1 + $0x4e0] ss:$8 sps:$4 sm:$0xff]  }
  0x82   : > { %2079 = vmatpush2.bf16.msra.mxu1 %v3016_v9  ;;  %2007 = vmatprep.subr.bf16.mxu0 %v3021_v10  ;;  %v3112_v9 = vld [vmem:[%s4182_s1 + $0x5e0] ss:$8 sps:$4 sm:$0xff]   ;;  %v3117_v10 = vld [vmem:[%s4182_s1 + $0x4d4] ss:$8 sps:$4 sm:$0xff]  }
  0x83   : > { %2080 = vmatprep.subr.bf16.mxu1 %v3024_v11  ;;  %v3120_v11 = vld [vmem:[%s4182_s1 + $0x5d4] ss:$8 sps:$4 sm:$0xff]  }
  0x85   : > { %2008 = vmatpush2.bf16.msra.mxu0 %v3019_v12  ;;  %v3115_v12 = vld [vmem:[%s4182_s1 + $0x4d0] ss:$8 sps:$4 sm:$0xff]  }
  0x86   : > { %2081 = vmatpush2.bf16.msra.mxu1 %v3022_v13  ;;  %2009 = vmatprep.subr.bf16.mxu0 %v3027_v14  ;;  %v3118_v13 = vld [vmem:[%s4182_s1 + $0x5d0] ss:$8 sps:$4 sm:$0xff]   ;;  %v3123_v14 = vld [vmem:[%s4182_s1 + $0x4c4] ss:$8 sps:$4 sm:$0xff]  }
  0x87   : > { %2082 = vmatprep.subr.bf16.mxu1 %v3030_v15  ;;  %v3126_v15 = vld [vmem:[%s4182_s1 + $0x5c4] ss:$8 sps:$4 sm:$0xff]  }
  0x89   : > { %2010 = vmatpush2.bf16.msra.mxu0 %v3025_v16  ;;  %v3121_v16 = vld [vmem:[%s4182_s1 + $0x4c0] ss:$8 sps:$4 sm:$0xff]  }
  0x8a   : > { %2083 = vmatpush2.bf16.msra.mxu1 %v3028_v17  ;;  %2125 = vmatprep.subr.bf16.mxu0 %v3039_v18  ;;  %v3124_v17 = vld [vmem:[%s4182_s1 + $0x5c0] ss:$8 sps:$4 sm:$0xff]   ;;  %v3129_v18 = vld [vmem:[%s4182_s1 + $0x4b4] ss:$8 sps:$4 sm:$0xff]  }
  0x8b   : > { %2198 = vmatprep.subr.bf16.mxu1 %v3042_v19  ;;  %v3132_v19 = vld [vmem:[%s4182_s1 + $0x5b4] ss:$8 sps:$4 sm:$0xff]  }
  0x8c   : > { %2012 = vmatmul.mubr.bf16.vlgmr.msra.gmra.mxu0 %v3031_v20  ;;  %v3127_v20 = vld [vmem:[%s4182_s1 + $0x4b0] ss:$8 sps:$4 sm:$0xff]  }
  0x8d   : > { %2085 = vmatmul.mubr.bf16.vlgmr.msra.gmra.mxu1 %v3034_v21  ;;  %2126 = vmatpush1.bf16.msra.mxu0 %v3037_v22  ;;  %v3130_v21 = vld [vmem:[%s4182_s1 + $0x5b0] ss:$8 sps:$4 sm:$0xff]   ;;  %v3135_v22 = vld [vmem:[%s4182_s1 + $0x4a4] ss:$8 sps:$4 sm:$0xff]  }
  0x8e   : > { %2199 = vmatpush1.bf16.msra.mxu1 %v3040_v23  ;;  %2127 = vmatprep.subr.bf16.mxu0 %v3045_v24  ;;  %v3138_v23 = vld [vmem:[%s4182_s1 + $0x5a4] ss:$8 sps:$4 sm:$0xff]   ;;  %v3133_v24 = vld [vmem:[%s4182_s1 + $0x4a0] ss:$8 sps:$4 sm:$0xff]  }
  0x8f   : > { %2200 = vmatprep.subr.bf16.mxu1 %v3048_v25  ;;  %2021 = vmatprep.mubr.bf16.mxu0 %v3049_v26  ;;  %v3136_v25 = vld [vmem:[%s4182_s1 + $0x5a0] ss:$8 sps:$4 sm:$0xff]   ;;  %v3141_v26 = vld [vmem:[%s4182_s1 + $0x494] ss:$8 sps:$4 sm:$0xff]  }
  0x90   : > { %2094 = vmatprep.mubr.bf16.mxu1 %v3058_v27  ;;  %v3144_v27 = vld [vmem:[%s4182_s1 + $0x594] ss:$8 sps:$4 sm:$0xff]  }
  0x91   : > { %2128 = vmatpush1.bf16.msra.mxu0 %v3043_v28  ;;  %v3139_v28 = vld [vmem:[%s4182_s1 + $0x490] ss:$8 sps:$4 sm:$0xff]  }
  0x92   : > { %2201 = vmatpush1.bf16.msra.mxu1 %v3046_v29  ;;  %2129 = vmatprep.subr.bf16.mxu0 %v3054_v30  ;;  %v3142_v29 = vld [vmem:[%s4182_s1 + $0x590] ss:$8 sps:$4 sm:$0xff]   ;;  %v3147_v30 = vld [vmem:[%s4182_s1 + $0x484] ss:$8 sps:$4 sm:$0xff]  }
  0x93   : > { %2202 = vmatprep.subr.bf16.mxu1 %v3057_v31  ;;  %v3150_v31 = vld [vmem:[%s4182_s1 + $0x584] ss:$8 sps:$4 sm:$0xff]  }
  0x94   : > { %2022 = vmatmul.mubr.bf16.gmra.mxu0 %v3051_v32  ;;  %v3145_v32 = vld [vmem:[%s4182_s1 + $0x480] ss:$8 sps:$4 sm:$0xff]  }
  0x95   : > { %2095 = vmatmul.mubr.bf16.gmra.mxu1 %v3060_v35  ;;  %2130 = vmatpush1.bf16.msra.mxu0 %v3052_v33  ;;  %v3148_v33 = vld [vmem:[%s4182_s1 + $0x580] ss:$8 sps:$4 sm:$0xff]  }
  0x96   : > { %2203 = vmatpush1.bf16.msra.mxu1 %v3055_v34  ;;  %2131 = vmatprep.subr.bf16.mxu0 %v3063_v36  ;;  %v3159_v34 = vld [vmem:[%s4182_s1 + $0x674] ss:$8 sps:$4 sm:$0xff]   ;;  %v3151_v35 = vld [vmem:[%s3402_s13 + $0x20] ss:$56 sps:$4 sm:$0xff]  }
  0x97   : > { %2204 = vmatprep.subr.bf16.mxu1 %v3066_v37  ;;  %2031 = vmatprep.mubr.bf16.mxu0 %v3067_v38  ;;  %v3154_v36 = vld [vmem:[%s3402_s13 + $0x28] ss:$56 sps:$4 sm:$0xff]   ;;  %v3157_v37 = vld [vmem:[%s4182_s1 + $0x670] ss:$8 sps:$4 sm:$0xff]   ;;  %v3162_v38 = vld [vmem:[%s4182_s1 + $0x664] ss:$8 sps:$4 sm:$0xff]  }
  0x98   : > { %2104 = vmatprep.mubr.bf16.mxu1 %v3076_v39  ;;  %v3163_v39 = vld [vmem:[%s3402_s13 + $0x94] ss:$56 sps:$4 sm:$0xff]  }
  0x99   : > { %2132 = vmatpush1.bf16.msra.mxu0 %v3061_v40  ;;  %v3169_v40 = vld [vmem:[%s3402_s13 + $0x9c] ss:$56 sps:$4 sm:$0xff]  }
  0x9a   : > { %2205 = vmatpush1.bf16.msra.mxu1 %v3064_v41  ;;  %2133 = vmatprep.subr.bf16.mxu0 %v3072_v42  ;;  %v3160_v41 = vld [vmem:[%s4182_s1 + $0x660] ss:$8 sps:$4 sm:$0xff]   ;;  %v3168_v42 = vld [vmem:[%s4182_s1 + $0x654] ss:$8 sps:$4 sm:$0xff]  }
  0x9b   : > { %2206 = vmatprep.subr.bf16.mxu1 %v3075_v43  ;;  %v3165_v43 = vld [vmem:[%s3402_s13 + $0x90] ss:$56 sps:$4 sm:$0xff]  }
  0x9c   : > { %2032 = vmatmul.mubr.bf16.gmra.mxu0 %v3069_v44  ;;  %v3171_v44 = vld [vmem:[%s3402_s13 + $0x98] ss:$56 sps:$4 sm:$0xff]  }
  0x9d   : > { %2105 = vmatmul.mubr.bf16.gmra.mxu1 %v3078_v47  ;;  %2134 = vmatpush1.bf16.msra.mxu0 %v3070_v45  ;;  %v3166_v45 = vld [vmem:[%s4182_s1 + $0x650] ss:$8 sps:$4 sm:$0xff]   ;;  %v3175_v47 = vld [vmem:[%s3402_s13 + $0x104] ss:$56 sps:$4 sm:$0xff]  }
  0x9e   : > { %2207 = vmatpush1.bf16.msra.mxu1 %v3073_v46  ;;  %2135 = vmatprep.subr.bf16.mxu0 %v3081_v48  ;;  %v3174_v46 = vld [vmem:[%s4182_s1 + $0x644] ss:$8 sps:$4 sm:$0xff]  }
  0x9f   : > { %2208 = vmatprep.subr.bf16.mxu1 %v3084_v49  ;;  %2041 = vmatprep.mubr.bf16.mxu0 %v3085_v50  ;;  %v3181_v48 = vld [vmem:[%s3402_s13 + $0x10c] ss:$56 sps:$4 sm:$0xff]   ;;  %v3172_v49 = vld [vmem:[%s4182_s1 + $0x640] ss:$8 sps:$4 sm:$0xff]   ;;  %v3180_v50 = vld [vmem:[%s4182_s1 + $0x634] ss:$8 sps:$4 sm:$0xff]  }
  0xa0   : > { %2114 = vmatprep.mubr.bf16.mxu1 %v3094_v51  ;;  %v3177_v51 = vld [vmem:[%s3402_s13 + $0x100] ss:$56 sps:$4 sm:$0xff]  }
  0xa1   : > { %2136 = vmatpush1.bf16.msra.mxu0 %v3079_v52  ;;  %v3183_v52 = vld [vmem:[%s3402_s13 + $0x108] ss:$56 sps:$4 sm:$0xff]  }
  0xa2   : > { %2209 = vmatpush1.bf16.msra.mxu1 %v3082_v53  ;;  %2137 = vmatprep.subr.bf16.mxu0 %v3090_v54  ;;  %v3178_v53 = vld [vmem:[%s4182_s1 + $0x630] ss:$8 sps:$4 sm:$0xff]   ;;  %v3186_v54 = vld [vmem:[%s4182_s1 + $0x624] ss:$8 sps:$4 sm:$0xff]  }
  0xa3   : > { %2210 = vmatprep.subr.bf16.mxu1 %v3093_v55  ;;  %v3187_v55 = vld [vmem:[%s3402_s13 + $0x174] ss:$56 sps:$4 sm:$0xff]  }
  0xa4   : > { %2042 = vmatmul.mubr.bf16.gmra.mxu0 %v3087_v56  ;;  %v3193_v56 = vld [vmem:[%s3402_s13 + $0x17c] ss:$56 sps:$4 sm:$0xff]  }
  0xa5   : > { %2115 = vmatmul.mubr.bf16.gmra.mxu1 %v3096_v59  ;;  %2138 = vmatpush1.bf16.msra.mxu0 %v3088_v57  ;;  %v3184_v57 = vld [vmem:[%s4182_s1 + $0x620] ss:$8 sps:$4 sm:$0xff]  }
  0xa6   : > { %2211 = vmatpush1.bf16.msra.mxu1 %v3091_v58  ;;  %2139 = vmatprep.subr.bf16.mxu0 %v3099_v60  ;;  %v3192_v58 = vld [vmem:[%s4182_s1 + $0x614] ss:$8 sps:$4 sm:$0xff]   ;;  %v3189_v59 = vld [vmem:[%s3402_s13 + $0x170] ss:$56 sps:$4 sm:$0xff]  }
  0xa7   : > { %2212 = vmatprep.subr.bf16.mxu1 %v3102_v61  ;;  %2157 = vmatprep.mubr.bf16.mxu0 %v3153_v62  ;;  %v3195_v60 = vld [vmem:[%s3402_s13 + $0x178] ss:$56 sps:$4 sm:$0xff]   ;;  %v3198_v62 = vld [vmem:[%s4182_s1 + $0x604] ss:$8 sps:$4 sm:$0xff]  }
  0xa8   : > { %2230 = vmatprep.mubr.bf16.mxu1 %v3156_v63  ;;  %v3190_v61 = vld [vmem:[%s4182_s1 + $0x610] ss:$8 sps:$4 sm:$0xff]   ;;  %v3213_v63 = vld [vmem:[%s3402_s13 + $0x34] ss:$56 sps:$4 sm:$0xff]  }
  0xa9   : > { %2140 = vmatpush1.bf16.msra.mxu0 %v3097_v0  ;;  %v3216_v0 = vld [vmem:[%s3402_s13 + $0x114] ss:$56 sps:$4 sm:$0xff]  }
  0xaa   : > { %2213 = vmatpush1.bf16.msra.mxu1 %v3100_v1  ;;  %2141 = vmatprep.subr.bf16.mxu0 %v3105_v2  ;;  %v3196_v1 = vld [vmem:[%s4182_s1 + $0x600] ss:$8 sps:$4 sm:$0xff]   ;;  %v3201_v2 = vld [vmem:[%s4182_s1 + $0x6b4] ss:$8 sps:$4 sm:$0xff]  }
  0xab   : > { %2214 = vmatprep.subr.bf16.mxu1 %v3108_v3  ;;  %v3199_v3 = vld [vmem:[%s4182_s1 + $0x6b0] ss:$8 sps:$4 sm:$0xff]  }
  0xad   : > { %2142 = vmatpush2.bf16.msra.mxu0 %v3103_v4  ;;  %v3204_v4 = vld [vmem:[%s4182_s1 + $0x6a4] ss:$8 sps:$4 sm:$0xff]  }
  0xae   : > { %2215 = vmatpush2.bf16.msra.mxu1 %v3106_v5  ;;  %2143 = vmatprep.subr.bf16.mxu0 %v3111_v6  ;;  %v3202_v5 = vld [vmem:[%s4182_s1 + $0x6a0] ss:$8 sps:$4 sm:$0xff]   ;;  %v3207_v6 = vld [vmem:[%s4182_s1 + $0x694] ss:$8 sps:$4 sm:$0xff]  }
  0xaf   : > { %2216 = vmatprep.subr.bf16.mxu1 %v3114_v7  ;;  %v3205_v7 = vld [vmem:[%s4182_s1 + $0x690] ss:$8 sps:$4 sm:$0xff]  }
  0xb1   : > { %2144 = vmatpush2.bf16.msra.mxu0 %v3109_v8  ;;  %v3210_v8 = vld [vmem:[%s4182_s1 + $0x684] ss:$8 sps:$4 sm:$0xff]  }
  0xb2   : > { %2217 = vmatpush2.bf16.msra.mxu1 %v3112_v9  ;;  %2145 = vmatprep.subr.bf16.mxu0 %v3117_v10  ;;  %v3208_v9 = vld [vmem:[%s4182_s1 + $0x680] ss:$8 sps:$4 sm:$0xff]  }
  0xb3   : > { %2218 = vmatprep.subr.bf16.mxu1 %v3120_v11  ;;  %v3211_v10 = vld [vmem:[%s3402_s13 + $0x30] ss:$56 sps:$4 sm:$0xff]  }
  0xb4   : > { %v3214_v11 = vld [vmem:[%s3402_s13 + $0x110] ss:$56 sps:$4 sm:$0xff]  }
  0xb5   : > { %2146 = vmatpush2.bf16.msra.mxu0 %v3115_v12  ;;  %v3217_v12 = vld [vmem:[%s3402_s13 + $0xa4] ss:$56 sps:$4 sm:$0xff]  }
  0xb6   : > { %2219 = vmatpush2.bf16.msra.mxu1 %v3118_v13  ;;  %2147 = vmatprep.subr.bf16.mxu0 %v3123_v14  ;;  %v3219_v13 = vld [vmem:[%s3402_s13 + $0x184] ss:$56 sps:$4 sm:$0xff]   ;;  %v454_v14 = vlaneseq }
  0xb7   : > { %2220 = vmatprep.subr.bf16.mxu1 %v3126_v15  ;;  %v3221_v15 = vld [vmem:[%s3402_s13 + $0xa0] ss:$56 sps:$4 sm:$0xff]  }
  0xb9   : > { %2148 = vmatpush2.bf16.msra.mxu0 %v3121_v16  ;;  %v3222_v16 = vld [vmem:[%s3402_s13 + $0x180] ss:$56 sps:$4 sm:$0xff]   ;;  %s2773_s13 = sshll.u32 %s4228_s24, 3 }
  0xba   : > { %2221 = vmatpush2.bf16.msra.mxu1 %v3124_v17  ;;  %2149 = vmatprep.subr.bf16.mxu0 %v3129_v18  ;;  %v455_v17 = vshrl.u32 %v454_v14, 7  ;;  %s4137_s17 = scalar_lea.vmem %s4184_s3, %s2773_s13 }
  0xbb   : > { %2222 = vmatprep.subr.bf16.mxu1 %v3132_v19  ;;  %v452_v19 = vld [vmem:[%s4183_s2] sm:$0x3] }
  0xbc   : > { %v456_v18 = vsub.s32 0, %v455_v17 }
  0xbd   : > { %2150 = vmatpush2.bf16.msra.mxu0 %v3127_v20  ;;  %v460_v20 = vsub.s32 1, %v455_v17 }
  0xbe   : > { %2223 = vmatpush2.bf16.msra.mxu1 %v3130_v21  ;;  %2151 = vmatprep.subr.bf16.mxu0 %v3135_v22  ;;  %v457_v21 = vrot.slane %v452_v19, %v456_v18 }
  0xbf   : > { %2224 = vmatprep.subr.bf16.mxu1 %v3138_v23  ;;  %v461_v22 = vrot.slane %v452_v19, %v460_v20 }
  0xc1   : > { %2152 = vmatpush2.bf16.msra.mxu0 %v3133_v24 }
  0xc2   : > { %2225 = vmatpush2.bf16.msra.mxu1 %v3136_v25  ;;  %2153 = vmatprep.subr.bf16.mxu0 %v3141_v26 }
  0xc3   : > { %2226 = vmatprep.subr.bf16.mxu1 %v3144_v27 }
  0xc5   : > { %2154 = vmatpush2.bf16.msra.mxu0 %v3139_v28 }
  0xc6   : > { %2227 = vmatpush2.bf16.msra.mxu1 %v3142_v29  ;;  %2155 = vmatprep.subr.bf16.mxu0 %v3147_v30 }
  0xc7   : > { %2228 = vmatprep.subr.bf16.mxu1 %v3150_v31 }
  0xc9   : > { %2156 = vmatpush2.bf16.msra.mxu0 %v3145_v32 }
  0xca   : > { %2229 = vmatpush2.bf16.msra.mxu1 %v3148_v33  ;;  %2271 = vmatprep.subr.bf16.mxu0 %v3159_v34 }
  0xcb   : > { %2782 = vmatprep.subr.bf16.mxu1 %v3159_v34 }
  0xcc   : > { %2158 = vmatmul.mubr.bf16.vlgmr.msra.gmra.mxu0 %v3151_v35 }
  0xcd   : > { %2231 = vmatmul.mubr.bf16.vlgmr.msra.gmra.mxu1 %v3154_v36  ;;  %2272 = vmatpush1.bf16.msra.mxu0 %v3157_v37 }
  0xce   : > { %2794 = vmatpush1.bf16.msra.mxu1 %v3157_v37  ;;  %2273 = vmatprep.subr.bf16.mxu0 %v3162_v38 }
  0xcf   : > { %2783 = vmatprep.subr.bf16.mxu1 %v3162_v38  ;;  %2167 = vmatprep.mubr.bf16.mxu0 %v3163_v39 }
  0xd0   : > { %2240 = vmatprep.mubr.bf16.mxu1 %v3169_v40 }
  0xd1   : > { %2274 = vmatpush1.bf16.msra.mxu0 %v3160_v41 }
  0xd2   : > { %2795 = vmatpush1.bf16.msra.mxu1 %v3160_v41  ;;  %2275 = vmatprep.subr.bf16.mxu0 %v3168_v42 }
  0xd3   : > { %2784 = vmatprep.subr.bf16.mxu1 %v3168_v42 }
  0xd4   : > { %2168 = vmatmul.mubr.bf16.gmra.mxu0 %v3165_v43 }
  0xd5   : > { %2241 = vmatmul.mubr.bf16.gmra.mxu1 %v3171_v44  ;;  %2276 = vmatpush1.bf16.msra.mxu0 %v3166_v45 }
  0xd6   : > { %2796 = vmatpush1.bf16.msra.mxu1 %v3166_v45  ;;  %2277 = vmatprep.subr.bf16.mxu0 %v3174_v46 }
  0xd7   : > { %2785 = vmatprep.subr.bf16.mxu1 %v3174_v46  ;;  %2177 = vmatprep.mubr.bf16.mxu0 %v3175_v47 }
  0xd8   : > { %2250 = vmatprep.mubr.bf16.mxu1 %v3181_v48 }
  0xd9   : > { %2278 = vmatpush1.bf16.msra.mxu0 %v3172_v49 }
  0xda   : > { %2797 = vmatpush1.bf16.msra.mxu1 %v3172_v49  ;;  %2279 = vmatprep.subr.bf16.mxu0 %v3180_v50 }
  0xdb   : > { %2786 = vmatprep.subr.bf16.mxu1 %v3180_v50 }
  0xdc   : > { %2178 = vmatmul.mubr.bf16.gmra.mxu0 %v3177_v51 }
  0xdd   : > { %2251 = vmatmul.mubr.bf16.gmra.mxu1 %v3183_v52  ;;  %2280 = vmatpush1.bf16.msra.mxu0 %v3178_v53 }
  0xde   : > { %2798 = vmatpush1.bf16.msra.mxu1 %v3178_v53  ;;  %2281 = vmatprep.subr.bf16.mxu0 %v3186_v54 }
  0xdf   : > { %2787 = vmatprep.subr.bf16.mxu1 %v3186_v54  ;;  %2187 = vmatprep.mubr.bf16.mxu0 %v3187_v55 }
  0xe0   : > { %2260 = vmatprep.mubr.bf16.mxu1 %v3193_v56 }
  0xe1   : > { %2282 = vmatpush1.bf16.msra.mxu0 %v3184_v57 }
  0xe2   : > { %2799 = vmatpush1.bf16.msra.mxu1 %v3184_v57  ;;  %2283 = vmatprep.subr.bf16.mxu0 %v3192_v58 }
  0xe3   : > { %2788 = vmatprep.subr.bf16.mxu1 %v3192_v58 }
  0xe4   : > { %2188 = vmatmul.mubr.bf16.gmra.mxu0 %v3189_v59 }
  0xe5   : > { %2261 = vmatmul.mubr.bf16.gmra.mxu1 %v3195_v60  ;;  %2284 = vmatpush1.bf16.msra.mxu0 %v3190_v61 }
  0xe6   : > { %2800 = vmatpush1.bf16.msra.mxu1 %v3190_v61  ;;  %2285 = vmatprep.subr.bf16.mxu0 %v3198_v62 }
  0xe7   : > { %2789 = vmatprep.subr.bf16.mxu1 %v3198_v62  ;;  %2759 = vmatprep.mubr.msk.bf16.mxu0 %vm1820_vm0, %v3213_v63 }
  0xe8   : > { %2761 = vmatprep.mubr.msk.bf16.mxu1 %vm1820_vm0, %v3216_v0 }
  0xe9   : > { %2286 = vmatpush1.bf16.msra.mxu0 %v3196_v1 }
  0xea   : > { %2801 = vmatpush1.bf16.msra.mxu1 %v3196_v1  ;;  %2295 = vmatprep.subr.bf16.mxu0 %v3201_v2 }
  0xeb   : > { %2790 = vmatprep.subr.bf16.mxu1 %v3201_v2 }
  0xed   : > { %2296 = vmatpush2.bf16.msra.mxu0 %v3199_v3 }
  0xee   : > { %2802 = vmatpush2.bf16.msra.mxu1 %v3199_v3  ;;  %2297 = vmatprep.subr.bf16.mxu0 %v3204_v4 }
  0xef   : > { %2791 = vmatprep.subr.bf16.mxu1 %v3204_v4 }
  0xf1   : > { %2298 = vmatpush2.bf16.msra.mxu0 %v3202_v5 }
  0xf2   : > { %2803 = vmatpush2.bf16.msra.mxu1 %v3202_v5  ;;  %2299 = vmatprep.subr.bf16.mxu0 %v3207_v6 }
  0xf3   : > { %2792 = vmatprep.subr.bf16.mxu1 %v3207_v6 }
  0xf5   : > { %2300 = vmatpush2.bf16.msra.mxu0 %v3205_v7 }
  0xf6   : > { %2804 = vmatpush2.bf16.msra.mxu1 %v3205_v7  ;;  %2301 = vmatprep.subr.bf16.mxu0 %v3210_v8 }
  0xf7   : > { %2793 = vmatprep.subr.bf16.mxu1 %v3210_v8 }
  0xf9   : > { %2302 = vmatpush2.bf16.msra.mxu0 %v3208_v9 }
  0xfa   : > { %2805 = vmatpush2.bf16.msra.mxu1 %v3208_v9 }
  0xfc   : > { %2304 = vmatmul.mubr.bf16.vlgmr.msra.gmra.mxu0 %v3211_v10 }
  0xfd   : > { %2324 = vmatmul.mubr.bf16.vlgmr.msra.gmra.mxu1 %v3214_v11  ;;  %2760 = vmatprep.mubr.msk.bf16.mxu0 %vm1820_vm0, %v3217_v12 }
  0xfe   : > { %2762 = vmatprep.mubr.msk.bf16.mxu1 %vm1820_vm0, %v3219_v13 }
 0x104   : > { %2314 = vmatmul.mubr.bf16.gmra.mxu0 %v3221_v15 }
 0x105   : > { %2334 = vmatmul.mubr.bf16.gmra.mxu1 %v3222_v16 }
 0x10c   : > { %v1867_v23 = vpop.f32.mrf.mxu0 }
 0x10d   : > { %v1940_v24 = vpop.f32.mrf.mxu1  ;;  %v1868_v25 = vadd.f32 %v1867_v23, %v457_v21 }
 0x10e   : > { %v1869_v26 = vpop.f32.mrf.mxu0 }
 0x10f   : > { %v1942_v27 = vpop.f32.mrf.mxu1  ;;  %v3980_v28 = vadd.f32 %v1940_v24, %v1868_v25  ;;  %v1870_v29 = vadd.f32 %v1869_v26, %v461_v22 }
 0x110   : > { %v1871_v30 = vpop.f32.mrf.mxu0 }
 0x111   : > { %v1944_v31 = vpop.f32.mrf.mxu1  ;;  %v3982_v32 = vadd.f32 %v1942_v27, %v1870_v29  ;;  %v1872_v33 = vadd.f32 %v1871_v30, %v457_v21 }
 0x112   : > { %v1873_v34 = vpop.f32.mrf.mxu0 }
 0x113   : > { %v1946_v35 = vpop.f32.mrf.mxu1  ;;  %v3984_v36 = vadd.f32 %v1944_v31, %v1872_v33  ;;  %v1874_v37 = vadd.f32 %v1873_v34, %v461_v22 }
 0x114   : > { %v1877_v38 = vpop.f32.mrf.mxu0 }
 0x115   : > { %v1950_v39 = vpop.f32.mrf.mxu1  ;;  %v3986_v40 = vadd.f32 %v1946_v35, %v1874_v37  ;;  %v1878_v41 = vadd.f32 %v1877_v38, %v457_v21 }
 0x116   : > { %v1879_v42 = vpop.f32.mrf.mxu0 }
 0x117   : > { %v1952_v43 = vpop.f32.mrf.mxu1  ;;  %v1880_v44 = vadd.f32 %v1879_v42, %v461_v22  ;;  %v3988_v45 = vadd.f32 %v1950_v39, %v1878_v41 }
 0x118   : > { %v1881_v46 = vpop.f32.mrf.mxu0 }
 0x119   : > { %v1954_v47 = vpop.f32.mrf.mxu1  ;;  %v1882_v48 = vadd.f32 %v1881_v46, %v457_v21  ;;  %v3990_v49 = vadd.f32 %v1952_v43, %v1880_v44 }
 0x11a   : > { %v1883_v50 = vpop.f32.mrf.mxu0 }
 0x11b   : > { %v1956_v51 = vpop.f32.mrf.mxu1  ;;  %v1884_v52 = vadd.f32 %v1883_v50, %v461_v22  ;;  %v3992_v53 = vadd.f32 %v1954_v47, %v1882_v48 }
 0x11c   : > { %v1887_v54 = vpop.f32.mrf.mxu0 }
 0x11d   : > { %v1960_v55 = vpop.f32.mrf.mxu1  ;;  %v1888_v56 = vadd.f32 %v1887_v54, %v457_v21  ;;  %v3994_v57 = vadd.f32 %v1956_v51, %v1884_v52 }
 0x11e   : > { %v1889_v58 = vpop.f32.mrf.mxu0 }
 0x11f   : > { %v1962_v59 = vpop.f32.mrf.mxu1  ;;  %v1890_v60 = vadd.f32 %v1889_v58, %v461_v22  ;;  %v3996_v61 = vadd.f32 %v1960_v55, %v1888_v56 }
 0x120   : > { %v1891_v62 = vpop.f32.mrf.mxu0 }
 0x121   : > { %v1964_v63 = vpop.f32.mrf.mxu1  ;;  %v1892_v0 = vadd.f32 %v1891_v62, %v457_v21  ;;  %v3998_v1 = vadd.f32 %v1962_v59, %v1890_v60 }
 0x122   : > { %v1893_v2 = vpop.f32.mrf.mxu0 }
 0x123   : > { %v1966_v3 = vpop.f32.mrf.mxu1  ;;  %v1894_v4 = vadd.f32 %v1893_v2, %v461_v22  ;;  %v4000_v5 = vadd.f32 %v1964_v63, %v1892_v0 }
 0x124   : > { %v1897_v6 = vpop.f32.mrf.mxu0 }
 0x125   : > { %v1970_v7 = vpop.f32.mrf.mxu1  ;;  %v1898_v8 = vadd.f32 %v1897_v6, %v457_v21  ;;  %v4002_v9 = vadd.f32 %v1966_v3, %v1894_v4 }
 0x126   : > { %v1899_v10 = vpop.f32.mrf.mxu0 }
 0x127   : > { %v1972_v11 = vpop.f32.mrf.mxu1  ;;  %v1900_v12 = vadd.f32 %v1899_v10, %v461_v22  ;;  %v4004_v13 = vadd.f32 %v1970_v7, %v1898_v8 }
 0x128   : > { %v1901_v14 = vpop.f32.mrf.mxu0 }
 0x129   : > { %v1974_v15 = vpop.f32.mrf.mxu1  ;;  %v1902_v16 = vadd.f32 %v1901_v14, %v457_v21  ;;  %v4006_v17 = vadd.f32 %v1972_v11, %v1900_v12 }
 0x12a   : > { %v1903_v18 = vpop.f32.mrf.mxu0 }
 0x12b   : > { %v1976_v19 = vpop.f32.mrf.mxu1  ;;  %v1904_v20 = vadd.f32 %v1903_v18, %v461_v22  ;;  %v4008_v23 = vadd.f32 %v1974_v15, %v1902_v16 }
 0x12d   : > { %v4010_v24 = vadd.f32 %v1976_v19, %v1904_v20 }
 0x14c   : > { %v2013_v25 = vpop.f32.mrf.mxu0 }
 0x14d   : > { %v4012_v26 = vpop.f32.mrf.mxu1 }
 0x14e   : > { %v2015_v27 = vpop.f32.mrf.mxu0 }
 0x14f   : > { %v4014_v29 = vpop.f32.mrf.mxu1 }
 0x150   : > { %v2017_v30 = vpop.f32.mrf.mxu0 }
 0x151   : > { %v4016_v31 = vpop.f32.mrf.mxu1 }
 0x152   : > { %v2019_v33 = vpop.f32.mrf.mxu0 }
 0x153   : > { %v4018_v21 = vpop.f32.mrf.mxu1 }
 0x154   : > { %v2023_v34 = vpop.f32.mrf.mxu0 }
 0x155   : > { %v4020_v35 = vpop.f32.mrf.mxu1 }
 0x156   : > { %v2025_v22 = vpop.f32.mrf.mxu0 }
 0x157   : > { %v4022_v37 = vpop.f32.mrf.mxu1 }
 0x158   : > { %v2027_v38 = vpop.f32.mrf.mxu0 }
 0x159   : > { %v4024_v39 = vpop.f32.mrf.mxu1 }
 0x15a   : > { %v2029_v41 = vpop.f32.mrf.mxu0 }
 0x15b   : > { %v4026_v42 = vpop.f32.mrf.mxu1 }
 0x15c   : > { %v2033_v43 = vpop.f32.mrf.mxu0 }
 0x15d   : > { %v2106_v44 = vpop.f32.mrf.mxu1 }
 0x15e   : > { %v2035_v46 = vpop.f32.mrf.mxu0 }
 0x15f   : > { %v2108_v47 = vpop.f32.mrf.mxu1 }
 0x160   : > { %v2037_v48 = vpop.f32.mrf.mxu0 }
 0x161   : > { %v4028_v50 = vpop.f32.mrf.mxu1 }
 0x162   : > { %v2039_v51 = vpop.f32.mrf.mxu0 }
 0x163   : > { %v4030_v52 = vpop.f32.mrf.mxu1 }
 0x164   : > { %v2043_v54 = vpop.f32.mrf.mxu0 }
 0x165   : > { %v4032_v55 = vpop.f32.mrf.mxu1 }
 0x166   : > { %v2045_v56 = vpop.f32.mrf.mxu0 }
 0x167   : > { %v4034_v58 = vpop.f32.mrf.mxu1 }
 0x168   : > { %4185 = vst [vmem:[#allocation2_spill] sm:$0xff] %v4034_v58  ;;  %v4036_v59 = vpop.f32.mrf.mxu0  ;;  %v2036_v58 = vadd.f32 %v2035_v46, %v3998_v1 }
 0x169   : > { %v4038_v60 = vpop.f32.mrf.mxu1 }
 0x16a   : > { %4186 = vst [vmem:[#allocation3_spill] sm:$0xff] %v4038_v60  ;;  %v4040_v62 = vpop.f32.mrf.mxu0 }
 0x16b   : > { %v4042_v63 = vpop.f32.mrf.mxu1 }
 0x16c   : > { %4187 = vst [vmem:[#allocation4_spill] sm:$0xff] %v4042_v63 }
 0x18c   : > { %v2159_v0 = vpop.f32.mrf.mxu0 }
 0x18d   : > { %v4044_v2 = vpop.f32.mrf.mxu1 }
 0x18e   : > { %4188 = vst [vmem:[#allocation5_spill] sm:$0xff] %v4044_v2  ;;  %v2161_v3 = vpop.f32.mrf.mxu0 }
 0x18f   : > { %v4046_v4 = vpop.f32.mrf.mxu1 }
 0x190   : > { %4189 = vst [vmem:[#allocation6_spill] sm:$0xff] %v4046_v4  ;;  %v2163_v6 = vpop.f32.mrf.mxu0 }
 0x191   : > { %v4048_v7 = vpop.f32.mrf.mxu1 }
 0x192   : > { %4190 = vst [vmem:[#allocation7_spill] sm:$0xff] %v4048_v7  ;;  %v4050_v8 = vpop.f32.mrf.mxu0 }
 0x193   : > { %4191 = vst [vmem:[#allocation8_spill] sm:$0xff] %v4050_v8  ;;  %v4052_v10 = vpop.f32.mrf.mxu1 }
 0x194   : > { %4192 = vst [vmem:[#allocation9_spill] sm:$0xff] %v4052_v10  ;;  %v4054_v11 = vpop.f32.mrf.mxu0 }
 0x195   : > { %4193 = vst [vmem:[#allocation10_spill] sm:$0xff] %v4054_v11  ;;  %v4056_v12 = vpop.f32.mrf.mxu1 }
 0x196   : > { %4194 = vst [vmem:[#allocation11_spill] sm:$0xff] %v4056_v12  ;;  %v4058_v14 = vpop.f32.mrf.mxu0 }
 0x197   : > { %4195 = vst [vmem:[#allocation12_spill] sm:$0xff] %v4058_v14  ;;  %v4060_v15 = vpop.f32.mrf.mxu1 }
 0x198   : > { %4196 = vst [vmem:[#allocation13_spill] sm:$0xff] %v4060_v15  ;;  %v4062_v16 = vpop.f32.mrf.mxu0 }
 0x199   : > { %4197 = vst [vmem:[#allocation14_spill] sm:$0xff] %v4062_v16  ;;  %v4064_v18 = vpop.f32.mrf.mxu1  ;;  %v2018_v16 = vadd.f32 %v2017_v30, %v3984_v36  ;;  %v2109_v30 = vadd.f32 %v2108_v47, %v2036_v58  ;;  %v4206_v47 = vld [vmem:[#allocation2_spill] sm:$0xff] }
 0x19a   : > { %4198 = vst [vmem:[#allocation15_spill] sm:$0xff] %v4064_v18  ;;  %v4066_v19 = vpop.f32.mrf.mxu0  ;;  %v2014_v18 = vadd.f32 %v2013_v25, %v3980_v28 }
 0x19b   : > { %4199 = vst [vmem:[#allocation16_spill] sm:$0xff] %v4066_v19  ;;  %v4068_v20 = vpop.f32.mrf.mxu1  ;;  %v2034_v19 = vadd.f32 %v2033_v43, %v3996_v61  ;;  %v2028_v61 = vadd.f32 %v2027_v38, %v3992_v53  ;;  %v2091_v1 = vadd.f32 %v4016_v31, %v2018_v16  ;;  %v2048_v38 = vadd.f32 %v4036_v59, %v4008_v23  ;;  %v4209_v59 = vld [vmem:[#allocation6_spill] sm:$0xff] }
 0x19c   : > { %4200 = vst [vmem:[#allocation17_spill] sm:$0xff] %v4068_v20  ;;  %v2179_v7 = vpop.f32.mrf.mxu0  ;;  %v2016_v20 = vadd.f32 %v2015_v27, %v3982_v32  ;;  %v2087_v28 = vadd.f32 %v4012_v26, %v2014_v18  ;;  %v2030_v32 = vadd.f32 %v2029_v41, %v3994_v57  ;;  %v2038_v27 = vadd.f32 %v2037_v48, %v4000_v5 }
 0x19d   : > { %v2252_v63 = vpop.f32.mrf.mxu1  ;;  %v2107_v25 = vadd.f32 %v2106_v44, %v2034_v19  ;;  %v2046_v5 = vadd.f32 %v2045_v56, %v4006_v17  ;;  %v2164_v41 = vadd.f32 %v2163_v6, %v2091_v1  ;;  %v4211_v6 = vld [vmem:[#allocation4_spill] sm:$0xff] }
 0x19e   : > { %v2181_v60 = vpop.f32.mrf.mxu0  ;;  %v2089_v36 = vadd.f32 %v4014_v29, %v2016_v20  ;;  %v2160_v26 = vadd.f32 %v2159_v0, %v2087_v28  ;;  %v4213_v18 = vld [vmem:[#allocation12_spill] sm:$0xff] }
 0x19f   : > { %v2254_v10 = vpop.f32.mrf.mxu1  ;;  %v2180_v53 = vadd.f32 %v2179_v7, %v2107_v25  ;;  %v2119_v48 = vadd.f32 %v4206_v47, %v2046_v5  ;;  %v4216_v25 = vld [vmem:[#allocation11_spill] sm:$0xff] }
 0x1a0   : > { %v2183_v4 = vpop.f32.mrf.mxu0 }
 0x1a1   : > { %v4070_v11 = vpop.f32.mrf.mxu1  ;;  %v2253_v46 = vadd.f32 %v2252_v63, %v2180_v53  ;;  %v4212_v63 = vld [vmem:[#allocation7_spill] sm:$0xff] }
 0x1a2   : > { %4201 = vst [vmem:[#allocation18_spill] sm:$0xff] %v4070_v11  ;;  %v2185_v12 = vpop.f32.mrf.mxu0 }
 0x1a3   : > { %v4072_v8 = vpop.f32.mrf.mxu1 }
 0x1a4   : > { %4202 = vst [vmem:[#allocation19_spill] sm:$0xff] %v4072_v8  ;;  %v4074_v14 = vpop.f32.mrf.mxu0  ;;  %v2020_v8 = vadd.f32 %v2019_v33, %v3986_v40  ;;  %v2101_v33 = vadd.f32 %v4024_v39, %v2028_v61  ;;  %v4205_v39 = vld [vmem:[#allocation5_spill] sm:$0xff] }
 0x1a5   : > { %4203 = vst [vmem:[#allocation20_spill] sm:$0xff] %v4074_v14  ;;  %v4076_v15 = vpop.f32.mrf.mxu1  ;;  %v2024_v14 = vadd.f32 %v2023_v34, %v3988_v45  ;;  %v2040_v45 = vadd.f32 %v2039_v51, %v4002_v9  ;;  %v2103_v34 = vadd.f32 %v4026_v42, %v2030_v32  ;;  %v2182_v9 = vadd.f32 %v2181_v60, %v2109_v30  ;;  %v4215_v32 = vld [vmem:[#allocation9_spill] sm:$0xff] }
 0x1a6   : > { %4204 = vst [vmem:[#allocation21_spill] sm:$0xff] %v4076_v15  ;;  %v4083_v2 = vpop.f32.mrf.mxu0  ;;  %v2026_v15 = vadd.f32 %v2025_v22, %v3990_v49  ;;  %v2044_v49 = vadd.f32 %v2043_v54, %v4004_v13  ;;  %v2093_v57 = vadd.f32 %v4018_v21, %v2020_v8  ;;  %v2162_v22 = vadd.f32 %v2161_v3, %v2089_v36  ;;  %v4208_v54 = vld [vmem:[#allocation10_spill] sm:$0xff]  ;;  %v4210_v3 = vld [vmem:[#allocation3_spill] sm:$0xff] }
 0x1a7   : > { %v4085_v11 = vpop.f32.mrf.mxu1  ;;  %v2097_v29 = vadd.f32 %v4020_v35, %v2024_v14  ;;  %v2111_v13 = vadd.f32 %v4028_v50, %v2038_v27  ;;  %v2050_v21 = vadd.f32 %v4040_v62, %v4010_v24  ;;  %v2113_v17 = vadd.f32 %v4030_v52, %v2040_v45  ;;  %v4207_v50 = vld [vmem:[#allocation8_spill] sm:$0xff] }
 0x1a8   : > { %v4096_v43 = vpop.f32.mrf.mxu0  ;;  %v2099_v31 = vadd.f32 %v4022_v37, %v2026_v15  ;;  %v2117_v37 = vadd.f32 %v4032_v55, %v2044_v49  ;;  %v2233_v42 = vadd.f32 %v4205_v39, %v2160_v26  ;;  %v2166_v51 = vadd.f32 %v4207_v50, %v2093_v57 }
 0x1a9   : > { %v4098_v40 = vpop.f32.mrf.mxu1  ;;  %v2170_v23 = vadd.f32 %v4208_v54, %v2097_v29  ;;  %v2184_v56 = vadd.f32 %v2183_v4, %v2111_v13  ;;  %v2235_v60 = vadd.f32 %v4209_v59, %v2162_v22  ;;  %v2255_v62 = vadd.f32 %v2254_v10, %v2182_v9  ;;  %v4217_v1 = vld [vmem:[#allocation18_spill] sm:$0xff] }
 0x1aa   : > { %v2195_v35 = vpop.f32.mrf.mxu0  ;;  %v2121_v55 = vadd.f32 %v4210_v3, %v2048_v38  ;;  %v2123_v7 = vadd.f32 %v4211_v6, %v2050_v21  ;;  %v2237_v8 = vadd.f32 %v4212_v63, %v2164_v41  ;;  %v2186_v14 = vadd.f32 %v2185_v12, %v2113_v17  ;;  %v4218_v29 = vld [vmem:[#allocation14_spill] sm:$0xff] }
 0x1ab   : > { %v4113_v44 = vpop.f32.mrf.mxu1  ;;  %v2172_v19 = vadd.f32 %v4213_v18, %v2099_v31  ;;  %v2239_v10 = vadd.f32 %v4215_v32, %v2166_v51  ;;  %v2243_v36 = vadd.f32 %v4216_v25, %v2170_v23  ;;  %v2257_v27 = vadd.f32 %v4217_v1, %v2184_v56  ;;  %v4219_v5 = vld [vmem:[#allocation19_spill] sm:$0xff] }
 0x1ac   : > { %v4214_v20 = vld [vmem:[#allocation20_spill] sm:$0xff]  ;;  %v2192_v30 = vadd.f32 %v4083_v2, %v2119_v48  ;;  %v2174_v31 = vadd.f32 %v4218_v29, %v2101_v33  ;;  %v2259_v22 = vadd.f32 %v4219_v5, %v2186_v14  ;;  %v4222_v33 = vld [vmem:[#allocation13_spill] sm:$0xff]  ;;  %v2194_v48 = vadd.f32 %v4096_v43, %v2121_v55 }
 0x1ad   : > { %v2190_v4 = vadd.f32 %v4214_v20, %v2117_v37  ;;  %v2245_v41 = vadd.f32 %v4222_v33, %v2172_v19  ;;  %v4223_v17 = vld [vmem:[#allocation21_spill] sm:$0xff] }
 0x1ae   : > { %v2265_v56 = vadd.f32 %v4085_v11, %v2192_v30  ;;  %v4225_v11 = vld [vmem:[#allocation15_spill] sm:$0xff]  ;;  %v2267_v6 = vadd.f32 %v4098_v40, %v2194_v48  ;;  %v4226_v20 = vld [vmem:[#allocation17_spill] sm:$0xff] }
 0x1af   : > { %v2263_v37 = vadd.f32 %v4223_v17, %v2190_v4 }
 0x1bc   : > { %v2305_v24 = vpop.f32.mrf.mxu0 }
 0x1bd   : > { %v2325_v58 = vpop.f32.mrf.mxu1  ;;  %v2306_v0 = vadd.f32 %v2305_v24, %v2233_v42  ;;  %v2196_v24 = vadd.f32 %v2195_v35, %v2123_v7  ;;  %v2247_v35 = vadd.f32 %v4225_v11, %v2174_v31 }
 0x1be   : > { %v2326_v52 = vadd.f32 %v2325_v58, %v2253_v46  ;;  %v2307_v15 = vpop.f32.mrf.mxu0  ;;  %v4224_v46 = vld [vmem:[#allocation16_spill] sm:$0xff] }
 0x1bf   : > { %v2327_v16 = vpop.f32.mrf.mxu1  ;;  %v2308_v28 = vadd.f32 %v2307_v15, %v2235_v60  ;;  %v2344_v12 = vmax.f32 %v2306_v0, 0.0  ;;  %v2176_v47 = vadd.f32 %v4224_v46, %v2103_v34 }
 0x1c0   : > { %v2328_v61 = vadd.f32 %v2327_v16, %v2255_v62  ;;  %v2309_v45 = vpop.f32.mrf.mxu0  ;;  %v2352_v26 = vmax.f32 %v2326_v52, 0.0 }
 0x1c1   : > { %v2329_v49 = vpop.f32.mrf.mxu1  ;;  %v2345_v53 = vmax.f32 %v2308_v28, 0.0  ;;  %v2310_v2 = vadd.f32 %v2309_v45, %v2237_v8  ;;  %v2249_v4 = vadd.f32 %v4226_v20, %v2176_v47  ;;  %v2269_v28 = vadd.f32 %v4113_v44, %v2196_v24 }
 0x1c2   : > { %v2353_v57 = vmax.f32 %v2328_v61, 0.0  ;;  %v2330_v13 = vadd.f32 %v2329_v49, %v2257_v27  ;;  %v2311_v38 = vpop.f32.mrf.mxu0 }
 0x1c3   : > { %v2331_v21 = vpop.f32.mrf.mxu1  ;;  %v2774_v39 = vpack.c.bf16 %v2345_v53, %v2344_v12  ;;  %v2312_v50 = vadd.f32 %v2311_v38, %v2239_v10  ;;  %v2346_v60 = vmax.f32 %v2310_v2, 0.0 }
 0x1c4   : > { %v2778_v42 = vpack.c.bf16 %v2353_v57, %v2352_v26  ;;  %v2332_v51 = vadd.f32 %v2331_v21, %v2259_v22  ;;  %v2315_v54 = vpop.f32.mrf.mxu0  ;;  %v2354_v62 = vmax.f32 %v2330_v13, 0.0 }
 0x1c5   : > { %v2335_v23 = vpop.f32.mrf.mxu1  ;;  %2411 = vst.msk [vmem:[%s4137_s17] sm:$0xff] %vm4141_vm3, %v2774_v39  ;;  %v2316_v58 = vadd.f32 %v2315_v54, %v2243_v36  ;;  %v2347_v34 = vmax.f32 %v2312_v50, 0.0 }
 0x1c6   : > { %2415 = vst.msk [vmem:[%s4137_s17 + $0x20] sm:$0xff] %vm4141_vm3, %v2778_v42  ;;  %v2336_v59 = vadd.f32 %v2335_v23, %v2263_v37  ;;  %v2355_v0 = vmax.f32 %v2332_v51, 0.0  ;;  %v2317_v43 = vpop.f32.mrf.mxu0 }
 0x1c7   : > { %v2337_v52 = vpop.f32.mrf.mxu1  ;;  %v2318_v3 = vadd.f32 %v2317_v43, %v2245_v41  ;;  %v2775_v7 = vpack.c.bf16 %v2347_v34, %v2346_v60  ;;  %v2348_v15 = vmax.f32 %v2316_v58, 0.0 }
 0x1c8   : > { %v2338_v55 = vadd.f32 %v2337_v52, %v2265_v56  ;;  %v2779_v63 = vpack.c.bf16 %v2355_v0, %v2354_v62  ;;  %v2319_v8 = vpop.f32.mrf.mxu0  ;;  %v2356_v16 = vmax.f32 %v2336_v59, 0.0 }
 0x1c9   : > { %v2339_v14 = vpop.f32.mrf.mxu1  ;;  %v2349_v18 = vmax.f32 %v2318_v3, 0.0  ;;  %2412 = vst.msk [vmem:[%s4137_s17 + $0x8] sm:$0xff] %vm4141_vm3, %v2775_v7  ;;  %v2320_v40 = vadd.f32 %v2319_v8, %v2247_v35 }
 0x1ca   : > { %v2357_v19 = vmax.f32 %v2338_v55, 0.0  ;;  %2416 = vst.msk [vmem:[%s4137_s17 + $0x28] sm:$0xff] %vm4141_vm3, %v2779_v63  ;;  %v2340_v61 = vadd.f32 %v2339_v14, %v2267_v6  ;;  %v2321_v32 = vpop.f32.mrf.mxu0 }
 0x1cb   : > { %v2341_v10 = vpop.f32.mrf.mxu1  ;;  %v2776_v25 = vpack.c.bf16 %v2349_v18, %v2348_v15  ;;  %v2322_v1 = vadd.f32 %v2321_v32, %v2249_v4  ;;  %v2350_v44 = vmax.f32 %v2320_v40, 0.0 }
 0x1cc   : > { %v2780_v36 = vpack.c.bf16 %v2357_v19, %v2356_v16  ;;  %v2342_v27 = vadd.f32 %v2341_v10, %v2269_v28  ;;  %v2358_v30 = vmax.f32 %v2340_v61, 0.0 }
 0x1cd   : > { %2413 = vst.msk [vmem:[%s4137_s17 + $0x10] sm:$0xff] %vm4141_vm3, %v2776_v25  ;;  %v2351_v45 = vmax.f32 %v2322_v1, 0.0 }
 0x1ce   : > { %2417 = vst.msk [vmem:[%s4137_s17 + $0x30] sm:$0xff] %vm4141_vm3, %v2780_v36  ;;  %v2359_v49 = vmax.f32 %v2342_v27, 0.0 }
 0x1cf   : > { %v2777_v12 = vpack.c.bf16 %v2351_v45, %v2350_v44 }
 0x1d0   : > { %v2781_v26 = vpack.c.bf16 %v2359_v49, %v2358_v30 }
 0x1d1   : > { %2414 = vst.msk [vmem:[%s4137_s17 + $0x18] sm:$0xff] %vm4141_vm3, %v2777_v12 }
 0x1d2   : > { %2418 = vst.msk [vmem:[%s4137_s17 + $0x38] sm:$0xff] %vm4141_vm3, %v2781_v26 }
 0x1d3 PF: > { %s13_s12 = sadd.s32 1, %s3229_s12  }
 0x1d4   : > { %p10_p4 = scmp.ge.s32.totalorder %s13_s12, 4  }
 0x1d6   :  { %12 = sbr.rel (!%p10_p4) target bundleno = 1 (0x1), region = 62 }

// kernel: allconvnet_forward.12
= control target key start
LH: loop header
LB: loop body
LE: loop exit
PB: predicated region body
PF: predicated region fallthrough
CT: control target
= control target key end

     0   :  { %s2585_s12 = smov 0   ;;  %s3275_s0 = inlined_call_operand.vmem [shape: bf16[32,1728], index: 0, kind: input, shape index: {}]   ;;  %s3276_s1 = inlined_call_operand.vmem [shape: bf16[1728,192], index: 1, kind: input, shape index: {}]   ;;  %s3277_s2 = inlined_call_operand.vmem [shape: f32[1,192], index: 2, kind: input, shape index: {}]   ;;  %s3278_s3 = inlined_call_operand.vmem [shape: bf16[32,192], index: 3, kind: output, shape index: {}]  }
   0x1 LB: > { %s1955_s13 = sadd.s32 4294967295, %s2563_s12   ;;  %p1959_p0 = scmp.ge.s32.totalorder %s2563_s12, 1  ;;  %s2563_s12 = sphi %s2585_s12, %s13_s12  }
   0x2   : > { %p139_p1 = scmp.lt.s32.totalorder %s2563_s12, 3 }
   0x4   : > { %p140_p2 = pnand %p1959_p0, %p139_p1 }
   0x5   : > { %s1960_s22 = sshll.u32 (!%p140_p2), %s1955_s13, 1 }
   0x6   : > { %143 = sbr.rel (%p140_p2) target bundleno = 458 (0x1ca), region = 32  ;;  %p166_p3 = scmp.lt.s32.totalorder (!%p140_p2), %s1960_s22, 3 }
   0xb   : > { %v2212_v0 = vld [vmem:[%s3276_s1 + $0x74] ss:$8 sps:$4 sm:$0xff]   ;;  %v2214_v1 = vld [vmem:[%s3276_s1 + $0x70] ss:$8 sps:$4 sm:$0xff]   ;;  %v2218_v4 = vld [vmem:[%s3276_s1 + $0x64] ss:$8 sps:$4 sm:$0xff]  }
   0xc   : > { %1575 = vmatprep.subr.bf16.mxu0 %v2212_v0  ;;  %v2215_v2 = vld [vmem:[%s3276_s1 + $0x174] ss:$8 sps:$4 sm:$0xff]   ;;  %v2217_v3 = vld [vmem:[%s3276_s1 + $0x170] ss:$8 sps:$4 sm:$0xff]   ;;  %v2220_v5 = vld [vmem:[%s3276_s1 + $0x60] ss:$8 sps:$4 sm:$0xff]  }
   0xd   : > { %1576 = vmatpush1.bf16.msra.mxu0 %v2214_v1  ;;  %1618 = vmatprep.subr.bf16.mxu1 %v2215_v2  ;;  %v2221_v6 = vld [vmem:[%s3276_s1 + $0x164] ss:$8 sps:$4 sm:$0xff]   ;;  %v2223_v7 = vld [vmem:[%s3276_s1 + $0x160] ss:$8 sps:$4 sm:$0xff]   ;;  %v2224_v8 = vld [vmem:[%s3276_s1 + $0x54] ss:$8 sps:$4 sm:$0xff]  }
   0xe   : > { %1619 = vmatpush1.bf16.msra.mxu1 %v2217_v3  ;;  %1577 = vmatprep.subr.bf16.mxu0 %v2218_v4  ;;  %v2226_v9 = vld [vmem:[%s3276_s1 + $0x50] ss:$8 sps:$4 sm:$0xff]   ;;  %v2227_v10 = vld [vmem:[%s3276_s1 + $0x154] ss:$8 sps:$4 sm:$0xff]   ;;  %v2230_v11 = vld [vmem:[%s3276_s1 + $0x44] ss:$8 sps:$4 sm:$0xff]  }
   0xf   : > { %1620 = vmatprep.subr.bf16.mxu1 %v2221_v6  ;;  %v2229_v12 = vld [vmem:[%s3276_s1 + $0x150] ss:$8 sps:$4 sm:$0xff]   ;;  %v2233_v13 = vld [vmem:[%s3276_s1 + $0x144] ss:$8 sps:$4 sm:$0xff]   ;;  %v2232_v14 = vld [vmem:[%s3276_s1 + $0x40] ss:$8 sps:$4 sm:$0xff]  }
  0x10   : > { %v2236_v15 = vld [vmem:[%s3276_s1 + $0x34] ss:$8 sps:$4 sm:$0xff]   ;;  %v2235_v16 = vld [vmem:[%s3276_s1 + $0x140] ss:$8 sps:$4 sm:$0xff]   ;;  %v2238_v18 = vld [vmem:[%s3276_s1 + $0x30] ss:$8 sps:$4 sm:$0xff]  }
  0x11   : > { %1578 = vmatpush1.bf16.msra.mxu0 %v2220_v5  ;;  %v2239_v17 = vld [vmem:[%s3276_s1 + $0x134] ss:$8 sps:$4 sm:$0xff]   ;;  %v2242_v19 = vld [vmem:[%s3276_s1 + $0x24] ss:$8 sps:$4 sm:$0xff]   ;;  %v2241_v20 = vld [vmem:[%s3276_s1 + $0x130] ss:$8 sps:$4 sm:$0xff]  }
  0x12   : > { %1579 = vmatprep.subr.bf16.mxu0 %v2224_v8  ;;  %1621 = vmatpush1.bf16.msra.mxu1 %v2223_v7  ;;  %v2245_v21 = vld [vmem:[%s3276_s1 + $0x124] ss:$8 sps:$4 sm:$0xff]   ;;  %v2244_v22 = vld [vmem:[%s3276_s1 + $0x20] ss:$8 sps:$4 sm:$0xff]   ;;  %v2248_v23 = vld [vmem:[%s3276_s1 + $0x14] ss:$8 sps:$4 sm:$0xff]  }
  0x13   : > { %1622 = vmatprep.subr.bf16.mxu1 %v2227_v10  ;;  %v2247_v24 = vld [vmem:[%s3276_s1 + $0x120] ss:$8 sps:$4 sm:$0xff]   ;;  %v2251_v25 = vld [vmem:[%s3276_s1 + $0x114] ss:$8 sps:$4 sm:$0xff]   ;;  %v2250_v26 = vld [vmem:[%s3276_s1 + $0x10] ss:$8 sps:$4 sm:$0xff]  }
  0x14   : > { %v2254_v27 = vld [vmem:[%s3276_s1 + $0x4] ss:$8 sps:$4 sm:$0xff]   ;;  %v2253_v28 = vld [vmem:[%s3276_s1 + $0x110] ss:$8 sps:$4 sm:$0xff]   ;;  %v2256_v30 = vld [vmem:[%s3276_s1] ss:$8 sps:$4 sm:$0xff]  }
  0x15   : > { %1580 = vmatpush1.bf16.msra.mxu0 %v2226_v9  ;;  %v2257_v29 = vld [vmem:[%s3276_s1 + $0x104] ss:$8 sps:$4 sm:$0xff]   ;;  %v2260_v31 = vld [vmem:[%s3276_s1 + $0xf4] ss:$8 sps:$4 sm:$0xff]   ;;  %v2259_v32 = vld [vmem:[%s3276_s1 + $0x100] ss:$8 sps:$4 sm:$0xff]  }
  0x16   : > { %1581 = vmatprep.subr.bf16.mxu0 %v2230_v11  ;;  %1623 = vmatpush1.bf16.msra.mxu1 %v2229_v12  ;;  %v2263_v33 = vld [vmem:[%s3276_s1 + $0x1f4] ss:$8 sps:$4 sm:$0xff]   ;;  %v2262_v34 = vld [vmem:[%s3276_s1 + $0xf0] ss:$8 sps:$4 sm:$0xff]   ;;  %v2266_v35 = vld [vmem:[%s3276_s1 + $0xe4] ss:$8 sps:$4 sm:$0xff]  }
  0x17   : > { %1624 = vmatprep.subr.bf16.mxu1 %v2233_v13  ;;  %s3280_s22 = smov (!%p166_p3, %s1960_s22), 3  ;;  %v2265_v36 = vld [vmem:[%s3276_s1 + $0x1f0] ss:$8 sps:$4 sm:$0xff]   ;;  %v2269_v37 = vld [vmem:[%s3276_s1 + $0x1e4] ss:$8 sps:$4 sm:$0xff]   ;;  %vm1571_vm0 = vcmask 523264  }
  0x18   : > { %v2268_v38 = vld [vmem:[%s3276_s1 + $0xe0] ss:$8 sps:$4 sm:$0xff]   ;;  %v2272_v39 = vld [vmem:[%s3276_s1 + $0xd4] ss:$8 sps:$4 sm:$0xff]   ;;  %s2203_s19 = smul.u32 56, %s3280_s22  ;;  %vm1892_vm1 = vcmask 1043456  }
  0x19   : > { %1582 = vmatpush1.bf16.msra.mxu0 %v2232_v14  ;;  %v2271_v40 = vld [vmem:[%s3276_s1 + $0x1e0] ss:$8 sps:$4 sm:$0xff]   ;;  %v2275_v41 = vld [vmem:[%s3276_s1 + $0x1d4] ss:$8 sps:$4 sm:$0xff]   ;;  %v2274_v42 = vld [vmem:[%s3276_s1 + $0xd0] ss:$8 sps:$4 sm:$0xff]  }
  0x1a   : > { %1583 = vmatprep.subr.bf16.mxu0 %v2236_v15  ;;  %1625 = vmatpush1.bf16.msra.mxu1 %v2235_v16  ;;  %v2278_v43 = vld [vmem:[%s3276_s1 + $0xc4] ss:$8 sps:$4 sm:$0xff]   ;;  %s2733_s13 = scalar_lea.vmem %s3275_s0, %s2203_s19  ;;  %v2277_v44 = vld [vmem:[%s3276_s1 + $0x1d0] ss:$8 sps:$4 sm:$0xff]   ;;  %v2280_v46 = vld [vmem:[%s3276_s1 + $0xc0] ss:$8 sps:$4 sm:$0xff]  }
  0x1b   : > { %1626 = vmatprep.subr.bf16.mxu1 %v2239_v17  ;;  %v2281_v45 = vld [vmem:[%s3276_s1 + $0x1c4] ss:$8 sps:$4 sm:$0xff]   ;;  %v2284_v48 = vld [vmem:[%s3276_s1 + $0xb4] ss:$8 sps:$4 sm:$0xff]   ;;  %v2283_v49 = vld [vmem:[%s3276_s1 + $0x1c0] ss:$8 sps:$4 sm:$0xff]  }
  0x1c   : > { %v2309_v47 = vld [vmem:[%s2733_s13 + $0x4] ss:$56 sps:$4 sm:$0xff]   ;;  %v2286_v52 = vld [vmem:[%s3276_s1 + $0xb0] ss:$8 sps:$4 sm:$0xff]   ;;  %v2292_v56 = vld [vmem:[%s3276_s1 + $0xa0] ss:$8 sps:$4 sm:$0xff]  }
  0x1d   : > { %1584 = vmatpush1.bf16.msra.mxu0 %v2238_v18  ;;  %1607 = vmatprep.mubr.bf16.mxu0 %v2309_v47  ;;  %v2287_v50 = vld [vmem:[%s3276_s1 + $0x1b4] ss:$8 sps:$4 sm:$0xff]   ;;  %v2316_v51 = vld [vmem:[%s2733_s13 + $0xc] ss:$56 sps:$4 sm:$0xff]   ;;  %v2289_v54 = vld [vmem:[%s3276_s1 + $0x1b0] ss:$8 sps:$4 sm:$0xff]  }
  0x1e   : > { %1585 = vmatprep.subr.bf16.mxu0 %v2242_v19  ;;  %1627 = vmatpush1.bf16.msra.mxu1 %v2241_v20  ;;  %v2290_v53 = vld [vmem:[%s3276_s1 + $0xa4] ss:$8 sps:$4 sm:$0xff]   ;;  %v2296_v57 = vld [vmem:[%s3276_s1 + $0x94] ss:$8 sps:$4 sm:$0xff]   ;;  %v2295_v58 = vld [vmem:[%s3276_s1 + $0x1a0] ss:$8 sps:$4 sm:$0xff]  }
  0x1f   : > { %1628 = vmatprep.subr.bf16.mxu1 %v2245_v21  ;;  %1650 = vmatprep.mubr.bf16.mxu1 %v2316_v51  ;;  %v2293_v55 = vld [vmem:[%s3276_s1 + $0x1a4] ss:$8 sps:$4 sm:$0xff]   ;;  %v2299_v59 = vld [vmem:[%s3276_s1 + $0x194] ss:$8 sps:$4 sm:$0xff]   ;;  %v2298_v60 = vld [vmem:[%s3276_s1 + $0x90] ss:$8 sps:$4 sm:$0xff]  }
  0x20   : > { %v2302_v61 = vld [vmem:[%s3276_s1 + $0x84] ss:$8 sps:$4 sm:$0xff]   ;;  %v2301_v62 = vld [vmem:[%s3276_s1 + $0x190] ss:$8 sps:$4 sm:$0xff]   ;;  %v2304_v0 = vld [vmem:[%s3276_s1 + $0x80] ss:$8 sps:$4 sm:$0xff]  }
  0x21   : > { %1586 = vmatpush1.bf16.msra.mxu0 %v2244_v22  ;;  %v2305_v63 = vld [vmem:[%s3276_s1 + $0x184] ss:$8 sps:$4 sm:$0xff]   ;;  %v2313_v1 = vld [vmem:[%s3276_s1 + $0x274] ss:$8 sps:$4 sm:$0xff]   ;;  %v2310_v2 = vld [vmem:[%s3276_s1 + $0x180] ss:$8 sps:$4 sm:$0xff]  }
  0x22   : > { %1587 = vmatprep.subr.bf16.mxu0 %v2248_v23  ;;  %1629 = vmatpush1.bf16.msra.mxu1 %v2247_v24  ;;  %v2307_v3 = vld [vmem:[%s2733_s13] ss:$56 sps:$4 sm:$0xff]   ;;  %v2319_v4 = vld [vmem:[%s3276_s1 + $0x374] ss:$8 sps:$4 sm:$0xff]   ;;  %v2322_v7 = vld [vmem:[%s3276_s1 + $0x264] ss:$8 sps:$4 sm:$0xff]  }
  0x23   : > { %1630 = vmatprep.subr.bf16.mxu1 %v2251_v25  ;;  %v2311_v5 = vld [vmem:[%s3276_s1 + $0x270] ss:$8 sps:$4 sm:$0xff]   ;;  %v2314_v6 = vld [vmem:[%s2733_s13 + $0x8] ss:$56 sps:$4 sm:$0xff]   ;;  %v2325_v9 = vld [vmem:[%s3276_s1 + $0x364] ss:$8 sps:$4 sm:$0xff]  }
  0x24   : > { %v2317_v8 = vld [vmem:[%s3276_s1 + $0x370] ss:$8 sps:$4 sm:$0xff]   ;;  %v2320_v10 = vld [vmem:[%s3276_s1 + $0x260] ss:$8 sps:$4 sm:$0xff]   ;;  %v2328_v11 = vld [vmem:[%s3276_s1 + $0x254] ss:$8 sps:$4 sm:$0xff]  }
  0x25   : > { %1588 = vmatpush1.bf16.msra.mxu0 %v2250_v26  ;;  %v2323_v12 = vld [vmem:[%s3276_s1 + $0x360] ss:$8 sps:$4 sm:$0xff]   ;;  %v2331_v13 = vld [vmem:[%s3276_s1 + $0x354] ss:$8 sps:$4 sm:$0xff]   ;;  %v2326_v14 = vld [vmem:[%s3276_s1 + $0x250] ss:$8 sps:$4 sm:$0xff]  }
  0x26   : > { %1589 = vmatprep.subr.bf16.mxu0 %v2254_v27  ;;  %1631 = vmatpush1.bf16.msra.mxu1 %v2253_v28  ;;  %v2334_v15 = vld [vmem:[%s3276_s1 + $0x244] ss:$8 sps:$4 sm:$0xff]   ;;  %v2329_v16 = vld [vmem:[%s3276_s1 + $0x350] ss:$8 sps:$4 sm:$0xff]   ;;  %v2332_v18 = vld [vmem:[%s3276_s1 + $0x240] ss:$8 sps:$4 sm:$0xff]  }
  0x27   : > { %1632 = vmatprep.subr.bf16.mxu1 %v2257_v29  ;;  %v2337_v17 = vld [vmem:[%s3276_s1 + $0x344] ss:$8 sps:$4 sm:$0xff]   ;;  %v2340_v19 = vld [vmem:[%s3276_s1 + $0x234] ss:$8 sps:$4 sm:$0xff]   ;;  %v2335_v20 = vld [vmem:[%s3276_s1 + $0x340] ss:$8 sps:$4 sm:$0xff]  }
  0x28   : > { %v2343_v21 = vld [vmem:[%s3276_s1 + $0x334] ss:$8 sps:$4 sm:$0xff]   ;;  %v2338_v22 = vld [vmem:[%s3276_s1 + $0x230] ss:$8 sps:$4 sm:$0xff]   ;;  %v2346_v23 = vld [vmem:[%s3276_s1 + $0x224] ss:$8 sps:$4 sm:$0xff]  }
  0x29   : > { %1590 = vmatpush1.bf16.msra.mxu0 %v2256_v30  ;;  %v2341_v24 = vld [vmem:[%s3276_s1 + $0x330] ss:$8 sps:$4 sm:$0xff]   ;;  %v2349_v25 = vld [vmem:[%s3276_s1 + $0x324] ss:$8 sps:$4 sm:$0xff]   ;;  %v2344_v26 = vld [vmem:[%s3276_s1 + $0x220] ss:$8 sps:$4 sm:$0xff]  }
  0x2a   : > { %1591 = vmatprep.subr.bf16.mxu0 %v2260_v31  ;;  %1633 = vmatpush1.bf16.msra.mxu1 %v2259_v32  ;;  %v2352_v27 = vld [vmem:[%s3276_s1 + $0x214] ss:$8 sps:$4 sm:$0xff]   ;;  %v2347_v28 = vld [vmem:[%s3276_s1 + $0x320] ss:$8 sps:$4 sm:$0xff]   ;;  %v2350_v30 = vld [vmem:[%s3276_s1 + $0x210] ss:$8 sps:$4 sm:$0xff]  }
  0x2b   : > { %1634 = vmatprep.subr.bf16.mxu1 %v2263_v33  ;;  %v2355_v29 = vld [vmem:[%s3276_s1 + $0x314] ss:$8 sps:$4 sm:$0xff]   ;;  %v2353_v31 = vld [vmem:[%s3276_s1 + $0x310] ss:$8 sps:$4 sm:$0xff]   ;;  %v2358_v32 = vld [vmem:[%s3276_s1 + $0x204] ss:$8 sps:$4 sm:$0xff]  }
  0x2c   : > { %v2412_v33 = vld [vmem:[%s2733_s13 + $0x14] ss:$56 sps:$4 sm:$0xff]   ;;  %vm1893_vm2 = vcmask 523268  }
  0x2d   : > { %1592 = vmatpush2.bf16.msra.mxu0 %v2262_v34  ;;  %v2361_v34 = vld [vmem:[%s3276_s1 + $0x304] ss:$8 sps:$4 sm:$0xff]   ;;  %v2379_v47 = vld [vmem:[%s3276_s1 + $0x3d4] ss:$8 sps:$4 sm:$0xff]   ;;  %vm1894_vm3 = vmor %vm1893_vm2, %vm1892_vm1 }
  0x2e   : > { %1593 = vmatprep.subr.bf16.mxu0 %v2266_v35  ;;  %1635 = vmatpush2.bf16.msra.mxu1 %v2265_v36  ;;  %v2356_v35 = vld [vmem:[%s3276_s1 + $0x200] ss:$8 sps:$4 sm:$0xff]   ;;  %v2418_v36 = vld [vmem:[%s2733_s13 + $0x1c] ss:$56 sps:$4 sm:$0xff]   ;;  %v2385_v51 = vld [vmem:[%s3276_s1 + $0x3c4] ss:$8 sps:$4 sm:$0xff]  }
  0x2f   : > { %1636 = vmatprep.subr.bf16.mxu1 %v2269_v37  ;;  %v2364_v37 = vld [vmem:[%s3276_s1 + $0x2f4] ss:$8 sps:$4 sm:$0xff]  }
  0x31   : > { %1594 = vmatpush2.bf16.msra.mxu0 %v2268_v38  ;;  %v2359_v38 = vld [vmem:[%s3276_s1 + $0x300] ss:$8 sps:$4 sm:$0xff]  }
  0x32   : > { %1595 = vmatprep.subr.bf16.mxu0 %v2272_v39  ;;  %1637 = vmatpush2.bf16.msra.mxu1 %v2271_v40  ;;  %v2367_v39 = vld [vmem:[%s3276_s1 + $0x3f4] ss:$8 sps:$4 sm:$0xff]   ;;  %v2362_v40 = vld [vmem:[%s3276_s1 + $0x2f0] ss:$8 sps:$4 sm:$0xff]  }
  0x33   : > { %1638 = vmatprep.subr.bf16.mxu1 %v2275_v41  ;;  %v2370_v41 = vld [vmem:[%s3276_s1 + $0x2e4] ss:$8 sps:$4 sm:$0xff]  }
  0x35   : > { %1596 = vmatpush2.bf16.msra.mxu0 %v2274_v42  ;;  %v2365_v42 = vld [vmem:[%s3276_s1 + $0x3f0] ss:$8 sps:$4 sm:$0xff]  }
  0x36   : > { %1597 = vmatprep.subr.bf16.mxu0 %v2278_v43  ;;  %1639 = vmatpush2.bf16.msra.mxu1 %v2277_v44  ;;  %v2373_v43 = vld [vmem:[%s3276_s1 + $0x3e4] ss:$8 sps:$4 sm:$0xff]   ;;  %v2368_v44 = vld [vmem:[%s3276_s1 + $0x2e0] ss:$8 sps:$4 sm:$0xff]  }
  0x37   : > { %1640 = vmatprep.subr.bf16.mxu1 %v2281_v45  ;;  %v2376_v45 = vld [vmem:[%s3276_s1 + $0x2d4] ss:$8 sps:$4 sm:$0xff]  }
  0x39   : > { %1598 = vmatpush2.bf16.msra.mxu0 %v2280_v46  ;;  %v2371_v46 = vld [vmem:[%s3276_s1 + $0x3e0] ss:$8 sps:$4 sm:$0xff]  }
  0x3a   : > { %1599 = vmatprep.subr.bf16.mxu0 %v2284_v48  ;;  %1641 = vmatpush2.bf16.msra.mxu1 %v2283_v49  ;;  %v2374_v48 = vld [vmem:[%s3276_s1 + $0x2d0] ss:$8 sps:$4 sm:$0xff]   ;;  %v2382_v49 = vld [vmem:[%s3276_s1 + $0x2c4] ss:$8 sps:$4 sm:$0xff]  }
  0x3b   : > { %1642 = vmatprep.subr.bf16.mxu1 %v2287_v50  ;;  %v2377_v50 = vld [vmem:[%s3276_s1 + $0x3d0] ss:$8 sps:$4 sm:$0xff]  }
  0x3d   : > { %1600 = vmatpush2.bf16.msra.mxu0 %v2286_v52  ;;  %v2380_v52 = vld [vmem:[%s3276_s1 + $0x2c0] ss:$8 sps:$4 sm:$0xff]  }
  0x3e   : > { %1601 = vmatprep.subr.bf16.mxu0 %v2290_v53  ;;  %1643 = vmatpush2.bf16.msra.mxu1 %v2289_v54  ;;  %v2388_v53 = vld [vmem:[%s3276_s1 + $0x2b4] ss:$8 sps:$4 sm:$0xff]   ;;  %v2383_v54 = vld [vmem:[%s3276_s1 + $0x3c0] ss:$8 sps:$4 sm:$0xff]  }
  0x3f   : > { %1644 = vmatprep.subr.bf16.mxu1 %v2293_v55  ;;  %v2391_v55 = vld [vmem:[%s3276_s1 + $0x3b4] ss:$8 sps:$4 sm:$0xff]  }
  0x41   : > { %1602 = vmatpush2.bf16.msra.mxu0 %v2292_v56  ;;  %v2386_v56 = vld [vmem:[%s3276_s1 + $0x2b0] ss:$8 sps:$4 sm:$0xff]  }
  0x42   : > { %1603 = vmatprep.subr.bf16.mxu0 %v2296_v57  ;;  %1645 = vmatpush2.bf16.msra.mxu1 %v2295_v58  ;;  %v2394_v57 = vld [vmem:[%s3276_s1 + $0x2a4] ss:$8 sps:$4 sm:$0xff]   ;;  %v2389_v58 = vld [vmem:[%s3276_s1 + $0x3b0] ss:$8 sps:$4 sm:$0xff]  }
  0x43   : > { %1646 = vmatprep.subr.bf16.mxu1 %v2299_v59  ;;  %v2397_v59 = vld [vmem:[%s3276_s1 + $0x3a4] ss:$8 sps:$4 sm:$0xff]  }
  0x45   : > { %1604 = vmatpush2.bf16.msra.mxu0 %v2298_v60  ;;  %v2392_v60 = vld [vmem:[%s3276_s1 + $0x2a0] ss:$8 sps:$4 sm:$0xff]  }
  0x46   : > { %1605 = vmatprep.subr.bf16.mxu0 %v2302_v61  ;;  %1647 = vmatpush2.bf16.msra.mxu1 %v2301_v62  ;;  %v2400_v61 = vld [vmem:[%s3276_s1 + $0x294] ss:$8 sps:$4 sm:$0xff]   ;;  %v2395_v62 = vld [vmem:[%s3276_s1 + $0x3a0] ss:$8 sps:$4 sm:$0xff]  }
  0x47   : > { %1648 = vmatprep.subr.bf16.mxu1 %v2305_v63  ;;  %v2403_v63 = vld [vmem:[%s3276_s1 + $0x394] ss:$8 sps:$4 sm:$0xff]  }
  0x49   : > { %1606 = vmatpush2.bf16.msra.mxu0 %v2304_v0  ;;  %v2398_v0 = vld [vmem:[%s3276_s1 + $0x290] ss:$8 sps:$4 sm:$0xff]  }
  0x4a   : > { %1661 = vmatprep.subr.bf16.mxu0 %v2313_v1  ;;  %1649 = vmatpush2.bf16.msra.mxu1 %v2310_v2  ;;  %v2406_v1 = vld [vmem:[%s3276_s1 + $0x284] ss:$8 sps:$4 sm:$0xff]   ;;  %v2401_v2 = vld [vmem:[%s3276_s1 + $0x390] ss:$8 sps:$4 sm:$0xff]  }
  0x4b   : > { %1704 = vmatprep.subr.bf16.mxu1 %v2319_v4  ;;  %v2404_v4 = vld [vmem:[%s3276_s1 + $0x280] ss:$8 sps:$4 sm:$0xff]  }
  0x4c   : > { %1608 = vmatmul.mubr.bf16.vlgmr.msra.gmra.mxu0 %v2307_v3  ;;  %v2409_v3 = vld [vmem:[%s3276_s1 + $0x384] ss:$8 sps:$4 sm:$0xff]  }
  0x4d   : > { %1662 = vmatpush1.bf16.msra.mxu0 %v2311_v5  ;;  %1651 = vmatmul.mubr.bf16.vlgmr.msra.gmra.mxu1 %v2314_v6  ;;  %v2415_v5 = vld [vmem:[%s3276_s1 + $0x474] ss:$8 sps:$4 sm:$0xff]   ;;  %v2407_v6 = vld [vmem:[%s3276_s1 + $0x380] ss:$8 sps:$4 sm:$0xff]  }
  0x4e   : > { %1663 = vmatprep.subr.bf16.mxu0 %v2322_v7  ;;  %1705 = vmatpush1.bf16.msra.mxu1 %v2317_v8  ;;  %v2410_v7 = vld [vmem:[%s2733_s13 + $0x10] ss:$56 sps:$4 sm:$0xff]   ;;  %v2421_v8 = vld [vmem:[%s3276_s1 + $0x574] ss:$8 sps:$4 sm:$0xff]  }
  0x4f   : > { %1706 = vmatprep.subr.bf16.mxu1 %v2325_v9  ;;  %1693 = vmatprep.mubr.bf16.mxu0 %v2412_v33  ;;  %v2413_v9 = vld [vmem:[%s3276_s1 + $0x470] ss:$8 sps:$4 sm:$0xff]   ;;  %v2454_v33 = vld [vmem:[%s3276_s1 + $0x414] ss:$8 sps:$4 sm:$0xff]  }
  0x50   : > { %1736 = vmatprep.mubr.bf16.mxu1 %v2418_v36  ;;  %v2452_v36 = vld [vmem:[%s3276_s1 + $0x410] ss:$8 sps:$4 sm:$0xff]  }
  0x51   : > { %1664 = vmatpush1.bf16.msra.mxu0 %v2320_v10  ;;  %v2416_v10 = vld [vmem:[%s2733_s13 + $0x18] ss:$56 sps:$4 sm:$0xff]  }
  0x52   : > { %1665 = vmatprep.subr.bf16.mxu0 %v2328_v11  ;;  %1707 = vmatpush1.bf16.msra.mxu1 %v2323_v12  ;;  %v2424_v11 = vld [vmem:[%s3276_s1 + $0x464] ss:$8 sps:$4 sm:$0xff]   ;;  %v2419_v12 = vld [vmem:[%s3276_s1 + $0x570] ss:$8 sps:$4 sm:$0xff]  }
  0x53   : > { %1708 = vmatprep.subr.bf16.mxu1 %v2331_v13  ;;  %v2427_v13 = vld [vmem:[%s3276_s1 + $0x564] ss:$8 sps:$4 sm:$0xff]  }
  0x55   : > { %1666 = vmatpush1.bf16.msra.mxu0 %v2326_v14  ;;  %v2422_v14 = vld [vmem:[%s3276_s1 + $0x460] ss:$8 sps:$4 sm:$0xff]  }
  0x56   : > { %1667 = vmatprep.subr.bf16.mxu0 %v2334_v15  ;;  %1709 = vmatpush1.bf16.msra.mxu1 %v2329_v16  ;;  %v2430_v15 = vld [vmem:[%s3276_s1 + $0x454] ss:$8 sps:$4 sm:$0xff]   ;;  %v2425_v16 = vld [vmem:[%s3276_s1 + $0x560] ss:$8 sps:$4 sm:$0xff]  }
  0x57   : > { %1710 = vmatprep.subr.bf16.mxu1 %v2337_v17  ;;  %v2433_v17 = vld [vmem:[%s3276_s1 + $0x554] ss:$8 sps:$4 sm:$0xff]  }
  0x59   : > { %1668 = vmatpush1.bf16.msra.mxu0 %v2332_v18  ;;  %v2514_v18 = vld [vmem:[%s2733_s13 + $0x24] ss:$56 sps:$4 sm:$0xff]  }
  0x5a   : > { %1669 = vmatprep.subr.bf16.mxu0 %v2340_v19  ;;  %1711 = vmatpush1.bf16.msra.mxu1 %v2335_v20  ;;  %v2428_v19 = vld [vmem:[%s3276_s1 + $0x450] ss:$8 sps:$4 sm:$0xff]  }
  0x5b   : > { %1712 = vmatprep.subr.bf16.mxu1 %v2343_v21  ;;  %v2431_v20 = vld [vmem:[%s3276_s1 + $0x550] ss:$8 sps:$4 sm:$0xff]   ;;  %v2436_v21 = vld [vmem:[%s3276_s1 + $0x444] ss:$8 sps:$4 sm:$0xff]  }
  0x5d   : > { %1670 = vmatpush1.bf16.msra.mxu0 %v2338_v22  ;;  %v2520_v22 = vld [vmem:[%s2733_s13 + $0x2c] ss:$56 sps:$4 sm:$0xff]  }
  0x5e   : > { %1671 = vmatprep.subr.bf16.mxu0 %v2346_v23  ;;  %1713 = vmatpush1.bf16.msra.mxu1 %v2341_v24  ;;  %v2439_v23 = vld [vmem:[%s3276_s1 + $0x544] ss:$8 sps:$4 sm:$0xff]   ;;  %v2434_v24 = vld [vmem:[%s3276_s1 + $0x440] ss:$8 sps:$4 sm:$0xff]  }
  0x5f   : > { %1714 = vmatprep.subr.bf16.mxu1 %v2349_v25  ;;  %v2442_v25 = vld [vmem:[%s3276_s1 + $0x434] ss:$8 sps:$4 sm:$0xff]  }
  0x61   : > { %1672 = vmatpush1.bf16.msra.mxu0 %v2344_v26  ;;  %v2437_v26 = vld [vmem:[%s3276_s1 + $0x540] ss:$8 sps:$4 sm:$0xff]  }
  0x62   : > { %1673 = vmatprep.subr.bf16.mxu0 %v2352_v27  ;;  %1715 = vmatpush1.bf16.msra.mxu1 %v2347_v28  ;;  %v2445_v27 = vld [vmem:[%s3276_s1 + $0x534] ss:$8 sps:$4 sm:$0xff]   ;;  %v2440_v28 = vld [vmem:[%s3276_s1 + $0x430] ss:$8 sps:$4 sm:$0xff]  }
  0x63   : > { %1716 = vmatprep.subr.bf16.mxu1 %v2355_v29  ;;  %v2448_v29 = vld [vmem:[%s3276_s1 + $0x424] ss:$8 sps:$4 sm:$0xff]  }
  0x65   : > { %1674 = vmatpush1.bf16.msra.mxu0 %v2350_v30  ;;  %v2443_v30 = vld [vmem:[%s3276_s1 + $0x530] ss:$8 sps:$4 sm:$0xff]  }
  0x66   : > { %1675 = vmatprep.subr.bf16.mxu0 %v2358_v32  ;;  %1717 = vmatpush1.bf16.msra.mxu1 %v2353_v31  ;;  %v2451_v31 = vld [vmem:[%s3276_s1 + $0x524] ss:$8 sps:$4 sm:$0xff]   ;;  %v2446_v32 = vld [vmem:[%s3276_s1 + $0x420] ss:$8 sps:$4 sm:$0xff]  }
  0x67   : > { %1718 = vmatprep.subr.bf16.mxu1 %v2361_v34  ;;  %v2449_v34 = vld [vmem:[%s3276_s1 + $0x520] ss:$8 sps:$4 sm:$0xff]  }
  0x69   : > { %1676 = vmatpush1.bf16.msra.mxu0 %v2356_v35  ;;  %v2457_v35 = vld [vmem:[%s3276_s1 + $0x514] ss:$8 sps:$4 sm:$0xff]  }
  0x6a   : > { %1677 = vmatprep.subr.bf16.mxu0 %v2364_v37  ;;  %1719 = vmatpush1.bf16.msra.mxu1 %v2359_v38  ;;  %v2460_v37 = vld [vmem:[%s3276_s1 + $0x404] ss:$8 sps:$4 sm:$0xff]   ;;  %v2455_v38 = vld [vmem:[%s3276_s1 + $0x510] ss:$8 sps:$4 sm:$0xff]  }
  0x6b   : > { %1720 = vmatprep.subr.bf16.mxu1 %v2367_v39  ;;  %v2463_v39 = vld [vmem:[%s3276_s1 + $0x504] ss:$8 sps:$4 sm:$0xff]  }
  0x6d   : > { %1678 = vmatpush2.bf16.msra.mxu0 %v2362_v40  ;;  %v2458_v40 = vld [vmem:[%s3276_s1 + $0x400] ss:$8 sps:$4 sm:$0xff]  }
  0x6e   : > { %1679 = vmatprep.subr.bf16.mxu0 %v2370_v41  ;;  %1721 = vmatpush2.bf16.msra.mxu1 %v2365_v42  ;;  %v2466_v41 = vld [vmem:[%s3276_s1 + $0x4f4] ss:$8 sps:$4 sm:$0xff]   ;;  %v2461_v42 = vld [vmem:[%s3276_s1 + $0x500] ss:$8 sps:$4 sm:$0xff]  }
  0x6f   : > { %1722 = vmatprep.subr.bf16.mxu1 %v2373_v43  ;;  %v2469_v43 = vld [vmem:[%s3276_s1 + $0x5f4] ss:$8 sps:$4 sm:$0xff]  }
  0x71   : > { %1680 = vmatpush2.bf16.msra.mxu0 %v2368_v44  ;;  %v2464_v44 = vld [vmem:[%s3276_s1 + $0x4f0] ss:$8 sps:$4 sm:$0xff]  }
  0x72   : > { %1681 = vmatprep.subr.bf16.mxu0 %v2376_v45  ;;  %1723 = vmatpush2.bf16.msra.mxu1 %v2371_v46  ;;  %v2472_v45 = vld [vmem:[%s3276_s1 + $0x4e4] ss:$8 sps:$4 sm:$0xff]   ;;  %v2467_v46 = vld [vmem:[%s3276_s1 + $0x5f0] ss:$8 sps:$4 sm:$0xff]  }
  0x73   : > { %1724 = vmatprep.subr.bf16.mxu1 %v2379_v47  ;;  %v2475_v47 = vld [vmem:[%s3276_s1 + $0x5e4] ss:$8 sps:$4 sm:$0xff]  }
  0x75   : > { %1682 = vmatpush2.bf16.msra.mxu0 %v2374_v48  ;;  %v2470_v48 = vld [vmem:[%s3276_s1 + $0x4e0] ss:$8 sps:$4 sm:$0xff]  }
  0x76   : > { %1683 = vmatprep.subr.bf16.mxu0 %v2382_v49  ;;  %1725 = vmatpush2.bf16.msra.mxu1 %v2377_v50  ;;  %v2478_v49 = vld [vmem:[%s3276_s1 + $0x4d4] ss:$8 sps:$4 sm:$0xff]   ;;  %v2473_v50 = vld [vmem:[%s3276_s1 + $0x5e0] ss:$8 sps:$4 sm:$0xff]  }
  0x77   : > { %1726 = vmatprep.subr.bf16.mxu1 %v2385_v51  ;;  %v2481_v51 = vld [vmem:[%s3276_s1 + $0x5d4] ss:$8 sps:$4 sm:$0xff]  }
  0x79   : > { %1684 = vmatpush2.bf16.msra.mxu0 %v2380_v52  ;;  %v2476_v52 = vld [vmem:[%s3276_s1 + $0x4d0] ss:$8 sps:$4 sm:$0xff]  }
  0x7a   : > { %1685 = vmatprep.subr.bf16.mxu0 %v2388_v53  ;;  %1727 = vmatpush2.bf16.msra.mxu1 %v2383_v54  ;;  %v2484_v53 = vld [vmem:[%s3276_s1 + $0x4c4] ss:$8 sps:$4 sm:$0xff]   ;;  %v2479_v54 = vld [vmem:[%s3276_s1 + $0x5d0] ss:$8 sps:$4 sm:$0xff]  }
  0x7b   : > { %1728 = vmatprep.subr.bf16.mxu1 %v2391_v55  ;;  %v2487_v55 = vld [vmem:[%s3276_s1 + $0x5c4] ss:$8 sps:$4 sm:$0xff]  }
  0x7d   : > { %1686 = vmatpush2.bf16.msra.mxu0 %v2386_v56  ;;  %v2482_v56 = vld [vmem:[%s3276_s1 + $0x4c0] ss:$8 sps:$4 sm:$0xff]  }
  0x7e   : > { %1687 = vmatprep.subr.bf16.mxu0 %v2394_v57  ;;  %1729 = vmatpush2.bf16.msra.mxu1 %v2389_v58  ;;  %v2490_v57 = vld [vmem:[%s3276_s1 + $0x4b4] ss:$8 sps:$4 sm:$0xff]   ;;  %v2485_v58 = vld [vmem:[%s3276_s1 + $0x5c0] ss:$8 sps:$4 sm:$0xff]  }
  0x7f   : > { %1730 = vmatprep.subr.bf16.mxu1 %v2397_v59  ;;  %v2493_v59 = vld [vmem:[%s3276_s1 + $0x5b4] ss:$8 sps:$4 sm:$0xff]  }
  0x81   : > { %1688 = vmatpush2.bf16.msra.mxu0 %v2392_v60  ;;  %v2488_v60 = vld [vmem:[%s3276_s1 + $0x4b0] ss:$8 sps:$4 sm:$0xff]  }
  0x82   : > { %1689 = vmatprep.subr.bf16.mxu0 %v2400_v61  ;;  %1731 = vmatpush2.bf16.msra.mxu1 %v2395_v62  ;;  %v2496_v61 = vld [vmem:[%s3276_s1 + $0x4a4] ss:$8 sps:$4 sm:$0xff]   ;;  %v2491_v62 = vld [vmem:[%s3276_s1 + $0x5b0] ss:$8 sps:$4 sm:$0xff]  }
  0x83   : > { %1732 = vmatprep.subr.bf16.mxu1 %v2403_v63  ;;  %v2499_v63 = vld [vmem:[%s3276_s1 + $0x5a4] ss:$8 sps:$4 sm:$0xff]  }
  0x85   : > { %1690 = vmatpush2.bf16.msra.mxu0 %v2398_v0  ;;  %v2494_v0 = vld [vmem:[%s3276_s1 + $0x4a0] ss:$8 sps:$4 sm:$0xff]  }
  0x86   : > { %1691 = vmatprep.subr.bf16.mxu0 %v2406_v1  ;;  %1733 = vmatpush2.bf16.msra.mxu1 %v2401_v2  ;;  %v2502_v1 = vld [vmem:[%s3276_s1 + $0x494] ss:$8 sps:$4 sm:$0xff]   ;;  %v2497_v2 = vld [vmem:[%s3276_s1 + $0x5a0] ss:$8 sps:$4 sm:$0xff]  }
  0x87   : > { %1734 = vmatprep.subr.bf16.mxu1 %v2409_v3  ;;  %v2505_v3 = vld [vmem:[%s3276_s1 + $0x594] ss:$8 sps:$4 sm:$0xff]  }
  0x89   : > { %1692 = vmatpush2.bf16.msra.mxu0 %v2404_v4  ;;  %v2500_v4 = vld [vmem:[%s3276_s1 + $0x490] ss:$8 sps:$4 sm:$0xff]  }
  0x8a   : > { %1747 = vmatprep.subr.bf16.mxu0 %v2415_v5  ;;  %1735 = vmatpush2.bf16.msra.mxu1 %v2407_v6  ;;  %v2508_v5 = vld [vmem:[%s3276_s1 + $0x484] ss:$8 sps:$4 sm:$0xff]   ;;  %v2503_v6 = vld [vmem:[%s3276_s1 + $0x590] ss:$8 sps:$4 sm:$0xff]  }
  0x8b   : > { %1790 = vmatprep.subr.bf16.mxu1 %v2421_v8  ;;  %v2506_v8 = vld [vmem:[%s3276_s1 + $0x480] ss:$8 sps:$4 sm:$0xff]  }
  0x8c   : > { %1694 = vmatmul.mubr.bf16.vlgmr.msra.gmra.mxu0 %v2410_v7  ;;  %v2511_v7 = vld [vmem:[%s3276_s1 + $0x584] ss:$8 sps:$4 sm:$0xff]  }
  0x8d   : > { %1748 = vmatpush1.bf16.msra.mxu0 %v2413_v9  ;;  %1737 = vmatmul.mubr.bf16.vlgmr.msra.gmra.mxu1 %v2416_v10  ;;  %v2517_v9 = vld [vmem:[%s3276_s1 + $0x674] ss:$8 sps:$4 sm:$0xff]   ;;  %v2509_v10 = vld [vmem:[%s3276_s1 + $0x580] ss:$8 sps:$4 sm:$0xff]  }
  0x8e   : > { %1749 = vmatprep.subr.bf16.mxu0 %v2424_v11  ;;  %1791 = vmatpush1.bf16.msra.mxu1 %v2419_v12  ;;  %v2512_v11 = vld [vmem:[%s2733_s13 + $0x20] ss:$56 sps:$4 sm:$0xff]  }
  0x8f   : > { %1792 = vmatprep.subr.bf16.mxu1 %v2427_v13  ;;  %1779 = vmatprep.mubr.bf16.mxu0 %v2514_v18  ;;  %v2515_v12 = vld [vmem:[%s3276_s1 + $0x670] ss:$8 sps:$4 sm:$0xff]   ;;  %v2554_v13 = vld [vmem:[%s2733_s13 + $0x34] ss:$56 sps:$4 sm:$0xff]  }
  0x90   : > { %1822 = vmatprep.mubr.bf16.mxu1 %v2520_v22  ;;  %v2524_v18 = vld [vmem:[%s3276_s1 + $0x650] ss:$8 sps:$4 sm:$0xff]  }
  0x91   : > { %1750 = vmatpush1.bf16.msra.mxu0 %v2422_v14  ;;  %v2518_v14 = vld [vmem:[%s2733_s13 + $0x28] ss:$56 sps:$4 sm:$0xff]   ;;  %v2530_v22 = vld [vmem:[%s3276_s1 + $0x630] ss:$8 sps:$4 sm:$0xff]  }
  0x92   : > { %1751 = vmatprep.subr.bf16.mxu0 %v2430_v15  ;;  %1793 = vmatpush1.bf16.msra.mxu1 %v2425_v16  ;;  %v2523_v15 = vld [vmem:[%s3276_s1 + $0x664] ss:$8 sps:$4 sm:$0xff]   ;;  %v2521_v16 = vld [vmem:[%s3276_s1 + $0x660] ss:$8 sps:$4 sm:$0xff]  }
  0x93   : > { %1794 = vmatprep.subr.bf16.mxu1 %v2433_v17  ;;  %v2526_v17 = vld [vmem:[%s3276_s1 + $0x654] ss:$8 sps:$4 sm:$0xff]  }
  0x95   : > { %1752 = vmatpush1.bf16.msra.mxu0 %v2428_v19  ;;  %v2529_v19 = vld [vmem:[%s3276_s1 + $0x644] ss:$8 sps:$4 sm:$0xff]  }
  0x96   : > { %1753 = vmatprep.subr.bf16.mxu0 %v2436_v21  ;;  %1795 = vmatpush1.bf16.msra.mxu1 %v2431_v20  ;;  %v2527_v20 = vld [vmem:[%s3276_s1 + $0x640] ss:$8 sps:$4 sm:$0xff]   ;;  %v2532_v21 = vld [vmem:[%s3276_s1 + $0x634] ss:$8 sps:$4 sm:$0xff]  }
  0x97   : > { %1796 = vmatprep.subr.bf16.mxu1 %v2439_v23  ;;  %v2535_v23 = vld [vmem:[%s3276_s1 + $0x624] ss:$8 sps:$4 sm:$0xff]  }
  0x99   : > { %1754 = vmatpush1.bf16.msra.mxu0 %v2434_v24  ;;  %v2533_v24 = vld [vmem:[%s3276_s1 + $0x620] ss:$8 sps:$4 sm:$0xff]  }
  0x9a   : > { %1755 = vmatprep.subr.bf16.mxu0 %v2442_v25  ;;  %1797 = vmatpush1.bf16.msra.mxu1 %v2437_v26  ;;  %v2538_v25 = vld [vmem:[%s3276_s1 + $0x614] ss:$8 sps:$4 sm:$0xff]   ;;  %v2536_v26 = vld [vmem:[%s3276_s1 + $0x610] ss:$8 sps:$4 sm:$0xff]  }
  0x9b   : > { %1798 = vmatprep.subr.bf16.mxu1 %v2445_v27  ;;  %v2541_v27 = vld [vmem:[%s3276_s1 + $0x604] ss:$8 sps:$4 sm:$0xff]  }
  0x9d   : > { %1756 = vmatpush1.bf16.msra.mxu0 %v2440_v28  ;;  %v2539_v28 = vld [vmem:[%s3276_s1 + $0x600] ss:$8 sps:$4 sm:$0xff]  }
  0x9e   : > { %1757 = vmatprep.subr.bf16.mxu0 %v2448_v29  ;;  %1799 = vmatpush1.bf16.msra.mxu1 %v2443_v30  ;;  %v2544_v29 = vld [vmem:[%s3276_s1 + $0x6b4] ss:$8 sps:$4 sm:$0xff]   ;;  %v2542_v30 = vld [vmem:[%s3276_s1 + $0x6b0] ss:$8 sps:$4 sm:$0xff]  }
  0x9f   : > { %1800 = vmatprep.subr.bf16.mxu1 %v2451_v31  ;;  %v2547_v31 = vld [vmem:[%s3276_s1 + $0x6a4] ss:$8 sps:$4 sm:$0xff]  }
  0xa1   : > { %1758 = vmatpush1.bf16.msra.mxu0 %v2446_v32  ;;  %v2545_v32 = vld [vmem:[%s3276_s1 + $0x6a0] ss:$8 sps:$4 sm:$0xff]  }
  0xa2   : > { %1759 = vmatprep.subr.bf16.mxu0 %v2454_v33  ;;  %1801 = vmatpush1.bf16.msra.mxu1 %v2449_v34  ;;  %v2550_v33 = vld [vmem:[%s3276_s1 + $0x694] ss:$8 sps:$4 sm:$0xff]   ;;  %v2548_v34 = vld [vmem:[%s3276_s1 + $0x690] ss:$8 sps:$4 sm:$0xff]  }
  0xa3   : > { %1802 = vmatprep.subr.bf16.mxu1 %v2457_v35  ;;  %v2553_v35 = vld [vmem:[%s3276_s1 + $0x684] ss:$8 sps:$4 sm:$0xff]  }
  0xa5   : > { %1760 = vmatpush1.bf16.msra.mxu0 %v2452_v36  ;;  %v2551_v36 = vld [vmem:[%s3276_s1 + $0x680] ss:$8 sps:$4 sm:$0xff]  }
  0xa6   : > { %1761 = vmatprep.subr.bf16.mxu0 %v2460_v37  ;;  %1803 = vmatpush1.bf16.msra.mxu1 %v2455_v38  ;;  %v2556_v37 = vld [vmem:[%s2733_s13 + $0x30] ss:$56 sps:$4 sm:$0xff]   ;;  %s2200_s13 = sshll.u32 %s3280_s22, 3 }
  0xa7   : > { %1804 = vmatprep.subr.bf16.mxu1 %v2463_v39  ;;  %s177_s18 = scalar_lea.vmem %s3278_s3, %s2200_s13 }
  0xa9   : > { %1762 = vmatpush1.bf16.msra.mxu0 %v2458_v40 }
  0xaa   : > { %1763 = vmatprep.subr.bf16.mxu0 %v2466_v41  ;;  %1805 = vmatpush1.bf16.msra.mxu1 %v2461_v42 }
  0xab   : > { %1806 = vmatprep.subr.bf16.mxu1 %v2469_v43  ;;  %v412_v43 = vlaneseq }
  0xad   : > { %1764 = vmatpush2.bf16.msra.mxu0 %v2464_v44 }
  0xae   : > { %1765 = vmatprep.subr.bf16.mxu0 %v2472_v45  ;;  %1807 = vmatpush2.bf16.msra.mxu1 %v2467_v46  ;;  %v413_v46 = vshrl.u32 %v412_v43, 7 }
  0xaf   : > { %1808 = vmatprep.subr.bf16.mxu1 %v2475_v47 }
  0xb1   : > { %1766 = vmatpush2.bf16.msra.mxu0 %v2470_v48 }
  0xb2   : > { %1767 = vmatprep.subr.bf16.mxu0 %v2478_v49  ;;  %1809 = vmatpush2.bf16.msra.mxu1 %v2473_v50  ;;  %v414_v49 = vsub.s32 0, %v413_v46  ;;  %v410_v50 = vld [vmem:[%s3277_s2] sm:$0x3] }
  0xb3   : > { %1810 = vmatprep.subr.bf16.mxu1 %v2481_v51 }
  0xb5   : > { %1768 = vmatpush2.bf16.msra.mxu0 %v2476_v52 }
  0xb6   : > { %1769 = vmatprep.subr.bf16.mxu0 %v2484_v53  ;;  %1811 = vmatpush2.bf16.msra.mxu1 %v2479_v54  ;;  %v418_v53 = vsub.s32 1, %v413_v46  ;;  %v415_v54 = vrot.slane %v410_v50, %v414_v49 }
  0xb7   : > { %1812 = vmatprep.subr.bf16.mxu1 %v2487_v55 }
  0xb9   : > { %1770 = vmatpush2.bf16.msra.mxu0 %v2482_v56 }
  0xba   : > { %1771 = vmatprep.subr.bf16.mxu0 %v2490_v57  ;;  %1813 = vmatpush2.bf16.msra.mxu1 %v2485_v58  ;;  %v419_v57 = vrot.slane %v410_v50, %v418_v53 }
  0xbb   : > { %1814 = vmatprep.subr.bf16.mxu1 %v2493_v59 }
  0xbd   : > { %1772 = vmatpush2.bf16.msra.mxu0 %v2488_v60 }
  0xbe   : > { %1773 = vmatprep.subr.bf16.mxu0 %v2496_v61  ;;  %1815 = vmatpush2.bf16.msra.mxu1 %v2491_v62 }
  0xbf   : > { %1816 = vmatprep.subr.bf16.mxu1 %v2499_v63 }
  0xc1   : > { %1774 = vmatpush2.bf16.msra.mxu0 %v2494_v0 }
  0xc2   : > { %1775 = vmatprep.subr.bf16.mxu0 %v2502_v1  ;;  %1817 = vmatpush2.bf16.msra.mxu1 %v2497_v2 }
  0xc3   : > { %1818 = vmatprep.subr.bf16.mxu1 %v2505_v3 }
  0xc5   : > { %1776 = vmatpush2.bf16.msra.mxu0 %v2500_v4 }
  0xc6   : > { %1777 = vmatprep.subr.bf16.mxu0 %v2508_v5  ;;  %1819 = vmatpush2.bf16.msra.mxu1 %v2503_v6 }
  0xc7   : > { %1820 = vmatprep.subr.bf16.mxu1 %v2511_v7 }
  0xc9   : > { %1778 = vmatpush2.bf16.msra.mxu0 %v2506_v8 }
  0xca   : > { %1833 = vmatprep.subr.bf16.mxu0 %v2517_v9  ;;  %1821 = vmatpush2.bf16.msra.mxu1 %v2509_v10 }
  0xcc   : > { %1780 = vmatmul.mubr.bf16.vlgmr.msra.gmra.mxu0 %v2512_v11 }
  0xcd   : > { %1834 = vmatpush1.bf16.msra.mxu0 %v2515_v12  ;;  %2195 = vmatprep.mubr.msk.bf16.mxu0 %vm1571_vm0, %v2554_v13 }
  0xce   : > { %1823 = vmatmul.mubr.bf16.vlgmr.msra.gmra.mxu1 %v2518_v14  ;;  %1835 = vmatprep.subr.bf16.mxu0 %v2523_v15 }
  0xd1   : > { %1836 = vmatpush1.bf16.msra.mxu0 %v2521_v16 }
  0xd2   : > { %1837 = vmatprep.subr.bf16.mxu0 %v2526_v17 }
  0xd5   : > { %1838 = vmatpush1.bf16.msra.mxu0 %v2524_v18 }
  0xd6   : > { %1839 = vmatprep.subr.bf16.mxu0 %v2529_v19 }
  0xd9   : > { %1840 = vmatpush1.bf16.msra.mxu0 %v2527_v20 }
  0xda   : > { %1841 = vmatprep.subr.bf16.mxu0 %v2532_v21 }
  0xdd   : > { %1842 = vmatpush1.bf16.msra.mxu0 %v2530_v22 }
  0xde   : > { %1843 = vmatprep.subr.bf16.mxu0 %v2535_v23 }
  0xe1   : > { %1844 = vmatpush1.bf16.msra.mxu0 %v2533_v24 }
  0xe2   : > { %1845 = vmatprep.subr.bf16.mxu0 %v2538_v25 }
  0xe5   : > { %1846 = vmatpush1.bf16.msra.mxu0 %v2536_v26 }
  0xe6   : > { %1847 = vmatprep.subr.bf16.mxu0 %v2541_v27 }
  0xe9   : > { %1848 = vmatpush1.bf16.msra.mxu0 %v2539_v28 }
  0xea   : > { %1857 = vmatprep.subr.bf16.mxu0 %v2544_v29 }
  0xed   : > { %1858 = vmatpush2.bf16.msra.mxu0 %v2542_v30 }
  0xee   : > { %1859 = vmatprep.subr.bf16.mxu0 %v2547_v31 }
  0xf1   : > { %1860 = vmatpush2.bf16.msra.mxu0 %v2545_v32 }
  0xf2   : > { %1861 = vmatprep.subr.bf16.mxu0 %v2550_v33 }
  0xf5   : > { %1862 = vmatpush2.bf16.msra.mxu0 %v2548_v34 }
  0xf6   : > { %1863 = vmatprep.subr.bf16.mxu0 %v2553_v35 }
  0xf9   : > { %1864 = vmatpush2.bf16.msra.mxu0 %v2551_v36 }
  0xfc   : > { %1866 = vmatmul.mubr.bf16.vlgmr.msra.gmra.mxu0 %v2556_v37 }
 0x10c   : > { %v1609_v38 = vpop.f32.mrf.mxu0 }
 0x10d   : > { %v1652_v40 = vpop.f32.mrf.mxu1  ;;  %v1610_v58 = vadd.f32 %v1609_v38, %v415_v54 }
 0x10e   : > { %v1611_v39 = vpop.f32.mrf.mxu0 }
 0x10f   : > { %v1654_v42 = vpop.f32.mrf.mxu1  ;;  %v1612_v61 = vadd.f32 %v1611_v39, %v419_v57  ;;  %v1653_v63 = vadd.f32 %v1652_v40, %v1610_v58 }
 0x110   : > { %v1613_v41 = vpop.f32.mrf.mxu0 }
 0x111   : > { %v1656_v45 = vpop.f32.mrf.mxu1  ;;  %v1614_v0 = vadd.f32 %v1613_v41, %v415_v54  ;;  %v1655_v2 = vadd.f32 %v1654_v42, %v1612_v61 }
 0x112   : > { %v1615_v44 = vpop.f32.mrf.mxu0 }
 0x113   : > { %v1658_v48 = vpop.f32.mrf.mxu1  ;;  %v1616_v3 = vadd.f32 %v1615_v44, %v419_v57  ;;  %v1657_v7 = vadd.f32 %v1656_v45, %v1614_v0 }
 0x115   : > { %v1659_v9 = vadd.f32 %v1658_v48, %v1616_v3 }
 0x14c   : > { %v1695_v47 = vpop.f32.mrf.mxu0 }
 0x14d   : > { %v1738_v52 = vpop.f32.mrf.mxu1  ;;  %v1696_v4 = vadd.f32 %v1695_v47, %v1653_v63 }
 0x14e   : > { %v1697_v51 = vpop.f32.mrf.mxu0 }
 0x14f   : > { %v1740_v56 = vpop.f32.mrf.mxu1  ;;  %v1698_v8 = vadd.f32 %v1697_v51, %v1655_v2  ;;  %v1739_v10 = vadd.f32 %v1738_v52, %v1696_v4 }
 0x150   : > { %v1699_v55 = vpop.f32.mrf.mxu0 }
 0x151   : > { %v1742_v60 = vpop.f32.mrf.mxu1  ;;  %v1700_v11 = vadd.f32 %v1699_v55, %v1657_v7  ;;  %v1741_v14 = vadd.f32 %v1740_v56, %v1698_v8 }
 0x152   : > { %v1701_v59 = vpop.f32.mrf.mxu0 }
 0x153   : > { %v1744_v1 = vpop.f32.mrf.mxu1  ;;  %v1702_v15 = vadd.f32 %v1701_v59, %v1659_v9  ;;  %v1743_v17 = vadd.f32 %v1742_v60, %v1700_v11 }
 0x155   : > { %v1745_v21 = vadd.f32 %v1744_v1, %v1702_v15 }
 0x18c   : > { %v1781_v62 = vpop.f32.mrf.mxu0 }
 0x18d   : > { %v1782_v16 = vadd.f32 %v1781_v62, %v1739_v10 }
 0x18e   : > { %v1783_v5 = vpop.f32.mrf.mxu0  ;;  %v1824_v6 = vpop.f32.mrf.mxu1 }
 0x18f   : > { %v1784_v18 = vadd.f32 %v1783_v5, %v1741_v14  ;;  %v1825_v22 = vadd.f32 %v1824_v6, %v1782_v16 }
 0x190   : > { %v1785_v12 = vpop.f32.mrf.mxu0  ;;  %v1826_v13 = vpop.f32.mrf.mxu1 }
 0x191   : > { %v1786_v23 = vadd.f32 %v1785_v12, %v1743_v17  ;;  %v1827_v25 = vadd.f32 %v1826_v13, %v1784_v18 }
 0x192   : > { %v1787_v19 = vpop.f32.mrf.mxu0  ;;  %v1828_v20 = vpop.f32.mrf.mxu1 }
 0x193   : > { %v1788_v26 = vadd.f32 %v1787_v19, %v1745_v21  ;;  %v1829_v30 = vadd.f32 %v1828_v20, %v1786_v23 }
 0x194   : > { %v1830_v28 = vpop.f32.mrf.mxu1 }
 0x195   : > { %v1831_v33 = vadd.f32 %v1830_v28, %v1788_v26 }
 0x1bc   : > { %v1867_v24 = vpop.f32.mrf.mxu0 }
 0x1bd   : > { %v1868_v27 = vadd.f32 %v1867_v24, %v1825_v22 }
 0x1be   : > { %v1869_v29 = vpop.f32.mrf.mxu0 }
 0x1bf   : > { %v1870_v31 = vadd.f32 %v1869_v29, %v1827_v25  ;;  %v1876_v34 = vmax.f32 %v1868_v27, 0.0 }
 0x1c0   : > { %v1871_v32 = vpop.f32.mrf.mxu0 }
 0x1c1   : > { %v1877_v35 = vmax.f32 %v1870_v31, 0.0  ;;  %v1872_v36 = vadd.f32 %v1871_v32, %v1829_v30 }
 0x1c2   : > { %v1873_v37 = vpop.f32.mrf.mxu0 }
 0x1c3   : > { %v2201_v38 = vpack.c.bf16 %v1877_v35, %v1876_v34  ;;  %v1874_v39 = vadd.f32 %v1873_v37, %v1831_v33  ;;  %v1878_v40 = vmax.f32 %v1872_v36, 0.0 }
 0x1c5   : > { %1895 = vst.msk [vmem:[%s177_s18] sm:$0xff] %vm1894_vm3, %v2201_v38  ;;  %v1879_v41 = vmax.f32 %v1874_v39, 0.0 }
 0x1c7   : > { %v2202_v42 = vpack.c.bf16 %v1879_v41, %v1878_v40 }
 0x1c9   : > { %1896 = vst.msk [vmem:[%s177_s18 + $0x8] sm:$0xff] %vm1894_vm3, %v2202_v42 }
 0x1ca PF: > { %s13_s12 = sadd.s32 1, %s2563_s12  }
 0x1cb   : > { %p10_p4 = scmp.ge.s32.totalorder %s13_s12, 4  }
 0x1cd   :  { %12 = sbr.rel (!%p10_p4) target bundleno = 1 (0x1), region = 62 }

// kernel: allconvnet_forward.13
= control target key start
LH: loop header
LB: loop body
LE: loop exit
PB: predicated region body
PF: predicated region fallthrough
CT: control target
= control target key end

     0   :  { %s4055_s0 = inlined_call_operand.vmem [shape: bf16[32,1728], index: 0, kind: input, shape index: {}]   ;;  %s4056_s1 = inlined_call_operand.vmem [shape: bf16[1728,192], index: 1, kind: input, shape index: {}]   ;;  %s4057_s2 = inlined_call_operand.vmem [shape: f32[1,192], index: 2, kind: input, shape index: {}]   ;;  %s4058_s3 = inlined_call_operand.vmem [shape: bf16[192,192], index: 3, kind: input, shape index: {}]   ;;  %s4059_s4 = inlined_call_operand.vmem [shape: f32[1,192], index: 4, kind: input, shape index: {}]   ;;  %s4060_s5 = inlined_call_operand.vmem [shape: bf16[192,10], index: 5, kind: input, shape index: {}]   ;;  %s4061_s6 = inlined_call_operand.vmem [shape: f32[1,10], index: 6, kind: input, shape index: {}]   ;;  %s4062_s7 = inlined_call_operand.hbm [shape: f32[2,10], index: 7, kind: output, shape index: {}]  }
   0x1   :  { %v2637_v0 = vld [vmem:[%s4056_s1 + $0x74] ss:$8 sps:$4 sm:$0xff]   ;;  %v2639_v1 = vld [vmem:[%s4056_s1 + $0x70] ss:$8 sps:$4 sm:$0xff]   ;;  %v2643_v4 = vld [vmem:[%s4056_s1 + $0x64] ss:$8 sps:$4 sm:$0xff]  }
   0x2   :  { %1509 = vmatprep.subr.bf16.mxu0 %v2637_v0  ;;  %v2640_v2 = vld [vmem:[%s4056_s1 + $0x174] ss:$8 sps:$4 sm:$0xff]   ;;  %v2642_v3 = vld [vmem:[%s4056_s1 + $0x170] ss:$8 sps:$4 sm:$0xff]   ;;  %v2645_v5 = vld [vmem:[%s4056_s1 + $0x60] ss:$8 sps:$4 sm:$0xff]  }
   0x3   :  { %1510 = vmatpush1.bf16.msra.mxu0 %v2639_v1  ;;  %1562 = vmatprep.subr.bf16.mxu1 %v2640_v2  ;;  %v2646_v6 = vld [vmem:[%s4056_s1 + $0x164] ss:$8 sps:$4 sm:$0xff]   ;;  %v2648_v7 = vld [vmem:[%s4056_s1 + $0x160] ss:$8 sps:$4 sm:$0xff]   ;;  %v2649_v8 = vld [vmem:[%s4056_s1 + $0x54] ss:$8 sps:$4 sm:$0xff]  }
   0x4   :  { %1563 = vmatpush1.bf16.msra.mxu1 %v2642_v3  ;;  %1511 = vmatprep.subr.bf16.mxu0 %v2643_v4  ;;  %v2651_v9 = vld [vmem:[%s4056_s1 + $0x50] ss:$8 sps:$4 sm:$0xff]   ;;  %v2652_v10 = vld [vmem:[%s4056_s1 + $0x154] ss:$8 sps:$4 sm:$0xff]   ;;  %v2655_v11 = vld [vmem:[%s4056_s1 + $0x44] ss:$8 sps:$4 sm:$0xff]  }
   0x5   :  { %1564 = vmatprep.subr.bf16.mxu1 %v2646_v6  ;;  %v2654_v12 = vld [vmem:[%s4056_s1 + $0x150] ss:$8 sps:$4 sm:$0xff]   ;;  %v2658_v13 = vld [vmem:[%s4056_s1 + $0x144] ss:$8 sps:$4 sm:$0xff]   ;;  %v2657_v14 = vld [vmem:[%s4056_s1 + $0x40] ss:$8 sps:$4 sm:$0xff]  }
   0x6   :  { %v2661_v15 = vld [vmem:[%s4056_s1 + $0x34] ss:$8 sps:$4 sm:$0xff]   ;;  %v2660_v16 = vld [vmem:[%s4056_s1 + $0x140] ss:$8 sps:$4 sm:$0xff]   ;;  %v2663_v18 = vld [vmem:[%s4056_s1 + $0x30] ss:$8 sps:$4 sm:$0xff]  }
   0x7   :  { %1512 = vmatpush1.bf16.msra.mxu0 %v2645_v5  ;;  %v2664_v17 = vld [vmem:[%s4056_s1 + $0x134] ss:$8 sps:$4 sm:$0xff]   ;;  %v2667_v19 = vld [vmem:[%s4056_s1 + $0x24] ss:$8 sps:$4 sm:$0xff]   ;;  %v2666_v20 = vld [vmem:[%s4056_s1 + $0x130] ss:$8 sps:$4 sm:$0xff]  }
   0x8   :  { %1513 = vmatprep.subr.bf16.mxu0 %v2649_v8  ;;  %1565 = vmatpush1.bf16.msra.mxu1 %v2648_v7  ;;  %v2670_v21 = vld [vmem:[%s4056_s1 + $0x124] ss:$8 sps:$4 sm:$0xff]   ;;  %v2669_v22 = vld [vmem:[%s4056_s1 + $0x20] ss:$8 sps:$4 sm:$0xff]   ;;  %v2673_v23 = vld [vmem:[%s4056_s1 + $0x14] ss:$8 sps:$4 sm:$0xff]  }
   0x9   :  { %1566 = vmatprep.subr.bf16.mxu1 %v2652_v10  ;;  %v2672_v24 = vld [vmem:[%s4056_s1 + $0x120] ss:$8 sps:$4 sm:$0xff]   ;;  %v2676_v25 = vld [vmem:[%s4056_s1 + $0x114] ss:$8 sps:$4 sm:$0xff]   ;;  %v2675_v26 = vld [vmem:[%s4056_s1 + $0x10] ss:$8 sps:$4 sm:$0xff]  }
   0xa   :  { %v2679_v27 = vld [vmem:[%s4056_s1 + $0x4] ss:$8 sps:$4 sm:$0xff]   ;;  %v2678_v28 = vld [vmem:[%s4056_s1 + $0x110] ss:$8 sps:$4 sm:$0xff]   ;;  %v2681_v30 = vld [vmem:[%s4056_s1] ss:$8 sps:$4 sm:$0xff]  }
   0xb   :  { %1514 = vmatpush1.bf16.msra.mxu0 %v2651_v9  ;;  %v2682_v29 = vld [vmem:[%s4056_s1 + $0x104] ss:$8 sps:$4 sm:$0xff]   ;;  %v2685_v31 = vld [vmem:[%s4056_s1 + $0xf4] ss:$8 sps:$4 sm:$0xff]   ;;  %v2684_v32 = vld [vmem:[%s4056_s1 + $0x100] ss:$8 sps:$4 sm:$0xff]  }
   0xc   :  { %1515 = vmatprep.subr.bf16.mxu0 %v2655_v11  ;;  %1567 = vmatpush1.bf16.msra.mxu1 %v2654_v12  ;;  %v2688_v33 = vld [vmem:[%s4056_s1 + $0x1f4] ss:$8 sps:$4 sm:$0xff]   ;;  %v2687_v34 = vld [vmem:[%s4056_s1 + $0xf0] ss:$8 sps:$4 sm:$0xff]   ;;  %v2691_v35 = vld [vmem:[%s4056_s1 + $0xe4] ss:$8 sps:$4 sm:$0xff]  }
   0xd   :  { %1568 = vmatprep.subr.bf16.mxu1 %v2658_v13  ;;  %v2690_v36 = vld [vmem:[%s4056_s1 + $0x1f0] ss:$8 sps:$4 sm:$0xff]   ;;  %v2694_v37 = vld [vmem:[%s4056_s1 + $0x1e4] ss:$8 sps:$4 sm:$0xff]   ;;  %v2693_v38 = vld [vmem:[%s4056_s1 + $0xe0] ss:$8 sps:$4 sm:$0xff]  }
   0xe   :  { %v2697_v39 = vld [vmem:[%s4056_s1 + $0xd4] ss:$8 sps:$4 sm:$0xff]   ;;  %v2696_v40 = vld [vmem:[%s4056_s1 + $0x1e0] ss:$8 sps:$4 sm:$0xff]   ;;  %v2699_v42 = vld [vmem:[%s4056_s1 + $0xd0] ss:$8 sps:$4 sm:$0xff]  }
   0xf   :  { %1516 = vmatpush1.bf16.msra.mxu0 %v2657_v14  ;;  %v2700_v41 = vld [vmem:[%s4056_s1 + $0x1d4] ss:$8 sps:$4 sm:$0xff]   ;;  %v2703_v43 = vld [vmem:[%s4056_s1 + $0xc4] ss:$8 sps:$4 sm:$0xff]   ;;  %v2702_v44 = vld [vmem:[%s4056_s1 + $0x1d0] ss:$8 sps:$4 sm:$0xff]  }
  0x10   :  { %1517 = vmatprep.subr.bf16.mxu0 %v2661_v15  ;;  %1569 = vmatpush1.bf16.msra.mxu1 %v2660_v16  ;;  %v2706_v45 = vld [vmem:[%s4056_s1 + $0x1c4] ss:$8 sps:$4 sm:$0xff]   ;;  %v2705_v46 = vld [vmem:[%s4056_s1 + $0xc0] ss:$8 sps:$4 sm:$0xff]   ;;  %v2709_v48 = vld [vmem:[%s4056_s1 + $0xb4] ss:$8 sps:$4 sm:$0xff]  }
  0x11   :  { %1570 = vmatprep.subr.bf16.mxu1 %v2664_v17  ;;  %v2734_v47 = vld [vmem:[%s4055_s0 + $0x4] ss:$56 sps:$4 sm:$0xff]   ;;  %v2708_v49 = vld [vmem:[%s4056_s1 + $0x1c0] ss:$8 sps:$4 sm:$0xff]   ;;  %v2711_v52 = vld [vmem:[%s4056_s1 + $0xb0] ss:$8 sps:$4 sm:$0xff]  }
  0x12   :  { %1541 = vmatprep.mubr.bf16.mxu0 %v2734_v47  ;;  %v2712_v50 = vld [vmem:[%s4056_s1 + $0x1b4] ss:$8 sps:$4 sm:$0xff]   ;;  %v2741_v51 = vld [vmem:[%s4055_s0 + $0xc] ss:$56 sps:$4 sm:$0xff]   ;;  %v2714_v54 = vld [vmem:[%s4056_s1 + $0x1b0] ss:$8 sps:$4 sm:$0xff]  }
  0x13   :  { %1518 = vmatpush1.bf16.msra.mxu0 %v2663_v18  ;;  %v2715_v53 = vld [vmem:[%s4056_s1 + $0xa4] ss:$8 sps:$4 sm:$0xff]   ;;  %1594 = vmatprep.mubr.bf16.mxu1 %v2741_v51  ;;  %v2717_v56 = vld [vmem:[%s4056_s1 + $0xa0] ss:$8 sps:$4 sm:$0xff]   ;;  %v2721_v57 = vld [vmem:[%s4056_s1 + $0x94] ss:$8 sps:$4 sm:$0xff]  }
  0x14   :  { %1519 = vmatprep.subr.bf16.mxu0 %v2667_v19  ;;  %1571 = vmatpush1.bf16.msra.mxu1 %v2666_v20  ;;  %v2718_v55 = vld [vmem:[%s4056_s1 + $0x1a4] ss:$8 sps:$4 sm:$0xff]   ;;  %v2720_v58 = vld [vmem:[%s4056_s1 + $0x1a0] ss:$8 sps:$4 sm:$0xff]   ;;  %v2724_v59 = vld [vmem:[%s4056_s1 + $0x194] ss:$8 sps:$4 sm:$0xff]  }
  0x15   :  { %1572 = vmatprep.subr.bf16.mxu1 %v2670_v21  ;;  %v2723_v60 = vld [vmem:[%s4056_s1 + $0x90] ss:$8 sps:$4 sm:$0xff]   ;;  %v2727_v61 = vld [vmem:[%s4056_s1 + $0x84] ss:$8 sps:$4 sm:$0xff]   ;;  %v2729_v0 = vld [vmem:[%s4056_s1 + $0x80] ss:$8 sps:$4 sm:$0xff]  }
  0x16   :  { %v2726_v62 = vld [vmem:[%s4056_s1 + $0x190] ss:$8 sps:$4 sm:$0xff]   ;;  %v2730_v63 = vld [vmem:[%s4056_s1 + $0x184] ss:$8 sps:$4 sm:$0xff]   ;;  %v2738_v1 = vld [vmem:[%s4056_s1 + $0x274] ss:$8 sps:$4 sm:$0xff]  }
  0x17   :  { %1520 = vmatpush1.bf16.msra.mxu0 %v2669_v22  ;;  %v2735_v2 = vld [vmem:[%s4056_s1 + $0x180] ss:$8 sps:$4 sm:$0xff]   ;;  %v2744_v4 = vld [vmem:[%s4056_s1 + $0x374] ss:$8 sps:$4 sm:$0xff]   ;;  %v2736_v5 = vld [vmem:[%s4056_s1 + $0x270] ss:$8 sps:$4 sm:$0xff]  }
  0x18   :  { %1521 = vmatprep.subr.bf16.mxu0 %v2673_v23  ;;  %1573 = vmatpush1.bf16.msra.mxu1 %v2672_v24  ;;  %v2732_v3 = vld [vmem:[%s4055_s0] ss:$56 sps:$4 sm:$0xff]   ;;  %v2747_v7 = vld [vmem:[%s4056_s1 + $0x264] ss:$8 sps:$4 sm:$0xff]   ;;  %v2753_v11 = vld [vmem:[%s4056_s1 + $0x254] ss:$8 sps:$4 sm:$0xff]  }
  0x19   :  { %1574 = vmatprep.subr.bf16.mxu1 %v2676_v25  ;;  %v2739_v6 = vld [vmem:[%s4055_s0 + $0x8] ss:$56 sps:$4 sm:$0xff]   ;;  %v2742_v8 = vld [vmem:[%s4056_s1 + $0x370] ss:$8 sps:$4 sm:$0xff]   ;;  %v2750_v9 = vld [vmem:[%s4056_s1 + $0x364] ss:$8 sps:$4 sm:$0xff]  }
  0x1a   :  { %v2745_v10 = vld [vmem:[%s4056_s1 + $0x260] ss:$8 sps:$4 sm:$0xff]   ;;  %v2756_v13 = vld [vmem:[%s4056_s1 + $0x354] ss:$8 sps:$4 sm:$0xff]   ;;  %v2751_v14 = vld [vmem:[%s4056_s1 + $0x250] ss:$8 sps:$4 sm:$0xff]  }
  0x1b   :  { %1522 = vmatpush1.bf16.msra.mxu0 %v2675_v26  ;;  %v2748_v12 = vld [vmem:[%s4056_s1 + $0x360] ss:$8 sps:$4 sm:$0xff]   ;;  %v2759_v15 = vld [vmem:[%s4056_s1 + $0x244] ss:$8 sps:$4 sm:$0xff]   ;;  %v2754_v16 = vld [vmem:[%s4056_s1 + $0x350] ss:$8 sps:$4 sm:$0xff]  }
  0x1c   :  { %1523 = vmatprep.subr.bf16.mxu0 %v2679_v27  ;;  %1575 = vmatpush1.bf16.msra.mxu1 %v2678_v28  ;;  %v2762_v17 = vld [vmem:[%s4056_s1 + $0x344] ss:$8 sps:$4 sm:$0xff]   ;;  %v2757_v18 = vld [vmem:[%s4056_s1 + $0x240] ss:$8 sps:$4 sm:$0xff]   ;;  %v2765_v19 = vld [vmem:[%s4056_s1 + $0x234] ss:$8 sps:$4 sm:$0xff]  }
  0x1d   :  { %1576 = vmatprep.subr.bf16.mxu1 %v2682_v29  ;;  %v2760_v20 = vld [vmem:[%s4056_s1 + $0x340] ss:$8 sps:$4 sm:$0xff]   ;;  %v2763_v21 = vld [vmem:[%s4056_s1 + $0x230] ss:$8 sps:$4 sm:$0xff]   ;;  %v2768_v22 = vld [vmem:[%s4056_s1 + $0x334] ss:$8 sps:$4 sm:$0xff]  }
  0x1e   :  { %v2766_v23 = vld [vmem:[%s4056_s1 + $0x330] ss:$8 sps:$4 sm:$0xff]   ;;  %v2814_v24 = vld [vmem:[%s4055_s0 + $0x74] ss:$56 sps:$4 sm:$0xff]   ;;  %v2769_v29 = vld [vmem:[%s4056_s1 + $0x220] ss:$8 sps:$4 sm:$0xff]  }
  0x1f   :  { %1524 = vmatpush1.bf16.msra.mxu0 %v2681_v30  ;;  %v2771_v25 = vld [vmem:[%s4056_s1 + $0x224] ss:$8 sps:$4 sm:$0xff]   ;;  %v2819_v27 = vld [vmem:[%s4055_s0 + $0x70] ss:$56 sps:$4 sm:$0xff]   ;;  %v2820_v28 = vld [vmem:[%s4055_s0 + $0x7c] ss:$56 sps:$4 sm:$0xff]  }
  0x20   :  { %1525 = vmatprep.subr.bf16.mxu0 %v2685_v31  ;;  %1577 = vmatpush1.bf16.msra.mxu1 %v2684_v32  ;;  %v2774_v26 = vld [vmem:[%s4056_s1 + $0x324] ss:$8 sps:$4 sm:$0xff]   ;;  %v2825_v30 = vld [vmem:[%s4055_s0 + $0x78] ss:$56 sps:$4 sm:$0xff]   ;;  %v2777_v31 = vld [vmem:[%s4056_s1 + $0x214] ss:$8 sps:$4 sm:$0xff]  }
  0x21   :  { %1578 = vmatprep.subr.bf16.mxu1 %v2688_v33  ;;  %v2772_v32 = vld [vmem:[%s4056_s1 + $0x320] ss:$8 sps:$4 sm:$0xff]   ;;  %v2780_v33 = vld [vmem:[%s4056_s1 + $0x314] ss:$8 sps:$4 sm:$0xff]   ;;  %v2798_v47 = vld [vmem:[%s4056_s1 + $0x3e4] ss:$8 sps:$4 sm:$0xff]  }
  0x22   :  { %v2804_v51 = vld [vmem:[%s4056_s1 + $0x3d4] ss:$8 sps:$4 sm:$0xff]  }
  0x23   :  { %1526 = vmatpush2.bf16.msra.mxu0 %v2687_v34  ;;  %v2775_v34 = vld [vmem:[%s4056_s1 + $0x210] ss:$8 sps:$4 sm:$0xff]  }
  0x24   :  { %1527 = vmatprep.subr.bf16.mxu0 %v2691_v35  ;;  %1579 = vmatpush2.bf16.msra.mxu1 %v2690_v36  ;;  %v2783_v35 = vld [vmem:[%s4056_s1 + $0x204] ss:$8 sps:$4 sm:$0xff]   ;;  %v2778_v36 = vld [vmem:[%s4056_s1 + $0x310] ss:$8 sps:$4 sm:$0xff]  }
  0x25   :  { %1580 = vmatprep.subr.bf16.mxu1 %v2694_v37  ;;  %v2786_v37 = vld [vmem:[%s4056_s1 + $0x304] ss:$8 sps:$4 sm:$0xff]  }
  0x27   :  { %1528 = vmatpush2.bf16.msra.mxu0 %v2693_v38  ;;  %v2781_v38 = vld [vmem:[%s4056_s1 + $0x200] ss:$8 sps:$4 sm:$0xff]  }
  0x28   :  { %1529 = vmatprep.subr.bf16.mxu0 %v2697_v39  ;;  %1581 = vmatpush2.bf16.msra.mxu1 %v2696_v40  ;;  %v2843_v39 = vld [vmem:[%s4055_s0 + $0x14] ss:$56 sps:$4 sm:$0xff]  }
  0x29   :  { %1582 = vmatprep.subr.bf16.mxu1 %v2700_v41  ;;  %v2789_v40 = vld [vmem:[%s4056_s1 + $0x2f4] ss:$8 sps:$4 sm:$0xff]   ;;  %v2784_v41 = vld [vmem:[%s4056_s1 + $0x300] ss:$8 sps:$4 sm:$0xff]  }
  0x2b   :  { %1530 = vmatpush2.bf16.msra.mxu0 %v2699_v42  ;;  %v2792_v42 = vld [vmem:[%s4056_s1 + $0x3f4] ss:$8 sps:$4 sm:$0xff]  }
  0x2c   :  { %1531 = vmatprep.subr.bf16.mxu0 %v2703_v43  ;;  %1583 = vmatpush2.bf16.msra.mxu1 %v2702_v44  ;;  %v2849_v43 = vld [vmem:[%s4055_s0 + $0x1c] ss:$56 sps:$4 sm:$0xff]   ;;  %v2787_v44 = vld [vmem:[%s4056_s1 + $0x2f0] ss:$8 sps:$4 sm:$0xff]  }
  0x2d   :  { %1584 = vmatprep.subr.bf16.mxu1 %v2706_v45  ;;  %v2795_v45 = vld [vmem:[%s4056_s1 + $0x2e4] ss:$8 sps:$4 sm:$0xff]  }
  0x2f   :  { %1532 = vmatpush2.bf16.msra.mxu0 %v2705_v46  ;;  %v2790_v46 = vld [vmem:[%s4056_s1 + $0x3f0] ss:$8 sps:$4 sm:$0xff]  }
  0x30   :  { %1533 = vmatprep.subr.bf16.mxu0 %v2709_v48  ;;  %1585 = vmatpush2.bf16.msra.mxu1 %v2708_v49  ;;  %v2793_v48 = vld [vmem:[%s4056_s1 + $0x2e0] ss:$8 sps:$4 sm:$0xff]   ;;  %v2801_v49 = vld [vmem:[%s4056_s1 + $0x2d4] ss:$8 sps:$4 sm:$0xff]  }
  0x31   :  { %1586 = vmatprep.subr.bf16.mxu1 %v2712_v50  ;;  %v2796_v50 = vld [vmem:[%s4056_s1 + $0x3e0] ss:$8 sps:$4 sm:$0xff]  }
  0x33   :  { %1534 = vmatpush2.bf16.msra.mxu0 %v2711_v52  ;;  %v2799_v52 = vld [vmem:[%s4056_s1 + $0x2d0] ss:$8 sps:$4 sm:$0xff]  }
  0x34   :  { %1535 = vmatprep.subr.bf16.mxu0 %v2715_v53  ;;  %1587 = vmatpush2.bf16.msra.mxu1 %v2714_v54  ;;  %v2807_v53 = vld [vmem:[%s4056_s1 + $0x2c4] ss:$8 sps:$4 sm:$0xff]   ;;  %v2802_v54 = vld [vmem:[%s4056_s1 + $0x3d0] ss:$8 sps:$4 sm:$0xff]  }
  0x35   :  { %1588 = vmatprep.subr.bf16.mxu1 %v2718_v55  ;;  %v2810_v55 = vld [vmem:[%s4056_s1 + $0x3c4] ss:$8 sps:$4 sm:$0xff]  }
  0x37   :  { %1536 = vmatpush2.bf16.msra.mxu0 %v2717_v56  ;;  %v2805_v56 = vld [vmem:[%s4056_s1 + $0x2c0] ss:$8 sps:$4 sm:$0xff]  }
  0x38   :  { %1537 = vmatprep.subr.bf16.mxu0 %v2721_v57  ;;  %1589 = vmatpush2.bf16.msra.mxu1 %v2720_v58  ;;  %v2813_v57 = vld [vmem:[%s4056_s1 + $0x2b4] ss:$8 sps:$4 sm:$0xff]   ;;  %v2808_v58 = vld [vmem:[%s4056_s1 + $0x3c0] ss:$8 sps:$4 sm:$0xff]  }
  0x39   :  { %1590 = vmatprep.subr.bf16.mxu1 %v2724_v59  ;;  %v2818_v59 = vld [vmem:[%s4056_s1 + $0x3b4] ss:$8 sps:$4 sm:$0xff]  }
  0x3b   :  { %1538 = vmatpush2.bf16.msra.mxu0 %v2723_v60  ;;  %v2811_v60 = vld [vmem:[%s4056_s1 + $0x2b0] ss:$8 sps:$4 sm:$0xff]  }
  0x3c   :  { %1539 = vmatprep.subr.bf16.mxu0 %v2727_v61  ;;  %1591 = vmatpush2.bf16.msra.mxu1 %v2726_v62  ;;  %v2824_v61 = vld [vmem:[%s4056_s1 + $0x2a4] ss:$8 sps:$4 sm:$0xff]   ;;  %v2816_v62 = vld [vmem:[%s4056_s1 + $0x3b0] ss:$8 sps:$4 sm:$0xff]  }
  0x3d   :  { %1592 = vmatprep.subr.bf16.mxu1 %v2730_v63  ;;  %v2828_v63 = vld [vmem:[%s4056_s1 + $0x3a4] ss:$8 sps:$4 sm:$0xff]  }
  0x3f   :  { %1540 = vmatpush2.bf16.msra.mxu0 %v2729_v0  ;;  %v2822_v0 = vld [vmem:[%s4056_s1 + $0x2a0] ss:$8 sps:$4 sm:$0xff]  }
  0x40   :  { %1615 = vmatprep.subr.bf16.mxu0 %v2738_v1  ;;  %1593 = vmatpush2.bf16.msra.mxu1 %v2735_v2  ;;  %v2831_v1 = vld [vmem:[%s4056_s1 + $0x294] ss:$8 sps:$4 sm:$0xff]   ;;  %v2826_v2 = vld [vmem:[%s4056_s1 + $0x3a0] ss:$8 sps:$4 sm:$0xff]  }
  0x41   :  { %1668 = vmatprep.subr.bf16.mxu1 %v2744_v4  ;;  %v2829_v4 = vld [vmem:[%s4056_s1 + $0x290] ss:$8 sps:$4 sm:$0xff]  }
  0x42   :  { %1542 = vmatmul.mubr.bf16.vlgmr.msra.gmra.mxu0 %v2732_v3  ;;  %v2834_v3 = vld [vmem:[%s4056_s1 + $0x394] ss:$8 sps:$4 sm:$0xff]  }
  0x43   :  { %1616 = vmatpush1.bf16.msra.mxu0 %v2736_v5  ;;  %1595 = vmatmul.mubr.bf16.vlgmr.msra.gmra.mxu1 %v2739_v6  ;;  %v2837_v5 = vld [vmem:[%s4056_s1 + $0x284] ss:$8 sps:$4 sm:$0xff]   ;;  %v2832_v6 = vld [vmem:[%s4056_s1 + $0x390] ss:$8 sps:$4 sm:$0xff]  }
  0x44   :  { %1617 = vmatprep.subr.bf16.mxu0 %v2747_v7  ;;  %1669 = vmatpush1.bf16.msra.mxu1 %v2742_v8  ;;  %v2840_v7 = vld [vmem:[%s4056_s1 + $0x384] ss:$8 sps:$4 sm:$0xff]   ;;  %v2835_v8 = vld [vmem:[%s4056_s1 + $0x280] ss:$8 sps:$4 sm:$0xff]  }
  0x45   :  { %1670 = vmatprep.subr.bf16.mxu1 %v2750_v9  ;;  %1551 = vmatprep.mubr.bf16.mxu0 %v2814_v24  ;;  %v2838_v9 = vld [vmem:[%s4056_s1 + $0x380] ss:$8 sps:$4 sm:$0xff]   ;;  %v2870_v24 = vld [vmem:[%s4056_s1 + $0x554] ss:$8 sps:$4 sm:$0xff]  }
  0x46   :  { %1604 = vmatprep.mubr.bf16.mxu1 %v2820_v28  ;;  %v2868_v28 = vld [vmem:[%s4056_s1 + $0x550] ss:$8 sps:$4 sm:$0xff]  }
  0x47   :  { %1618 = vmatpush1.bf16.msra.mxu0 %v2745_v10  ;;  %v2841_v10 = vld [vmem:[%s4055_s0 + $0x10] ss:$56 sps:$4 sm:$0xff]  }
  0x48   :  { %1619 = vmatprep.subr.bf16.mxu0 %v2753_v11  ;;  %1671 = vmatpush1.bf16.msra.mxu1 %v2748_v12  ;;  %v2846_v11 = vld [vmem:[%s4056_s1 + $0x474] ss:$8 sps:$4 sm:$0xff]   ;;  %v2844_v12 = vld [vmem:[%s4056_s1 + $0x470] ss:$8 sps:$4 sm:$0xff]  }
  0x49   :  { %1672 = vmatprep.subr.bf16.mxu1 %v2756_v13  ;;  %v2847_v13 = vld [vmem:[%s4055_s0 + $0x18] ss:$56 sps:$4 sm:$0xff]  }
  0x4a   :  { %1552 = vmatmul.mubr.bf16.gmra.mxu0 %v2819_v27  ;;  %v2873_v27 = vld [vmem:[%s4056_s1 + $0x444] ss:$8 sps:$4 sm:$0xff]  }
  0x4b   :  { %1620 = vmatpush1.bf16.msra.mxu0 %v2751_v14  ;;  %1605 = vmatmul.mubr.bf16.gmra.mxu1 %v2825_v30  ;;  %v2852_v14 = vld [vmem:[%s4056_s1 + $0x574] ss:$8 sps:$4 sm:$0xff]   ;;  %v2871_v30 = vld [vmem:[%s4056_s1 + $0x440] ss:$8 sps:$4 sm:$0xff]  }
  0x4c   :  { %1621 = vmatprep.subr.bf16.mxu0 %v2759_v15  ;;  %1673 = vmatpush1.bf16.msra.mxu1 %v2754_v16  ;;  %v2850_v15 = vld [vmem:[%s4056_s1 + $0x570] ss:$8 sps:$4 sm:$0xff]   ;;  %v2859_v16 = vld [vmem:[%s4055_s0 + $0x84] ss:$56 sps:$4 sm:$0xff]  }
  0x4d   :  { %1674 = vmatprep.subr.bf16.mxu1 %v2762_v17  ;;  %1647 = vmatprep.mubr.bf16.mxu0 %v2843_v39  ;;  %v2855_v17 = vld [vmem:[%s4056_s1 + $0x464] ss:$8 sps:$4 sm:$0xff]  }
  0x4e   :  { %1700 = vmatprep.mubr.bf16.mxu1 %v2849_v43  ;;  %v2888_v39 = vld [vmem:[%s4056_s1 + $0x524] ss:$8 sps:$4 sm:$0xff]   ;;  %v2894_v43 = vld [vmem:[%s4056_s1 + $0x514] ss:$8 sps:$4 sm:$0xff]  }
  0x4f   :  { %1622 = vmatpush1.bf16.msra.mxu0 %v2757_v18  ;;  %v2865_v18 = vld [vmem:[%s4055_s0 + $0x8c] ss:$56 sps:$4 sm:$0xff]  }
  0x50   :  { %1623 = vmatprep.subr.bf16.mxu0 %v2765_v19  ;;  %1675 = vmatpush1.bf16.msra.mxu1 %v2760_v20  ;;  %v2858_v19 = vld [vmem:[%s4056_s1 + $0x564] ss:$8 sps:$4 sm:$0xff]   ;;  %v2853_v20 = vld [vmem:[%s4056_s1 + $0x460] ss:$8 sps:$4 sm:$0xff]  }
  0x51   :  { %1676 = vmatprep.subr.bf16.mxu1 %v2768_v22  ;;  %v2856_v22 = vld [vmem:[%s4056_s1 + $0x560] ss:$8 sps:$4 sm:$0xff]  }
  0x53   :  { %1624 = vmatpush1.bf16.msra.mxu0 %v2763_v21  ;;  %v2864_v21 = vld [vmem:[%s4056_s1 + $0x454] ss:$8 sps:$4 sm:$0xff]  }
  0x54   :  { %1625 = vmatprep.subr.bf16.mxu0 %v2771_v25  ;;  %1677 = vmatpush1.bf16.msra.mxu1 %v2766_v23  ;;  %v2861_v23 = vld [vmem:[%s4055_s0 + $0x80] ss:$56 sps:$4 sm:$0xff]  }
  0x55   :  { %1678 = vmatprep.subr.bf16.mxu1 %v2774_v26  ;;  %v2862_v25 = vld [vmem:[%s4056_s1 + $0x450] ss:$8 sps:$4 sm:$0xff]   ;;  %v2867_v26 = vld [vmem:[%s4055_s0 + $0x88] ss:$56 sps:$4 sm:$0xff]  }
  0x57   :  { %1626 = vmatpush1.bf16.msra.mxu0 %v2769_v29  ;;  %v2876_v29 = vld [vmem:[%s4056_s1 + $0x544] ss:$8 sps:$4 sm:$0xff]  }
  0x58   :  { %1627 = vmatprep.subr.bf16.mxu0 %v2777_v31  ;;  %1679 = vmatpush1.bf16.msra.mxu1 %v2772_v32  ;;  %v2951_v31 = vld [vmem:[%s4055_s0 + $0x24] ss:$56 sps:$4 sm:$0xff]  }
  0x59   :  { %1680 = vmatprep.subr.bf16.mxu1 %v2780_v33  ;;  %v2879_v32 = vld [vmem:[%s4056_s1 + $0x434] ss:$8 sps:$4 sm:$0xff]   ;;  %v2874_v33 = vld [vmem:[%s4056_s1 + $0x540] ss:$8 sps:$4 sm:$0xff]  }
  0x5b   :  { %1628 = vmatpush1.bf16.msra.mxu0 %v2775_v34  ;;  %v2882_v34 = vld [vmem:[%s4056_s1 + $0x534] ss:$8 sps:$4 sm:$0xff]  }
  0x5c   :  { %1629 = vmatprep.subr.bf16.mxu0 %v2783_v35  ;;  %1681 = vmatpush1.bf16.msra.mxu1 %v2778_v36  ;;  %v2957_v35 = vld [vmem:[%s4055_s0 + $0x2c] ss:$56 sps:$4 sm:$0xff]   ;;  %v2877_v36 = vld [vmem:[%s4056_s1 + $0x430] ss:$8 sps:$4 sm:$0xff]  }
  0x5d   :  { %1682 = vmatprep.subr.bf16.mxu1 %v2786_v37  ;;  %v2885_v37 = vld [vmem:[%s4056_s1 + $0x424] ss:$8 sps:$4 sm:$0xff]  }
  0x5f   :  { %1630 = vmatpush1.bf16.msra.mxu0 %v2781_v38  ;;  %v2880_v38 = vld [vmem:[%s4056_s1 + $0x530] ss:$8 sps:$4 sm:$0xff]  }
  0x60   :  { %1631 = vmatprep.subr.bf16.mxu0 %v2789_v40  ;;  %1683 = vmatpush1.bf16.msra.mxu1 %v2784_v41  ;;  %v2883_v40 = vld [vmem:[%s4056_s1 + $0x420] ss:$8 sps:$4 sm:$0xff]   ;;  %v2891_v41 = vld [vmem:[%s4056_s1 + $0x414] ss:$8 sps:$4 sm:$0xff]  }
  0x61   :  { %1684 = vmatprep.subr.bf16.mxu1 %v2792_v42  ;;  %v2886_v42 = vld [vmem:[%s4056_s1 + $0x520] ss:$8 sps:$4 sm:$0xff]  }
  0x63   :  { %1632 = vmatpush2.bf16.msra.mxu0 %v2787_v44  ;;  %v2889_v44 = vld [vmem:[%s4056_s1 + $0x410] ss:$8 sps:$4 sm:$0xff]  }
  0x64   :  { %1633 = vmatprep.subr.bf16.mxu0 %v2795_v45  ;;  %1685 = vmatpush2.bf16.msra.mxu1 %v2790_v46  ;;  %v2897_v45 = vld [vmem:[%s4056_s1 + $0x404] ss:$8 sps:$4 sm:$0xff]   ;;  %v2892_v46 = vld [vmem:[%s4056_s1 + $0x510] ss:$8 sps:$4 sm:$0xff]  }
  0x65   :  { %1686 = vmatprep.subr.bf16.mxu1 %v2798_v47  ;;  %v2900_v47 = vld [vmem:[%s4056_s1 + $0x504] ss:$8 sps:$4 sm:$0xff]  }
  0x67   :  { %1634 = vmatpush2.bf16.msra.mxu0 %v2793_v48  ;;  %v2895_v48 = vld [vmem:[%s4056_s1 + $0x400] ss:$8 sps:$4 sm:$0xff]  }
  0x68   :  { %1635 = vmatprep.subr.bf16.mxu0 %v2801_v49  ;;  %1687 = vmatpush2.bf16.msra.mxu1 %v2796_v50  ;;  %v2903_v49 = vld [vmem:[%s4056_s1 + $0x4f4] ss:$8 sps:$4 sm:$0xff]   ;;  %v2898_v50 = vld [vmem:[%s4056_s1 + $0x500] ss:$8 sps:$4 sm:$0xff]  }
  0x69   :  { %1688 = vmatprep.subr.bf16.mxu1 %v2804_v51  ;;  %v2906_v51 = vld [vmem:[%s4056_s1 + $0x5f4] ss:$8 sps:$4 sm:$0xff]  }
  0x6b   :  { %1636 = vmatpush2.bf16.msra.mxu0 %v2799_v52  ;;  %v2901_v52 = vld [vmem:[%s4056_s1 + $0x4f0] ss:$8 sps:$4 sm:$0xff]  }
  0x6c   :  { %1637 = vmatprep.subr.bf16.mxu0 %v2807_v53  ;;  %1689 = vmatpush2.bf16.msra.mxu1 %v2802_v54  ;;  %v2909_v53 = vld [vmem:[%s4056_s1 + $0x4e4] ss:$8 sps:$4 sm:$0xff]   ;;  %v2904_v54 = vld [vmem:[%s4056_s1 + $0x5f0] ss:$8 sps:$4 sm:$0xff]  }
  0x6d   :  { %1690 = vmatprep.subr.bf16.mxu1 %v2810_v55  ;;  %v2907_v55 = vld [vmem:[%s4056_s1 + $0x4e0] ss:$8 sps:$4 sm:$0xff]  }
  0x6f   :  { %1638 = vmatpush2.bf16.msra.mxu0 %v2805_v56  ;;  %v2912_v56 = vld [vmem:[%s4056_s1 + $0x5e4] ss:$8 sps:$4 sm:$0xff]  }
  0x70   :  { %1639 = vmatprep.subr.bf16.mxu0 %v2813_v57  ;;  %1691 = vmatpush2.bf16.msra.mxu1 %v2808_v58  ;;  %v2915_v57 = vld [vmem:[%s4056_s1 + $0x4d4] ss:$8 sps:$4 sm:$0xff]   ;;  %v2910_v58 = vld [vmem:[%s4056_s1 + $0x5e0] ss:$8 sps:$4 sm:$0xff]  }
  0x71   :  { %1692 = vmatprep.subr.bf16.mxu1 %v2818_v59  ;;  %v2918_v59 = vld [vmem:[%s4056_s1 + $0x5d4] ss:$8 sps:$4 sm:$0xff]  }
  0x73   :  { %1640 = vmatpush2.bf16.msra.mxu0 %v2811_v60  ;;  %v2913_v60 = vld [vmem:[%s4056_s1 + $0x4d0] ss:$8 sps:$4 sm:$0xff]  }
  0x74   :  { %1641 = vmatprep.subr.bf16.mxu0 %v2824_v61  ;;  %1693 = vmatpush2.bf16.msra.mxu1 %v2816_v62  ;;  %v2921_v61 = vld [vmem:[%s4056_s1 + $0x4c4] ss:$8 sps:$4 sm:$0xff]   ;;  %v2916_v62 = vld [vmem:[%s4056_s1 + $0x5d0] ss:$8 sps:$4 sm:$0xff]  }
  0x75   :  { %1694 = vmatprep.subr.bf16.mxu1 %v2828_v63  ;;  %v2924_v63 = vld [vmem:[%s4056_s1 + $0x5c4] ss:$8 sps:$4 sm:$0xff]  }
  0x77   :  { %1642 = vmatpush2.bf16.msra.mxu0 %v2822_v0  ;;  %v2919_v0 = vld [vmem:[%s4056_s1 + $0x4c0] ss:$8 sps:$4 sm:$0xff]  }
  0x78   :  { %1643 = vmatprep.subr.bf16.mxu0 %v2831_v1  ;;  %1695 = vmatpush2.bf16.msra.mxu1 %v2826_v2  ;;  %v2927_v1 = vld [vmem:[%s4056_s1 + $0x4b4] ss:$8 sps:$4 sm:$0xff]   ;;  %v2922_v2 = vld [vmem:[%s4056_s1 + $0x5c0] ss:$8 sps:$4 sm:$0xff]  }
  0x79   :  { %1696 = vmatprep.subr.bf16.mxu1 %v2834_v3  ;;  %v2930_v3 = vld [vmem:[%s4056_s1 + $0x5b4] ss:$8 sps:$4 sm:$0xff]  }
  0x7b   :  { %1644 = vmatpush2.bf16.msra.mxu0 %v2829_v4  ;;  %v2925_v4 = vld [vmem:[%s4056_s1 + $0x4b0] ss:$8 sps:$4 sm:$0xff]  }
  0x7c   :  { %1645 = vmatprep.subr.bf16.mxu0 %v2837_v5  ;;  %1697 = vmatpush2.bf16.msra.mxu1 %v2832_v6  ;;  %v2933_v5 = vld [vmem:[%s4056_s1 + $0x4a4] ss:$8 sps:$4 sm:$0xff]   ;;  %v2928_v6 = vld [vmem:[%s4056_s1 + $0x5b0] ss:$8 sps:$4 sm:$0xff]  }
  0x7d   :  { %1698 = vmatprep.subr.bf16.mxu1 %v2840_v7  ;;  %v2936_v7 = vld [vmem:[%s4056_s1 + $0x5a4] ss:$8 sps:$4 sm:$0xff]  }
  0x7f   :  { %1646 = vmatpush2.bf16.msra.mxu0 %v2835_v8  ;;  %v2931_v8 = vld [vmem:[%s4056_s1 + $0x4a0] ss:$8 sps:$4 sm:$0xff]  }
  0x80   :  { %1721 = vmatprep.subr.bf16.mxu0 %v2846_v11  ;;  %1699 = vmatpush2.bf16.msra.mxu1 %v2838_v9 }
  0x81   :  { %1774 = vmatprep.subr.bf16.mxu1 %v2852_v14 }
  0x82   :  { %1648 = vmatmul.mubr.bf16.vlgmr.msra.gmra.mxu0 %v2841_v10 }
  0x83   :  { %1722 = vmatpush1.bf16.msra.mxu0 %v2844_v12  ;;  %1657 = vmatprep.mubr.bf16.mxu0 %v2859_v16 }
  0x84   :  { %1701 = vmatmul.mubr.bf16.vlgmr.msra.gmra.mxu1 %v2847_v13  ;;  %1723 = vmatprep.subr.bf16.mxu0 %v2855_v17 }
  0x85   :  { %1775 = vmatpush1.bf16.msra.mxu1 %v2850_v15  ;;  %1710 = vmatprep.mubr.bf16.mxu1 %v2865_v18 }
  0x86   :  { %1776 = vmatprep.subr.bf16.mxu1 %v2858_v19 }
  0x87   :  { %1724 = vmatpush1.bf16.msra.mxu0 %v2853_v20 }
  0x88   :  { %1725 = vmatprep.subr.bf16.mxu0 %v2864_v21 }
  0x89   :  { %1777 = vmatpush1.bf16.msra.mxu1 %v2856_v22 }
  0x8a   :  { %1658 = vmatmul.mubr.bf16.gmra.mxu0 %v2861_v23  ;;  %1778 = vmatprep.subr.bf16.mxu1 %v2870_v24 }
  0x8b   :  { %1726 = vmatpush1.bf16.msra.mxu0 %v2862_v25  ;;  %1753 = vmatprep.mubr.bf16.mxu0 %v2951_v31 }
  0x8c   :  { %1711 = vmatmul.mubr.bf16.gmra.mxu1 %v2867_v26  ;;  %1727 = vmatprep.subr.bf16.mxu0 %v2873_v27 }
  0x8d   :  { %1779 = vmatpush1.bf16.msra.mxu1 %v2868_v28  ;;  %1806 = vmatprep.mubr.bf16.mxu1 %v2957_v35 }
  0x8e   :  { %1780 = vmatprep.subr.bf16.mxu1 %v2876_v29 }
  0x8f   :  { %1728 = vmatpush1.bf16.msra.mxu0 %v2871_v30 }
  0x90   :  { %1729 = vmatprep.subr.bf16.mxu0 %v2879_v32 }
  0x91   :  { %1781 = vmatpush1.bf16.msra.mxu1 %v2874_v33 }
  0x92   :  { %1782 = vmatprep.subr.bf16.mxu1 %v2882_v34 }
  0x93   :  { %1730 = vmatpush1.bf16.msra.mxu0 %v2877_v36 }
  0x94   :  { %1731 = vmatprep.subr.bf16.mxu0 %v2885_v37 }
  0x95   :  { %1783 = vmatpush1.bf16.msra.mxu1 %v2880_v38 }
  0x96   :  { %1784 = vmatprep.subr.bf16.mxu1 %v2888_v39 }
  0x97   :  { %1732 = vmatpush1.bf16.msra.mxu0 %v2883_v40 }
  0x98   :  { %1733 = vmatprep.subr.bf16.mxu0 %v2891_v41 }
  0x99   :  { %1785 = vmatpush1.bf16.msra.mxu1 %v2886_v42 }
  0x9a   :  { %1786 = vmatprep.subr.bf16.mxu1 %v2894_v43 }
  0x9b   :  { %1734 = vmatpush1.bf16.msra.mxu0 %v2889_v44 }
  0x9c   :  { %1735 = vmatprep.subr.bf16.mxu0 %v2897_v45 }
  0x9d   :  { %1787 = vmatpush1.bf16.msra.mxu1 %v2892_v46 }
  0x9e   :  { %1788 = vmatprep.subr.bf16.mxu1 %v2900_v47 }
  0x9f   :  { %1736 = vmatpush1.bf16.msra.mxu0 %v2895_v48 }
  0xa0   :  { %1737 = vmatprep.subr.bf16.mxu0 %v2903_v49 }
  0xa1   :  { %1789 = vmatpush1.bf16.msra.mxu1 %v2898_v50 }
  0xa2   :  { %1790 = vmatprep.subr.bf16.mxu1 %v2906_v51 }
  0xa3   :  { %1738 = vmatpush2.bf16.msra.mxu0 %v2901_v52 }
  0xa4   :  { %1739 = vmatprep.subr.bf16.mxu0 %v2909_v53 }
  0xa5   :  { %1791 = vmatpush2.bf16.msra.mxu1 %v2904_v54 }
  0xa6   :  { %1792 = vmatprep.subr.bf16.mxu1 %v2912_v56 }
  0xa7   :  { %1740 = vmatpush2.bf16.msra.mxu0 %v2907_v55 }
  0xa8   :  { %1741 = vmatprep.subr.bf16.mxu0 %v2915_v57 }
  0xa9   :  { %1793 = vmatpush2.bf16.msra.mxu1 %v2910_v58 }
  0xaa   :  { %1794 = vmatprep.subr.bf16.mxu1 %v2918_v59 }
  0xab   :  { %1742 = vmatpush2.bf16.msra.mxu0 %v2913_v60 }
  0xac   :  { %1743 = vmatprep.subr.bf16.mxu0 %v2921_v61 }
  0xad   :  { %1795 = vmatpush2.bf16.msra.mxu1 %v2916_v62 }
  0xae   :  { %1796 = vmatprep.subr.bf16.mxu1 %v2924_v63 }
  0xaf   :  { %1744 = vmatpush2.bf16.msra.mxu0 %v2919_v0 }
  0xb0   :  { %1745 = vmatprep.subr.bf16.mxu0 %v2927_v1 }
  0xb1   :  { %1797 = vmatpush2.bf16.msra.mxu1 %v2922_v2 }
  0xb2   :  { %1798 = vmatprep.subr.bf16.mxu1 %v2930_v3 }
  0xb3   :  { %1746 = vmatpush2.bf16.msra.mxu0 %v2925_v4 }
  0xb4   :  { %12 = vsyncpa [#allocation3], 0  ;;  %1747 = vmatprep.subr.bf16.mxu0 %v2933_v5  ;;  %v2939_v9 = vld [vmem:[%s4056_s1 + $0x494] ss:$8 sps:$4 sm:$0xff]   ;;  %v2934_v10 = vld [vmem:[%s4056_s1 + $0x5a0] ss:$8 sps:$4 sm:$0xff]  }
  0xb5   :  { %1799 = vmatpush2.bf16.msra.mxu1 %v2928_v6  ;;  %v2942_v11 = vld [vmem:[%s4056_s1 + $0x594] ss:$8 sps:$4 sm:$0xff]   ;;  %v2937_v12 = vld [vmem:[%s4056_s1 + $0x490] ss:$8 sps:$4 sm:$0xff]   ;;  %v2945_v13 = vld [vmem:[%s4056_s1 + $0x484] ss:$8 sps:$4 sm:$0xff]  }
  0xb6   :  { %1800 = vmatprep.subr.bf16.mxu1 %v2936_v7  ;;  %v2940_v14 = vld [vmem:[%s4056_s1 + $0x590] ss:$8 sps:$4 sm:$0xff]   ;;  %v2948_v15 = vld [vmem:[%s4056_s1 + $0x584] ss:$8 sps:$4 sm:$0xff]   ;;  %v2943_v16 = vld [vmem:[%s4056_s1 + $0x480] ss:$8 sps:$4 sm:$0xff]  }
  0xb7   :  { %1748 = vmatpush2.bf16.msra.mxu0 %v2931_v8  ;;  %v2954_v17 = vld [vmem:[%s4056_s1 + $0x674] ss:$8 sps:$4 sm:$0xff]   ;;  %v2946_v18 = vld [vmem:[%s4056_s1 + $0x580] ss:$8 sps:$4 sm:$0xff]   ;;  %v2952_v20 = vld [vmem:[%s4056_s1 + $0x670] ss:$8 sps:$4 sm:$0xff]  }
  0xb8   :  { %1749 = vmatprep.subr.bf16.mxu0 %v2939_v9  ;;  %v2949_v19 = vld [vmem:[%s4055_s0 + $0x20] ss:$56 sps:$4 sm:$0xff]   ;;  %v2961_v21 = vld [vmem:[%s4055_s0 + $0x94] ss:$56 sps:$4 sm:$0xff]   ;;  %v2963_v27 = vld [vmem:[%s4055_s0 + $0x90] ss:$56 sps:$4 sm:$0xff]  }
  0xb9   :  { %1801 = vmatpush2.bf16.msra.mxu1 %v2934_v10  ;;  %v2955_v22 = vld [vmem:[%s4055_s0 + $0x28] ss:$56 sps:$4 sm:$0xff]   ;;  %v2960_v23 = vld [vmem:[%s4056_s1 + $0x664] ss:$8 sps:$4 sm:$0xff]   ;;  %v2967_v24 = vld [vmem:[%s4055_s0 + $0x9c] ss:$56 sps:$4 sm:$0xff]  }
  0xba   :  { %1802 = vmatprep.subr.bf16.mxu1 %v2942_v11  ;;  %v2958_v25 = vld [vmem:[%s4056_s1 + $0x660] ss:$8 sps:$4 sm:$0xff]   ;;  %v2966_v26 = vld [vmem:[%s4056_s1 + $0x654] ss:$8 sps:$4 sm:$0xff]   ;;  %v2964_v28 = vld [vmem:[%s4056_s1 + $0x650] ss:$8 sps:$4 sm:$0xff]  }
  0xbb   :  { %1750 = vmatpush2.bf16.msra.mxu0 %v2937_v12  ;;  %v2999_v29 = vld [vmem:[%s4055_s0 + $0x34] ss:$56 sps:$4 sm:$0xff]   ;;  %v2969_v30 = vld [vmem:[%s4055_s0 + $0x98] ss:$56 sps:$4 sm:$0xff]   ;;  %vm1502_vm0 = vcmask 523264   ;;  %vm2281_vm1 = vcmask 80896  }
  0xbc   :  { %1751 = vmatprep.subr.bf16.mxu0 %v2945_v13  ;;  %v2972_v31 = vld [vmem:[%s4056_s1 + $0x644] ss:$8 sps:$4 sm:$0xff]   ;;  %v2970_v32 = vld [vmem:[%s4056_s1 + $0x640] ss:$8 sps:$4 sm:$0xff]   ;;  %v2975_v33 = vld [vmem:[%s4056_s1 + $0x634] ss:$8 sps:$4 sm:$0xff]  }
  0xbd   :  { %1803 = vmatpush2.bf16.msra.mxu1 %v2940_v14  ;;  %v2973_v34 = vld [vmem:[%s4056_s1 + $0x630] ss:$8 sps:$4 sm:$0xff]   ;;  %v2978_v35 = vld [vmem:[%s4056_s1 + $0x624] ss:$8 sps:$4 sm:$0xff]   ;;  %v2976_v36 = vld [vmem:[%s4056_s1 + $0x620] ss:$8 sps:$4 sm:$0xff]  }
  0xbe   :  { %1804 = vmatprep.subr.bf16.mxu1 %v2948_v15  ;;  %v2981_v37 = vld [vmem:[%s4056_s1 + $0x614] ss:$8 sps:$4 sm:$0xff]   ;;  %v2979_v38 = vld [vmem:[%s4056_s1 + $0x610] ss:$8 sps:$4 sm:$0xff]   ;;  %v2984_v39 = vld [vmem:[%s4056_s1 + $0x604] ss:$8 sps:$4 sm:$0xff]  }
  0xbf   :  { %1752 = vmatpush2.bf16.msra.mxu0 %v2943_v16  ;;  %v2982_v40 = vld [vmem:[%s4056_s1 + $0x600] ss:$8 sps:$4 sm:$0xff]   ;;  %v2987_v41 = vld [vmem:[%s4056_s1 + $0x6b4] ss:$8 sps:$4 sm:$0xff]   ;;  %v2985_v42 = vld [vmem:[%s4056_s1 + $0x6b0] ss:$8 sps:$4 sm:$0xff]  }
  0xc0   :  { %1827 = vmatprep.subr.bf16.mxu0 %v2954_v17  ;;  %v2990_v43 = vld [vmem:[%s4056_s1 + $0x6a4] ss:$8 sps:$4 sm:$0xff]   ;;  %v2988_v44 = vld [vmem:[%s4056_s1 + $0x6a0] ss:$8 sps:$4 sm:$0xff]   ;;  %v2993_v45 = vld [vmem:[%s4056_s1 + $0x694] ss:$8 sps:$4 sm:$0xff]  }
  0xc1   :  { %1805 = vmatpush2.bf16.msra.mxu1 %v2946_v18  ;;  %v2991_v46 = vld [vmem:[%s4056_s1 + $0x690] ss:$8 sps:$4 sm:$0xff]   ;;  %v2996_v47 = vld [vmem:[%s4056_s1 + $0x684] ss:$8 sps:$4 sm:$0xff]   ;;  %v2994_v48 = vld [vmem:[%s4056_s1 + $0x680] ss:$8 sps:$4 sm:$0xff]  }
  0xc2   :  { %1754 = vmatmul.mubr.bf16.vlgmr.msra.gmra.mxu0 %v2949_v19  ;;  %v2997_v49 = vld [vmem:[%s4055_s0 + $0x30] ss:$56 sps:$4 sm:$0xff]   ;;  %v3000_v50 = vld [vmem:[%s4055_s0 + $0xa4] ss:$56 sps:$4 sm:$0xff]   ;;  %v3002_v51 = vld [vmem:[%s4055_s0 + $0xa0] ss:$56 sps:$4 sm:$0xff]  }
  0xc3   :  { %1828 = vmatpush1.bf16.msra.mxu0 %v2952_v20  ;;  %1763 = vmatprep.mubr.bf16.mxu0 %v2961_v21  ;;  %v3005_v52 = vld [vmem:[%s4058_s3 + $0x74] ss:$8 sps:$4 sm:$0xff]   ;;  %v3003_v53 = vld [vmem:[%s4058_s3 + $0x70] ss:$8 sps:$4 sm:$0xff]   ;;  %v3008_v54 = vld [vmem:[%s4058_s3 + $0x64] ss:$8 sps:$4 sm:$0xff]  }
  0xc4   :  { %1807 = vmatmul.mubr.bf16.vlgmr.msra.gmra.mxu1 %v2955_v22  ;;  %1829 = vmatprep.subr.bf16.mxu0 %v2960_v23  ;;  %v3006_v55 = vld [vmem:[%s4058_s3 + $0x60] ss:$8 sps:$4 sm:$0xff]   ;;  %v3011_v56 = vld [vmem:[%s4058_s3 + $0x54] ss:$8 sps:$4 sm:$0xff]   ;;  %v3009_v57 = vld [vmem:[%s4058_s3 + $0x50] ss:$8 sps:$4 sm:$0xff]  }
  0xc5   :  { %1816 = vmatprep.mubr.bf16.mxu1 %v2967_v24  ;;  %2054 = vmatprep.subr.bf16.mxu1 %v3005_v52  ;;  %v3014_v58 = vld [vmem:[%s4058_s3 + $0x44] ss:$8 sps:$4 sm:$0xff]   ;;  %v3012_v59 = vld [vmem:[%s4058_s3 + $0x40] ss:$8 sps:$4 sm:$0xff]   ;;  %v3017_v60 = vld [vmem:[%s4058_s3 + $0x34] ss:$8 sps:$4 sm:$0xff]   ;;  %v274_v52 = vlaneseq }
  0xc6   :  { %2055 = vmatpush1.bf16.msra.mxu1 %v3003_v53  ;;  %v3015_v61 = vld [vmem:[%s4058_s3 + $0x30] ss:$8 sps:$4 sm:$0xff]   ;;  %v3020_v62 = vld [vmem:[%s4058_s3 + $0x24] ss:$8 sps:$4 sm:$0xff]   ;;  %v3018_v63 = vld [vmem:[%s4058_s3 + $0x20] ss:$8 sps:$4 sm:$0xff]  }
  0xc7   :  { %1830 = vmatpush1.bf16.msra.mxu0 %v2958_v25  ;;  %2056 = vmatprep.subr.bf16.mxu1 %v3008_v54  ;;  %v3023_v0 = vld [vmem:[%s4058_s3 + $0x14] ss:$8 sps:$4 sm:$0xff]   ;;  %v3021_v1 = vld [vmem:[%s4058_s3 + $0x10] ss:$8 sps:$4 sm:$0xff]   ;;  %v3026_v2 = vld [vmem:[%s4058_s3 + $0x4] ss:$8 sps:$4 sm:$0xff]  }
  0xc8   :  { %1831 = vmatprep.subr.bf16.mxu0 %v2966_v26  ;;  %v3024_v3 = vld [vmem:[%s4058_s3] ss:$8 sps:$4 sm:$0xff]   ;;  %v3029_v4 = vld [vmem:[%s4058_s3 + $0xb4] ss:$8 sps:$4 sm:$0xff]   ;;  %v3027_v5 = vld [vmem:[%s4058_s3 + $0xb0] ss:$8 sps:$4 sm:$0xff]  }
  0xc9   :  { %v3032_v6 = vld [vmem:[%s4058_s3 + $0xa4] ss:$8 sps:$4 sm:$0xff]   ;;  %v3030_v7 = vld [vmem:[%s4058_s3 + $0xa0] ss:$8 sps:$4 sm:$0xff]   ;;  %v3035_v8 = vld [vmem:[%s4058_s3 + $0x94] ss:$8 sps:$4 sm:$0xff]  }
  0xca   :  { %1764 = vmatmul.mubr.bf16.gmra.mxu0 %v2963_v27  ;;  %2057 = vmatpush1.bf16.msra.mxu1 %v3006_v55  ;;  %v3033_v9 = vld [vmem:[%s4058_s3 + $0x90] ss:$8 sps:$4 sm:$0xff]   ;;  %v3038_v10 = vld [vmem:[%s4058_s3 + $0x84] ss:$8 sps:$4 sm:$0xff]   ;;  %v3036_v11 = vld [vmem:[%s4058_s3 + $0x80] ss:$8 sps:$4 sm:$0xff]  }
  0xcb   :  { %1832 = vmatpush1.bf16.msra.mxu0 %v2964_v28  ;;  %2568 = vmatprep.mubr.msk.bf16.mxu0 %vm1502_vm0, %v2999_v29  ;;  %v3924_v12 = vld [vmem:[%s4060_s5 + $0x38] sm:$0xff]   ;;  %v4063_v13 = vmov 0   ;;  %v3932_v14 = vld [vmem:[%s4060_s5 + $0x30] sm:$0xff]   ;;  %v3939_v15 = vld [vmem:[%s4060_s5 + $0x28] sm:$0xff]   ;;  %v3990_v55 = vshrl.u32 %v274_v52, 7  ;;  %vm2305_vm2 = vcmask 1041409  }
  0xcc   :  { %1817 = vmatmul.mubr.bf16.gmra.mxu1 %v2969_v30  ;;  %1833 = vmatprep.subr.bf16.mxu0 %v2972_v31  ;;  %4077 = vst [vmem:[#allocation5_spill] sm:$0xff] %v3932_v14  ;;  %4078 = vst [vmem:[#allocation6_spill] sm:$0xff] %v3939_v15  ;;  %v3946_v16 = vld [vmem:[%s4060_s5 + $0x20] sm:$0xff]   ;;  %v3953_v17 = vld [vmem:[%s4060_s5 + $0x18] sm:$0xff]   ;;  %vm2308_vm3 = vcmask 74752  }
  0xcd   :  { %2058 = vmatprep.subr.bf16.mxu1 %v3011_v56  ;;  %4079 = vst [vmem:[#allocation7_spill] sm:$0xff] %v3946_v16  ;;  %4080 = vst [vmem:[#allocation8_spill] sm:$0xff] %v3953_v17  ;;  %v3960_v19 = vld [vmem:[%s4060_s5 + $0x10] sm:$0xff]   ;;  %v3967_v21 = vld [vmem:[%s4060_s5 + $0x8] sm:$0xff]  }
  0xce   :  { %2059 = vmatpush1.bf16.msra.mxu1 %v3009_v57  ;;  %4081 = vst [vmem:[#allocation9_spill] sm:$0xff] %v3960_v19  ;;  %4082 = vst [vmem:[#allocation10_spill] sm:$0xff] %v3967_v21  ;;  %v3974_v23 = vld [vmem:[%s4060_s5] sm:$0xff]   ;;  %v3981_v26 = vld [vmem:[%s4060_s5 + $0x58] sm:$0xff]  }
  0xcf   :  { %1834 = vmatpush1.bf16.msra.mxu0 %v2970_v32  ;;  %2060 = vmatprep.subr.bf16.mxu1 %v3014_v58  ;;  %4083 = vst [vmem:[#allocation11_spill] sm:$0xff] %v3974_v23  ;;  %4084 = vst [vmem:[#allocation12_spill] sm:$0xff] %v3981_v26  ;;  %v4069_v58 = vsub.s32 1, %v3990_v55 }
  0xd0   :  { %1835 = vmatprep.subr.bf16.mxu0 %v2975_v33  ;;  %4085 = vst [vmem:[#allocation13_spill] sm:$0xff] %v3990_v55 }
  0xd2   :  { %2061 = vmatpush1.bf16.msra.mxu1 %v3012_v59  ;;  %v272_v59 = vld [vmem:[%s4057_s2] sm:$0x3] }
  0xd3   :  { %1836 = vmatpush1.bf16.msra.mxu0 %v2973_v34  ;;  %2062 = vmatprep.subr.bf16.mxu1 %v3017_v60  ;;  %v4073_v60 = vsub.s32 0, %v3990_v55 }
  0xd4   :  { %1837 = vmatprep.subr.bf16.mxu0 %v2978_v35 }
  0xd6   :  { %2063 = vmatpush1.bf16.msra.mxu1 %v3015_v61 }
  0xd7   :  { %1838 = vmatpush1.bf16.msra.mxu0 %v2976_v36  ;;  %2064 = vmatprep.subr.bf16.mxu1 %v3020_v62 }
  0xd8   :  { %1839 = vmatprep.subr.bf16.mxu0 %v2981_v37 }
  0xda   :  { %2065 = vmatpush1.bf16.msra.mxu1 %v3018_v63 }
  0xdb   :  { %1840 = vmatpush1.bf16.msra.mxu0 %v2979_v38  ;;  %2066 = vmatprep.subr.bf16.mxu1 %v3023_v0  ;;  %v281_v0 = vrot.slane %v272_v59, %v4069_v58 }
  0xdc   :  { %1841 = vmatprep.subr.bf16.mxu0 %v2984_v39 }
  0xde   :  { %2067 = vmatpush1.bf16.msra.mxu1 %v3021_v1  ;;  %v277_v1 = vrot.slane %v272_v59, %v4073_v60 }
  0xdf   :  { %1842 = vmatpush1.bf16.msra.mxu0 %v2982_v40  ;;  %2068 = vmatprep.subr.bf16.mxu1 %v3026_v2 }
  0xe0   :  { %1851 = vmatprep.subr.bf16.mxu0 %v2987_v41 }
  0xe2   :  { %2069 = vmatpush1.bf16.msra.mxu1 %v3024_v3 }
  0xe3   :  { %1852 = vmatpush2.bf16.msra.mxu0 %v2985_v42  ;;  %2078 = vmatprep.subr.bf16.mxu1 %v3029_v4 }
  0xe4   :  { %1853 = vmatprep.subr.bf16.mxu0 %v2990_v43 }
  0xe6   :  { %2079 = vmatpush2.bf16.msra.mxu1 %v3027_v5 }
  0xe7   :  { %1854 = vmatpush2.bf16.msra.mxu0 %v2988_v44  ;;  %2080 = vmatprep.subr.bf16.mxu1 %v3032_v6 }
  0xe8   :  { %1855 = vmatprep.subr.bf16.mxu0 %v2993_v45 }
  0xea   :  { %2081 = vmatpush2.bf16.msra.mxu1 %v3030_v7 }
  0xeb   :  { %1856 = vmatpush2.bf16.msra.mxu0 %v2991_v46  ;;  %2082 = vmatprep.subr.bf16.mxu1 %v3035_v8 }
  0xec   :  { %1857 = vmatprep.subr.bf16.mxu0 %v2996_v47 }
  0xee   :  { %2083 = vmatpush2.bf16.msra.mxu1 %v3033_v9 }
  0xef   :  { %1858 = vmatpush2.bf16.msra.mxu0 %v2994_v48  ;;  %2084 = vmatprep.subr.bf16.mxu1 %v3038_v10 }
  0xf0   :  { %2228 = vmatprep.subr.bf16.mxu0 %v4063_v13 }
  0xf2   :  { %1860 = vmatmul.mubr.bf16.vlgmr.msra.gmra.mxu0 %v2997_v49  ;;  %2085 = vmatpush2.bf16.msra.mxu1 %v3036_v11 }
  0xf3   :  { %2569 = vmatprep.mubr.msk.bf16.mxu0 %vm1502_vm0, %v3000_v50  ;;  %2611 = vmatprep.subr.bf16.mxu1 %v4063_v13 }
  0xf4   :  { %2229 = vmatpush1.bf16.msra.mxu0 %v3924_v12 }
  0xf5   :  { %2230 = vmatprep.subr.bf16.mxu0 %v4063_v13 }
  0xf8   :  { %2231 = vmatpush1.bf16.msra.mxu0 %v3932_v14 }
  0xf9   :  { %2232 = vmatprep.subr.bf16.mxu0 %v4063_v13 }
  0xfa   :  { %1870 = vmatmul.mubr.bf16.gmra.mxu0 %v3002_v51 }
  0xfc   :  { %2233 = vmatpush1.bf16.msra.mxu0 %v3939_v15 }
  0xfd   :  { %2234 = vmatprep.subr.bf16.mxu0 %v4063_v13 }
 0x100   :  { %2235 = vmatpush1.bf16.msra.mxu0 %v3946_v16 }
 0x101   :  { %2236 = vmatprep.subr.bf16.mxu0 %v4063_v13 }
 0x102   :  { %v1543_v18 = vpop.f32.mrf.mxu0 }
 0x103   :  { %v1596_v24 = vpop.f32.mrf.mxu1  ;;  %v1544_v6 = vadd.f32 %v1543_v18, %v277_v1 }
 0x104   :  { %2237 = vmatpush1.bf16.msra.mxu0 %v3953_v17  ;;  %v1545_v20 = vpop.f32.mrf.mxu0 }
 0x105   :  { %2238 = vmatprep.subr.bf16.mxu0 %v4063_v13  ;;  %v1598_v28 = vpop.f32.mrf.mxu1  ;;  %v1546_v4 = vadd.f32 %v1545_v20, %v281_v0  ;;  %v1597_v52 = vadd.f32 %v1596_v24, %v1544_v6 }
 0x106   :  { %v1547_v22 = vpop.f32.mrf.mxu0 }
 0x107   :  { %v1600_v30 = vpop.f32.mrf.mxu1  ;;  %v1548_v5 = vadd.f32 %v1547_v22, %v277_v1  ;;  %v1599_v10 = vadd.f32 %v1598_v28, %v1546_v4 }
 0x108   :  { %2239 = vmatpush1.bf16.msra.mxu0 %v3960_v19  ;;  %v1549_v25 = vpop.f32.mrf.mxu0 }
 0x109   :  { %2240 = vmatprep.subr.bf16.mxu0 %v4063_v13  ;;  %v1602_v32 = vpop.f32.mrf.mxu1  ;;  %v1550_v7 = vadd.f32 %v1549_v25, %v281_v0  ;;  %v1601_v11 = vadd.f32 %v1600_v30, %v1548_v5 }
 0x10a   :  { %v1553_v27 = vpop.f32.mrf.mxu0 }
 0x10b   :  { %v3986_v33 = vpop.f32.mrf.mxu1  ;;  %v1554_v60 = vadd.f32 %v1553_v27, %v277_v1 }
 0x10c   :  { %2241 = vmatpush1.bf16.msra.mxu0 %v3967_v21  ;;  %v1555_v29 = vpop.f32.mrf.mxu0 }
 0x10d   :  { %2242 = vmatprep.subr.bf16.mxu0 %v4063_v13  ;;  %v1608_v36 = vpop.f32.mrf.mxu1  ;;  %v1556_v21 = vadd.f32 %v1555_v29, %v281_v0 }
 0x10e   :  { %v1557_v31 = vpop.f32.mrf.mxu0 }
 0x10f   :  { %v1610_v38 = vpop.f32.mrf.mxu1  ;;  %v1558_v55 = vadd.f32 %v1557_v31, %v277_v1  ;;  %v1609_v18 = vadd.f32 %v1608_v36, %v1556_v21 }
 0x110   :  { %2243 = vmatpush1.bf16.msra.mxu0 %v3974_v23  ;;  %v1559_v34 = vpop.f32.mrf.mxu0 }
 0x111   :  { %2252 = vmatprep.subr.bf16.mxu0 %v4063_v13  ;;  %v1612_v40 = vpop.f32.mrf.mxu1  ;;  %v1560_v16 = vadd.f32 %v1559_v34, %v281_v0  ;;  %v1611_v28 = vadd.f32 %v1610_v38, %v1558_v55 }
 0x113   :  { %v1613_v4 = vadd.f32 %v1612_v40, %v1560_v16 }
 0x114   :  { %2253 = vmatpush2.bf16.msra.mxu0 %v3981_v26 }
 0x115   :  { %2254 = vmatprep.subr.bf16.mxu0 %v4063_v13  ;;  %v1603_v13 = vadd.f32 %v1602_v32, %v1550_v7 }
 0x142   :  { %v1649_v35 = vpop.f32.mrf.mxu0 }
 0x143   :  { %v1650_v19 = vadd.f32 %v1649_v35, %v1597_v52 }
 0x144   :  { %v1651_v37 = vpop.f32.mrf.mxu0  ;;  %v1702_v41 = vpop.f32.mrf.mxu1 }
 0x145   :  { %v1652_v26 = vadd.f32 %v1651_v37, %v1599_v10  ;;  %v1703_v25 = vadd.f32 %v1702_v41, %v1650_v19  ;;  %v1607_v37 = vadd.f32 %v3986_v33, %v1554_v60  ;;  %v4086_v10 = vmov 0  }
 0x146   :  { %v1653_v39 = vpop.f32.mrf.mxu0  ;;  %v1704_v43 = vpop.f32.mrf.mxu1 }
 0x147   :  { %v1654_v23 = vadd.f32 %v1653_v39, %v1601_v11  ;;  %v1705_v20 = vadd.f32 %v1704_v43, %v1652_v26 }
 0x148   :  { %v1655_v42 = vpop.f32.mrf.mxu0  ;;  %v1706_v45 = vpop.f32.mrf.mxu1 }
 0x149   :  { %v1656_v59 = vadd.f32 %v1655_v42, %v1603_v13  ;;  %v1707_v22 = vadd.f32 %v1706_v45, %v1654_v23 }
 0x14a   :  { %v1659_v44 = vpop.f32.mrf.mxu0  ;;  %v1708_v47 = vpop.f32.mrf.mxu1 }
 0x14b   :  { %v1709_v30 = vadd.f32 %v1708_v47, %v1656_v59  ;;  %v1660_v27 = vadd.f32 %v1659_v44, %v1607_v37  ;;  %v3048_v37 = vld [vmem:[%s4060_s5 + $0x50] sm:$0xff]  }
 0x14c   :  { %v1661_v46 = vpop.f32.mrf.mxu0  ;;  %v3988_v49 = vpop.f32.mrf.mxu1  ;;  %2255 = vmatpush2.bf16.msra.mxu0 %v3048_v37 }
 0x14d   :  { %v1662_v29 = vadd.f32 %v1661_v46, %v1609_v18  ;;  %v1713_v33 = vadd.f32 %v3988_v49, %v1660_v27  ;;  %v4088_v18 = vld [vmem:[#allocation6_spill] sm:$0xff]  ;;  %2256 = vmatprep.subr.bf16.mxu0 %v4086_v10 }
 0x14e   :  { %v1663_v48 = vpop.f32.mrf.mxu0  ;;  %v1714_v53 = vpop.f32.mrf.mxu1 }
 0x14f   :  { %v1664_v31 = vadd.f32 %v1663_v48, %v1611_v28  ;;  %v1715_v36 = vadd.f32 %v1714_v53, %v1662_v29  ;;  %v4091_v28 = vld [vmem:[#allocation9_spill] sm:$0xff] }
 0x150   :  { %v1665_v50 = vpop.f32.mrf.mxu0  ;;  %v1716_v56 = vpop.f32.mrf.mxu1  ;;  %v3049_v29 = vld [vmem:[%s4060_s5 + $0x48] sm:$0xff]  }
 0x151   :  { %v1666_v23 = vadd.f32 %v1665_v50, %v1613_v4  ;;  %v1717_v42 = vadd.f32 %v1716_v56, %v1664_v31  ;;  %2257 = vmatpush2.bf16.msra.mxu0 %v3049_v29  ;;  %v4095_v31 = vld [vmem:[#allocation13_spill] sm:$0xff] }
 0x152   :  { %v1718_v61 = vpop.f32.mrf.mxu1  ;;  %2258 = vmatprep.subr.bf16.mxu0 %v4086_v10 }
 0x153   :  { %v1719_v40 = vadd.f32 %v1718_v61, %v1666_v23 }
 0x182   :  { %v1755_v51 = vpop.f32.mrf.mxu0 }
 0x183   :  { %v1756_v35 = vadd.f32 %v1755_v51, %v1703_v25  ;;  %v4090_v25 = vld [vmem:[#allocation8_spill] sm:$0xff] }
 0x184   :  { %v1757_v54 = vpop.f32.mrf.mxu0  ;;  %v1808_v62 = vpop.f32.mrf.mxu1 }
 0x185   :  { %v1758_v24 = vadd.f32 %v1757_v54, %v1705_v20  ;;  %v1809_v41 = vadd.f32 %v1808_v62, %v1756_v35  ;;  %v4087_v20 = vld [vmem:[#allocation5_spill] sm:$0xff] }
 0x186   :  { %v1759_v57 = vpop.f32.mrf.mxu0  ;;  %v1810_v2 = vpop.f32.mrf.mxu1  ;;  %v3050_v35 = vld [vmem:[%s4060_s5 + $0x40] sm:$0xff]  }
 0x187   :  { %v1760_v32 = vadd.f32 %v1759_v57, %v1707_v22  ;;  %v1811_v21 = vadd.f32 %v1810_v2, %v1758_v24  ;;  %v4093_v24 = vld [vmem:[#allocation11_spill] sm:$0xff]  ;;  %2259 = vmatpush2.bf16.msra.mxu0 %v3050_v35 }
 0x188   :  { %v1761_v63 = vpop.f32.mrf.mxu0  ;;  %v1812_v8 = vpop.f32.mrf.mxu1 }
 0x189   :  { %v1762_v13 = vadd.f32 %v1761_v63, %v1709_v30  ;;  %v1813_v19 = vadd.f32 %v1812_v8, %v1760_v32  ;;  %v4092_v30 = vld [vmem:[#allocation10_spill] sm:$0xff]  ;;  %v4094_v32 = vld [vmem:[#allocation12_spill] sm:$0xff] }
 0x18a   :  { %v1765_v3 = vpop.f32.mrf.mxu0  ;;  %v1814_v58 = vpop.f32.mrf.mxu1 }
 0x18b   :  { %v1815_v43 = vadd.f32 %v1814_v58, %v1762_v13  ;;  %v1766_v55 = vadd.f32 %v1765_v3, %v1713_v33  ;;  %v4096_v13 = vsub.s32 1, %v4095_v31 }
 0x18c   :  { %v1767_v9 = vpop.f32.mrf.mxu0  ;;  %v1818_v15 = vpop.f32.mrf.mxu1 }
 0x18d   :  { %v1768_v48 = vadd.f32 %v1767_v9, %v1715_v36  ;;  %v1819_v49 = vadd.f32 %v1818_v15, %v1766_v55 }
 0x18e   :  { %v1769_v17 = vpop.f32.mrf.mxu0  ;;  %v1820_v34 = vpop.f32.mrf.mxu1 }
 0x18f   :  { %v1770_v44 = vadd.f32 %v1769_v17, %v1717_v42  ;;  %v1821_v0 = vadd.f32 %v1820_v34, %v1768_v48  ;;  %v4097_v34 = vsub.s32 0, %v4095_v31 }
 0x190   :  { %v1771_v14 = vpop.f32.mrf.mxu0  ;;  %v1822_v46 = vpop.f32.mrf.mxu1 }
 0x191   :  { %v1772_v60 = vadd.f32 %v1771_v14, %v1719_v40  ;;  %v1823_v1 = vadd.f32 %v1822_v46, %v1770_v44 }
 0x192   :  { %v1824_v63 = vpop.f32.mrf.mxu1 }
 0x193   :  { %v1825_v7 = vadd.f32 %v1824_v63, %v1772_v60 }
 0x1b2   :  { %v1861_v39 = vpop.f32.mrf.mxu0 }
 0x1b3   :  { %v1862_v51 = vadd.f32 %v1861_v39, %v1809_v41  ;;  %v1916_v39 = vld [vmem:[%s4059_s4] sm:$0x3] }
 0x1b4   :  { %v1863_v26 = vpop.f32.mrf.mxu0  ;;  %v1925_v27 = vrot.slane %v1916_v39, %v4096_v13 }
 0x1b5   :  { %v1864_v45 = vadd.f32 %v1863_v26, %v1811_v21  ;;  %v1880_v56 = vmax.f32 %v1862_v51, 0.0  ;;  %v1921_v26 = vrot.slane %v1916_v39, %v4097_v34 }
 0x1b6   :  { %v1865_v38 = vpop.f32.mrf.mxu0 }
 0x1b7   :  { %v1866_v47 = vadd.f32 %v1865_v38, %v1813_v19  ;;  %v1881_v53 = vmax.f32 %v1864_v45, 0.0 }
 0x1b8   :  { %v1867_v16 = vpop.f32.mrf.mxu0 }
 0x1b9   :  { %v1868_v54 = vadd.f32 %v1867_v16, %v1815_v43  ;;  %v1882_v50 = vmax.f32 %v1866_v47, 0.0 }
 0x1ba   :  { %v1871_v57 = vpop.f32.mrf.mxu0 }
 0x1bb   :  { %v1883_v62 = vmax.f32 %v1868_v54, 0.0  ;;  %v1888_v5 = vpack.c.bf16 %v1882_v50, %v1880_v56  ;;  %v1872_v17 = vadd.f32 %v1871_v57, %v1819_v49 }
 0x1bc   :  { %v1873_v58 = vpop.f32.mrf.mxu0 }
 0x1bd   :  { %v1889_v2 = vpack.c.bf16 %v1883_v62, %v1881_v53  ;;  %v1874_v61 = vadd.f32 %v1873_v58, %v1821_v0  ;;  %v1884_v59 = vmax.f32 %v1872_v17, 0.0  ;;  %v2596_v0 = vld [vmem:[%s4061_s6] ss:$0 sm:$0xff]  ;;  %s3074_s6 = smov [#allocation2]  }
 0x1be   :  { %v1875_v6 = vpop.f32.mrf.mxu0  ;;  %s2316_s28 = sshll.u32 %s3074_s6, 4  ;;  %s2317_s28 = int_to_ptr.vmem [resolvable:$true] %s2316_s28 }
 0x1bf   :  { %v1876_v8 = vadd.f32 %v1875_v6, %v1823_v1  ;;  %2594 = vmatprep.mubr.msk.bf16.mxu1 %vm1502_vm0, %v1889_v2  ;;  %v1885_v11 = vmax.f32 %v1874_v61, 0.0  ;;  %s3051_s29 = scalar_lea.vmem %s2317_s28, 32  ;;  %p3056_p1 = scmp.lt.s32.totalorder %s2317_s28, %s2317_s28 }
 0x1c0   :  { %v1877_v3 = vpop.f32.mrf.mxu0  ;;  %2087 = vmatmul.mubr.bf16.vlgmr.msra.gmra.mxu1 %v1888_v5  ;;  %p3052_p0 = scmp.ne.s32.totalorder %s2317_s28, %s3051_s29  ;;  %p3057_p2 = scmp.lt.s32.totalorder %s3051_s29, %s3051_s29 }
 0x1c1   :  { %v1878_v14 = vadd.f32 %v1877_v3, %v1825_v7  ;;  %2623 = vmatpush1.bf16.msra.mxu1 %v3924_v12  ;;  %v1886_v9 = vmax.f32 %v1876_v8, 0.0  ;;  %v4089_v12 = vld [vmem:[#allocation7_spill] sm:$0xff] }
 0x1c2   :  { %2612 = vmatprep.subr.bf16.mxu1 %v4086_v10  ;;  %p3058_p3 = por %p3057_p2, %p3056_p1 }
 0x1c3   :  { %v1887_v52 = vmax.f32 %v1878_v14, 0.0  ;;  %v1890_v22 = vpack.c.bf16 %v1886_v9, %v1884_v59 }
 0x1c4   :  { %p3059_p4 = pnand %p3058_p3, %p3052_p0 }
 0x1c5   :  { %v1891_v15 = vpack.c.bf16 %v1887_v52, %v1885_v11  ;;  %2624 = vmatpush1.bf16.msra.mxu1 %v4087_v20 }
 0x1c6   :  { %2613 = vmatprep.subr.bf16.mxu1 %v4086_v10 }
 0x1c7   :  { %2595 = vmatprep.mubr.msk.bf16.mxu1 %vm1502_vm0, %v1891_v15 }
 0x1c8   :  { %2097 = vmatmul.mubr.bf16.gmra.mxu1 %v1890_v22 }
 0x1c9   :  { %2625 = vmatpush1.bf16.msra.mxu1 %v4088_v18 }
 0x1ca   :  { %2614 = vmatprep.subr.bf16.mxu1 %v4086_v10 }
 0x1cd   :  { %2626 = vmatpush1.bf16.msra.mxu1 %v4089_v12 }
 0x1ce   :  { %2615 = vmatprep.subr.bf16.mxu1 %v4086_v10 }
 0x1d1   :  { %2627 = vmatpush1.bf16.msra.mxu1 %v4090_v25 }
 0x1d2   :  { %2616 = vmatprep.subr.bf16.mxu1 %v4086_v10 }
 0x1d5   :  { %2628 = vmatpush1.bf16.msra.mxu1 %v4091_v28 }
 0x1d6   :  { %2617 = vmatprep.subr.bf16.mxu1 %v4086_v10 }
 0x1d9   :  { %2629 = vmatpush1.bf16.msra.mxu1 %v4092_v30 }
 0x1da   :  { %2618 = vmatprep.subr.bf16.mxu1 %v4086_v10 }
 0x1dd   :  { %2630 = vmatpush1.bf16.msra.mxu1 %v4093_v24 }
 0x1de   :  { %2619 = vmatprep.subr.bf16.mxu1 %v4086_v10 }
 0x1e1   :  { %2631 = vmatpush2.bf16.msra.mxu1 %v4094_v32 }
 0x1e2   :  { %2620 = vmatprep.subr.bf16.mxu1 %v4086_v10 }
 0x1e5   :  { %2632 = vmatpush2.bf16.msra.mxu1 %v3048_v37 }
 0x1e6   :  { %2621 = vmatprep.subr.bf16.mxu1 %v4086_v10 }
 0x1e9   :  { %2633 = vmatpush2.bf16.msra.mxu1 %v3049_v29 }
 0x1ea   :  { %2622 = vmatprep.subr.bf16.mxu1 %v4086_v10 }
 0x1ed   :  { %2634 = vmatpush2.bf16.msra.mxu1 %v3050_v35 }
 0x280   :  { %v2088_v4 = vpop.f32.mrf.mxu1 }
 0x281   :  { %v2089_v41 = vadd.f32 %v2088_v4, %v1921_v26 }
 0x282   :  { %v2090_v23 = vpop.f32.mrf.mxu1 }
 0x283   :  { %v2091_v19 = vadd.f32 %v2090_v23, %v1925_v27  ;;  %v2107_v46 = vmax.f32 %v2089_v41, 0.0 }
 0x284   :  { %v2092_v21 = vpop.f32.mrf.mxu1 }
 0x285   :  { %v2093_v36 = vadd.f32 %v2092_v21, %v1921_v26  ;;  %v2108_v47 = vmax.f32 %v2091_v19, 0.0 }
 0x286   :  { %v2094_v38 = vpop.f32.mrf.mxu1 }
 0x287   :  { %v2095_v42 = vadd.f32 %v2094_v38, %v1925_v27  ;;  %v2109_v43 = vmax.f32 %v2093_v36, 0.0 }
 0x288   :  { %v2098_v45 = vpop.f32.mrf.mxu1 }
 0x289   :  { %v2110_v33 = vmax.f32 %v2095_v42, 0.0  ;;  %v2115_v40 = vpack.c.bf16 %v2109_v43, %v2107_v46  ;;  %v2099_v55 = vadd.f32 %v2098_v45, %v1921_v26 }
 0x28a   :  { %v2100_v51 = vpop.f32.mrf.mxu1 }
 0x28b   :  { %v2116_v16 = vpack.c.bf16 %v2110_v33, %v2108_v47  ;;  %v2101_v44 = vadd.f32 %v2100_v51, %v1925_v27  ;;  %v2111_v63 = vmax.f32 %v2099_v55, 0.0 }
 0x28c   :  { %v2102_v48 = vpop.f32.mrf.mxu1 }
 0x28d   :  { %v2103_v54 = vadd.f32 %v2102_v48, %v1921_v26  ;;  %2609 = vmatprep.mubr.msk.bf16.mxu0 %vm1502_vm0, %v2116_v16  ;;  %v2112_v53 = vmax.f32 %v2101_v44, 0.0 }
 0x28e   :  { %v2104_v50 = vpop.f32.mrf.mxu1  ;;  %2261 = vmatmul.mubr.bf16.vlgmr.msra.gmra.mxu0 %v2115_v40 }
 0x28f   :  { %v2105_v57 = vadd.f32 %v2104_v50, %v1925_v27  ;;  %v2113_v60 = vmax.f32 %v2103_v54, 0.0 }
 0x291   :  { %v2114_v62 = vmax.f32 %v2105_v57, 0.0  ;;  %v2117_v58 = vpack.c.bf16 %v2113_v60, %v2111_v63 }
 0x293   :  { %v2118_v56 = vpack.c.bf16 %v2114_v62, %v2112_v53 }
 0x295   :  { %2610 = vmatprep.mubr.msk.bf16.mxu1 %vm1502_vm0, %v2118_v56 }
 0x296   :  { %2269 = vmatmul.mubr.bf16.vlgmr.msra.gmra.mxu1 %v2117_v58 }
 0x34e   :  { %v2262_v1 = vpop.f32.mrf.mxu0 }
 0x34f   :  { %v2263_v2 = vadd.f32 %v2596_v0, %v2262_v1 }
 0x350   :  { %v2264_v49 = vpop.f32.mrf.mxu0 }
 0x351   :  { %v2277_v6 = vmax.f32 %v2263_v2, 0.0 }
 0x352   :  { %v2265_v5 = vpop.f32.mrf.mxu0 }
 0x353   :  { %v2266_v7 = vadd.f32 %v2596_v0, %v2265_v5  ;;  %v2282_v3 = vsel %vm2281_vm1, %v2277_v6, 0.0 }
 0x354   :  { %v2267_v61 = vpop.f32.mrf.mxu0 }
 0x355   :  { %v2278_v8 = vmax.f32 %v2266_v7, 0.0 }
 0x356   :  { %v2270_v17 = vpop.f32.mrf.mxu1 }
 0x357   :  { %v2283_v14 = vsel %vm2281_vm1, %v2278_v8, 0.0  ;;  %v2271_v9 = vadd.f32 %v2596_v0, %v2270_v17 }
 0x358   :  { %v2284_v10 = vadd.f32 %v2283_v14, %v2282_v3  ;;  %v2272_v11 = vpop.f32.mrf.mxu1 }
 0x359   :  { %v2279_v15 = vmax.f32 %v2271_v9, 0.0 }
 0x35a   :  { %v2285_v52 = vrot.slane %v2284_v10, 4  ;;  %v2273_v59 = vpop.f32.mrf.mxu1 }
 0x35b   :  { %v2274_v20 = vadd.f32 %v2596_v0, %v2273_v59  ;;  %v2291_v28 = vsel %vm2281_vm1, %v2279_v15, 0.0 }
 0x35c   :  { %v2286_v22 = vadd.f32 %v2285_v52, %v2284_v10  ;;  %v2275_v18 = vpop.f32.mrf.mxu1 }
 0x35d   :  { %v2280_v12 = vmax.f32 %v2274_v20, 0.0 }
 0x35e   :  { %v2287_v25 = vrot.slane %v2286_v22, 2 }
 0x35f   :  { %v2292_v30 = vsel %vm2281_vm1, %v2280_v12, 0.0 }
 0x360   :  { %v2293_v24 = vadd.f32 %v2292_v30, %v2291_v28  ;;  %v2288_v32 = vadd.f32 %v2287_v25, %v2286_v22 }
 0x362   :  { %v2294_v37 = vrot.slane %v2293_v24, 4  ;;  %v2289_v39 = vrot.slane %v2288_v32, 1 }
 0x364   :  { %v2295_v29 = vadd.f32 %v2294_v37, %v2293_v24  ;;  %v2290_v31 = vadd.f32 %v2289_v39, %v2288_v32 }
 0x366   :  { %v2296_v35 = vrot.slane %v2295_v29, 2  ;;  %v2301_v34 = vmul.f32 0.0625, %v2290_v31 }
 0x368   :  { %v2297_v4 = vadd.f32 %v2296_v35, %v2295_v29 }
 0x36a   :  { %v2298_v13 = vrot.slane %v2297_v4, 1 }
 0x36c   :  { %v2299_v27 = vadd.f32 %v2298_v13, %v2297_v4 }
 0x36e   :  { %v2302_v26 = vmul.f32 0.0625, %v2299_v27 }
 0x370   :  { %v2306_v23 = vsel %vm2305_vm2, %v2302_v26, %v2301_v34 }
 0x371   :  { %2309 = vst.msk [vmem:[#allocation2] sm:$0x3] %vm2308_vm3, %v2306_v23 }
 0x372   :  { %3062 = shalt.err (!%p3059_p4)
}
 0x373   :  { %2319 = dma.vmem_to_hbm [thread:$0]  %s2317_s28, 32, %s4062_s7, [#allocation3]  }
 0x374   :  { %3071 = dma.done.wait [#allocation3], 32  }
 0x375   :  { %3072 = vsyncadd [#allocation3], 4294967264 }
 0x376   :  { %2323 = vsyncpa [#allocation3], 1 }

</bundles_post_ra>
